<compile_context>
chip_gen: v5e
topology: v5e:2x2
jax: 0.10.0
libtpu: 0.0.40
codegen_flags: <defaults>
</compile_context>

<pallas_src>
import jax
import jax.numpy as jnp
from jax.experimental import pallas as pl
from jax.experimental.pallas import tpu as pltpu

EPS = 1e-5  # PyTorch InstanceNorm1d default eps


def _sigmoid(x):
    # One EUP transcendental (tanh) per element; avoids exp + divide.
    half = jnp.asarray(0.5, dtype=x.dtype)
    one = jnp.asarray(1.0, dtype=x.dtype)
    return half * (jnp.tanh(x * half) + one)


def _glu(x):
    # GLU in this module == x * sigmoid(x)
    return x * _sigmoid(x)


def _elementwise_dtype():
    """bf16 elementwise chain on chips with bf16 VPU/EUP; f32 on v5e."""
    try:
        kind = jax.devices()[0].device_kind.lower()
    except Exception:
        return jnp.bfloat16
    if "v5 lite" in kind or "v5e" in kind or "v5lite" in kind:
        return jnp.float32
    return jnp.bfloat16


def _vmem_limit_bytes():
    """~3/4 of physical VMEM: ~96 MiB on v5e/v6e (128 MiB), ~48 MiB on v7x (64 MiB)."""
    try:
        cap = pltpu.get_tpu_info().vmem_capacity_bytes
    except Exception:
        cap = 64 * 1024 * 1024
    return max(32 * 1024 * 1024, min(int(cap) * 3 // 4, 100 * 1024 * 1024))


def _pick_bblk(B, T, target_rows=512):
    """Batch-block size: M = Bblk*T near target_rows, Bblk an exact divisor of B."""
    rows_cap = max(1, target_rows // max(T, 1))
    bblk = max(1, min(B, rows_cap))
    while B % bblk != 0:
        bblk -= 1
    return bblk


def _make_kernel(act_dtype):
    def kernel(x_ref,
               w1_ref, b1_ref,
               w2_ref, g2_ref, be2_ref,
               w3_ref, g3_ref, be3_ref,
               w4_ref, g4_ref, be4_ref,
               wo_ref, bo_ref,
               out_ref):
        # x_ref / out_ref: (Bblk, T, 1) block. w2/w3/w4 are bf16 (MXU operands);
        # biases / IN affine / wo stay f32.
        bblk, T, _ = x_ref.shape
        inv_t = 1.0 / T

        x = x_ref[...]                                           # (Bblk, T, 1) f32

        # convLayer1: Conv1d(1,128,k=1) + GLU (broadcast outer product on the VPU)
        h = _glu((x * w1_ref[...] + b1_ref[...]).astype(act_dtype))   # (Bblk, T, 128)

        def down_block(h, w_ref, g_ref, be_ref):
            cin = h.shape[-1]
            # 1x1 conv == matmul over channels with M = Bblk*T rows (MXU, bf16 in / f32 acc).
            # Conv bias intentionally omitted: exactly cancelled by InstanceNorm.
            y = jnp.dot(h.reshape(bblk * T, cin).astype(jnp.bfloat16), w_ref[...],
                        preferred_element_type=jnp.float32)
            cout = y.shape[-1]
            y = y.reshape(bblk, T, cout)                          # (Bblk, T, Cout) f32
            # Fused InstanceNorm1d (biased variance, eps=1e-5), affine folded in; stats in f32.
            m = jnp.sum(y, axis=1, keepdims=True) * inv_t         # (Bblk, 1, Cout)
            ex2 = jnp.sum(y * y, axis=1, keepdims=True) * inv_t   # (Bblk, 1, Cout)
            var = jnp.maximum(ex2 - m * m, 0.0)
            scale = g_ref[...] * jax.lax.rsqrt(var + EPS)         # gamma / sqrt(var+eps)
            shift = be_ref[...] - m * scale                       # beta - mean*scale
            # Apply + GLU in act_dtype (bf16 on v6e/v7x, f32 on v5e).
            yn = (y.astype(act_dtype) * scale.astype(act_dtype)
                  + shift.astype(act_dtype))
            return _glu(yn)

        h = down_block(h, w2_ref, g2_ref, be2_ref)                # (Bblk, T, 256)
        h = down_block(h, w3_ref, g3_ref, be3_ref)                # (Bblk, T, 512)
        h = down_block(h, w4_ref, g4_ref, be4_ref)                # (Bblk, T, 1024)

        # outputConvLayer: Conv1d(1024,1,k=1) + sigmoid. N=1 matmul wastes the MXU,
        # so use a VPU multiply + lane reduction (f32 accumulation).
        o = jnp.sum(h.astype(jnp.float32) * wo_ref[...], axis=-1, keepdims=True)
        o = o + bo_ref[...]                                       # (Bblk, T, 1)
        out_ref[...] = _sigmoid(o)

    return kernel


def discriminator_f0(x, params):
    B, T = x.shape
    (w1, b1, w2, b2, g2, be2, w3, b3, g3, be3,
     w4, b4, g4, be4, wo, bo) = params
    del b2, b3, b4  # exactly cancelled by the following InstanceNorm layers

    act_dtype = _elementwise_dtype()

    # bf16 MXU operands (halves resident weight VMEM); biases / IN affine stay f32.
    w2b = w2.astype(jnp.bfloat16)
    w3b = w3.astype(jnp.bfloat16)
    w4b = w4.astype(jnp.bfloat16)
    wo_row = wo.reshape(1, -1).astype(jnp.float32)        # (1, 1024) — VPU path, keep f32

    weight_args = (w1, b1, w2b, g2, be2, w3b, g3, be3, w4b, g4, be4, wo_row, bo)

    x3 = x[:, :, None]                                    # (B, T, 1); no in-kernel transpose

    bblk = _pick_bblk(B, T)                               # M = bblk*T rows per MXU pass
    grid = (B // bblk,)

    def const_spec(a):
        # Weights are resident across the grid (constant index_map).
        return pl.BlockSpec(a.shape, lambda b: (0,) * a.ndim)

    flops = 2 * B * T * (128 * 256 + 256 * 512 + 512 * 1024) \
        + 2 * B * T * (128 + 1024)
    transcendentals = B * T * (128 + 256 + 512 + 1024 + 1)
    bytes_accessed = (x3.size * 4 + B * T * 4
                      + sum(a.size * a.dtype.itemsize for a in weight_args))

    out = pl.pallas_call(
        _make_kernel(act_dtype),
        grid=grid,
        out_shape=jax.ShapeDtypeStruct((B, T, 1), jnp.float32),
        in_specs=[pl.BlockSpec((bblk, T, 1), lambda b: (b, 0, 0))]
                 + [const_spec(a) for a in weight_args],
        out_specs=pl.BlockSpec((bblk, T, 1), lambda b: (b, 0, 0)),
        compiler_params=pltpu.CompilerParams(
            dimension_semantics=("parallel",),            # batch axis -> megacore sharding
            vmem_limit_bytes=_vmem_limit_bytes()),
        cost_estimate=pl.CostEstimate(flops=flops,
                                      transcendentals=transcendentals,
                                      bytes_accessed=bytes_accessed),
    )(x3, *weight_args)

    return jnp.transpose(out, (0, 2, 1))                  # (B, 1, T) — match PyTorch NCW


def init_params(key):
    """Deterministic synthetic parameters (shapes follow the PyTorch module)."""
    keys = jax.random.split(key, 16)

    def rnd(k, shape, scale):
        return (scale * jax.random.normal(k, shape)).astype(jnp.float32)

    params = [
        rnd(keys[0], (1, 128), 0.5),   rnd(keys[1], (1, 128), 0.1),        # convLayer1
        rnd(keys[2], (128, 256), 0.05), rnd(keys[3], (1, 256), 0.1),       # downSample1 conv (+bias)
        1.0 + rnd(keys[4], (1, 256), 0.1), rnd(keys[5], (1, 256), 0.1),    # downSample1 IN affine
        rnd(keys[6], (256, 512), 0.05), rnd(keys[7], (1, 512), 0.1),       # downSample2 conv (+bias)
        1.0 + rnd(keys[8], (1, 512), 0.1), rnd(keys[9], (1, 512), 0.1),    # downSample2 IN affine
        rnd(keys[10], (512, 1024), 0.03), rnd(keys[11], (1, 1024), 0.1),   # downSample3 conv (+bias)
        1.0 + rnd(keys[12], (1, 1024), 0.1), rnd(keys[13], (1, 1024), 0.1),
        rnd(keys[14], (1, 1024), 0.03), rnd(keys[15], (1, 1), 0.1),        # outputConvLayer
    ]
    return params


def ref_forward(x, params):
    """Pure-JAX f32 reference of the PyTorch forward (conv biases included)."""
    (w1, b1, w2, b2, g2, be2, w3, b3, g3, be3,
     w4, b4, g4, be4, wo, bo) = params
    B, T = x.shape
    h = x[:, :, None] * w1[None] + b1[None]            # (B, T, 128)
    h = h * jax.nn.sigmoid(h)

    def down(h, w, bias, gamma, beta):
        y = jnp.einsum('btc,cd->btd', h, w) + bias[None]
        m = jnp.mean(y, axis=1, keepdims=True)
        v = jnp.mean((y - m) ** 2, axis=1, keepdims=True)
        yn = (y - m) / jnp.sqrt(v + EPS) * gamma[None] + beta[None]
        return yn * jax.nn.sigmoid(yn)

    h = down(h, w2, b2, g2, be2)
    h = down(h, w3, b3, g3, be3)
    h = down(h, w4, b4, g4, be4)
    o = jnp.einsum('btc,c->bt', h, wo[0]) + bo[0, 0]
    return jax.nn.sigmoid(o).reshape(B, 1, T)


if __name__ == "__main__":
    key = jax.random.PRNGKey(0)
    pkey, xkey = jax.random.split(key)
    params = init_params(pkey)

    B, T = 2, 16
    x = jax.random.normal(xkey, (B, T), dtype=jnp.float32)

    out = discriminator_f0(x, params)
    out = jax.block_until_ready(out)
    assert out.shape == (B, 1, T)

    ref = ref_forward(x, params)
    # bf16 MXU operands + bf16 elementwise chain (f32 IN statistics) through three
    # normalized layers introduce ~1e-3..1e-2 level error on the [0,1] output;
    # 5e-2 absolute tolerance comfortably absorbs it.
    err = float(jnp.max(jnp.abs(out - ref)))
    assert err < 5e-2, f"max abs diff too large: {err}"

    print("KERNEL_OK")
</pallas_src>

<mosaic_0001>
module attributes {stable_mosaic.version = 11 : i64} {
  func.func @kernel(%arg0: i32, %arg1: memref<2x16x1xf32, #tpu.memory_space<vmem>>, %arg2: memref<1x128xf32, #tpu.memory_space<vmem>>, %arg3: memref<1x128xf32, #tpu.memory_space<vmem>>, %arg4: memref<128x256xbf16, #tpu.memory_space<vmem>>, %arg5: memref<1x256xf32, #tpu.memory_space<vmem>>, %arg6: memref<1x256xf32, #tpu.memory_space<vmem>>, %arg7: memref<256x512xbf16, #tpu.memory_space<vmem>>, %arg8: memref<1x512xf32, #tpu.memory_space<vmem>>, %arg9: memref<1x512xf32, #tpu.memory_space<vmem>>, %arg10: memref<512x1024xbf16, #tpu.memory_space<vmem>>, %arg11: memref<1x1024xf32, #tpu.memory_space<vmem>>, %arg12: memref<1x1024xf32, #tpu.memory_space<vmem>>, %arg13: memref<1x1024xf32, #tpu.memory_space<vmem>>, %arg14: memref<1x1xf32, #tpu.memory_space<vmem>>, %arg15: memref<2x16x1xf32, #tpu.memory_space<vmem>>) attributes {dimension_semantics = [#tpu.dimension_semantics<parallel>], iteration_bounds = array<i64: 1>, scalar_prefetch = 0 : i64, scratch_operands = 0 : i64, tpu.core_type = #tpu.core_type<tc>, window_params = [{transform_indices = @transform_0, window_bounds = array<i64: 2, 16, 1>}, {pipeline_mode = #tpu.pipeline_mode<synchronous>, transform_indices = @transform_1, window_bounds = array<i64: 1, 128>}, {pipeline_mode = #tpu.pipeline_mode<synchronous>, transform_indices = @transform_2, window_bounds = array<i64: 1, 128>}, {pipeline_mode = #tpu.pipeline_mode<synchronous>, transform_indices = @transform_3, window_bounds = array<i64: 128, 256>}, {pipeline_mode = #tpu.pipeline_mode<synchronous>, transform_indices = @transform_4, window_bounds = array<i64: 1, 256>}, {pipeline_mode = #tpu.pipeline_mode<synchronous>, transform_indices = @transform_5, window_bounds = array<i64: 1, 256>}, {pipeline_mode = #tpu.pipeline_mode<synchronous>, transform_indices = @transform_6, window_bounds = array<i64: 256, 512>}, {pipeline_mode = #tpu.pipeline_mode<synchronous>, transform_indices = @transform_7, window_bounds = array<i64: 1, 512>}, {pipeline_mode = #tpu.pipeline_mode<synchronous>, transform_indices = @transform_8, window_bounds = array<i64: 1, 512>}, {pipeline_mode = #tpu.pipeline_mode<synchronous>, transform_indices = @transform_9, window_bounds = array<i64: 512, 1024>}, {pipeline_mode = #tpu.pipeline_mode<synchronous>, transform_indices = @transform_10, window_bounds = array<i64: 1, 1024>}, {pipeline_mode = #tpu.pipeline_mode<synchronous>, transform_indices = @transform_11, window_bounds = array<i64: 1, 1024>}, {pipeline_mode = #tpu.pipeline_mode<synchronous>, transform_indices = @transform_12, window_bounds = array<i64: 1, 1024>}, {pipeline_mode = #tpu.pipeline_mode<synchronous>, transform_indices = @transform_13, window_bounds = array<i64: 1, 1>}, {transform_indices = @transform_14, window_bounds = array<i64: 2, 16, 1>}]} {
    %c0 = arith.constant 0 : index
    %c0_0 = arith.constant 0 : index
    %c0_1 = arith.constant 0 : index
    %0 = vector.load %arg1[%c0, %c0_0, %c0_1] : memref<2x16x1xf32, #tpu.memory_space<vmem>>, vector<2x16x1xf32>
    %c0_2 = arith.constant 0 : index
    %c0_3 = arith.constant 0 : index
    %1 = vector.load %arg2[%c0_2, %c0_3] : memref<1x128xf32, #tpu.memory_space<vmem>>, vector<1x128xf32>
    %2 = vector.shape_cast %1 : vector<1x128xf32> to vector<1x1x128xf32>
    %3 = vector.broadcast %0 : vector<2x16x1xf32> to vector<2x16x128xf32>
    %4 = vector.broadcast %2 : vector<1x1x128xf32> to vector<2x16x128xf32>
    %5 = arith.mulf %3, %4 : vector<2x16x128xf32>
    %c0_4 = arith.constant 0 : index
    %c0_5 = arith.constant 0 : index
    %6 = vector.load %arg3[%c0_4, %c0_5] : memref<1x128xf32, #tpu.memory_space<vmem>>, vector<1x128xf32>
    %7 = vector.shape_cast %6 : vector<1x128xf32> to vector<1x1x128xf32>
    %8 = vector.broadcast %7 : vector<1x1x128xf32> to vector<2x16x128xf32>
    %9 = arith.addf %5, %8 : vector<2x16x128xf32>
    %10 = arith.truncf %9 : vector<2x16x128xf32> to vector<2x16x128xbf16>
    %cst = arith.constant 5.000000e-01 : bf16
    %11 = vector.broadcast %cst : bf16 to vector<2x16x128xbf16>
    %12 = arith.mulf %10, %11 : vector<2x16x128xbf16>
    %13 = math.tanh %12 : vector<2x16x128xbf16>
    %cst_6 = arith.constant 1.000000e+00 : bf16
    %14 = vector.broadcast %cst_6 : bf16 to vector<2x16x128xbf16>
    %15 = arith.addf %13, %14 : vector<2x16x128xbf16>
    %cst_7 = arith.constant 5.000000e-01 : bf16
    %16 = vector.broadcast %cst_7 : bf16 to vector<2x16x128xbf16>
    %17 = arith.mulf %16, %15 : vector<2x16x128xbf16>
    %18 = arith.mulf %10, %17 : vector<2x16x128xbf16>
    %19 = vector.shape_cast %18 : vector<2x16x128xbf16> to vector<32x128xbf16>
    %c0_8 = arith.constant 0 : index
    %c0_9 = arith.constant 0 : index
    %20 = vector.load %arg4[%c0_8, %c0_9] : memref<128x256xbf16, #tpu.memory_space<vmem>>, vector<128x256xbf16>
    %cst_10 = arith.constant dense<0.000000e+00> : vector<32x256xf32>
    %21 = tpu.matmul %19, %20, %cst_10 {dimension_numbers = #tpu.dot_dimension_numbers<[1], [0], [0], [1], [0, 0, 1, 1], [], []>} : vector<32x128xbf16>, vector<128x256xbf16>, vector<32x256xf32> -> vector<32x256xf32>
    %22 = vector.shape_cast %21 : vector<32x256xf32> to vector<2x16x256xf32>
    %cst_11 = arith.constant dense<0.000000e+00> : vector<2x256xf32>
    %23 = vector.multi_reduction <add>, %22, %cst_11 [1] : vector<2x16x256xf32> to vector<2x256xf32>
    %24 = vector.shape_cast %23 : vector<2x256xf32> to vector<2x1x256xf32>
    %cst_12 = arith.constant 6.250000e-02 : f32
    %25 = vector.broadcast %cst_12 : f32 to vector<2x1x256xf32>
    %26 = arith.mulf %24, %25 : vector<2x1x256xf32>
    %27 = arith.mulf %22, %22 : vector<2x16x256xf32>
    %cst_13 = arith.constant dense<0.000000e+00> : vector<2x256xf32>
    %28 = vector.multi_reduction <add>, %27, %cst_13 [1] : vector<2x16x256xf32> to vector<2x256xf32>
    %29 = vector.shape_cast %28 : vector<2x256xf32> to vector<2x1x256xf32>
    %cst_14 = arith.constant 6.250000e-02 : f32
    %30 = vector.broadcast %cst_14 : f32 to vector<2x1x256xf32>
    %31 = arith.mulf %29, %30 : vector<2x1x256xf32>
    %32 = arith.mulf %26, %26 : vector<2x1x256xf32>
    %33 = arith.subf %31, %32 : vector<2x1x256xf32>
    %cst_15 = arith.constant 0.000000e+00 : f32
    %34 = vector.broadcast %cst_15 : f32 to vector<2x1x256xf32>
    %35 = arith.maximumf %33, %34 : vector<2x1x256xf32>
    %c0_16 = arith.constant 0 : index
    %c0_17 = arith.constant 0 : index
    %36 = vector.load %arg5[%c0_16, %c0_17] : memref<1x256xf32, #tpu.memory_space<vmem>>, vector<1x256xf32>
    %cst_18 = arith.constant 9.99999974E-6 : f32
    %37 = vector.broadcast %cst_18 : f32 to vector<2x1x256xf32>
    %38 = arith.addf %35, %37 : vector<2x1x256xf32>
    %39 = math.rsqrt %38 : vector<2x1x256xf32>
    %40 = vector.shape_cast %36 : vector<1x256xf32> to vector<1x1x256xf32>
    %41 = vector.broadcast %40 : vector<1x1x256xf32> to vector<2x1x256xf32>
    %42 = arith.mulf %41, %39 : vector<2x1x256xf32>
    %c0_19 = arith.constant 0 : index
    %c0_20 = arith.constant 0 : index
    %43 = vector.load %arg6[%c0_19, %c0_20] : memref<1x256xf32, #tpu.memory_space<vmem>>, vector<1x256xf32>
    %44 = arith.mulf %26, %42 : vector<2x1x256xf32>
    %45 = vector.shape_cast %43 : vector<1x256xf32> to vector<1x1x256xf32>
    %46 = vector.broadcast %45 : vector<1x1x256xf32> to vector<2x1x256xf32>
    %47 = arith.subf %46, %44 : vector<2x1x256xf32>
    %48 = arith.truncf %22 : vector<2x16x256xf32> to vector<2x16x256xbf16>
    %49 = arith.truncf %42 : vector<2x1x256xf32> to vector<2x1x256xbf16>
    %50 = vector.broadcast %49 : vector<2x1x256xbf16> to vector<2x16x256xbf16>
    %51 = arith.mulf %48, %50 : vector<2x16x256xbf16>
    %52 = arith.truncf %47 : vector<2x1x256xf32> to vector<2x1x256xbf16>
    %53 = vector.broadcast %52 : vector<2x1x256xbf16> to vector<2x16x256xbf16>
    %54 = arith.addf %51, %53 : vector<2x16x256xbf16>
    %cst_21 = arith.constant 5.000000e-01 : bf16
    %55 = vector.broadcast %cst_21 : bf16 to vector<2x16x256xbf16>
    %56 = arith.mulf %54, %55 : vector<2x16x256xbf16>
    %57 = math.tanh %56 : vector<2x16x256xbf16>
    %cst_22 = arith.constant 1.000000e+00 : bf16
    %58 = vector.broadcast %cst_22 : bf16 to vector<2x16x256xbf16>
    %59 = arith.addf %57, %58 : vector<2x16x256xbf16>
    %cst_23 = arith.constant 5.000000e-01 : bf16
    %60 = vector.broadcast %cst_23 : bf16 to vector<2x16x256xbf16>
    %61 = arith.mulf %60, %59 : vector<2x16x256xbf16>
    %62 = arith.mulf %54, %61 : vector<2x16x256xbf16>
    %63 = vector.shape_cast %62 : vector<2x16x256xbf16> to vector<32x256xbf16>
    %c0_24 = arith.constant 0 : index
    %c0_25 = arith.constant 0 : index
    %64 = vector.load %arg7[%c0_24, %c0_25] : memref<256x512xbf16, #tpu.memory_space<vmem>>, vector<256x512xbf16>
    %cst_26 = arith.constant dense<0.000000e+00> : vector<32x512xf32>
    %65 = tpu.matmul %63, %64, %cst_26 {dimension_numbers = #tpu.dot_dimension_numbers<[1], [0], [0], [1], [0, 0, 1, 1], [], []>} : vector<32x256xbf16>, vector<256x512xbf16>, vector<32x512xf32> -> vector<32x512xf32>
    %66 = vector.shape_cast %65 : vector<32x512xf32> to vector<2x16x512xf32>
    %cst_27 = arith.constant dense<0.000000e+00> : vector<2x512xf32>
    %67 = vector.multi_reduction <add>, %66, %cst_27 [1] : vector<2x16x512xf32> to vector<2x512xf32>
    %68 = vector.shape_cast %67 : vector<2x512xf32> to vector<2x1x512xf32>
    %cst_28 = arith.constant 6.250000e-02 : f32
    %69 = vector.broadcast %cst_28 : f32 to vector<2x1x512xf32>
    %70 = arith.mulf %68, %69 : vector<2x1x512xf32>
    %71 = arith.mulf %66, %66 : vector<2x16x512xf32>
    %cst_29 = arith.constant dense<0.000000e+00> : vector<2x512xf32>
    %72 = vector.multi_reduction <add>, %71, %cst_29 [1] : vector<2x16x512xf32> to vector<2x512xf32>
    %73 = vector.shape_cast %72 : vector<2x512xf32> to vector<2x1x512xf32>
    %cst_30 = arith.constant 6.250000e-02 : f32
    %74 = vector.broadcast %cst_30 : f32 to vector<2x1x512xf32>
    %75 = arith.mulf %73, %74 : vector<2x1x512xf32>
    %76 = arith.mulf %70, %70 : vector<2x1x512xf32>
    %77 = arith.subf %75, %76 : vector<2x1x512xf32>
    %cst_31 = arith.constant 0.000000e+00 : f32
    %78 = vector.broadcast %cst_31 : f32 to vector<2x1x512xf32>
    %79 = arith.maximumf %77, %78 : vector<2x1x512xf32>
    %c0_32 = arith.constant 0 : index
    %c0_33 = arith.constant 0 : index
    %80 = vector.load %arg8[%c0_32, %c0_33] : memref<1x512xf32, #tpu.memory_space<vmem>>, vector<1x512xf32>
    %cst_34 = arith.constant 9.99999974E-6 : f32
    %81 = vector.broadcast %cst_34 : f32 to vector<2x1x512xf32>
    %82 = arith.addf %79, %81 : vector<2x1x512xf32>
    %83 = math.rsqrt %82 : vector<2x1x512xf32>
    %84 = vector.shape_cast %80 : vector<1x512xf32> to vector<1x1x512xf32>
    %85 = vector.broadcast %84 : vector<1x1x512xf32> to vector<2x1x512xf32>
    %86 = arith.mulf %85, %83 : vector<2x1x512xf32>
    %c0_35 = arith.constant 0 : index
    %c0_36 = arith.constant 0 : index
    %87 = vector.load %arg9[%c0_35, %c0_36] : memref<1x512xf32, #tpu.memory_space<vmem>>, vector<1x512xf32>
    %88 = arith.mulf %70, %86 : vector<2x1x512xf32>
    %89 = vector.shape_cast %87 : vector<1x512xf32> to vector<1x1x512xf32>
    %90 = vector.broadcast %89 : vector<1x1x512xf32> to vector<2x1x512xf32>
    %91 = arith.subf %90, %88 : vector<2x1x512xf32>
    %92 = arith.truncf %66 : vector<2x16x512xf32> to vector<2x16x512xbf16>
    %93 = arith.truncf %86 : vector<2x1x512xf32> to vector<2x1x512xbf16>
    %94 = vector.broadcast %93 : vector<2x1x512xbf16> to vector<2x16x512xbf16>
    %95 = arith.mulf %92, %94 : vector<2x16x512xbf16>
    %96 = arith.truncf %91 : vector<2x1x512xf32> to vector<2x1x512xbf16>
    %97 = vector.broadcast %96 : vector<2x1x512xbf16> to vector<2x16x512xbf16>
    %98 = arith.addf %95, %97 : vector<2x16x512xbf16>
    %cst_37 = arith.constant 5.000000e-01 : bf16
    %99 = vector.broadcast %cst_37 : bf16 to vector<2x16x512xbf16>
    %100 = arith.mulf %98, %99 : vector<2x16x512xbf16>
    %101 = math.tanh %100 : vector<2x16x512xbf16>
    %cst_38 = arith.constant 1.000000e+00 : bf16
    %102 = vector.broadcast %cst_38 : bf16 to vector<2x16x512xbf16>
    %103 = arith.addf %101, %102 : vector<2x16x512xbf16>
    %cst_39 = arith.constant 5.000000e-01 : bf16
    %104 = vector.broadcast %cst_39 : bf16 to vector<2x16x512xbf16>
    %105 = arith.mulf %104, %103 : vector<2x16x512xbf16>
    %106 = arith.mulf %98, %105 : vector<2x16x512xbf16>
    %107 = vector.shape_cast %106 : vector<2x16x512xbf16> to vector<32x512xbf16>
    %c0_40 = arith.constant 0 : index
    %c0_41 = arith.constant 0 : index
    %108 = vector.load %arg10[%c0_40, %c0_41] : memref<512x1024xbf16, #tpu.memory_space<vmem>>, vector<512x1024xbf16>
    %cst_42 = arith.constant dense<0.000000e+00> : vector<32x1024xf32>
    %109 = tpu.matmul %107, %108, %cst_42 {dimension_numbers = #tpu.dot_dimension_numbers<[1], [0], [0], [1], [0, 0, 1, 1], [], []>} : vector<32x512xbf16>, vector<512x1024xbf16>, vector<32x1024xf32> -> vector<32x1024xf32>
    %110 = vector.shape_cast %109 : vector<32x1024xf32> to vector<2x16x1024xf32>
    %cst_43 = arith.constant dense<0.000000e+00> : vector<2x1024xf32>
    %111 = vector.multi_reduction <add>, %110, %cst_43 [1] : vector<2x16x1024xf32> to vector<2x1024xf32>
    %112 = vector.shape_cast %111 : vector<2x1024xf32> to vector<2x1x1024xf32>
    %cst_44 = arith.constant 6.250000e-02 : f32
    %113 = vector.broadcast %cst_44 : f32 to vector<2x1x1024xf32>
    %114 = arith.mulf %112, %113 : vector<2x1x1024xf32>
    %115 = arith.mulf %110, %110 : vector<2x16x1024xf32>
    %cst_45 = arith.constant dense<0.000000e+00> : vector<2x1024xf32>
    %116 = vector.multi_reduction <add>, %115, %cst_45 [1] : vector<2x16x1024xf32> to vector<2x1024xf32>
    %117 = vector.shape_cast %116 : vector<2x1024xf32> to vector<2x1x1024xf32>
    %cst_46 = arith.constant 6.250000e-02 : f32
    %118 = vector.broadcast %cst_46 : f32 to vector<2x1x1024xf32>
    %119 = arith.mulf %117, %118 : vector<2x1x1024xf32>
    %120 = arith.mulf %114, %114 : vector<2x1x1024xf32>
    %121 = arith.subf %119, %120 : vector<2x1x1024xf32>
    %cst_47 = arith.constant 0.000000e+00 : f32
    %122 = vector.broadcast %cst_47 : f32 to vector<2x1x1024xf32>
    %123 = arith.maximumf %121, %122 : vector<2x1x1024xf32>
    %c0_48 = arith.constant 0 : index
    %c0_49 = arith.constant 0 : index
    %124 = vector.load %arg11[%c0_48, %c0_49] : memref<1x1024xf32, #tpu.memory_space<vmem>>, vector<1x1024xf32>
    %cst_50 = arith.constant 9.99999974E-6 : f32
    %125 = vector.broadcast %cst_50 : f32 to vector<2x1x1024xf32>
    %126 = arith.addf %123, %125 : vector<2x1x1024xf32>
    %127 = math.rsqrt %126 : vector<2x1x1024xf32>
    %128 = vector.shape_cast %124 : vector<1x1024xf32> to vector<1x1x1024xf32>
    %129 = vector.broadcast %128 : vector<1x1x1024xf32> to vector<2x1x1024xf32>
    %130 = arith.mulf %129, %127 : vector<2x1x1024xf32>
    %c0_51 = arith.constant 0 : index
    %c0_52 = arith.constant 0 : index
    %131 = vector.load %arg12[%c0_51, %c0_52] : memref<1x1024xf32, #tpu.memory_space<vmem>>, vector<1x1024xf32>
    %132 = arith.mulf %114, %130 : vector<2x1x1024xf32>
    %133 = vector.shape_cast %131 : vector<1x1024xf32> to vector<1x1x1024xf32>
    %134 = vector.broadcast %133 : vector<1x1x1024xf32> to vector<2x1x1024xf32>
    %135 = arith.subf %134, %132 : vector<2x1x1024xf32>
    %136 = arith.truncf %110 : vector<2x16x1024xf32> to vector<2x16x1024xbf16>
    %137 = arith.truncf %130 : vector<2x1x1024xf32> to vector<2x1x1024xbf16>
    %138 = vector.broadcast %137 : vector<2x1x1024xbf16> to vector<2x16x1024xbf16>
    %139 = arith.mulf %136, %138 : vector<2x16x1024xbf16>
    %140 = arith.truncf %135 : vector<2x1x1024xf32> to vector<2x1x1024xbf16>
    %141 = vector.broadcast %140 : vector<2x1x1024xbf16> to vector<2x16x1024xbf16>
    %142 = arith.addf %139, %141 : vector<2x16x1024xbf16>
    %cst_53 = arith.constant 5.000000e-01 : bf16
    %143 = vector.broadcast %cst_53 : bf16 to vector<2x16x1024xbf16>
    %144 = arith.mulf %142, %143 : vector<2x16x1024xbf16>
    %145 = math.tanh %144 : vector<2x16x1024xbf16>
    %cst_54 = arith.constant 1.000000e+00 : bf16
    %146 = vector.broadcast %cst_54 : bf16 to vector<2x16x1024xbf16>
    %147 = arith.addf %145, %146 : vector<2x16x1024xbf16>
    %cst_55 = arith.constant 5.000000e-01 : bf16
    %148 = vector.broadcast %cst_55 : bf16 to vector<2x16x1024xbf16>
    %149 = arith.mulf %148, %147 : vector<2x16x1024xbf16>
    %150 = arith.mulf %142, %149 : vector<2x16x1024xbf16>
    %151 = arith.extf %150 : vector<2x16x1024xbf16> to vector<2x16x1024xf32>
    %c0_56 = arith.constant 0 : index
    %c0_57 = arith.constant 0 : index
    %152 = vector.load %arg13[%c0_56, %c0_57] : memref<1x1024xf32, #tpu.memory_space<vmem>>, vector<1x1024xf32>
    %153 = vector.shape_cast %152 : vector<1x1024xf32> to vector<1x1x1024xf32>
    %154 = vector.broadcast %153 : vector<1x1x1024xf32> to vector<2x16x1024xf32>
    %155 = arith.mulf %151, %154 : vector<2x16x1024xf32>
    %cst_58 = arith.constant dense<0.000000e+00> : vector<2x16xf32>
    %156 = vector.multi_reduction <add>, %155, %cst_58 [2] : vector<2x16x1024xf32> to vector<2x16xf32>
    %157 = vector.shape_cast %156 : vector<2x16xf32> to vector<2x16x1xf32>
    %c0_59 = arith.constant 0 : index
    %c0_60 = arith.constant 0 : index
    %158 = vector.load %arg14[%c0_59, %c0_60] : memref<1x1xf32, #tpu.memory_space<vmem>>, vector<1x1xf32>
    %159 = vector.shape_cast %158 : vector<1x1xf32> to vector<1x1x1xf32>
    %160 = vector.broadcast %159 : vector<1x1x1xf32> to vector<2x16x1xf32>
    %161 = arith.addf %157, %160 : vector<2x16x1xf32>
    %cst_61 = arith.constant 5.000000e-01 : f32
    %162 = vector.broadcast %cst_61 : f32 to vector<2x16x1xf32>
    %163 = arith.mulf %161, %162 : vector<2x16x1xf32>
    %164 = math.tanh %163 : vector<2x16x1xf32>
    %cst_62 = arith.constant 1.000000e+00 : f32
    %165 = vector.broadcast %cst_62 : f32 to vector<2x16x1xf32>
    %166 = arith.addf %164, %165 : vector<2x16x1xf32>
    %cst_63 = arith.constant 5.000000e-01 : f32
    %167 = vector.broadcast %cst_63 : f32 to vector<2x16x1xf32>
    %168 = arith.mulf %167, %166 : vector<2x16x1xf32>
    %c0_64 = arith.constant 0 : index
    %c0_65 = arith.constant 0 : index
    %c0_66 = arith.constant 0 : index
    %169 = vector.load %arg15[%c0_64, %c0_65, %c0_66] : memref<2x16x1xf32, #tpu.memory_space<vmem>>, vector<2x16x1xf32>
    tpu.vector_store %arg15[%c0_64, %c0_65, %c0_66], %168 {strides = array<i32>} : memref<2x16x1xf32, #tpu.memory_space<vmem>>, vector<2x16x1xf32>,
    return
  }
  func.func @transform_0(%arg0: i32) -> (i32, i32, i32) {
    %c0_i32 = arith.constant 0 : i32
    %c0_i32_0 = arith.constant 0 : i32
    %c0_i32_1 = arith.constant 0 : i32
    return %arg0, %c0_i32, %c0_i32_0 : i32, i32, i32
  }
  func.func @transform_1(%arg0: i32) -> (i32, i32) {
    %c0_i32 = arith.constant 0 : i32
    %c0_i32_0 = arith.constant 0 : i32
    %c0_i32_1 = arith.constant 0 : i32
    return %c0_i32, %c0_i32_0 : i32, i32
  }
  func.func @transform_2(%arg0: i32) -> (i32, i32) {
    %c0_i32 = arith.constant 0 : i32
    %c0_i32_0 = arith.constant 0 : i32
    %c0_i32_1 = arith.constant 0 : i32
    return %c0_i32, %c0_i32_0 : i32, i32
  }
  func.func @transform_3(%arg0: i32) -> (i32, i32) {
    %c0_i32 = arith.constant 0 : i32
    %c0_i32_0 = arith.constant 0 : i32
    %c0_i32_1 = arith.constant 0 : i32
    return %c0_i32, %c0_i32_0 : i32, i32
  }
  func.func @transform_4(%arg0: i32) -> (i32, i32) {
    %c0_i32 = arith.constant 0 : i32
    %c0_i32_0 = arith.constant 0 : i32
    %c0_i32_1 = arith.constant 0 : i32
    return %c0_i32, %c0_i32_0 : i32, i32
  }
  func.func @transform_5(%arg0: i32) -> (i32, i32) {
    %c0_i32 = arith.constant 0 : i32
    %c0_i32_0 = arith.constant 0 : i32
    %c0_i32_1 = arith.constant 0 : i32
    return %c0_i32, %c0_i32_0 : i32, i32
  }
  func.func @transform_6(%arg0: i32) -> (i32, i32) {
    %c0_i32 = arith.constant 0 : i32
    %c0_i32_0 = arith.constant 0 : i32
    %c0_i32_1 = arith.constant 0 : i32
    return %c0_i32, %c0_i32_0 : i32, i32
  }
  func.func @transform_7(%arg0: i32) -> (i32, i32) {
    %c0_i32 = arith.constant 0 : i32
    %c0_i32_0 = arith.constant 0 : i32
    %c0_i32_1 = arith.constant 0 : i32
    return %c0_i32, %c0_i32_0 : i32, i32
  }
  func.func @transform_8(%arg0: i32) -> (i32, i32) {
    %c0_i32 = arith.constant 0 : i32
    %c0_i32_0 = arith.constant 0 : i32
    %c0_i32_1 = arith.constant 0 : i32
    return %c0_i32, %c0_i32_0 : i32, i32
  }
  func.func @transform_9(%arg0: i32) -> (i32, i32) {
    %c0_i32 = arith.constant 0 : i32
    %c0_i32_0 = arith.constant 0 : i32
    %c0_i32_1 = arith.constant 0 : i32
    return %c0_i32, %c0_i32_0 : i32, i32
  }
  func.func @transform_10(%arg0: i32) -> (i32, i32) {
    %c0_i32 = arith.constant 0 : i32
    %c0_i32_0 = arith.constant 0 : i32
    %c0_i32_1 = arith.constant 0 : i32
    return %c0_i32, %c0_i32_0 : i32, i32
  }
  func.func @transform_11(%arg0: i32) -> (i32, i32) {
    %c0_i32 = arith.constant 0 : i32
    %c0_i32_0 = arith.constant 0 : i32
    %c0_i32_1 = arith.constant 0 : i32
    return %c0_i32, %c0_i32_0 : i32, i32
  }
  func.func @transform_12(%arg0: i32) -> (i32, i32) {
    %c0_i32 = arith.constant 0 : i32
    %c0_i32_0 = arith.constant 0 : i32
    %c0_i32_1 = arith.constant 0 : i32
    return %c0_i32, %c0_i32_0 : i32, i32
  }
  func.func @transform_13(%arg0: i32) -> (i32, i32) {
    %c0_i32 = arith.constant 0 : i32
    %c0_i32_0 = arith.constant 0 : i32
    %c0_i32_1 = arith.constant 0 : i32
    return %c0_i32, %c0_i32_0 : i32, i32
  }
  func.func @transform_14(%arg0: i32) -> (i32, i32, i32) {
    %c0_i32 = arith.constant 0 : i32
    %c0_i32_0 = arith.constant 0 : i32
    %c0_i32_1 = arith.constant 0 : i32
    return %arg0, %c0_i32, %c0_i32_0 : i32, i32, i32
  }
}

</mosaic_0001>

<bundles_post_ra>
// kernel: tpu_custom_call.1
= control target key start
LH: loop header
LB: loop body
LE: loop exit
PB: predicated region body
PF: predicated region fallthrough
CT: control target
= control target key end

     0   :  { %s10219_s0 = inlined_call_operand.vmem [shape: f32[2,16,1], index: 0, kind: input, shape index: {}]   ;;  %s10220_s1 = inlined_call_operand.hbm [shape: f32[1,128], index: 1, kind: input, shape index: {}]   ;;  %s10221_s2 = inlined_call_operand.vmem [shape: f32[1,128], index: 2, kind: input, shape index: {}]   ;;  %s10222_s3 = inlined_call_operand.hbm [shape: bf16[128,256], index: 3, kind: input, shape index: {}]   ;;  %s10223_s4 = inlined_call_operand.vmem [shape: f32[1,256], index: 4, kind: input, shape index: {}]   ;;  %s10224_s5 = inlined_call_operand.vmem [shape: f32[1,256], index: 5, kind: input, shape index: {}]   ;;  %s10225_s6 = inlined_call_operand.hbm [shape: bf16[256,512], index: 6, kind: input, shape index: {}]   ;;  %s10226_s7 = inlined_call_operand.vmem [shape: f32[1,512], index: 7, kind: input, shape index: {}]   ;;  %s10227_s8 = inlined_call_operand.vmem [shape: f32[1,512], index: 8, kind: input, shape index: {}]   ;;  %s10228_s9 = inlined_call_operand.hbm [shape: bf16[512,1024], index: 9, kind: input, shape index: {}]   ;;  %s10229_s10 = inlined_call_operand.vmem [shape: f32[1,1024], index: 10, kind: input, shape index: {}]   ;;  %s10230_s11 = inlined_call_operand.vmem [shape: f32[1,1024], index: 11, kind: input, shape index: {}]   ;;  %s10231_s12 = inlined_call_operand.vmem [shape: f32[1,1024], index: 12, kind: input, shape index: {}]   ;;  %s10232_s13 = inlined_call_operand.<no memory space> [shape: f32[1,1], index: 13, kind: input, shape index: {}]   ;;  %s10233_s14 = inlined_call_operand.vmem [shape: f32[2,16,1], index: 14, kind: output, shape index: {}]  }
   0x1   :  { %v19_v0 = vstv %s10232_s13 }
   0x2   :  { %20 = vst [vmem:[#allocation2] sm:$0x1] %v19_v0 }
   0x3   :  { %21 = vsyncpa [#allocation4], 0 }
   0x4   :  { %22 = vsyncpa [#allocation6], 0  ;;  %s43_s17 = sshll.u32 %s10222_s3, 4  ;;  %s44_s17 = int_to_ptr.hbm [resolvable:$true] %s43_s17 }
   0x5   :  { %23 = vsyncpa [#allocation9], 0  ;;  %s7937_s18 = smov [#allocation5]   ;;  %s31_s22 = sshll.u32 %s10220_s1, 4  ;;  %s32_s22 = int_to_ptr.hbm [resolvable:$true] %s31_s22 }
   0x6   :  { %s45_s19 = sshll.u32 %s7937_s18, 4  ;;  %s7938_s23 = smov 128   ;;  %s46_s19 = int_to_ptr.vmem [resolvable:$true] %s45_s19 }
   0x7   :  { %s7939_s24 = smov 8   ;;  %s7940_s13 = smov [#allocation3]  }
   0x8   :  { %51 = dma.hbm_to_vmem [thread:$0]  %s44_s17, 2048, %s46_s19, [#allocation6], %s7938_s23, %s7938_s23, %s7939_s24  }
   0x9   :  { %s33_s25 = sshll.u32 %s7940_s13, 4  ;;  %s60_s28 = sshll.u32 %s10225_s6, 4  ;;  %s34_s25 = int_to_ptr.vmem [resolvable:$true] %s33_s25  ;;  %s61_s28 = int_to_ptr.hbm [resolvable:$true] %s60_s28 }
   0xa   :  { %36 = dma.hbm_to_vmem [thread:$0]  %s32_s22, 16, %s34_s25, [#allocation4]  }
   0xb   :  { %s7941_s3 = smov [#allocation7]   ;;  %s77_s1 = sshll.u32 %s10228_s9, 4  ;;  %s78_s1 = int_to_ptr.hbm [resolvable:$true] %s77_s1 }
   0xc   :  { %s62_s29 = sshll.u32 %s7941_s3, 4  ;;  %s7942_s16 = smov 256   ;;  %s63_s29 = int_to_ptr.vmem [resolvable:$true] %s62_s29 }
   0xd   :  { %s7943_s18 = smov 16   ;;  %s7944_s17 = smov [#allocation8]  }
   0xe   :  { %68 = dma.hbm_to_vmem [thread:$0]  %s61_s28, 8192, %s63_s29, [#allocation6], %s7942_s16, %s7942_s16, %s7943_s18  }
   0xf   :  { %s79_s19 = sshll.u32 %s7944_s17, 4  ;;  %s7945_s20 = smov 512   ;;  %s80_s19 = int_to_ptr.vmem [resolvable:$true] %s79_s19 }
  0x10   :  { %s7946_s21 = smov 32  }
  0x11   :  { %85 = dma.hbm_to_vmem [thread:$0]  %s78_s1, 32768, %s80_s19, [#allocation9], %s7945_s20, %s7945_s20, %s7946_s21  }
  0x12   :  { %7931 = dma.done.wait [#allocation4], 16  }
  0x13   :  { %7932 = vsyncadd [#allocation4], 4294967280 }
  0x14   :  { %7933 = dma.done.wait [#allocation6], 10240  }
  0x15   :  { %7934 = vsyncadd [#allocation6], 4294957056 }
  0x16   :  { %7935 = dma.done.wait [#allocation9], 32768  }
  0x17   :  { %7936 = vsyncadd [#allocation9], 4294934528  ;;  %v7947_v1 = vmov 0   ;;  %v112_v2 = vld [vmem:[%s10219_s0 + $0x10] sm:$0xff]  ;;  %v110_v3 = vld [vmem:[%s10219_s0] sm:$0xff]  ;;  %vm495_vm5 = vcmask 1040384  }
  0x18   :  { %7647 = vset.pattern.permute.xlu1 %v7947_v1  ;;  %7646 = vset.pattern.permute.xlu0 %v7947_v1  ;;  %v113_v4 = vld [vmem:[%s10219_s0 + $0x18] sm:$0xff]  ;;  %v111_v5 = vld [vmem:[%s10219_s0 + $0x8] sm:$0xff]  ;;  %v5997_v6 = vld [vmem:[#allocation5 + $0x70] sm:$0xf] }
  0x19   :  { %127 = vperm.xlu1 %7647, %v112_v2   ;;  %117 = vperm.xlu0 %7646, %v110_v3   ;;  %v7298_v7 = vld [vmem:[#allocation5 + $0x74] sm:$0xf0]  ;;  %v7297_v8 = vld [vmem:[#allocation5 + $0x74] sm:$0xf]  ;;  %v5999_v10 = vld [vmem:[#allocation5 + $0x78] sm:$0xf0] }
  0x1a   :  { %v5998_v9 = vor.u32 %v7298_v7, %v5997_v6  ;;  %v6002_v11 = vor.u32 %v7297_v8, %v5999_v10  ;;  %v5989_v12 = vld [vmem:[#allocation5 + $0x60] sm:$0xf]  ;;  %v7296_v13 = vld [vmem:[#allocation5 + $0x64] sm:$0xf0]  ;;  %v7295_v14 = vld [vmem:[#allocation5 + $0x64] sm:$0xf] }
  0x1b   :  { %v5990_v15 = vor.u32 %v7296_v13, %v5989_v12  ;;  %v5991_v16 = vld [vmem:[#allocation5 + $0x68] sm:$0xf0]  ;;  %v7648_v18 = vld [vmem:[#allocation3] ss:$0 sm:$0xff]  ;;  %v5981_v19 = vld [vmem:[#allocation5 + $0x50] sm:$0xf] }
  0x1c   :  { %322 = vmatpush.bf16.msra.mxu0 %v5998_v9  ;;  %341 = vmatpush.bf16.msra.mxu1 %v6002_v11  ;;  %v5994_v17 = vor.u32 %v7295_v14, %v5991_v16  ;;  %v7294_v20 = vld [vmem:[#allocation5 + $0x54] sm:$0xf0]  ;;  %v7293_v21 = vld [vmem:[#allocation5 + $0x54] sm:$0xf]  ;;  %v5983_v23 = vld [vmem:[#allocation5 + $0x58] sm:$0xf0] }
  0x1d   :  { %v5982_v22 = vor.u32 %v7294_v20, %v5981_v19  ;;  %v7649_v24 = vld [vmem:[%s10221_s2] ss:$0 sm:$0xff]  ;;  %v5986_v25 = vor.u32 %v7293_v21, %v5983_v23  ;;  %v5973_v30 = vld [vmem:[#allocation5 + $0x40] sm:$0xf]  ;;  %v7292_v31 = vld [vmem:[#allocation5 + $0x44] sm:$0xf0] }
  0x1e   :  { %v7291_v32 = vld [vmem:[#allocation5 + $0x44] sm:$0xf]  ;;  %v5974_v33 = vor.u32 %v7292_v31, %v5973_v30  ;;  %v5975_v34 = vld [vmem:[#allocation5 + $0x48] sm:$0xf0]  ;;  %v5965_v35 = vld [vmem:[#allocation5 + $0x30] sm:$0xf] }
  0x1f   :  { %v7290_v36 = vld [vmem:[#allocation5 + $0x34] sm:$0xf0]  ;;  %v5978_v39 = vor.u32 %v7291_v32, %v5975_v34  ;;  %v7289_v40 = vld [vmem:[#allocation5 + $0x34] sm:$0xf]  ;;  %v5967_v41 = vld [vmem:[#allocation5 + $0x38] sm:$0xf0] }
  0x20   :  { %323 = vmatpush.bf16.msra.mxu0 %v5990_v15  ;;  %342 = vmatpush.bf16.msra.mxu1 %v5994_v17  ;;  %v5966_v42 = vor.u32 %v7290_v36, %v5965_v35  ;;  %v5957_v43 = vld [vmem:[#allocation5 + $0x20] sm:$0xf]  ;;  %v5970_v46 = vor.u32 %v7289_v40, %v5967_v41  ;;  %v7288_v47 = vld [vmem:[#allocation5 + $0x24] sm:$0xf0]  ;;  %v7287_v48 = vld [vmem:[#allocation5 + $0x24] sm:$0xf] }
  0x21   :  { %132 = vperm.xlu1 %7647, %v113_v4   ;;  %122 = vperm.xlu0 %7646, %v111_v5   ;;  %v5959_v49 = vld [vmem:[#allocation5 + $0x28] sm:$0xf0]  ;;  %v5958_v54 = vor.u32 %v7288_v47, %v5957_v43  ;;  %v5949_v60 = vld [vmem:[#allocation5 + $0x10] sm:$0xf]  ;;  %v7286_v61 = vld [vmem:[#allocation5 + $0x14] sm:$0xf0] }
  0x22   :  { %v5962_v55 = vor.u32 %v7287_v48, %v5959_v49  ;;  %v7285_v62 = vld [vmem:[#allocation5 + $0x14] sm:$0xf]  ;;  %v5951_v63 = vld [vmem:[#allocation5 + $0x18] sm:$0xf0]  ;;  %v5950_v4 = vor.u32 %v7286_v61, %v5949_v60  ;;  %v5941_v9 = vld [vmem:[#allocation5] sm:$0xf] }
  0x23   :  { %v5954_v8 = vor.u32 %v7285_v62, %v5951_v63  ;;  %v7284_v10 = vld [vmem:[#allocation5 + $0x4] sm:$0xf0]  ;;  %v7283_v12 = vld [vmem:[#allocation5 + $0x4] sm:$0xf]  ;;  %v5943_v13 = vld [vmem:[#allocation5 + $0x8] sm:$0xf0] }
  0x24   :  { %324 = vmatpush.bf16.msra.mxu0 %v5982_v22  ;;  %343 = vmatpush.bf16.msra.mxu1 %v5986_v25  ;;  %v5942_v16 = vor.u32 %v7284_v10, %v5941_v9  ;;  %v5946_v19 = vor.u32 %v7283_v12, %v5943_v13 }
  0x28   :  { %325 = vmatpush.bf16.msra.mxu0 %v5974_v33  ;;  %344 = vmatpush.bf16.msra.mxu1 %v5978_v39 }
  0x2c   :  { %326 = vmatpush.bf16.msra.mxu0 %v5966_v42  ;;  %345 = vmatpush.bf16.msra.mxu1 %v5970_v46 }
  0x30   :  { %327 = vmatpush.bf16.msra.mxu0 %v5958_v54  ;;  %346 = vmatpush.bf16.msra.mxu1 %v5962_v55 }
  0x34   :  { %328 = vmatpush.bf16.msra.mxu0 %v5950_v4  ;;  %347 = vmatpush.bf16.msra.mxu1 %v5954_v8 }
  0x38   :  { %329 = vmatpush.bf16.msra.mxu0 %v5942_v16  ;;  %348 = vmatpush.bf16.msra.mxu1 %v5946_v19 }
  0x8b   :  { %v128_v26 = vpop.permute.xlu1 %127  ;;  %v118_v27 = vpop.permute.xlu0 %117 }
  0x8c   :  { %v140_v28 = vmul.f32 %v7648_v18, %v128_v26  ;;  %v138_v29 = vmul.f32 %v7648_v18, %v118_v27 }
  0x8e   :  { %v148_v37 = vadd.f32 %v7649_v24, %v140_v28  ;;  %v146_v38 = vadd.f32 %v7649_v24, %v138_v29 }
  0x90   :  { %v152_v44 = vpack.c.bf16 %v148_v37, %v148_v37  ;;  %v150_v45 = vpack.c.bf16 %v146_v38, %v146_v38 }
  0x92   :  { %v8053_v50 = vunpack.c.l.bf16 %v152_v44  ;;  %v8055_v51 = vunpack.c.l.bf16 %v150_v45 }
  0x93   :  { %v133_v52 = vpop.permute.xlu1 %132  ;;  %v123_v53 = vpop.permute.xlu0 %122 }
  0x94   :  { %v160_v56 = vmul.f32 0.5, %v8053_v50  ;;  %v158_v57 = vmul.f32 0.5, %v8055_v51  ;;  %v141_v58 = vmul.f32 %v7648_v18, %v133_v52  ;;  %v139_v59 = vmul.f32 %v7648_v18, %v123_v53 }
  0x96   :  { %v164_v0 = vpack.c.bf16 %v160_v56, %v160_v56  ;;  %v162_v1 = vpack.c.bf16 %v158_v57, %v158_v57  ;;  %v149_v2 = vadd.f32 %v7649_v24, %v141_v58  ;;  %v147_v3 = vadd.f32 %v7649_v24, %v139_v59 }
  0x98   :  { %v166_v5 = vunpack.c.l.bf16 %v162_v1  ;;  %v153_v6 = vpack.c.bf16 %v149_v2, %v149_v2  ;;  %v151_v7 = vpack.c.bf16 %v147_v3, %v147_v3  ;;  %v168_v11 = vunpack.c.l.bf16 %v164_v0 }
  0x9a   :  { %v8059_v14 = vunpack.c.l.bf16 %v153_v6  ;;  %v155_v15 = vunpack.c.l.bf16 %v151_v7  ;;  %7651 = vtanh.f32 %v166_v5 }
  0x9b   :  { %7653 = vtanh.f32 %v168_v11 }
  0x9c   :  { %v161_v17 = vmul.f32 0.5, %v8059_v14  ;;  %v159_v18 = vmul.f32 0.5, %v155_v15 }
  0x9e   :  { %v165_v20 = vpack.c.bf16 %v161_v17, %v161_v17  ;;  %v163_v21 = vpack.c.bf16 %v159_v18, %v159_v18 }
  0xa0   :  { %v169_v22 = vunpack.c.l.bf16 %v165_v20  ;;  %v167_v23 = vunpack.c.l.bf16 %v163_v21  ;;  %v7652_v24 = vpop.eup %7651 }
  0xa1   :  { %v174_v25 = vpack.c.bf16 %v7652_v24, %v7652_v24  ;;  %v7654_v26 = vpop.eup %7653 }
  0xa2   :  { %7655 = vtanh.f32 %v169_v22  ;;  %v176_v28 = vpack.c.bf16 %v7654_v26, %v7654_v26 }
  0xa3   :  { %7657 = vtanh.f32 %v167_v23  ;;  %v178_v27 = vunpack.c.l.bf16 %v174_v25 }
  0xa4   :  { %v180_v34 = vunpack.c.l.bf16 %v176_v28 }
  0xa5   :  { %v182_v29 = vadd.f32 1.0, %v178_v27 }
  0xa6   :  { %v184_v43 = vadd.f32 1.0, %v180_v34 }
  0xa7   :  { %v186_v31 = vpack.c.bf16 %v182_v29, %v182_v29 }
  0xa8   :  { %v7656_v30 = vpop.eup %7655  ;;  %v188_v48 = vpack.c.bf16 %v184_v43, %v184_v43 }
  0xa9   :  { %v7658_v32 = vpop.eup %7657  ;;  %v177_v33 = vpack.c.bf16 %v7656_v30, %v7656_v30  ;;  %v190_v36 = vunpack.c.l.bf16 %v186_v31 }
  0xaa   :  { %v175_v35 = vpack.c.bf16 %v7658_v32, %v7658_v32  ;;  %v192_v55 = vunpack.c.l.bf16 %v188_v48 }
  0xab   :  { %v181_v37 = vunpack.c.l.bf16 %v177_v33  ;;  %v194_v39 = vmul.f32 0.5, %v190_v36 }
  0xac   :  { %v179_v38 = vunpack.c.l.bf16 %v175_v35  ;;  %v196_v60 = vmul.f32 0.5, %v192_v55 }
  0xad   :  { %v185_v40 = vadd.f32 1.0, %v181_v37  ;;  %v198_v42 = vpack.c.bf16 %v194_v39, %v194_v39 }
  0xae   :  { %v183_v41 = vadd.f32 1.0, %v179_v38  ;;  %v200_v1 = vpack.c.bf16 %v196_v60, %v196_v60 }
  0xaf   :  { %v189_v45 = vpack.c.bf16 %v185_v40, %v185_v40  ;;  %v202_v47 = vunpack.c.l.bf16 %v198_v42 }
  0xb0   :  { %v187_v44 = vpack.c.bf16 %v183_v41, %v183_v41  ;;  %v204_v4 = vunpack.c.l.bf16 %v200_v1 }
  0xb1   :  { %v193_v52 = vunpack.c.l.bf16 %v189_v45  ;;  %v206_v54 = vmul.f32 %v202_v47, %v8055_v51 }
  0xb2   :  { %v191_v46 = vunpack.c.l.bf16 %v187_v44  ;;  %v208_v51 = vmul.f32 %v204_v4, %v8053_v50 }
  0xb3   :  { %v197_v57 = vmul.f32 0.5, %v193_v52  ;;  %v210_v59 = vpack.c.bf16 %v206_v54, %v206_v54 }
  0xb4   :  { %v195_v49 = vmul.f32 0.5, %v191_v46  ;;  %v212_v7 = vpack.c.bf16 %v208_v51, %v208_v51 }
  0xb5   :  { %v201_v62 = vpack.c.bf16 %v197_v57, %v197_v57  ;;  %v234_v63 = vunpack.c.l.b16 %v210_v59 }
  0xb6   :  { %v199_v53 = vpack.c.bf16 %v195_v49, %v195_v49  ;;  %v236_v9 = vunpack.c.l.b16 %v212_v7 }
  0xb7   :  { %v205_v3 = vunpack.c.l.bf16 %v201_v62 }
  0xb8   :  { %v203_v56 = vunpack.c.l.bf16 %v199_v53 }
  0xb9   :  { %v209_v5 = vmul.f32 %v205_v3, %v8059_v14 }
  0xba   :  { %v207_v58 = vmul.f32 %v203_v56, %v155_v15 }
  0xbb   :  { %v213_v6 = vpack.c.bf16 %v209_v5, %v209_v5 }
  0xbc   :  { %v211_v61 = vpack.c.bf16 %v207_v58, %v207_v58 }
  0xbd   :  { %v237_v8 = vunpack.c.l.b16 %v213_v6 }
  0xbe   :  { %v235_v0 = vunpack.c.l.b16 %v211_v61 }
  0xbf   :  { %v239_v10 = vpack.c.b16 %v237_v8, %v236_v9 }
  0xc0   :  { %v238_v2 = vpack.c.b16 %v235_v0, %v234_v63 }
  0xc2   :  { %330 = vmatmul.bf16.vlgmr.msra.gmra.mxu0 %v238_v2  ;;  %349 = vmatmul.bf16.vlgmr.msra.gmra.mxu1 %v238_v2 }
  0xd2   :  { %335 = vmatmul.bf16.gmra.mxu0 %v239_v10  ;;  %354 = vmatmul.bf16.gmra.mxu1 %v239_v10 }
 0x13f   :  { %v331_v11 = vpop.f32.mrf.mxu0  ;;  %v350_v12 = vpop.f32.mrf.mxu1 }
 0x140   :  { %v8065_v13 = vpack.c.bf16 %v350_v12, %v331_v11  ;;  %v392_v15 = vmul.f32 %v331_v11, %v331_v11  ;;  %v393_v16 = vmul.f32 %v350_v12, %v350_v12 }
 0x147   :  { %v8067_v17 = vpop.f32.mrf.mxu0  ;;  %v8069_v18 = vpop.f32.mrf.mxu1 }
 0x148   :  { %v360_v14 = vadd.f32 %v8067_v17, %v331_v11  ;;  %v394_v50 = vmul.f32 %v8067_v17, %v8067_v17  ;;  %v367_v19 = vadd.f32 %v8069_v18, %v350_v12  ;;  %v395_v20 = vmul.f32 %v8069_v18, %v8069_v18 }
 0x14a   :  { %v361_v21 = vrot.slane %v360_v14, 4  ;;  %v400_v22 = vadd.f32 %v394_v50, %v392_v15  ;;  %v368_v23 = vrot.slane %v367_v19, 4  ;;  %v407_v24 = vadd.f32 %v395_v20, %v393_v16 }
 0x14c   :  { %v362_v25 = vadd.f32 %v361_v21, %v360_v14  ;;  %v401_v26 = vrot.slane %v400_v22, 4  ;;  %v369_v27 = vadd.f32 %v368_v23, %v367_v19  ;;  %v408_v28 = vrot.slane %v407_v24, 4 }
 0x14e   :  { %v363_v29 = vrot.slane %v362_v25, 2  ;;  %v402_v30 = vadd.f32 %v401_v26, %v400_v22  ;;  %v370_v31 = vrot.slane %v369_v27, 2  ;;  %v409_v32 = vadd.f32 %v408_v28, %v407_v24 }
 0x14f   :  { %v336_v33 = vpop.f32.mrf.mxu0  ;;  %v355_v34 = vpop.f32.mrf.mxu1 }
 0x150   :  { %v364_v35 = vadd.f32 %v363_v29, %v362_v25  ;;  %v403_v36 = vrot.slane %v402_v30, 2  ;;  %v371_v37 = vadd.f32 %v370_v31, %v369_v27  ;;  %v410_v38 = vrot.slane %v409_v32, 2 }
 0x151   :  { %v8077_v39 = vpack.c.bf16 %v355_v34, %v336_v33  ;;  %v396_v54 = vmul.f32 %v336_v33, %v336_v33  ;;  %v397_v55 = vmul.f32 %v355_v34, %v355_v34 }
 0x152   :  { %v365_v40 = vrot.slane %v364_v35, 1  ;;  %v404_v41 = vadd.f32 %v403_v36, %v402_v30  ;;  %v372_v42 = vrot.slane %v371_v37, 1  ;;  %v411_v43 = vadd.f32 %v410_v38, %v409_v32 }
 0x154   :  { %v366_v44 = vadd.f32 %v365_v40, %v364_v35  ;;  %v405_v45 = vrot.slane %v404_v41, 1  ;;  %v373_v46 = vadd.f32 %v372_v42, %v371_v37  ;;  %v412_v47 = vrot.slane %v411_v43, 1 }
 0x156   :  { %v8079_v48 = vmul.f32 0.0625, %v366_v44  ;;  %v406_v49 = vadd.f32 %v405_v45, %v404_v41  ;;  %v8081_v52 = vmul.f32 0.0625, %v373_v46  ;;  %v413_v53 = vadd.f32 %v412_v47, %v411_v43 }
 0x157   :  { %v8083_v56 = vpop.f32.mrf.mxu0  ;;  %v8085_v57 = vpop.f32.mrf.mxu1 }
 0x158   :  { %v428_v58 = vmul.f32 0.0625, %v406_v49  ;;  %v432_v59 = vmul.f32 %v8079_v48, %v8079_v48  ;;  %v429_v60 = vmul.f32 0.0625, %v413_v53  ;;  %v433_v61 = vmul.f32 %v8081_v52, %v8081_v52 }
 0x159   :  { %v374_v62 = vadd.f32 %v8083_v56, %v336_v33  ;;  %v398_v63 = vmul.f32 %v8083_v56, %v8083_v56  ;;  %v381_v0 = vadd.f32 %v8085_v57, %v355_v34  ;;  %v399_v1 = vmul.f32 %v8085_v57, %v8085_v57 }
 0x15a   :  { %v436_v2 = vsub.f32 %v428_v58, %v432_v59  ;;  %v437_v3 = vsub.f32 %v429_v60, %v433_v61 }
 0x15b   :  { %v375_v4 = vrot.slane %v374_v62, 4  ;;  %v414_v5 = vadd.f32 %v398_v63, %v396_v54  ;;  %v382_v51 = vrot.slane %v381_v0, 4  ;;  %v421_v6 = vadd.f32 %v399_v1, %v397_v55 }
 0x15c   :  { %v440_v7 = vmax.f32 %v436_v2, 0.0  ;;  %v441_v8 = vmax.f32 %v437_v3, 0.0  ;;  %v8114_v3 = vld [vmem:[%s10223_s4] sm:$0x3] }
 0x15d   :  { %v376_v9 = vadd.f32 %v375_v4, %v374_v62  ;;  %v415_v10 = vrot.slane %v414_v5, 4  ;;  %v383_v11 = vadd.f32 %v382_v51, %v381_v0  ;;  %v422_v12 = vrot.slane %v421_v6, 4 }
 0x15e   :  { %v445_v15 = vadd.f32 1e-05, %v440_v7  ;;  %v446_v16 = vadd.f32 1e-05, %v441_v8  ;;  %v8122_v8 = vpack.c.bf16 %v8069_v18, %v8067_v17  ;;  %v8137_v18 = vld [vmem:[%s10224_s5] sm:$0x3] }
 0x15f   :  { %v377_v14 = vrot.slane %v376_v9, 2  ;;  %v416_v50 = vadd.f32 %v415_v10, %v414_v5  ;;  %v384_v19 = vrot.slane %v383_v11, 2  ;;  %v423_v20 = vadd.f32 %v422_v12, %v421_v6 }
 0x160   :  { %7659 = vrsqrt.f32 %v445_v15  ;;  %vm465_vm1 = vweird.f32 %v446_v16  ;;  %vm455_vm4 = vweird.f32 %v445_v15 }
 0x161   :  { %7661 = vrsqrt.f32 %v446_v16  ;;  %v378_v21 = vadd.f32 %v377_v14, %v376_v9  ;;  %v417_v22 = vrot.slane %v416_v50, 2  ;;  %v385_v23 = vadd.f32 %v384_v19, %v383_v11 }
 0x162   :  { %v424_v24 = vrot.slane %v423_v20, 2  ;;  %v562_v14 = vunpack.c.h.bf16 %v8065_v13 }
 0x163   :  { %v379_v25 = vrot.slane %v378_v21, 1  ;;  %v418_v26 = vadd.f32 %v417_v22, %v416_v50  ;;  %v386_v27 = vrot.slane %v385_v23, 1  ;;  %v564_v22 = vunpack.c.h.bf16 %v8122_v8 }
 0x164   :  { %v425_v28 = vadd.f32 %v424_v24, %v423_v20 }
 0x165   :  { %v380_v29 = vadd.f32 %v379_v25, %v378_v21  ;;  %v419_v30 = vrot.slane %v418_v26, 1  ;;  %v387_v31 = vadd.f32 %v386_v27, %v385_v23  ;;  %v563_v21 = vunpack.c.l.bf16 %v8122_v8  ;;  %v6117_v27 = vld [vmem:[#allocation7 + $0xe0] sm:$0xf] }
 0x166   :  { %v7660_v32 = vpop.eup %7659  ;;  %v426_v33 = vrot.slane %v425_v28, 1  ;;  %v6197_v8 = vld [vmem:[#allocation7 + $0x180] sm:$0xf] }
 0x167   :  { %v7662_v34 = vpop.eup %7661  ;;  %v450_v35 = vmul.f32 %v7660_v32, %v445_v15  ;;  %v8097_v36 = vmul.f32 0.0625, %v380_v29  ;;  %v420_v37 = vadd.f32 %v419_v30, %v418_v26  ;;  %v8099_v40 = vmul.f32 0.0625, %v387_v31  ;;  %v6245_v31 = vld [vmem:[#allocation7 + $0x1e0] sm:$0xf] }
 0x168   :  { %v460_v38 = vmul.f32 %v7662_v34, %v446_v16  ;;  %v427_v41 = vadd.f32 %v426_v33, %v425_v28  ;;  %vm466_vm0 = vweird.f32 %v7662_v34  ;;  %vm456_vm2 = vweird.f32 %v7660_v32  ;;  %v7329_v28 = vld [vmem:[#allocation7 + $0xec] sm:$0xf0] }
 0x169   :  { %v451_v42 = vmul.f32 %v7660_v32, %v450_v35  ;;  %v430_v43 = vmul.f32 0.0625, %v420_v37  ;;  %v434_v44 = vmul.f32 %v8097_v36, %v8097_v36  ;;  %v435_v47 = vmul.f32 %v8099_v40, %v8099_v40  ;;  %vm467_vm3 = vmor %vm465_vm1, %vm466_vm0  ;;  %v7327_v37 = vld [vmem:[#allocation7 + $0xe4] sm:$0xf] }
 0x16a   :  { %v461_v45 = vmul.f32 %v7662_v34, %v460_v38  ;;  %v431_v46 = vmul.f32 0.0625, %v427_v41  ;;  %vm457_vm6 = vmor %vm455_vm4, %vm456_vm2  ;;  %v561_v15 = vunpack.c.l.bf16 %v8065_v13  ;;  %v6118_v30 = vor.u32 %v7329_v28, %v6117_v27  ;;  %v6119_v38 = vld [vmem:[#allocation7 + $0xf0] sm:$0xf0]  ;;  %v7353_v27 = vld [vmem:[#allocation7 + $0x1ac] sm:$0xf0] }
 0x16b   :  { %v452_v49 = vmul.f32 0.5, %v451_v42  ;;  %v438_v53 = vsub.f32 %v430_v43, %v434_v44  ;;  %v6122_v44 = vor.u32 %v7327_v37, %v6119_v38  ;;  %v8177_v37 = vpack.c.bf16 %v8085_v57, %v8083_v56  ;;  %v6215_v38 = vld [vmem:[#allocation7 + $0x1b0] sm:$0xf0] }
 0x16c   :  { %v462_v54 = vmul.f32 0.5, %v461_v45  ;;  %v439_v55 = vsub.f32 %v431_v46, %v435_v47  ;;  %1151 = vmatpush.bf16.msra.mxu2 %v6118_v30  ;;  %v7359_v45 = vld [vmem:[#allocation7 + $0x1e4] sm:$0xf]  ;;  %v6247_v46 = vld [vmem:[#allocation7 + $0x1f0] sm:$0xf0]  ;;  %v566_v13 = vunpack.c.h.bf16 %v8077_v39 }
 0x16d   :  { %v453_v58 = vsub.f32 1.5, %v452_v49  ;;  %v442_v59 = vmax.f32 %v438_v53, 0.0  ;;  %v6250_v53 = vor.u32 %v7359_v45, %v6247_v46  ;;  %1189 = vmatpush.bf16.msrb.mxu0 %v6122_v44  ;;  %v7315_v46 = vld [vmem:[#allocation7 + $0x84] sm:$0xf] }
 0x16e   :  { %v463_v60 = vsub.f32 1.5, %v462_v54  ;;  %v443_v61 = vmax.f32 %v439_v55, 0.0  ;;  %v6101_v54 = vld [vmem:[#allocation7 + $0xc0] sm:$0xf]  ;;  %v7325_v55 = vld [vmem:[#allocation7 + $0xcc] sm:$0xf0] }
 0x16f   :  { %v8105_v62 = vadd.f32 1e-05, %v442_v59  ;;  %v454_v63 = vmul.f32 %v7660_v32, %v453_v58  ;;  %v6229_v58 = vld [vmem:[#allocation7 + $0x1c0] sm:$0xf]  ;;  %1208 = vmatpush.bf16.msrb.mxu1 %v6250_v53  ;;  %v7347_v53 = vld [vmem:[#allocation7 + $0x184] sm:$0xf] }
 0x170   :  { %v464_v0 = vmul.f32 %v7662_v34, %v463_v60  ;;  %v8107_v1 = vadd.f32 1e-05, %v443_v61 }
 0x171   :  { %7663 = vrsqrt.f32 %v8105_v62  ;;  %v458_v5 = vsel %vm457_vm6, %v7660_v32, %v454_v63  ;;  %v6102_v63 = vor.u32 %v7325_v55, %v6101_v54  ;;  %vm475_vm11 = vweird.f32 %v8105_v62  ;;  %v6199_v54 = vld [vmem:[#allocation7 + $0x190] sm:$0xf0] }
 0x172   :  { %v468_v2 = vsel %vm467_vm3, %v7662_v34, %v464_v0  ;;  %7665 = vrsqrt.f32 %v8107_v1  ;;  %vm485_vm7 = vweird.f32 %v8107_v1  ;;  %v7357_v0 = vld [vmem:[#allocation7 + $0x1cc] sm:$0xf0] }
 0x173   :  { %v493_v4 = vrot.slane %v468_v2, 7  ;;  %v7323_v2 = vld [vmem:[#allocation7 + $0xc4] sm:$0xf]  ;;  %1152 = vmatpush.bf16.msra.mxu2 %v6102_v63  ;;  %v8185_v63 = vld [vmem:[#allocation7 + $0x160] sm:$0xf] }
 0x175   :  { %v496_v51 = vsel %vm495_vm5, %v458_v5, %v493_v4 }
 0x176   :  { %v500_v6 = vmul.f32 %v496_v51, %v8114_v3 }
 0x177   :  { %v8118_v7 = vpop.eup %7663 }
 0x178   :  { %v8124_v9 = vpop.eup %7665  ;;  %v505_v10 = vperm.slane %v500_v6, 0  ;;  %v506_v11 = vperm.slane %v500_v6, 1  ;;  %v470_v12 = vmul.f32 %v8118_v7, %v8105_v62  ;;  %vm476_vm9 = vweird.f32 %v8118_v7  ;;  %v6213_v62 = vld [vmem:[#allocation7 + $0x1a0] sm:$0xf] }
 0x179   :  { %v480_v16 = vmul.f32 %v8124_v9, %v8107_v1  ;;  %vm486_vm8 = vweird.f32 %v8124_v9  ;;  %v7321_v1 = vld [vmem:[#allocation7 + $0xac] sm:$0xf0]  ;;  %vm8164_vm12 = vmor %vm475_vm11, %vm476_vm9  ;;  %v6214_v30 = vor.u32 %v7353_v27, %v6213_v62  ;;  %v7307_v27 = vld [vmem:[#allocation7 + $0x44] sm:$0xf]  ;;  %vm1575_vm11 = vcmask 1042434  }
 0x17a   :  { %v514_v50 = vmul.f32 %v506_v11, %v8081_v52  ;;  %v533_v19 = vpack.c.bf16 %v506_v11, %v505_v10  ;;  %v471_v17 = vmul.f32 %v8118_v7, %v470_v12  ;;  %v513_v20 = vmul.f32 %v505_v10, %v8079_v48  ;;  %v7361_v48 = vld [vmem:[#allocation7 + $0x1ec] sm:$0xf0]  ;;  %vm8154_vm10 = vmor %vm485_vm7, %vm486_vm8  ;;  %v6103_v11 = vld [vmem:[#allocation7 + $0xd0] sm:$0xf0] }
 0x17b   :  { %v481_v23 = vmul.f32 %v8124_v9, %v480_v16  ;;  %v6246_v43 = vor.u32 %v7361_v48, %v6245_v31  ;;  %v6230_v10 = vor.u32 %v7357_v0, %v6229_v58  ;;  %v7355_v12 = vld [vmem:[#allocation7 + $0x1c4] sm:$0xf]  ;;  %v6087_v48 = vld [vmem:[#allocation7 + $0xb0] sm:$0xf0]  ;;  %v7341_v62 = vld [vmem:[#allocation7 + $0x14c] sm:$0xf0] }
 0x17c   :  { %v521_v24 = vrot.slane %v514_v50, 7  ;;  %v537_v25 = vunpack.c.l.b16 %v533_v19  ;;  %v538_v26 = vunpack.c.h.b16 %v533_v19  ;;  %v472_v52 = vmul.f32 0.5, %v471_v17  ;;  %v6231_v17 = vld [vmem:[#allocation7 + $0x1d0] sm:$0xf0]  ;;  %v7319_v31 = vld [vmem:[#allocation7 + $0xa4] sm:$0xf] }
 0x17d   :  { %v482_v29 = vmul.f32 0.5, %v481_v23  ;;  %1170 = vmatpush.bf16.msra.mxu3 %v6246_v43  ;;  %v6106_v19 = vor.u32 %v7323_v2, %v6103_v11  ;;  %v7311_v2 = vld [vmem:[#allocation7 + $0x64] sm:$0xf] }
 0x17e   :  { %v523_v32 = vsel %vm495_vm5, %v513_v20, %v521_v24  ;;  %v541_v33 = vpack.c.b16 %v537_v25, %v537_v25  ;;  %v542_v34 = vpack.c.b16 %v538_v26, %v538_v26  ;;  %v473_v35 = vsub.f32 1.5, %v472_v52  ;;  %v6085_v20 = vld [vmem:[#allocation7 + $0xa0] sm:$0xf]  ;;  %v7343_v11 = vld [vmem:[#allocation7 + $0x164] sm:$0xf] }
 0x17f   :  { %v527_v41 = vsub.f32 %v8137_v18, %v523_v32  ;;  %v483_v42 = vsub.f32 1.5, %v482_v29  ;;  %v6234_v52 = vor.u32 %v7355_v12, %v6231_v17  ;;  %1190 = vmatpush.bf16.msrb.mxu0 %v6106_v19  ;;  %v7351_v32 = vld [vmem:[#allocation7 + $0x1a4] sm:$0xf]  ;;  %v6183_v17 = vld [vmem:[#allocation7 + $0x170] sm:$0xf0] }
 0x180   :  { %v546_v47 = vpack.i.b16 %v541_v33, %v541_v33  ;;  %v550_v49 = vpack.i.b16 %v542_v34, %v542_v34  ;;  %v474_v51 = vmul.f32 %v8118_v7, %v473_v35 }
 0x181   :  { %v587_v59 = vperm.slane %v527_v41, 0  ;;  %v588_v60 = vperm.slane %v527_v41, 1  ;;  %v484_v61 = vmul.f32 %v8124_v9, %v483_v42  ;;  %1171 = vmatpush.bf16.msra.mxu3 %v6230_v10  ;;  %1209 = vmatpush.bf16.msrb.mxu1 %v6234_v52  ;;  %v6069_v41 = vld [vmem:[#allocation7 + $0x80] sm:$0xf]  ;;  %v7317_v42 = vld [vmem:[#allocation7 + $0x8c] sm:$0xf0] }
 0x182   :  { %v548_v4 = vperm.slane %v546_v47, 0  ;;  %v552_v5 = vperm.slane %v550_v49, 0  ;;  %v478_v35 = vsel %vm8164_vm12, %v8118_v7, %v474_v51  ;;  %v6218_v47 = vor.u32 %v7351_v32, %v6215_v38  ;;  %v6071_v49 = vld [vmem:[#allocation7 + $0x90] sm:$0xf0]  ;;  %v8199_v52 = vld [vmem:[#allocation7 + $0x140] sm:$0xf] }
 0x183   :  { %v595_v16 = vpack.c.bf16 %v588_v60, %v587_v59  ;;  %v488_v50 = vsel %vm8154_vm10, %v8124_v9, %v484_v61  ;;  %v6086_v9 = vor.u32 %v7321_v1, %v6085_v20  ;;  %v6070_v59 = vor.u32 %v7317_v42, %v6069_v41  ;;  %v6053_v60 = vld [vmem:[#allocation7 + $0x60] sm:$0xf]  ;;  %v7313_v61 = vld [vmem:[#allocation7 + $0x6c] sm:$0xf0]  ;;  %v6167_v32 = vld [vmem:[#allocation7 + $0x150] sm:$0xf0] }
 0x184   :  { %v569_v23 = vunpack.c.l.bf16 %v548_v4  ;;  %v570_v24 = vunpack.c.l.bf16 %v552_v5  ;;  %v494_v26 = vrot.slane %v488_v50, 7  ;;  %v6055_v4 = vld [vmem:[#allocation7 + $0x70] sm:$0xf0]  ;;  %v6202_v50 = vor.u32 %v7347_v53, %v6199_v54  ;;  %v6037_v20 = vld [vmem:[#allocation7 + $0x40] sm:$0xf] }
 0x185   :  { %v599_v28 = vunpack.c.l.b16 %v595_v16  ;;  %v600_v29 = vunpack.c.h.b16 %v595_v16  ;;  %1153 = vmatpush.bf16.msra.mxu2 %v6086_v9  ;;  %1172 = vmatpush.bf16.msra.mxu3 %v6214_v30  ;;  %v6074_v16 = vor.u32 %v7315_v46, %v6071_v49  ;;  %v6054_v19 = vor.u32 %v7313_v61, %v6053_v60  ;;  %v7309_v1 = vld [vmem:[#allocation7 + $0x4c] sm:$0xf0]  ;;  %v6021_v38 = vld [vmem:[#allocation7 + $0x20] sm:$0xf]  ;;  %v6151_v49 = vld [vmem:[#allocation7 + $0x130] sm:$0xf0] }
 0x186   :  { %v575_v33 = vmul.f32 %v569_v23, %v563_v21  ;;  %v576_v34 = vmul.f32 %v570_v24, %v564_v22  ;;  %v497_v45 = vsel %vm495_vm5, %v478_v35, %v494_v26  ;;  %v6090_v21 = vor.u32 %v7319_v31, %v6087_v48  ;;  %v7349_v22 = vld [vmem:[#allocation7 + $0x18c] sm:$0xf0]  ;;  %1210 = vmatpush.bf16.msrb.mxu1 %v6218_v47  ;;  %v6039_v31 = vld [vmem:[#allocation7 + $0x50] sm:$0xf0]  ;;  %v7339_v48 = vld [vmem:[#allocation7 + $0x144] sm:$0xf] }
 0x187   :  { %v603_v43 = vpack.c.b16 %v599_v28, %v599_v28  ;;  %v604_v44 = vpack.c.b16 %v600_v29, %v600_v29  ;;  %v573_v7 = vmul.f32 %v569_v23, %v561_v15  ;;  %v574_v56 = vmul.f32 %v570_v24, %v562_v14  ;;  %v7345_v14 = vld [vmem:[#allocation7 + $0x16c] sm:$0xf0]  ;;  %v7335_v47 = vld [vmem:[#allocation7 + $0x124] sm:$0xf]  ;;  %v6133_v61 = vld [vmem:[#allocation7 + $0x100] sm:$0xf] }
 0x188   :  { %v501_v57 = vmul.f32 %v497_v45, %v8114_v3  ;;  %1191 = vmatpush.bf16.msrb.mxu0 %v6090_v21  ;;  %v582_v0 = vpack.c.bf16 %v576_v34, %v575_v33  ;;  %v565_v15 = vunpack.c.l.bf16 %v8077_v39  ;;  %v567_v3 = vunpack.c.l.bf16 %v8177_v37  ;;  %v7305_v41 = vld [vmem:[#allocation7 + $0x2c] sm:$0xf0]  ;;  %v6149_v21 = vld [vmem:[#allocation7 + $0x120] sm:$0xf] }
 0x189   :  { %v608_v55 = vpack.i.b16 %v603_v43, %v603_v43  ;;  %v612_v58 = vpack.i.b16 %v604_v44, %v604_v44  ;;  %1154 = vmatpush.bf16.msra.mxu2 %v6070_v59  ;;  %v6198_v12 = vor.u32 %v7349_v22, %v6197_v8  ;;  %v8194_v23 = vpack.c.bf16 %v574_v56, %v573_v7  ;;  %v7337_v8 = vld [vmem:[#allocation7 + $0x12c] sm:$0xf0]  ;;  %v8205_v22 = vld [vmem:[#allocation7 + $0x24] sm:$0xf]  ;;  %v6005_v59 = vld [vmem:[#allocation7] sm:$0xf] }
 0x18a   :  { %v507_v6 = vperm.slane %v501_v57, 0  ;;  %v508_v10 = vperm.slane %v501_v57, 1  ;;  %v625_v28 = vunpack.c.l.bf16 %v582_v0  ;;  %v6182_v9 = vor.u32 %v7345_v14, %v8185_v63  ;;  %1211 = vmatpush.bf16.msrb.mxu1 %v6202_v50  ;;  %v6023_v57 = vld [vmem:[#allocation7 + $0x30] sm:$0xf0]  ;;  %v7301_v60 = vld [vmem:[#allocation7 + $0xc] sm:$0xf0] }
 0x18b   :  { %v8190_v5 = vperm.slane %v608_v55, 0  ;;  %v8192_v51 = vperm.slane %v612_v58, 0  ;;  %1173 = vmatpush.bf16.msra.mxu3 %v6198_v12  ;;  %v6058_v30 = vor.u32 %v7311_v2, %v6055_v4  ;;  %v626_v33 = vunpack.c.h.bf16 %v582_v0  ;;  %v7333_v4 = vld [vmem:[#allocation7 + $0x10c] sm:$0xf0] }
 0x18c   :  { %v516_v26 = vmul.f32 %v508_v10, %v8099_v40  ;;  %v534_v29 = vpack.c.bf16 %v508_v10, %v507_v6  ;;  %1192 = vmatpush.bf16.msrb.mxu0 %v6074_v16  ;;  %v515_v34 = vmul.f32 %v507_v6, %v8097_v36  ;;  %v6186_v40 = vor.u32 %v7343_v11, %v6183_v17  ;;  %v6007_v16 = vld [vmem:[#allocation7 + $0x10] sm:$0xf0] }
 0x18d   :  { %v631_v24 = vunpack.c.l.bf16 %v8190_v5  ;;  %v632_v25 = vunpack.c.l.bf16 %v8192_v51  ;;  %1155 = vmatpush.bf16.msra.mxu2 %v6054_v19  ;;  %v6038_v45 = vor.u32 %v7309_v1, %v6037_v20  ;;  %v6166_v7 = vor.u32 %v7341_v62, %v8199_v52  ;;  %v7331_v52 = vld [vmem:[#allocation7 + $0x104] sm:$0xf]  ;;  %v6135_v62 = vld [vmem:[#allocation7 + $0x110] sm:$0xf0] }
 0x18e   :  { %v522_v35 = vrot.slane %v516_v26, 7  ;;  %v539_v43 = vunpack.c.l.b16 %v534_v29  ;;  %v540_v44 = vunpack.c.h.b16 %v534_v29  ;;  %v6042_v56 = vor.u32 %v7307_v27, %v6039_v31  ;;  %1212 = vmatpush.bf16.msrb.mxu1 %v6186_v40 }
 0x18f   :  { %v637_v42 = vadd.f32 %v631_v24, %v625_v28  ;;  %v638_v46 = vadd.f32 %v632_v25, %v626_v33  ;;  %v623_v53 = vunpack.c.l.bf16 %v8194_v23  ;;  %1174 = vmatpush.bf16.msra.mxu3 %v6182_v9  ;;  %v624_v63 = vunpack.c.h.bf16 %v8194_v23 }
 0x190   :  { %v524_v36 = vsel %vm495_vm5, %v515_v34, %v522_v35  ;;  %v543_v55 = vpack.c.b16 %v539_v43, %v539_v43  ;;  %v544_v58 = vpack.c.b16 %v540_v44, %v540_v44  ;;  %1193 = vmatpush.bf16.msrb.mxu0 %v6058_v30  ;;  %v6170_v0 = vor.u32 %v7339_v48, %v6167_v32 }
 0x191   :  { %v528_v54 = vsub.f32 %v8137_v18, %v524_v36  ;;  %1156 = vmatpush.bf16.msra.mxu2 %v6038_v45  ;;  %v6022_v14 = vor.u32 %v7305_v41, %v6021_v38  ;;  %v6150_v2 = vor.u32 %v7337_v8, %v6149_v21  ;;  %v7299_v18 = vld [vmem:[#allocation7 + $0x4] sm:$0xf]  ;;  %v6026_v50 = vor.u32 %v8205_v22, %v6023_v57 }
 0x192   :  { %v554_v6 = vpack.i.b16 %v543_v55, %v543_v55  ;;  %v558_v10 = vpack.i.b16 %v544_v58, %v544_v58  ;;  %v6154_v19 = vor.u32 %v7335_v47, %v6151_v49  ;;  %v6006_v17 = vor.u32 %v7301_v60, %v6005_v59  ;;  %1213 = vmatpush.bf16.msrb.mxu1 %v6170_v0 }
 0x193   :  { %v589_v11 = vperm.slane %v528_v54, 0  ;;  %v590_v12 = vperm.slane %v528_v54, 1  ;;  %v6134_v20 = vor.u32 %v7333_v4, %v6133_v61  ;;  %1175 = vmatpush.bf16.msra.mxu3 %v6166_v7  ;;  %v635_v27 = vadd.f32 %v631_v24, %v623_v53  ;;  %v6253_v4 = vld [vmem:[#allocation7 + $0x1e8] sm:$0xf] }
 0x194   :  { %v556_v1 = vperm.slane %v554_v6, 0  ;;  %v560_v26 = vperm.slane %v558_v10, 0  ;;  %1194 = vmatpush.bf16.msrb.mxu0 %v6042_v56  ;;  %v568_v28 = vunpack.c.h.bf16 %v8177_v37  ;;  %v6010_v29 = vor.u32 %v7299_v18, %v6007_v16  ;;  %v6127_v18 = vld [vmem:[#allocation7 + $0xf8] sm:$0xf0] }
 0x195   :  { %v596_v23 = vpack.c.bf16 %v590_v12, %v589_v11  ;;  %1157 = vmatpush.bf16.msra.mxu2 %v6022_v14  ;;  %v636_v9 = vadd.f32 %v632_v25, %v624_v63  ;;  %v8220_v30 = vpack.c.bf16 %v638_v46, %v637_v42  ;;  %v6138_v34 = vor.u32 %v7331_v52, %v6135_v62  ;;  %v6125_v14 = vld [vmem:[#allocation7 + $0xe8] sm:$0xf]  ;;  %v7362_v11 = vld [vmem:[#allocation7 + $0x1f4] sm:$0xf0]  ;;  %v7328_v12 = vld [vmem:[#allocation7 + $0xec] sm:$0xf] }
 0x196   :  { %v571_v31 = vunpack.c.l.bf16 %v556_v1  ;;  %v572_v48 = vunpack.c.l.bf16 %v560_v26  ;;  %1214 = vmatpush.bf16.msrb.mxu1 %v6154_v19  ;;  %v6254_v16 = vor.u32 %v7362_v11, %v6253_v4  ;;  %v7360_v19 = vld [vmem:[#allocation7 + $0x1ec] sm:$0xf]  ;;  %v6237_v52 = vld [vmem:[#allocation7 + $0x1c8] sm:$0xf]  ;;  %v7358_v62 = vld [vmem:[#allocation7 + $0x1d4] sm:$0xf0] }
 0x197   :  { %v601_v32 = vunpack.c.l.b16 %v596_v23  ;;  %v602_v33 = vunpack.c.h.b16 %v596_v23  ;;  %v8222_v35 = vpack.c.bf16 %v636_v9, %v635_v27  ;;  %v649_v5 = vunpack.c.l.bf16 %v8220_v30  ;;  %1176 = vmatpush.bf16.msra.mxu3 %v6150_v2  ;;  %v7330_v2 = vld [vmem:[#allocation7 + $0xf4] sm:$0xf0]  ;;  %v6111_v9 = vld [vmem:[#allocation7 + $0xd8] sm:$0xf0] }
 0x198   :  { %v650_v24 = vunpack.c.h.bf16 %v8220_v30  ;;  %v577_v40 = vmul.f32 %v571_v31, %v565_v15  ;;  %v578_v51 = vmul.f32 %v572_v48, %v566_v13  ;;  %v579_v25 = vmul.f32 %v571_v31, %v567_v3  ;;  %1195 = vmatpush.bf16.msrb.mxu0 %v6026_v50  ;;  %v7326_v23 = vld [vmem:[#allocation7 + $0xd4] sm:$0xf0]  ;;  %v7356_v31 = vld [vmem:[#allocation7 + $0x1cc] sm:$0xf]  ;;  %v6207_v4 = vld [vmem:[#allocation7 + $0x198] sm:$0xf0] }
 0x199   :  { %v580_v38 = vmul.f32 %v572_v48, %v568_v28  ;;  %v605_v41 = vpack.c.b16 %v601_v32, %v601_v32  ;;  %v606_v42 = vpack.c.b16 %v602_v33, %v602_v33  ;;  %v647_v43 = vunpack.c.l.bf16 %v8222_v35  ;;  %1158 = vmatpush.bf16.msra.mxu2 %v6006_v17  ;;  %v6255_v17 = vld [vmem:[#allocation7 + $0x1f8] sm:$0xf0]  ;;  %v7302_v30 = vld [vmem:[#allocation7 + $0x14] sm:$0xf0] }
 0x19a   :  { %v648_v44 = vunpack.c.h.bf16 %v8222_v35  ;;  %v583_v45 = vpack.c.bf16 %v578_v51, %v577_v40  ;;  %v657_v15 = vmul.f32 0.5, %v649_v5  ;;  %v658_v39 = vmul.f32 0.5, %v650_v24  ;;  %1215 = vmatpush.bf16.msrb.mxu1 %v6138_v34  ;;  %v6239_v34 = vld [vmem:[#allocation7 + $0x1d8] sm:$0xf0]  ;;  %v6093_v40 = vld [vmem:[#allocation7 + $0xa8] sm:$0xf] }
 0x19b   :  { %v616_v37 = vpack.i.b16 %v605_v41, %v605_v41  ;;  %v620_v13 = vpack.i.b16 %v606_v42, %v606_v42  ;;  %v655_v3 = vmul.f32 0.5, %v647_v43  ;;  %v584_v8 = vpack.c.bf16 %v580_v38, %v579_v25  ;;  %1177 = vmatpush.bf16.msra.mxu3 %v6134_v20  ;;  %v6109_v20 = vld [vmem:[#allocation7 + $0xc8] sm:$0xf]  ;;  %v7322_v51 = vld [vmem:[#allocation7 + $0xb4] sm:$0xf0] }
 0x19c   :  { %v656_v21 = vmul.f32 0.5, %v648_v44  ;;  %1196 = vmatpush.bf16.msrb.mxu0 %v6010_v29  ;;  %v664_v7 = vpack.c.bf16 %v658_v39, %v657_v15  ;;  %v627_v56 = vunpack.c.l.bf16 %v583_v45  ;;  %v628_v57 = vunpack.c.h.bf16 %v583_v45  ;;  %v7324_v29 = vld [vmem:[#allocation7 + $0xcc] sm:$0xf]  ;;  %v6221_v41 = vld [vmem:[#allocation7 + $0x1a8] sm:$0xf] }
 0x19d   :  { %v618_v22 = vperm.slane %v616_v37, 0  ;;  %v622_v46 = vperm.slane %v620_v13, 0  ;;  %v629_v55 = vunpack.c.l.bf16 %v584_v8  ;;  %v630_v58 = vunpack.c.h.bf16 %v584_v8  ;;  %v7354_v42 = vld [vmem:[#allocation7 + $0x1b4] sm:$0xf0]  ;;  %v7320_v45 = vld [vmem:[#allocation7 + $0xac] sm:$0xf] }
 0x19e   :  { %v663_v36 = vpack.c.bf16 %v656_v21, %v655_v3  ;;  %v669_v59 = vunpack.c.l.bf16 %v664_v7  ;;  %v670_v60 = vunpack.c.h.bf16 %v664_v7  ;;  %v6126_v10 = vor.u32 %v7330_v2, %v6125_v14  ;;  %v6095_v21 = vld [vmem:[#allocation7 + $0xb8] sm:$0xf0]  ;;  %v7352_v8 = vld [vmem:[#allocation7 + $0x1ac] sm:$0xf] }
 0x19f   :  { %v633_v47 = vunpack.c.l.bf16 %v618_v22  ;;  %v634_v49 = vunpack.c.l.bf16 %v622_v46  ;;  %v6130_v50 = vor.u32 %v7328_v12, %v6127_v18  ;;  %v6258_v26 = vor.u32 %v7360_v19, %v6255_v17  ;;  %1246 = vmatpush.bf16.msrb.mxu3 %v6254_v16  ;;  %v6223_v22 = vld [vmem:[#allocation7 + $0x1b8] sm:$0xf0]  ;;  %v7348_v2 = vld [vmem:[#allocation7 + $0x18c] sm:$0xf] }
 0x1a0   :  { %v667_v53 = vunpack.c.l.bf16 %v663_v36  ;;  %v668_v54 = vunpack.c.h.bf16 %v663_v36  ;;  %1227 = vmatpush.bf16.msrb.mxu2 %v6126_v10  ;;  %v6110_v27 = vor.u32 %v7326_v23, %v6109_v20  ;;  %v6238_v28 = vor.u32 %v7358_v62, %v6237_v52 }
 0x1a1   :  { %v639_v61 = vadd.f32 %v633_v47, %v627_v56  ;;  %v641_v63 = vadd.f32 %v633_v47, %v629_v55  ;;  %v642_v0 = vadd.f32 %v634_v49, %v630_v58  ;;  %v640_v6 = vadd.f32 %v634_v49, %v628_v57  ;;  %1265 = vmatpush.bf16.msra.mxu0 %v6130_v50  ;;  %v6077_v56 = vld [vmem:[#allocation7 + $0x88] sm:$0xf]  ;;  %v7318_v57 = vld [vmem:[#allocation7 + $0x94] sm:$0xf0] }
 0x1a2   :  { %7667 = vtanh.f32 %v667_v53  ;;  %1284 = vmatpush.bf16.msra.mxu1 %v6258_v26  ;;  %v6114_v33 = vor.u32 %v7324_v29, %v6111_v9  ;;  %v6242_v38 = vor.u32 %v7356_v31, %v6239_v34  ;;  %v6094_v3 = vor.u32 %v7322_v51, %v6093_v40  ;;  %v6205_v47 = vld [vmem:[#allocation7 + $0x188] sm:$0xf] }
 0x1a3   :  { %7669 = vtanh.f32 %v668_v54  ;;  %v8242_v1 = vpack.c.bf16 %v640_v6, %v639_v61  ;;  %v8244_v48 = vpack.c.bf16 %v642_v0, %v641_v63  ;;  %1247 = vmatpush.bf16.msrb.mxu3 %v6238_v28  ;;  %v6222_v36 = vor.u32 %v7354_v42, %v6221_v41  ;;  %v7316_v61 = vld [vmem:[#allocation7 + $0x8c] sm:$0xf]  ;;  %v6079_v63 = vld [vmem:[#allocation7 + $0x98] sm:$0xf0]  ;;  %v6061_v41 = vld [vmem:[#allocation7 + $0x68] sm:$0xf] }
 0x1a4   :  { %7671 = vtanh.f32 %v669_v59  ;;  %1228 = vmatpush.bf16.msrb.mxu2 %v6110_v27  ;;  %v6098_v7 = vor.u32 %v7320_v45, %v6095_v21  ;;  %v6226_v59 = vor.u32 %v7352_v8, %v6223_v22  ;;  %v6078_v0 = vor.u32 %v7318_v57, %v6077_v56  ;;  %v7314_v42 = vld [vmem:[#allocation7 + $0x74] sm:$0xf0]  ;;  %v6189_v45 = vld [vmem:[#allocation7 + $0x168] sm:$0xf]  ;;  %v7312_v8 = vld [vmem:[#allocation7 + $0x6c] sm:$0xf] }
 0x1a5   :  { %7673 = vtanh.f32 %v670_v60  ;;  %v651_v15 = vunpack.c.l.bf16 %v8242_v1  ;;  %v652_v39 = vunpack.c.h.bf16 %v8242_v1  ;;  %1266 = vmatpush.bf16.msra.mxu0 %v6114_v33  ;;  %v653_v49 = vunpack.c.l.bf16 %v8244_v48  ;;  %v7350_v60 = vld [vmem:[#allocation7 + $0x194] sm:$0xf0]  ;;  %v6191_v56 = vld [vmem:[#allocation7 + $0x178] sm:$0xf0] }
 0x1a6   :  { %v654_v53 = vunpack.c.h.bf16 %v8244_v48  ;;  %1285 = vmatpush.bf16.msra.mxu1 %v6242_v38  ;;  %v6206_v14 = vor.u32 %v7350_v60, %v6205_v47  ;;  %v6082_v50 = vor.u32 %v7316_v61, %v6079_v63  ;;  %v6210_v62 = vor.u32 %v7348_v2, %v6207_v4  ;;  %v7346_v21 = vld [vmem:[#allocation7 + $0x174] sm:$0xf0]  ;;  %v6173_v60 = vld [vmem:[#allocation7 + $0x148] sm:$0xf]  ;;  %v7308_v2 = vld [vmem:[#allocation7 + $0x4c] sm:$0xf] }
 0x1a7   :  { %v659_v6 = vmul.f32 0.5, %v651_v15  ;;  %v660_v10 = vmul.f32 0.5, %v652_v39  ;;  %1248 = vmatpush.bf16.msrb.mxu3 %v6222_v36  ;;  %v661_v19 = vmul.f32 0.5, %v653_v49  ;;  %v6062_v22 = vor.u32 %v7314_v42, %v6061_v41  ;;  %v6063_v36 = vld [vmem:[#allocation7 + $0x78] sm:$0xf0] }
 0x1a8   :  { %v7668_v32 = vpop.eup %7667  ;;  %1229 = vmatpush.bf16.msrb.mxu2 %v6094_v3  ;;  %v662_v17 = vmul.f32 0.5, %v654_v53  ;;  %v6047_v4 = vld [vmem:[#allocation7 + $0x58] sm:$0xf0]  ;;  %vm1577_vm12 = vcmask 1041408  }
 0x1a9   :  { %v7670_v25 = vpop.eup %7669  ;;  %1267 = vmatpush.bf16.msra.mxu0 %v6098_v7  ;;  %v665_v20 = vpack.c.bf16 %v660_v10, %v659_v6  ;;  %v7344_v7 = vld [vmem:[#allocation7 + $0x16c] sm:$0xf] }
 0x1aa   :  { %v7672_v37 = vpop.eup %7671  ;;  %v683_v13 = vpack.c.bf16 %v7670_v25, %v7668_v32  ;;  %1286 = vmatpush.bf16.msra.mxu1 %v6226_v59  ;;  %v666_v27 = vpack.c.bf16 %v662_v17, %v661_v19  ;;  %v7310_v59 = vld [vmem:[#allocation7 + $0x54] sm:$0xf0]  ;;  %v6194_v63 = vor.u32 %v7344_v7, %v6191_v56  ;;  %v6015_v7 = vld [vmem:[#allocation7 + $0x18] sm:$0xf0]  ;;  %v7332_v56 = vld [vmem:[#allocation7 + $0x10c] sm:$0xf] }
 0x1ab   :  { %v7674_v46 = vpop.eup %7673  ;;  %v671_v28 = vunpack.c.l.bf16 %v665_v20  ;;  %v672_v29 = vunpack.c.h.bf16 %v665_v20  ;;  %1249 = vmatpush.bf16.msrb.mxu3 %v6206_v14  ;;  %v7342_v14 = vld [vmem:[#allocation7 + $0x154] sm:$0xf0]  ;;  %v6050_v20 = vor.u32 %v7308_v2, %v6047_v4 }
 0x1ac   :  { %v684_v54 = vpack.c.bf16 %v7674_v46, %v7672_v37  ;;  %v687_v55 = vunpack.c.l.bf16 %v683_v13  ;;  %v688_v58 = vunpack.c.h.bf16 %v683_v13  ;;  %1230 = vmatpush.bf16.msrb.mxu2 %v6078_v0  ;;  %v673_v33 = vunpack.c.l.bf16 %v666_v27 }
 0x1ad   :  { %1268 = vmatpush.bf16.msra.mxu0 %v6082_v50  ;;  %v674_v34 = vunpack.c.h.bf16 %v666_v27  ;;  %7675 = vtanh.f32 %v671_v28  ;;  %v6190_v46 = vor.u32 %v7346_v21, %v6189_v45  ;;  %v6029_v50 = vld [vmem:[#allocation7 + $0x28] sm:$0xf]  ;;  %v6174_v17 = vor.u32 %v7342_v14, %v6173_v60  ;;  %v7334_v45 = vld [vmem:[#allocation7 + $0x114] sm:$0xf0]  ;;  %v7300_v21 = vld [vmem:[#allocation7 + $0xc] sm:$0xf] }
 0x1ae   :  { %v689_v11 = vunpack.c.l.bf16 %v684_v54  ;;  %v690_v12 = vunpack.c.h.bf16 %v684_v54  ;;  %v695_v18 = vadd.f32 1.0, %v687_v55  ;;  %v696_v16 = vadd.f32 1.0, %v688_v58  ;;  %1287 = vmatpush.bf16.msra.mxu1 %v6210_v62  ;;  %v6045_v58 = vld [vmem:[#allocation7 + $0x48] sm:$0xf]  ;;  %v7338_v62 = vld [vmem:[#allocation7 + $0x134] sm:$0xf0] }
 0x1af   :  { %7677 = vtanh.f32 %v672_v29  ;;  %v6066_v55 = vor.u32 %v7312_v8, %v6063_v36  ;;  %1250 = vmatpush.bf16.msrb.mxu3 %v6190_v46  ;;  %v6046_v0 = vor.u32 %v7310_v59, %v6045_v58  ;;  %v7304_v29 = vld [vmem:[#allocation7 + $0x2c] sm:$0xf]  ;;  %v6018_v14 = vor.u32 %v7300_v21, %v6015_v7 }
 0x1b0   :  { %v697_v26 = vadd.f32 1.0, %v689_v11  ;;  %v698_v23 = vadd.f32 1.0, %v690_v12  ;;  %v703_v52 = vpack.c.bf16 %v696_v16, %v695_v18  ;;  %7679 = vtanh.f32 %v673_v33  ;;  %1231 = vmatpush.bf16.msrb.mxu2 %v6062_v22  ;;  %v7340_v18 = vld [vmem:[#allocation7 + $0x14c] sm:$0xf]  ;;  %v6175_v16 = vld [vmem:[#allocation7 + $0x158] sm:$0xf0] }
 0x1b1   :  { %7681 = vtanh.f32 %v674_v34  ;;  %1269 = vmatpush.bf16.msra.mxu0 %v6066_v55 }
 0x1b2   :  { %v704_v9 = vpack.c.bf16 %v698_v23, %v697_v26  ;;  %v707_v31 = vunpack.c.l.bf16 %v703_v52  ;;  %v708_v32 = vunpack.c.h.bf16 %v703_v52  ;;  %1288 = vmatpush.bf16.msra.mxu1 %v6194_v63  ;;  %v6178_v26 = vor.u32 %v7340_v18, %v6175_v16  ;;  %v7306_v23 = vld [vmem:[#allocation7 + $0x34] sm:$0xf0]  ;;  %v6157_v52 = vld [vmem:[#allocation7 + $0x128] sm:$0xf] }
 0x1b3   :  { %v7676_v61 = vpop.eup %7675  ;;  %1251 = vmatpush.bf16.msrb.mxu3 %v6174_v17  ;;  %v6030_v33 = vor.u32 %v7306_v23, %v6029_v50  ;;  %v6158_v34 = vor.u32 %v7338_v62, %v6157_v52 }
 0x1b4   :  { %v709_v40 = vunpack.c.l.bf16 %v704_v9  ;;  %v710_v51 = vunpack.c.h.bf16 %v704_v9  ;;  %v715_v25 = vmul.f32 0.5, %v707_v31  ;;  %v716_v38 = vmul.f32 0.5, %v708_v32  ;;  %v6031_v9 = vld [vmem:[#allocation7 + $0x38] sm:$0xf0]  ;;  %v7336_v31 = vld [vmem:[#allocation7 + $0x12c] sm:$0xf]  ;;  %1232 = vmatpush.bf16.msrb.mxu2 %v6046_v0 }
 0x1b5   :  { %v7678_v19 = vpop.eup %7677  ;;  %1270 = vmatpush.bf16.msra.mxu0 %v6050_v20 }
 0x1b6   :  { %v717_v37 = vmul.f32 0.5, %v709_v40  ;;  %v718_v13 = vmul.f32 0.5, %v710_v51  ;;  %v723_v3 = vpack.c.bf16 %v716_v38, %v715_v25  ;;  %v7680_v27 = vpop.eup %7679  ;;  %v6034_v40 = vor.u32 %v7304_v29, %v6031_v9  ;;  %v6159_v51 = vld [vmem:[#allocation7 + $0x138] sm:$0xf0]  ;;  %v6013_v25 = vld [vmem:[#allocation7 + $0x8] sm:$0xf]  ;;  %1289 = vmatpush.bf16.msra.mxu1 %v6178_v26 }
 0x1b7   :  { %v7682_v32 = vpop.eup %7681  ;;  %1252 = vmatpush.bf16.msrb.mxu3 %v6158_v34  ;;  %v6014_v55 = vor.u32 %v7302_v30, %v6013_v25 }
 0x1b8   :  { %v724_v57 = vpack.c.bf16 %v718_v13, %v717_v37  ;;  %v727_v47 = vunpack.c.l.bf16 %v723_v3  ;;  %v728_v54 = vunpack.c.h.bf16 %v723_v3  ;;  %v6162_v3 = vor.u32 %v7336_v31, %v6159_v51  ;;  %1233 = vmatpush.bf16.msrb.mxu2 %v6030_v33 }
 0x1b9   :  { %1271 = vmatpush.bf16.msra.mxu0 %v6034_v40 }
 0x1ba   :  { %v729_v6 = vunpack.c.l.bf16 %v724_v57  ;;  %v730_v10 = vunpack.c.h.bf16 %v724_v57  ;;  %v735_v11 = vmul.f32 %v727_v47, %v647_v43  ;;  %v736_v12 = vmul.f32 %v728_v54, %v648_v44  ;;  %v6143_v57 = vld [vmem:[#allocation7 + $0x118] sm:$0xf0]  ;;  %1290 = vmatpush.bf16.msra.mxu1 %v6162_v3 }
 0x1bb   :  { %v685_v44 = vpack.c.bf16 %v7678_v19, %v7676_v61  ;;  %v6146_v2 = vor.u32 %v7332_v56, %v6143_v57 }
 0x1bc   :  { %v737_v28 = vmul.f32 %v729_v6, %v649_v5  ;;  %v738_v35 = vmul.f32 %v730_v10, %v650_v24  ;;  %v743_v43 = vpack.c.bf16 %v736_v12, %v735_v11  ;;  %v686_v5 = vpack.c.bf16 %v7682_v32, %v7680_v27  ;;  %v6141_v24 = vld [vmem:[#allocation7 + $0x108] sm:$0xf]  ;;  %1234 = vmatpush.bf16.msrb.mxu2 %v6014_v55 }
 0x1bd   :  { %v691_v37 = vunpack.c.l.bf16 %v685_v44  ;;  %v692_v13 = vunpack.c.h.bf16 %v685_v44  ;;  %v6142_v58 = vor.u32 %v7334_v45, %v6141_v24  ;;  %1272 = vmatpush.bf16.msra.mxu0 %v6018_v14 }
 0x1be   :  { %v744_v38 = vpack.c.bf16 %v738_v35, %v737_v28  ;;  %v815_v41 = vunpack.c.l.b16 %v743_v43  ;;  %v816_v42 = vunpack.c.h.b16 %v743_v43  ;;  %v693_v46 = vunpack.c.l.bf16 %v686_v5  ;;  %1291 = vmatpush.bf16.msra.mxu1 %v6146_v2 }
 0x1bf   :  { %v694_v36 = vunpack.c.h.bf16 %v686_v5  ;;  %v699_v47 = vadd.f32 1.0, %v691_v37  ;;  %v700_v54 = vadd.f32 1.0, %v692_v13  ;;  %1253 = vmatpush.bf16.msrb.mxu3 %v6142_v58 }
 0x1c0   :  { %v817_v8 = vunpack.c.l.b16 %v744_v38  ;;  %v818_v22 = vunpack.c.h.b16 %v744_v38  ;;  %v701_v61 = vadd.f32 1.0, %v693_v46 }
 0x1c1   :  { %v702_v63 = vadd.f32 1.0, %v694_v36  ;;  %v705_v0 = vpack.c.bf16 %v700_v54, %v699_v47 }
 0x1c2   :  { %v823_v59 = vpack.c.b16 %v817_v8, %v815_v41  ;;  %v824_v60 = vpack.c.b16 %v818_v22, %v816_v42 }
 0x1c3   :  { %v706_v4 = vpack.c.bf16 %v702_v63, %v701_v61  ;;  %v711_v6 = vunpack.c.l.bf16 %v705_v0  ;;  %v712_v10 = vunpack.c.h.bf16 %v705_v0 }
 0x1c4   :  { %1159 = vmatmul.bf16.vlgmr.msra.gmra.mxu2 %v823_v59  ;;  %1178 = vmatmul.bf16.vlgmr.msra.gmra.mxu3 %v824_v60 }
 0x1c5   :  { %1197 = vmatmul.bf16.vlgmr.msrb.gmra.mxu0 %v823_v59  ;;  %1216 = vmatmul.bf16.vlgmr.msrb.gmra.mxu1 %v824_v60  ;;  %v713_v11 = vunpack.c.l.bf16 %v706_v4  ;;  %v714_v12 = vunpack.c.h.bf16 %v706_v4  ;;  %v719_v18 = vmul.f32 0.5, %v711_v6  ;;  %v720_v16 = vmul.f32 0.5, %v712_v10 }
 0x1c7   :  { %v721_v50 = vmul.f32 0.5, %v713_v11  ;;  %v722_v19 = vmul.f32 0.5, %v714_v12  ;;  %v725_v17 = vpack.c.bf16 %v720_v16, %v719_v18 }
 0x1c9   :  { %v726_v20 = vpack.c.bf16 %v722_v19, %v721_v50  ;;  %v731_v26 = vunpack.c.l.bf16 %v725_v17  ;;  %v732_v23 = vunpack.c.h.bf16 %v725_v17 }
 0x1cb   :  { %v733_v52 = vunpack.c.l.bf16 %v726_v20  ;;  %v734_v62 = vunpack.c.h.bf16 %v726_v20  ;;  %v739_v27 = vmul.f32 %v731_v26, %v651_v15  ;;  %v740_v28 = vmul.f32 %v732_v23, %v652_v39 }
 0x1cd   :  { %v741_v35 = vmul.f32 %v733_v52, %v653_v49  ;;  %v742_v43 = vmul.f32 %v734_v62, %v654_v53  ;;  %v745_v44 = vpack.c.bf16 %v740_v28, %v739_v27 }
 0x1cf   :  { %v746_v29 = vpack.c.bf16 %v742_v43, %v741_v35  ;;  %v819_v9 = vunpack.c.l.b16 %v745_v44  ;;  %v820_v31 = vunpack.c.h.b16 %v745_v44 }
 0x1d1   :  { %v821_v32 = vunpack.c.l.b16 %v746_v29  ;;  %v822_v33 = vunpack.c.h.b16 %v746_v29 }
 0x1d3   :  { %v825_v34 = vpack.c.b16 %v821_v32, %v819_v9  ;;  %v826_v40 = vpack.c.b16 %v822_v33, %v820_v31 }
 0x1d5   :  { %1164 = vmatmul.bf16.gmra.mxu2 %v825_v34  ;;  %1183 = vmatmul.bf16.gmra.mxu3 %v826_v40 }
 0x1d6   :  { %1202 = vmatmul.bf16.gmra.mxu0 %v825_v34  ;;  %1221 = vmatmul.bf16.gmra.mxu1 %v826_v40 }
 0x1e5   :  { %1235 = vmatmul.bf16.vlgmr.msrb.gmra.mxu2 %v823_v59  ;;  %1254 = vmatmul.bf16.vlgmr.msrb.gmra.mxu3 %v824_v60 }
 0x1e6   :  { %1273 = vmatmul.bf16.vlgmr.msra.gmra.mxu0 %v823_v59  ;;  %1292 = vmatmul.bf16.vlgmr.msra.gmra.mxu1 %v824_v60 }
 0x1f5   :  { %1240 = vmatmul.bf16.gmra.mxu2 %v825_v34  ;;  %1259 = vmatmul.bf16.gmra.mxu3 %v826_v40 }
 0x1f6   :  { %1278 = vmatmul.bf16.gmra.mxu0 %v825_v34  ;;  %1297 = vmatmul.bf16.gmra.mxu1 %v826_v40 }
 0x242   :  { %v1198_v1 = vpop.f32.mrf.mxu0  ;;  %v1217_v48 = vpop.f32.mrf.mxu1 }
 0x243   :  { %v1218_v49 = vadd.f32 %v1217_v48, %v1198_v1 }
 0x245   :  { %v1368_v42 = vmul.f32 %v1218_v49, %v1218_v49 }
 0x247   :  { %v1160_v15 = vpop.f32.mrf.mxu2  ;;  %v1179_v39 = vpop.f32.mrf.mxu3 }
 0x248   :  { %v1180_v53 = vadd.f32 %v1179_v39, %v1160_v15 }
 0x24a   :  { %v8274_v51 = vpack.c.bf16 %v1218_v49, %v1180_v53  ;;  %v1200_v25 = vpop.f32.mrf.mxu0  ;;  %v1219_v38 = vpop.f32.mrf.mxu1  ;;  %v1367_v36 = vmul.f32 %v1180_v53, %v1180_v53 }
 0x24b   :  { %v1220_v41 = vadd.f32 %v1219_v38, %v1200_v25 }
 0x24d   :  { %v1310_v5 = vadd.f32 %v1220_v41, %v1218_v49  ;;  %v1372_v30 = vmul.f32 %v1220_v41, %v1220_v41 }
 0x24f   :  { %v1311_v24 = vrot.slane %v1310_v5, 4  ;;  %v1390_v45 = vadd.f32 %v1372_v30, %v1368_v42  ;;  %v1162_v37 = vpop.f32.mrf.mxu2  ;;  %v1181_v13 = vpop.f32.mrf.mxu3 }
 0x250   :  { %v1182_v3 = vadd.f32 %v1181_v13, %v1162_v37 }
 0x251   :  { %v1312_v21 = vadd.f32 %v1311_v24, %v1310_v5  ;;  %v1391_v7 = vrot.slane %v1390_v45, 4 }
 0x252   :  { %v1303_v8 = vadd.f32 %v1182_v3, %v1180_v53  ;;  %v1371_v22 = vmul.f32 %v1182_v3, %v1182_v3  ;;  %v8276_v46 = vpack.c.bf16 %v1220_v41, %v1182_v3 }
 0x253   :  { %v1203_v56 = vpop.f32.mrf.mxu0  ;;  %v1222_v57 = vpop.f32.mrf.mxu1  ;;  %v1313_v55 = vrot.slane %v1312_v21, 2  ;;  %v1392_v58 = vadd.f32 %v1391_v7, %v1390_v45 }
 0x254   :  { %v1304_v47 = vrot.slane %v1303_v8, 4  ;;  %v1383_v54 = vadd.f32 %v1371_v22, %v1367_v36  ;;  %v1223_v14 = vadd.f32 %v1222_v57, %v1203_v56 }
 0x255   :  { %v1314_v0 = vadd.f32 %v1313_v55, %v1312_v21  ;;  %v1393_v4 = vrot.slane %v1392_v58, 2 }
 0x256   :  { %v1305_v59 = vadd.f32 %v1304_v47, %v1303_v8  ;;  %v1384_v60 = vrot.slane %v1383_v54, 4  ;;  %v1376_v17 = vmul.f32 %v1223_v14, %v1223_v14 }
 0x257   :  { %v1315_v50 = vrot.slane %v1314_v0, 1  ;;  %v1394_v19 = vadd.f32 %v1393_v4, %v1392_v58 }
 0x258   :  { %v1165_v61 = vpop.f32.mrf.mxu2  ;;  %v1184_v63 = vpop.f32.mrf.mxu3  ;;  %v1306_v12 = vrot.slane %v1305_v59, 2  ;;  %v1385_v18 = vadd.f32 %v1384_v60, %v1383_v54 }
 0x259   :  { %v1185_v2 = vadd.f32 %v1184_v63, %v1165_v61  ;;  %v1316_v44 = vadd.f32 %v1315_v50, %v1314_v0  ;;  %v1395_v29 = vrot.slane %v1394_v19, 1 }
 0x25a   :  { %v1307_v23 = vadd.f32 %v1306_v12, %v1305_v59  ;;  %v1386_v52 = vrot.slane %v1385_v18, 2 }
 0x25b   :  { %v8278_v6 = vpack.c.bf16 %v1223_v14, %v1185_v2  ;;  %v1205_v10 = vpop.f32.mrf.mxu0  ;;  %v1224_v11 = vpop.f32.mrf.mxu1  ;;  %v1375_v32 = vmul.f32 %v1185_v2, %v1185_v2  ;;  %v8282_v5 = vmul.f32 0.0625, %v1316_v44  ;;  %v1396_v30 = vadd.f32 %v1395_v29, %v1394_v19 }
 0x25c   :  { %v1225_v16 = vadd.f32 %v1224_v11, %v1205_v10  ;;  %v1308_v15 = vrot.slane %v1307_v23, 1  ;;  %v1387_v39 = vadd.f32 %v1386_v52, %v1385_v18 }
 0x25d   :  { %v1440_v7 = vmul.f32 0.0625, %v1396_v30  ;;  %v1448_v56 = vmul.f32 %v8282_v5, %v8282_v5 }
 0x25e   :  { %v1338_v20 = vadd.f32 %v1225_v16, %v1223_v14  ;;  %v1380_v26 = vmul.f32 %v1225_v16, %v1225_v16  ;;  %v1309_v37 = vadd.f32 %v1308_v15, %v1307_v23  ;;  %v1388_v13 = vrot.slane %v1387_v39, 1 }
 0x25f   :  { %v1456_v14 = vsub.f32 %v1440_v7, %v1448_v56 }
 0x260   :  { %v1339_v62 = vrot.slane %v1338_v20, 4  ;;  %v1418_v27 = vadd.f32 %v1380_v26, %v1376_v17  ;;  %v1167_v28 = vpop.f32.mrf.mxu2  ;;  %v1186_v35 = vpop.f32.mrf.mxu3  ;;  %v8286_v55 = vmul.f32 0.0625, %v1309_v37  ;;  %v1389_v58 = vadd.f32 %v1388_v13, %v1387_v39 }
 0x261   :  { %v1187_v43 = vadd.f32 %v1186_v35, %v1167_v28  ;;  %v1464_v44 = vmax.f32 %v1456_v14, 0.0 }
 0x262   :  { %v1340_v9 = vadd.f32 %v1339_v62, %v1338_v20  ;;  %v1419_v31 = vrot.slane %v1418_v27, 4  ;;  %v1439_v10 = vmul.f32 0.0625, %v1389_v58  ;;  %v1447_v11 = vmul.f32 %v8286_v55, %v8286_v55 }
 0x263   :  { %v1331_v33 = vadd.f32 %v1187_v43, %v1185_v2  ;;  %v1379_v34 = vmul.f32 %v1187_v43, %v1187_v43  ;;  %v8280_v40 = vpack.c.bf16 %v1225_v16, %v1187_v43  ;;  %v1274_v1 = vpop.f32.mrf.mxu0  ;;  %v1293_v48 = vpop.f32.mrf.mxu1 }
 0x264   :  { %v1341_v49 = vrot.slane %v1340_v9, 2  ;;  %v1420_v53 = vadd.f32 %v1419_v31, %v1418_v27  ;;  %v8288_v59 = vadd.f32 %v1293_v48, %v1274_v1  ;;  %v1455_v29 = vsub.f32 %v1439_v10, %v1447_v11 }
 0x265   :  { %v1332_v25 = vrot.slane %v1331_v33, 4  ;;  %v1411_v38 = vadd.f32 %v1379_v34, %v1375_v32 }
 0x266   :  { %v1342_v41 = vadd.f32 %v1341_v49, %v1340_v9  ;;  %v1421_v42 = vrot.slane %v1420_v53, 2  ;;  %v1370_v12 = vmul.f32 %v8288_v59, %v8288_v59 }
 0x267   :  { %v1333_v24 = vadd.f32 %v1332_v25, %v1331_v33  ;;  %v1412_v45 = vrot.slane %v1411_v38, 4 }
 0x268   :  { %v1236_v3 = vpop.f32.mrf.mxu2  ;;  %v1255_v21 = vpop.f32.mrf.mxu3  ;;  %v1343_v8 = vrot.slane %v1342_v41, 1  ;;  %v1422_v22 = vadd.f32 %v1421_v42, %v1420_v53 }
 0x269   :  { %v1334_v36 = vrot.slane %v1333_v24, 2  ;;  %v1413_v57 = vadd.f32 %v1412_v45, %v1411_v38  ;;  %v8302_v23 = vadd.f32 %v1255_v21, %v1236_v3  ;;  %v8314_v38 = vadd.f32 1e-05, %v1464_v44 }
 0x26a   :  { %v1344_v60 = vadd.f32 %v1343_v8, %v1342_v41  ;;  %v1423_v61 = vrot.slane %v1422_v22, 1  ;;  %v1463_v41 = vmax.f32 %v1455_v29, 0.0 }
 0x26b   :  { %v1276_v47 = vpop.f32.mrf.mxu0  ;;  %v1295_v54 = vpop.f32.mrf.mxu1  ;;  %v1335_v0 = vadd.f32 %v1334_v36, %v1333_v24  ;;  %v1414_v2 = vrot.slane %v1413_v57, 2  ;;  %v1369_v15 = vmul.f32 %v8302_v23, %v8302_v23  ;;  %7683 = vrsqrt.f32 %v8314_v38 }
 0x26c   :  { %v8290_v63 = vadd.f32 %v1295_v54, %v1276_v47  ;;  %v8300_v19 = vmul.f32 0.0625, %v1344_v60  ;;  %v1424_v17 = vadd.f32 %v1423_v61, %v1422_v22  ;;  %v8319_v58 = vadd.f32 1e-05, %v1463_v41 }
 0x26d   :  { %v1336_v26 = vrot.slane %v1335_v0, 1  ;;  %v1415_v27 = vadd.f32 %v1414_v2, %v1413_v57  ;;  %vm1496_vm14 = vweird.f32 %v8314_v38 }
 0x26e   :  { %v1324_v4 = vadd.f32 %v8290_v63, %v8288_v59  ;;  %v1374_v18 = vmul.f32 %v8290_v63, %v8290_v63  ;;  %v1444_v32 = vmul.f32 0.0625, %v1424_v17  ;;  %v1452_v33 = vmul.f32 %v8300_v19, %v8300_v19 }
 0x26f   :  { %v1337_v48 = vadd.f32 %v1336_v26, %v1335_v0  ;;  %v1416_v39 = vrot.slane %v1415_v27, 1  ;;  %7685 = vrsqrt.f32 %v8319_v58  ;;  %vm1486_vm4 = vweird.f32 %v8319_v58 }
 0x270   :  { %v1238_v16 = vpop.f32.mrf.mxu2  ;;  %v1257_v50 = vpop.f32.mrf.mxu3  ;;  %v1325_v20 = vrot.slane %v1324_v4, 4  ;;  %v1404_v52 = vadd.f32 %v1374_v18, %v1370_v12  ;;  %v1460_v45 = vsub.f32 %v1444_v32, %v1452_v33 }
 0x271   :  { %v8304_v62 = vadd.f32 %v1257_v50, %v1238_v16  ;;  %v8316_v8 = vmul.f32 0.0625, %v1337_v48  ;;  %v1417_v22 = vadd.f32 %v1416_v39, %v1415_v27  ;;  %v8334_v26 = vpop.eup %7683 }
 0x272   :  { %v1326_v28 = vadd.f32 %v1325_v20, %v1324_v4  ;;  %v1405_v9 = vrot.slane %v1404_v52, 4  ;;  %v1468_v60 = vmax.f32 %v1460_v45, 0.0  ;;  %v1491_v48 = vmul.f32 %v8334_v26, %v8314_v38 }
 0x273   :  { %v1279_v35 = vpop.f32.mrf.mxu0  ;;  %v1298_v43 = vpop.f32.mrf.mxu1  ;;  %v1317_v31 = vadd.f32 %v8304_v62, %v8302_v23  ;;  %v1373_v1 = vmul.f32 %v8304_v62, %v8304_v62  ;;  %v1443_v11 = vmul.f32 0.0625, %v1417_v22  ;;  %v1451_v12 = vmul.f32 %v8316_v8, %v8316_v8 }
 0x274   :  { %v1327_v34 = vrot.slane %v1326_v28, 2  ;;  %v1406_v53 = vadd.f32 %v1405_v9, %v1404_v52  ;;  %v8323_v0 = vadd.f32 %v1298_v43, %v1279_v35  ;;  %v8336_v52 = vadd.f32 1e-05, %v1468_v60 }
 0x275   :  { %v1318_v25 = vrot.slane %v1317_v31, 4  ;;  %v1397_v42 = vadd.f32 %v1373_v1, %v1369_v15  ;;  %v1459_v44 = vsub.f32 %v1443_v11, %v1451_v12  ;;  %vm1497_vm13 = vweird.f32 %v8334_v26 }
 0x276   :  { %v1328_v49 = vadd.f32 %v1327_v34, %v1326_v28  ;;  %v1407_v13 = vrot.slane %v1406_v53, 2  ;;  %v1378_v9 = vmul.f32 %v8323_v0, %v8323_v0  ;;  %7687 = vrsqrt.f32 %v8336_v52  ;;  %vm8405_vm0 = vmor %vm1496_vm14, %vm1497_vm13 }
 0x277   :  { %v1319_v3 = vadd.f32 %v1318_v25, %v1317_v31  ;;  %v1398_v21 = vrot.slane %v1397_v42, 4  ;;  %vm1536_vm13 = vweird.f32 %v8336_v52 }
 0x278   :  { %v1241_v30 = vpop.f32.mrf.mxu2  ;;  %v1260_v24 = vpop.f32.mrf.mxu3  ;;  %v1329_v37 = vrot.slane %v1328_v49, 1  ;;  %v1408_v57 = vadd.f32 %v1407_v13, %v1406_v53 }
 0x279   :  { %v1320_v47 = vrot.slane %v1319_v3, 2  ;;  %v1399_v54 = vadd.f32 %v1398_v21, %v1397_v42  ;;  %v8342_v34 = vadd.f32 %v1260_v24, %v1241_v30  ;;  %v8353_v42 = vpop.eup %7685 }
 0x27a   :  { %v1330_v36 = vadd.f32 %v1329_v37, %v1328_v49  ;;  %v1409_v14 = vrot.slane %v1408_v57, 1  ;;  %v1467_v37 = vmax.f32 %v1459_v44, 0.0  ;;  %vm1487_vm1 = vweird.f32 %v8353_v42 }
 0x27b   :  { %v1281_v7 = vpop.f32.mrf.mxu0  ;;  %v1300_v56 = vpop.f32.mrf.mxu1  ;;  %v1321_v2 = vadd.f32 %v1320_v47, %v1319_v3  ;;  %v1400_v4 = vrot.slane %v1399_v54, 2  ;;  %v1377_v3 = vmul.f32 %v8342_v34, %v8342_v34  ;;  %v1481_v47 = vmul.f32 %v8353_v42, %v8319_v58  ;;  %vm8428_vm7 = vmor %vm1486_vm4, %vm1487_vm1 }
 0x27c   :  { %v8321_v61 = vmul.f32 0.0625, %v1330_v36  ;;  %v8325_v10 = vadd.f32 %v1300_v56, %v1281_v7  ;;  %v1410_v16 = vadd.f32 %v1409_v14, %v1408_v57  ;;  %v1492_v57 = vmul.f32 %v8334_v26, %v1491_v48  ;;  %v8367_v11 = vpop.eup %7687 }
 0x27d   :  { %v1322_v50 = vrot.slane %v1321_v2, 1  ;;  %v1401_v17 = vadd.f32 %v1400_v4, %v1399_v54  ;;  %v8369_v12 = vadd.f32 1e-05, %v1467_v37  ;;  %vm1537_vm9 = vweird.f32 %v8367_v11 }
 0x27e   :  { %v1450_v18 = vmul.f32 %v8321_v61, %v8321_v61  ;;  %v1352_v20 = vadd.f32 %v8325_v10, %v8323_v0  ;;  %v1442_v27 = vmul.f32 0.0625, %v1410_v16  ;;  %v1382_v1 = vmul.f32 %v8325_v10, %v8325_v10  ;;  %vm8470_vm14 = vmor %vm1536_vm13, %vm1537_vm9 }
 0x27f   :  { %v1323_v28 = vadd.f32 %v1322_v50, %v1321_v2  ;;  %v1402_v29 = vrot.slane %v1401_v17, 1 }
 0x280   :  { %v1243_v35 = vpop.f32.mrf.mxu2  ;;  %v1262_v43 = vpop.f32.mrf.mxu3  ;;  %v1353_v31 = vrot.slane %v1352_v20, 4  ;;  %v1458_v32 = vsub.f32 %v1442_v27, %v1450_v18  ;;  %v1432_v41 = vadd.f32 %v1382_v1, %v1378_v9  ;;  %v1482_v27 = vmul.f32 %v8353_v42, %v1481_v47 }
 0x281   :  { %v8340_v33 = vmul.f32 0.0625, %v1323_v28  ;;  %v1403_v15 = vadd.f32 %v1402_v29, %v1401_v17  ;;  %v8348_v49 = vadd.f32 %v1262_v43, %v1243_v35  ;;  %v1531_v43 = vmul.f32 %v8367_v11, %v8336_v52 }
 0x282   :  { %v1354_v39 = vadd.f32 %v1353_v31, %v1352_v20  ;;  %v1466_v53 = vmax.f32 %v1458_v32, 0.0  ;;  %v1433_v21 = vrot.slane %v1432_v41, 4  ;;  %v1493_v20 = vmul.f32 0.5, %v1492_v57 }
 0x283   :  { %v1449_v25 = vmul.f32 %v8340_v33, %v8340_v33  ;;  %v1441_v30 = vmul.f32 0.0625, %v1403_v15  ;;  %v1345_v45 = vadd.f32 %v8348_v49, %v8342_v34  ;;  %v1381_v56 = vmul.f32 %v8348_v49, %v8348_v49 }
 0x284   :  { %v1355_v24 = vrot.slane %v1354_v39, 2  ;;  %v8357_v13 = vadd.f32 1e-05, %v1466_v53  ;;  %v1434_v54 = vadd.f32 %v1433_v21, %v1432_v41  ;;  %v1494_v15 = vsub.f32 1.5, %v1493_v20 }
 0x285   :  { %v1457_v22 = vsub.f32 %v1441_v30, %v1449_v25  ;;  %v1346_v7 = vrot.slane %v1345_v45, 4  ;;  %v1425_v4 = vadd.f32 %v1381_v56, %v1377_v3  ;;  %v1483_v41 = vmul.f32 0.5, %v1482_v27 }
 0x286   :  { %v1356_v36 = vadd.f32 %v1355_v24, %v1354_v39  ;;  %7689 = vrsqrt.f32 %v8357_v13  ;;  %v1435_v18 = vrot.slane %v1434_v54, 2  ;;  %v1532_v30 = vmul.f32 %v8367_v11, %v1531_v43 }
 0x287   :  { %v1465_v60 = vmax.f32 %v1457_v22, 0.0  ;;  %v1347_v2 = vadd.f32 %v1346_v7, %v1345_v45  ;;  %v1426_v35 = vrot.slane %v1425_v4, 4  ;;  %v1701_v22 = vunpack.c.l.bf16 %v8274_v51 }
 0x288   :  { %v1357_v14 = vrot.slane %v1356_v36, 1  ;;  %v1436_v28 = vadd.f32 %v1435_v18, %v1434_v54  ;;  %v1702_v18 = vunpack.c.h.bf16 %v8274_v51  ;;  %vm1516_vm2 = vweird.f32 %v8357_v13 }
 0x289   :  { %v8371_v16 = vadd.f32 1e-05, %v1465_v60  ;;  %v1348_v17 = vrot.slane %v1347_v2, 2  ;;  %v1427_v32 = vadd.f32 %v1426_v35, %v1425_v4  ;;  %v1495_v60 = vmul.f32 %v8334_v26, %v1494_v15 }
 0x28a   :  { %v1358_v50 = vadd.f32 %v1357_v14, %v1356_v36  ;;  %v1437_v31 = vrot.slane %v1436_v28, 1  ;;  %v1484_v14 = vsub.f32 1.5, %v1483_v41  ;;  %v1710_v52 = vunpack.c.h.bf16 %v8278_v6 }
 0x28b   :  { %7691 = vrsqrt.f32 %v8371_v16  ;;  %v1349_v29 = vadd.f32 %v1348_v17, %v1347_v2  ;;  %v1428_v25 = vrot.slane %v1427_v32, 2  ;;  %v1533_v2 = vmul.f32 0.5, %v1532_v30 }
 0x28c   :  { %v8377_v44 = vmul.f32 0.0625, %v1358_v50  ;;  %v8379_v9 = vpop.eup %7689  ;;  %7693 = vrsqrt.f32 %v8369_v12  ;;  %v1438_v39 = vadd.f32 %v1437_v31, %v1436_v28  ;;  %vm1506_vm8 = vweird.f32 %v8371_v16 }
 0x28d   :  { %v1511_v1 = vmul.f32 %v8379_v9, %v8357_v13  ;;  %v1350_v48 = vrot.slane %v1349_v29, 1  ;;  %v1429_v3 = vadd.f32 %v1428_v25, %v1427_v32  ;;  %vm1517_vm15 = vweird.f32 %v8379_v9 }
 0x28e   :  { %v1454_v53 = vmul.f32 %v8377_v44, %v8377_v44  ;;  %v1446_v37 = vmul.f32 0.0625, %v1438_v39  ;;  %v1499_v32 = vsel %vm8405_vm0, %v8334_v26, %v1495_v60  ;;  %v1705_v39 = vunpack.c.l.bf16 %v8276_v46  ;;  %vm8424_vm6 = vmor %vm1516_vm2, %vm1517_vm15 }
 0x28f   :  { %v1512_v24 = vmul.f32 %v8379_v9, %v1511_v1  ;;  %v1351_v45 = vadd.f32 %v1350_v48, %v1349_v29  ;;  %v1430_v54 = vrot.slane %v1429_v3, 1  ;;  %v1485_v1 = vmul.f32 %v8353_v42, %v1484_v14 }
 0x290   :  { %v1462_v47 = vsub.f32 %v1446_v37, %v1454_v53  ;;  %v1534_v48 = vsub.f32 1.5, %v1533_v2  ;;  %v8434_v13 = vpack.c.bf16 %v8288_v59, %v8302_v23  ;;  %vm1526_vm15 = vweird.f32 %v8369_v12 }
 0x291   :  { %v7692_v21 = vpop.eup %7691  ;;  %v1513_v36 = vmul.f32 0.5, %v1512_v24  ;;  %v8389_v7 = vmul.f32 0.0625, %v1351_v45  ;;  %v1431_v20 = vadd.f32 %v1430_v54, %v1429_v3  ;;  %v1568_v24 = vrot.slane %v1499_v32, 7  ;;  %v8456_v54 = vld [vmem:[%s10226_s7] sm:$0xf] }
 0x292   :  { %v8391_v56 = vpop.eup %7693  ;;  %v1501_v57 = vmul.f32 %v7692_v21, %v8371_v16  ;;  %v1470_v17 = vmax.f32 %v1462_v47, 0.0  ;;  %vm1507_vm3 = vweird.f32 %v7692_v21  ;;  %v1489_v45 = vsel %vm8428_vm7, %v8353_v42, %v1485_v1 }
 0x293   :  { %v1514_v4 = vsub.f32 1.5, %v1513_v36  ;;  %v1521_v27 = vmul.f32 %v8391_v56, %v8369_v12  ;;  %v1453_v28 = vmul.f32 %v8389_v7, %v8389_v7  ;;  %v1445_v38 = vmul.f32 0.0625, %v1431_v20  ;;  %vm1508_vm10 = vmor %vm1506_vm8, %vm1507_vm3 }
 0x294   :  { %v1502_v50 = vmul.f32 %v7692_v21, %v1501_v57  ;;  %v8410_v31 = vadd.f32 1e-05, %v1470_v17  ;;  %v1535_v59 = vmul.f32 %v8367_v11, %v1534_v48  ;;  %v1706_v47 = vunpack.c.h.bf16 %v8276_v46 }
 0x295   :  { %v1515_v43 = vmul.f32 %v8379_v9, %v1514_v4  ;;  %v1522_v53 = vmul.f32 %v8391_v56, %v1521_v27  ;;  %v1461_v25 = vsub.f32 %v1445_v38, %v1453_v28  ;;  %v1709_v42 = vunpack.c.l.bf16 %v8278_v6 }
 0x296   :  { %v1503_v29 = vmul.f32 0.5, %v1502_v50  ;;  %7695 = vrsqrt.f32 %v8410_v31  ;;  %v1574_v60 = vsel %vm495_vm5, %v1489_v45, %v1568_v24  ;;  %v1539_v17 = vsel %vm8470_vm14, %v8367_v11, %v1535_v59 }
 0x297   :  { %v1519_v58 = vsel %vm8424_vm6, %v8379_v9, %v1515_v43  ;;  %v1469_v37 = vmax.f32 %v1461_v25, 0.0  ;;  %v1523_v3 = vmul.f32 0.5, %v1522_v53  ;;  %v1703_v27 = vunpack.c.l.bf16 %v8434_v13 }
 0x298   :  { %v1504_v15 = vsub.f32 1.5, %v1503_v29  ;;  %v1570_v9 = vrot.slane %v1519_v58, 5  ;;  %v1704_v35 = vunpack.c.h.bf16 %v8434_v13  ;;  %v8486_v53 = vrot.slane %v1539_v17, 7 }
 0x299   :  { %v8446_v57 = vadd.f32 1e-05, %v1469_v37  ;;  %v1524_v20 = vsub.f32 1.5, %v1523_v3  ;;  %vm1527_vm0 = vweird.f32 %v8391_v56  ;;  %v8492_v11 = vpack.c.bf16 %v8323_v0, %v8342_v34 }
 0x29a   :  { %v1505_v30 = vmul.f32 %v7692_v21, %v1504_v15  ;;  %vm8509_vm1 = vmor %vm1526_vm15, %vm1527_vm0  ;;  %vm1556_vm3 = vweird.f32 %v8410_v31 }
 0x29b   :  { %7697 = vrsqrt.f32 %v8446_v57  ;;  %v8497_v25 = vmul.f32 %v8391_v56, %v1524_v20  ;;  %vm1546_vm7 = vweird.f32 %v8446_v57 }
 0x29c   :  { %v1509_v23 = vsel %vm1508_vm10, %v7692_v21, %v1505_v30  ;;  %v8448_v16 = vpop.eup %7695  ;;  %v8460_v21 = vpack.c.bf16 %v8290_v63, %v8304_v62  ;;  %v1713_v63 = vunpack.c.l.bf16 %v8280_v40  ;;  %v1714_v62 = vunpack.c.h.bf16 %v8280_v40 }
 0x29d   :  { %v1569_v36 = vrot.slane %v1509_v23, 6  ;;  %v1551_v2 = vmul.f32 %v8448_v16, %v8410_v31  ;;  %vm1557_vm2 = vweird.f32 %v8448_v16 }
 0x29e   :  { %v1707_v43 = vunpack.c.l.bf16 %v8460_v21  ;;  %v1708_v29 = vunpack.c.h.bf16 %v8460_v21  ;;  %vm8538_vm4 = vmor %vm1556_vm3, %vm1557_vm2 }
 0x29f   :  { %v1576_v14 = vsel %vm1575_vm11, %v1569_v36, %v1570_v9  ;;  %v1552_v38 = vmul.f32 %v8448_v16, %v1551_v2 }
 0x2a0   :  { %v1578_v50 = vsel %vm1577_vm12, %v1574_v60, %v1576_v14  ;;  %v1529_v60 = vsel %vm8509_vm1, %v8391_v56, %v8497_v25  ;;  %v1712_v56 = vunpack.c.h.bf16 %v8492_v11 }
 0x2a1   :  { %v1584_v28 = vmul.f32 %v1578_v50, %v8456_v54  ;;  %v8494_v26 = vpop.eup %7697  ;;  %v1553_v37 = vmul.f32 0.5, %v1552_v38 }
 0x2a2   :  { %v1541_v59 = vmul.f32 %v8494_v26, %v8446_v57  ;;  %vm1547_vm6 = vweird.f32 %v8494_v26 }
 0x2a3   :  { %v1589_v32 = vperm.slane %v1584_v28, 0  ;;  %v1590_v1 = vperm.slane %v1584_v28, 1  ;;  %v1591_v48 = vperm.slane %v1584_v28, 2  ;;  %v1592_v15 = vperm.slane %v1584_v28, 3  ;;  %vm1548_vm8 = vmor %vm1546_vm7, %vm1547_vm6 }
 0x2a4   :  { %v1542_v2 = vmul.f32 %v8494_v26, %v1541_v59 }
 0x2a5   :  { %v1606_v41 = vmul.f32 %v1590_v1, %v8282_v5  ;;  %v1607_v58 = vmul.f32 %v1591_v48, %v8340_v33  ;;  %v1608_v30 = vmul.f32 %v1592_v15, %v8321_v61  ;;  %v1645_v24 = vpack.c.bf16 %v1590_v1, %v1589_v32  ;;  %v8516_v61 = vld [vmem:[%s10227_s8] sm:$0xf] }
 0x2a6   :  { %v1646_v45 = vpack.c.bf16 %v1592_v15, %v1591_v48  ;;  %v1605_v0 = vmul.f32 %v1589_v32, %v8286_v55  ;;  %v1554_v32 = vsub.f32 1.5, %v1553_v37  ;;  %v8529_v1 = vpack.c.bf16 %v8325_v10, %v8348_v49 }
 0x2a7   :  { %v1621_v34 = vrot.slane %v1606_v41, 7  ;;  %v1622_v23 = vrot.slane %v1607_v58, 6  ;;  %v1623_v3 = vrot.slane %v1608_v30, 5  ;;  %v1653_v33 = vunpack.c.l.b16 %v1645_v24 }
 0x2a8   :  { %v1654_v9 = vunpack.c.h.b16 %v1645_v24  ;;  %v1655_v36 = vunpack.c.l.b16 %v1646_v45  ;;  %v1656_v55 = vunpack.c.h.b16 %v1646_v45  ;;  %v1543_v58 = vmul.f32 0.5, %v1542_v2 }
 0x2a9   :  { %v1627_v12 = vsel %vm495_vm5, %v1605_v0, %v1621_v34  ;;  %v1628_v14 = vsel %vm1575_vm11, %v1622_v23, %v1623_v3  ;;  %v1661_v50 = vpack.c.b16 %v1653_v33, %v1653_v33  ;;  %v1555_v37 = vmul.f32 %v8448_v16, %v1554_v32 }
 0x2aa   :  { %v1629_v4 = vsel %vm1577_vm12, %v1627_v12, %v1628_v14  ;;  %v1662_v17 = vpack.c.b16 %v1654_v9, %v1654_v9  ;;  %v1663_v20 = vpack.c.b16 %v1655_v36, %v1655_v36  ;;  %v1664_v38 = vpack.c.b16 %v1656_v55, %v1656_v55 }
 0x2ab   :  { %v1635_v28 = vsub.f32 %v8516_v61, %v1629_v4  ;;  %v1670_v48 = vpack.i.b16 %v1661_v50, %v1661_v50  ;;  %v1559_v51 = vsel %vm8538_vm4, %v8448_v16, %v1555_v37 }
 0x2ac   :  { %v1674_v15 = vpack.i.b16 %v1662_v17, %v1662_v17  ;;  %v1678_v41 = vpack.i.b16 %v1663_v20, %v1663_v20  ;;  %v1682_v30 = vpack.i.b16 %v1664_v38, %v1664_v38  ;;  %v1544_v20 = vsub.f32 1.5, %v1543_v58 }
 0x2ad   :  { %v1751_v24 = vperm.slane %v1635_v28, 0  ;;  %v1752_v45 = vperm.slane %v1635_v28, 1  ;;  %v1753_v59 = vperm.slane %v1635_v28, 2  ;;  %v1672_v0 = vperm.slane %v1670_v48, 0 }
 0x2ae   :  { %v1676_v34 = vperm.slane %v1674_v15, 0  ;;  %v1680_v23 = vperm.slane %v1678_v41, 0  ;;  %v1754_v3 = vperm.slane %v1635_v28, 3  ;;  %v1684_v33 = vperm.slane %v1682_v30, 0 }
 0x2af   :  { %v1767_v9 = vpack.c.bf16 %v1752_v45, %v1751_v24  ;;  %v1717_v10 = vunpack.c.l.bf16 %v1672_v0  ;;  %v1545_v30 = vmul.f32 %v8494_v26, %v1544_v20  ;;  %v1573_v21 = vrot.slane %v1559_v51, 5 }
 0x2b0   :  { %v1718_v49 = vunpack.c.l.bf16 %v1676_v34  ;;  %v1719_v36 = vunpack.c.l.bf16 %v1680_v23  ;;  %v1768_v55 = vpack.c.bf16 %v1754_v3, %v1753_v59  ;;  %v1720_v12 = vunpack.c.l.bf16 %v1684_v33 }
 0x2b1   :  { %v1775_v14 = vunpack.c.l.b16 %v1767_v9  ;;  %v1776_v2 = vunpack.c.h.b16 %v1767_v9  ;;  %v1725_v4 = vmul.f32 %v1717_v10, %v1701_v22  ;;  %v1729_v15 = vmul.f32 %v1717_v10, %v1705_v39 }
 0x2b2   :  { %v1726_v50 = vmul.f32 %v1718_v49, %v1702_v18  ;;  %v1727_v28 = vmul.f32 %v1719_v36, %v1703_v27  ;;  %v1728_v38 = vmul.f32 %v1720_v12, %v1704_v35  ;;  %v1731_v31 = vmul.f32 %v1719_v36, %v1707_v43 }
 0x2b3   :  { %v1732_v22 = vmul.f32 %v1720_v12, %v1708_v29  ;;  %v1777_v18 = vunpack.c.l.b16 %v1768_v55  ;;  %v1778_v32 = vunpack.c.h.b16 %v1768_v55  ;;  %v1783_v48 = vpack.c.b16 %v1775_v14, %v1775_v14 }
 0x2b4   :  { %v1730_v13 = vmul.f32 %v1718_v49, %v1706_v47  ;;  %v1741_v27 = vpack.c.bf16 %v1726_v50, %v1725_v4  ;;  %v1784_v35 = vpack.c.b16 %v1776_v2, %v1776_v2  ;;  %v1742_v16 = vpack.c.bf16 %v1728_v38, %v1727_v28 }
 0x2b5   :  { %v1785_v41 = vpack.c.b16 %v1777_v18, %v1777_v18  ;;  %v1786_v43 = vpack.c.b16 %v1778_v32, %v1778_v32  ;;  %v1792_v58 = vpack.i.b16 %v1783_v48, %v1783_v48  ;;  %v1744_v29 = vpack.c.bf16 %v1732_v22, %v1731_v31 }
 0x2b6   :  { %v1796_v24 = vpack.i.b16 %v1784_v35, %v1784_v35  ;;  %v1743_v39 = vpack.c.bf16 %v1730_v13, %v1729_v15  ;;  %v1823_v46 = vunpack.c.l.bf16 %v1741_v27  ;;  %v1824_v47 = vunpack.c.h.bf16 %v1741_v27 }
 0x2b7   :  { %v1794_v45 = vperm.slane %v1792_v58, 0  ;;  %v1800_v59 = vpack.i.b16 %v1785_v41, %v1785_v41  ;;  %v1804_v0 = vpack.i.b16 %v1786_v43, %v1786_v43  ;;  %v1549_v9 = vsel %vm1548_vm8, %v8494_v26, %v1545_v30 }
 0x2b8   :  { %v1798_v34 = vperm.slane %v1796_v24, 0  ;;  %v1825_v37 = vunpack.c.l.bf16 %v1742_v16  ;;  %v1826_v10 = vunpack.c.h.bf16 %v1742_v16  ;;  %v1572_v57 = vrot.slane %v1549_v9, 6  ;;  %v6485_v16 = vld [vmem:[#allocation8 + $0x1c0] sm:$0xf] }
 0x2b9   :  { %v1802_v23 = vperm.slane %v1800_v59, 0  ;;  %v1806_v3 = vperm.slane %v1804_v0, 0  ;;  %v1839_v33 = vunpack.c.l.bf16 %v1794_v45  ;;  %v1829_v36 = vunpack.c.l.bf16 %v1744_v29  ;;  %v7423_v59 = vld [vmem:[#allocation8 + $0x1dc] sm:$0xf0] }
 0x2ba   :  { %v1840_v49 = vunpack.c.l.bf16 %v1798_v34  ;;  %v1830_v55 = vunpack.c.h.bf16 %v1744_v29  ;;  %v1579_v2 = vsel %vm495_vm5, %v1529_v60, %v8486_v53  ;;  %v1580_v26 = vsel %vm1575_vm11, %v1572_v57, %v1573_v21 }
 0x2bb   :  { %v1841_v12 = vunpack.c.l.bf16 %v1802_v23  ;;  %v1842_v14 = vunpack.c.l.bf16 %v1806_v3  ;;  %v1847_v4 = vadd.f32 %v1839_v33, %v1823_v46  ;;  %v1827_v31 = vunpack.c.l.bf16 %v1743_v39 }
 0x2bc   :  { %v1848_v50 = vadd.f32 %v1840_v49, %v1824_v47  ;;  %v1828_v51 = vunpack.c.h.bf16 %v1743_v39  ;;  %v1711_v22 = vunpack.c.l.bf16 %v8492_v11  ;;  %v1581_v18 = vsel %vm1577_vm12, %v1579_v2, %v1580_v26  ;;  %v7487_v2 = vld [vmem:[#allocation8 + $0x3dc] sm:$0xf0] }
 0x2bd   :  { %v1849_v17 = vadd.f32 %v1841_v12, %v1825_v37  ;;  %v1850_v20 = vadd.f32 %v1842_v14, %v1826_v10  ;;  %v1853_v28 = vadd.f32 %v1841_v12, %v1829_v36  ;;  %v1854_v38 = vadd.f32 %v1842_v14, %v1830_v55 }
 0x2be   :  { %v1585_v53 = vmul.f32 %v1581_v18, %v8456_v54  ;;  %v8579_v25 = vadd.f32 %v1839_v33, %v1827_v31  ;;  %v8581_v60 = vadd.f32 %v1840_v49, %v1828_v51  ;;  %v8583_v48 = vpack.c.bf16 %v1848_v50, %v1847_v4  ;;  %v6997_v18 = vld [vmem:[#allocation8 + $0x5c0] sm:$0xf] }
 0x2bf   :  { %v8573_v5 = vpack.c.bf16 %v1850_v20, %v1849_v17  ;;  %v8575_v32 = vpack.c.bf16 %v1854_v38, %v1853_v28  ;;  %v1715_v15 = vunpack.c.l.bf16 %v8529_v1  ;;  %v6486_v49 = vor.u32 %v7423_v59, %v6485_v16  ;;  %v7615_v16 = vld [vmem:[#allocation8 + $0x7dc] sm:$0xf0] }
 0x2c0   :  { %v1593_v43 = vperm.slane %v1585_v53, 0  ;;  %v1594_v58 = vperm.slane %v1585_v53, 1  ;;  %v1595_v30 = vperm.slane %v1585_v53, 2  ;;  %v1596_v54 = vperm.slane %v1585_v53, 3  ;;  %v7551_v53 = vld [vmem:[#allocation8 + $0x5dc] sm:$0xf0] }
 0x2c1   :  { %v1873_v13 = vunpack.c.l.bf16 %v8573_v5  ;;  %v1874_v27 = vunpack.c.h.bf16 %v8573_v5  ;;  %v1877_v35 = vunpack.c.l.bf16 %v8575_v32  ;;  %v1878_v41 = vunpack.c.h.bf16 %v8575_v32  ;;  %3647 = vmatpush.bf16.msra.mxu2 %v6486_v49  ;;  %v7415_v59 = vld [vmem:[#allocation8 + $0x19c] sm:$0xf0] }
 0x2c2   :  { %v1609_v0 = vmul.f32 %v1593_v43, %v8316_v8  ;;  %v1610_v39 = vmul.f32 %v1594_v58, %v8300_v19  ;;  %v1611_v34 = vmul.f32 %v1595_v30, %v8389_v7  ;;  %v1612_v46 = vmul.f32 %v1596_v54, %v8377_v44  ;;  %v6741_v44 = vld [vmem:[#allocation8 + $0x3c0] sm:$0xf] }
 0x2c3   :  { %v1889_v24 = vmul.f32 0.5, %v1873_v13  ;;  %v1890_v21 = vmul.f32 0.5, %v1874_v27  ;;  %v1893_v29 = vmul.f32 0.5, %v1877_v35  ;;  %v1894_v45 = vmul.f32 0.5, %v1878_v41  ;;  %v7407_v32 = vld [vmem:[#allocation8 + $0x15c] sm:$0xf0] }
 0x2c4   :  { %v1647_v3 = vpack.c.bf16 %v1594_v58, %v1593_v43  ;;  %v1648_v33 = vpack.c.bf16 %v1596_v54, %v1595_v30  ;;  %v1624_v9 = vrot.slane %v1610_v39, 7  ;;  %v1625_v37 = vrot.slane %v1611_v34, 6  ;;  %v7253_v54 = vld [vmem:[#allocation8 + $0x7c0] sm:$0xf] }
 0x2c5   :  { %v1904_v47 = vpack.c.bf16 %v1890_v21, %v1889_v24  ;;  %v1906_v23 = vpack.c.bf16 %v1894_v45, %v1893_v29  ;;  %v1626_v10 = vrot.slane %v1612_v46, 5  ;;  %v6742_v51 = vor.u32 %v7487_v2, %v6741_v44 }
 0x2c6   :  { %v1630_v8 = vsel %vm495_vm5, %v1609_v0, %v1624_v9  ;;  %v1657_v14 = vunpack.c.l.b16 %v1647_v3  ;;  %v1658_v7 = vunpack.c.h.b16 %v1647_v3  ;;  %v1659_v50 = vunpack.c.l.b16 %v1648_v33 }
 0x2c7   :  { %v1913_v57 = vunpack.c.l.bf16 %v1904_v47  ;;  %v1914_v36 = vunpack.c.h.bf16 %v1904_v47  ;;  %v1917_v55 = vunpack.c.l.bf16 %v1906_v23  ;;  %v1918_v12 = vunpack.c.h.bf16 %v1906_v23  ;;  %3666 = vmatpush.bf16.msra.mxu3 %v6742_v51 }
 0x2c8   :  { %v1631_v19 = vsel %vm1575_vm11, %v1625_v37, %v1626_v10  ;;  %v1660_v26 = vunpack.c.h.b16 %v1648_v33  ;;  %v1665_v20 = vpack.c.b16 %v1657_v14, %v1657_v14  ;;  %v1666_v28 = vpack.c.b16 %v1658_v7, %v1658_v7 }
 0x2c9   :  { %7699 = vtanh.f32 %v1913_v57  ;;  %v1632_v4 = vsel %vm1577_vm12, %v1630_v8, %v1631_v19  ;;  %v1667_v38 = vpack.c.b16 %v1659_v50, %v1659_v50  ;;  %v6998_v46 = vor.u32 %v7551_v53, %v6997_v18 }
 0x2ca   :  { %7701 = vtanh.f32 %v1914_v36  ;;  %v1636_v17 = vsub.f32 %v8516_v61, %v1632_v4  ;;  %v1668_v31 = vpack.c.b16 %v1660_v26, %v1660_v26  ;;  %v1686_v43 = vpack.i.b16 %v1665_v20, %v1665_v20  ;;  %v6453_v61 = vld [vmem:[#allocation8 + $0x180] sm:$0xf] }
 0x2cb   :  { %7703 = vtanh.f32 %v1917_v55  ;;  %v1690_v58 = vpack.i.b16 %v1666_v28, %v1666_v28  ;;  %v1694_v24 = vpack.i.b16 %v1667_v38, %v1667_v38  ;;  %v7254_v9 = vor.u32 %v7615_v16, %v7253_v54  ;;  %3685 = vmatpush.bf16.msrb.mxu0 %v6998_v46 }
 0x2cc   :  { %7705 = vtanh.f32 %v1918_v12  ;;  %v1755_v30 = vperm.slane %v1636_v17, 0  ;;  %v1698_v21 = vpack.i.b16 %v1668_v31, %v1668_v31  ;;  %v1756_v29 = vperm.slane %v1636_v17, 1 }
 0x2cd   :  { %v1757_v45 = vperm.slane %v1636_v17, 2  ;;  %v1688_v0 = vperm.slane %v1686_v43, 0  ;;  %v1692_v39 = vperm.slane %v1690_v58, 0  ;;  %v1758_v34 = vperm.slane %v1636_v17, 3  ;;  %3704 = vmatpush.bf16.msrb.mxu1 %v7254_v9 }
 0x2ce   :  { %v1696_v23 = vperm.slane %v1694_v24, 0  ;;  %v1700_v3 = vperm.slane %v1698_v21, 0  ;;  %v1769_v33 = vpack.c.bf16 %v1756_v29, %v1755_v30  ;;  %v1716_v10 = vunpack.c.h.bf16 %v8529_v1 }
 0x2cf   :  { %v7700_v47 = vpop.eup %7699  ;;  %v1721_v49 = vunpack.c.l.bf16 %v1688_v0  ;;  %v1722_v57 = vunpack.c.l.bf16 %v1692_v39  ;;  %v6454_v36 = vor.u32 %v7415_v59, %v6453_v61  ;;  %v8609_v12 = vpack.c.bf16 %v8581_v60, %v8579_v25 }
 0x2d0   :  { %v7702_v37 = vpop.eup %7701  ;;  %v1723_v19 = vunpack.c.l.bf16 %v1696_v23  ;;  %v1871_v14 = vunpack.c.l.bf16 %v8583_v48  ;;  %v1724_v44 = vunpack.c.l.bf16 %v1700_v3  ;;  %v1770_v2 = vpack.c.bf16 %v1758_v34, %v1757_v45 }
 0x2d1   :  { %v7704_v55 = vpop.eup %7703  ;;  %v1944_v8 = vpack.c.bf16 %v7702_v37, %v7700_v47  ;;  %v1779_v4 = vunpack.c.l.b16 %v1769_v33  ;;  %3648 = vmatpush.bf16.msra.mxu2 %v6454_v36  ;;  %v1872_v50 = vunpack.c.h.bf16 %v8583_v48  ;;  %v1733_v28 = vmul.f32 %v1721_v49, %v1709_v42  ;;  %v7371_v48 = vld [vmem:[#allocation8 + $0x44] sm:$0xf] }
 0x2d2   :  { %v7706_v7 = vpop.eup %7705  ;;  %v1734_v25 = vmul.f32 %v1722_v57, %v1710_v52  ;;  %v1735_v60 = vmul.f32 %v1723_v19, %v1711_v22  ;;  %v1737_v38 = vmul.f32 %v1721_v49, %v1713_v63  ;;  %v1738_v31 = vmul.f32 %v1722_v57, %v1714_v62 }
 0x2d3   :  { %v1946_v26 = vpack.c.bf16 %v7706_v7, %v7704_v55  ;;  %v1953_v17 = vunpack.c.l.bf16 %v1944_v8  ;;  %v1954_v20 = vunpack.c.h.bf16 %v1944_v8  ;;  %v1736_v58 = vmul.f32 %v1724_v44, %v1712_v56 }
 0x2d4   :  { %v1739_v6 = vmul.f32 %v1723_v19, %v1715_v15  ;;  %v1740_v42 = vmul.f32 %v1724_v44, %v1716_v10  ;;  %v1780_v52 = vunpack.c.h.b16 %v1769_v33  ;;  %v1781_v16 = vunpack.c.l.b16 %v1770_v2 }
 0x2d5   :  { %v1957_v51 = vunpack.c.l.bf16 %v1946_v26  ;;  %v1958_v18 = vunpack.c.h.bf16 %v1946_v26  ;;  %v1969_v53 = vadd.f32 1.0, %v1953_v17  ;;  %v1970_v43 = vadd.f32 1.0, %v1954_v20 }
 0x2d6   :  { %v1745_v63 = vpack.c.bf16 %v1734_v25, %v1733_v28  ;;  %v1782_v24 = vunpack.c.h.b16 %v1770_v2  ;;  %v1787_v40 = vpack.c.b16 %v1779_v4, %v1779_v4  ;;  %v1788_v62 = vpack.c.b16 %v1780_v52, %v1780_v52  ;;  %v7479_v52 = vld [vmem:[#allocation8 + $0x39c] sm:$0xf0] }
 0x2d7   :  { %v1973_v30 = vadd.f32 1.0, %v1957_v51  ;;  %v1974_v22 = vadd.f32 1.0, %v1958_v18  ;;  %v1984_v54 = vpack.c.bf16 %v1970_v43, %v1969_v53  ;;  %v1789_v61 = vpack.c.b16 %v1781_v16, %v1781_v16  ;;  %v6709_v53 = vld [vmem:[#allocation8 + $0x380] sm:$0xf] }
 0x2d8   :  { %v1746_v59 = vpack.c.bf16 %v1736_v58, %v1735_v60  ;;  %v1790_v11 = vpack.c.b16 %v1782_v24, %v1782_v24  ;;  %v1808_v56 = vpack.i.b16 %v1787_v40, %v1787_v40  ;;  %v1812_v0 = vpack.i.b16 %v1788_v62, %v1788_v62  ;;  %v7221_v16 = vld [vmem:[#allocation8 + $0x780] sm:$0xf] }
 0x2d9   :  { %v1986_v21 = vpack.c.bf16 %v1974_v22, %v1973_v30  ;;  %v1993_v29 = vunpack.c.l.bf16 %v1984_v54  ;;  %v1994_v45 = vunpack.c.h.bf16 %v1984_v54  ;;  %v1816_v23 = vpack.i.b16 %v1789_v61, %v1789_v61  ;;  %v6965_v30 = vld [vmem:[#allocation8 + $0x580] sm:$0xf] }
 0x2da   :  { %v1810_v46 = vperm.slane %v1808_v56, 0  ;;  %v1814_v47 = vperm.slane %v1812_v0, 0  ;;  %v1820_v3 = vpack.i.b16 %v1790_v11, %v1790_v11  ;;  %v1747_v10 = vpack.c.bf16 %v1738_v31, %v1737_v38  ;;  %v6421_v24 = vld [vmem:[#allocation8 + $0x140] sm:$0xf] }
 0x2db   :  { %v1997_v1 = vunpack.c.l.bf16 %v1986_v21  ;;  %v1998_v15 = vunpack.c.h.bf16 %v1986_v21  ;;  %v2009_v39 = vmul.f32 0.5, %v1993_v29  ;;  %v2010_v34 = vmul.f32 0.5, %v1994_v45  ;;  %v7471_v29 = vld [vmem:[#allocation8 + $0x35c] sm:$0xf0] }
 0x2dc   :  { %v1748_v49 = vpack.c.bf16 %v1740_v42, %v1739_v6  ;;  %v1818_v57 = vperm.slane %v1816_v23, 0  ;;  %v1822_v36 = vperm.slane %v1820_v3, 0  ;;  %v1831_v55 = vunpack.c.l.bf16 %v1745_v63  ;;  %v6933_v56 = vld [vmem:[#allocation8 + $0x540] sm:$0xf] }
 0x2dd   :  { %v2013_v33 = vmul.f32 0.5, %v1997_v1  ;;  %v2014_v9 = vmul.f32 0.5, %v1998_v15  ;;  %v2024_v37 = vpack.c.bf16 %v2010_v34, %v2009_v39  ;;  %v1832_v44 = vunpack.c.h.bf16 %v1745_v63  ;;  %v7607_v63 = vld [vmem:[#allocation8 + $0x79c] sm:$0xf0] }
 0x2de   :  { %v1833_v2 = vunpack.c.l.bf16 %v1746_v59  ;;  %v1834_v4 = vunpack.c.h.bf16 %v1746_v59  ;;  %v1843_v26 = vunpack.c.l.bf16 %v1810_v46  ;;  %v1844_v17 = vunpack.c.l.bf16 %v1814_v47  ;;  %v7535_v0 = vld [vmem:[#allocation8 + $0x55c] sm:$0xf0] }
 0x2df   :  { %v2026_v8 = vpack.c.bf16 %v2014_v9, %v2013_v33  ;;  %v2033_v19 = vunpack.c.l.bf16 %v2024_v37  ;;  %v2034_v7 = vunpack.c.h.bf16 %v2024_v37  ;;  %v1835_v38 = vunpack.c.l.bf16 %v1747_v10  ;;  %v7189_v1 = vld [vmem:[#allocation8 + $0x740] sm:$0xf] }
 0x2e0   :  { %v1837_v31 = vunpack.c.l.bf16 %v1748_v49  ;;  %v1845_v51 = vunpack.c.l.bf16 %v1818_v57  ;;  %v1846_v18 = vunpack.c.l.bf16 %v1822_v36  ;;  %v1838_v42 = vunpack.c.h.bf16 %v1748_v49  ;;  %v7599_v47 = vld [vmem:[#allocation8 + $0x75c] sm:$0xf0] }
 0x2e1   :  { %v2037_v20 = vunpack.c.l.bf16 %v2026_v8  ;;  %v2038_v28 = vunpack.c.h.bf16 %v2026_v8  ;;  %v2049_v25 = vmul.f32 %v2033_v19, %v1873_v13  ;;  %v2050_v60 = vmul.f32 %v2034_v7, %v1874_v27  ;;  %v7543_v13 = vld [vmem:[#allocation8 + $0x59c] sm:$0xf0] }
 0x2e2   :  { %v1836_v22 = vunpack.c.h.bf16 %v1747_v10  ;;  %v1857_v5 = vadd.f32 %v1845_v51, %v1833_v2  ;;  %v1858_v27 = vadd.f32 %v1846_v18, %v1834_v4  ;;  %v1861_v54 = vadd.f32 %v1845_v51, %v1837_v31  ;;  %v6389_v23 = vld [vmem:[#allocation8 + $0x100] sm:$0xf] }
 0x2e3   :  { %v2053_v43 = vmul.f32 %v2037_v20, %v1877_v35  ;;  %v2054_v58 = vmul.f32 %v2038_v28, %v1878_v41  ;;  %v8635_v6 = vpack.c.bf16 %v2050_v60, %v2049_v25  ;;  %v1855_v62 = vadd.f32 %v1843_v26, %v1831_v55  ;;  %v6677_v41 = vld [vmem:[#allocation8 + $0x340] sm:$0xf] }
 0x2e4   :  { %v1856_v35 = vadd.f32 %v1844_v17, %v1832_v44  ;;  %v1862_v21 = vadd.f32 %v1846_v18, %v1838_v42  ;;  %v1859_v45 = vadd.f32 %v1843_v26, %v1835_v38  ;;  %v1860_v61 = vadd.f32 %v1844_v17, %v1836_v22  ;;  %v7399_v3 = vld [vmem:[#allocation8 + $0x11c] sm:$0xf0] }
 0x2e5   :  { %v8637_v40 = vpack.c.bf16 %v2054_v58, %v2053_v43  ;;  %v8639_v59 = vpack.c.bf16 %v1858_v27, %v1857_v5  ;;  %v6710_v11 = vor.u32 %v7479_v52, %v6709_v53  ;;  %v2337_v15 = vunpack.c.l.b16 %v8635_v6  ;;  %v6645_v49 = vld [vmem:[#allocation8 + $0x300] sm:$0xf] }
 0x2e6   :  { %v2338_v39 = vunpack.c.h.b16 %v8635_v6  ;;  %v8643_v34 = vpack.c.bf16 %v1862_v21, %v1861_v54  ;;  %v6966_v46 = vor.u32 %v7543_v13, %v6965_v30  ;;  %v7222_v37 = vor.u32 %v7607_v63, %v7221_v16  ;;  %v7463_v57 = vld [vmem:[#allocation8 + $0x31c] sm:$0xf0] }
 0x2e7   :  { %v1881_v33 = vunpack.c.l.bf16 %v8639_v59  ;;  %v1882_v9 = vunpack.c.h.bf16 %v8639_v59  ;;  %3667 = vmatpush.bf16.msra.mxu3 %v6710_v11  ;;  %v6422_v10 = vor.u32 %v7407_v32, %v6421_v24  ;;  %v8647_v36 = vld [vmem:[#allocation8 + $0x500] sm:$0xf]  ;;  %v2341_v55 = vunpack.c.l.b16 %v8637_v40 }
 0x2e8   :  { %v2342_v8 = vunpack.c.h.b16 %v8637_v40  ;;  %v1885_v19 = vunpack.c.l.bf16 %v8643_v34  ;;  %v1886_v7 = vunpack.c.h.bf16 %v8643_v34  ;;  %3686 = vmatpush.bf16.msrb.mxu0 %v6966_v46  ;;  %v7527_v44 = vld [vmem:[#allocation8 + $0x51c] sm:$0xf0]  ;;  %3705 = vmatpush.bf16.msrb.mxu1 %v7222_v37  ;;  %v6678_v20 = vor.u32 %v7471_v29, %v6677_v41 }
 0x2e9   :  { %v8653_v2 = vld [vmem:[#allocation8 + $0x700] sm:$0xf]  ;;  %v1897_v26 = vmul.f32 0.5, %v1881_v33  ;;  %v1898_v17 = vmul.f32 0.5, %v1882_v9  ;;  %3649 = vmatpush.bf16.msra.mxu2 %v6422_v10  ;;  %v6934_v28 = vor.u32 %v7535_v0, %v6933_v56  ;;  %v7190_v51 = vor.u32 %v7599_v47, %v7189_v1 }
 0x2ea   :  { %v8655_v4 = vld [vmem:[#allocation8 + $0x71c] sm:$0xf0]  ;;  %v1901_v38 = vmul.f32 0.5, %v1885_v19  ;;  %v1902_v31 = vmul.f32 0.5, %v1886_v7  ;;  %v6390_v18 = vor.u32 %v7399_v3, %v6389_v23  ;;  %v6646_v22 = vor.u32 %v7463_v57, %v6645_v49 }
 0x2eb   :  { %v6357_v25 = vld [vmem:[#allocation8 + $0xc0] sm:$0xf]  ;;  %v1908_v13 = vpack.c.bf16 %v1898_v17, %v1897_v26  ;;  %3668 = vmatpush.bf16.msra.mxu3 %v6678_v20  ;;  %v1875_v16 = vunpack.c.l.bf16 %v8609_v12  ;;  %v1876_v63 = vunpack.c.h.bf16 %v8609_v12  ;;  %v8681_v24 = vpack.c.bf16 %v1856_v35, %v1855_v62  ;;  %v6263_v12 = vld [vmem:[#allocation8 + $0x20] sm:$0xf0] }
 0x2ec   :  { %v7391_v60 = vld [vmem:[#allocation8 + $0xdc] sm:$0xf0]  ;;  %v8683_v40 = vpack.c.bf16 %v1860_v61, %v1859_v45  ;;  %v1910_v21 = vpack.c.bf16 %v1902_v31, %v1901_v38  ;;  %3687 = vmatpush.bf16.msrb.mxu0 %v6934_v28  ;;  %v6902_v32 = vor.u32 %v7527_v44, %v8647_v36  ;;  %3706 = vmatpush.bf16.msrb.mxu1 %v7190_v51  ;;  %v1887_v28 = vmul.f32 0.5, %v1871_v14 }
 0x2ed   :  { %v6613_v53 = vld [vmem:[#allocation8 + $0x2c0] sm:$0xf]  ;;  %v1921_v56 = vunpack.c.l.bf16 %v1908_v13  ;;  %v1922_v0 = vunpack.c.h.bf16 %v1908_v13  ;;  %3650 = vmatpush.bf16.msra.mxu2 %v6390_v18  ;;  %v7158_v62 = vor.u32 %v8655_v4, %v8653_v2  ;;  %v6358_v35 = vor.u32 %v7391_v60, %v6357_v25 }
 0x2ee   :  { %v7455_v43 = vld [vmem:[#allocation8 + $0x2dc] sm:$0xf0]  ;;  %v8702_v46 = vpack.c.b16 %v2341_v55, %v2337_v15  ;;  %v8706_v47 = vpack.c.b16 %v2342_v8, %v2338_v39  ;;  %v1925_v23 = vunpack.c.l.bf16 %v1910_v21  ;;  %v1926_v3 = vunpack.c.h.bf16 %v1910_v21 }
 0x2ef   :  { %v8665_v58 = vld [vmem:[#allocation8 + $0x4c0] sm:$0xf]  ;;  %7707 = vtanh.f32 %v1921_v56  ;;  %3669 = vmatpush.bf16.msra.mxu3 %v6646_v22  ;;  %v6614_v57 = vor.u32 %v7455_v43, %v6613_v53  ;;  %v1888_v25 = vmul.f32 0.5, %v1872_v50  ;;  %v1891_v60 = vmul.f32 0.5, %v1875_v16 }
 0x2f0   :  { %v8667_v42 = vld [vmem:[#allocation8 + $0x4dc] sm:$0xf0]  ;;  %7709 = vtanh.f32 %v1922_v0  ;;  %3688 = vmatpush.bf16.msrb.mxu0 %v6902_v32  ;;  %3707 = vmatpush.bf16.msrb.mxu1 %v7158_v62  ;;  %v1892_v51 = vmul.f32 0.5, %v1876_v63  ;;  %v1879_v18 = vunpack.c.l.bf16 %v8681_v24  ;;  %v1880_v53 = vunpack.c.h.bf16 %v8681_v24  ;;  %v6429_v24 = vld [vmem:[#allocation8 + $0x148] sm:$0xf] }
 0x2f1   :  { %v8669_v52 = vld [vmem:[#allocation8 + $0x6c0] sm:$0xf]  ;;  %v6870_v36 = vor.u32 %v8667_v42, %v8665_v58  ;;  %7711 = vtanh.f32 %v1925_v23  ;;  %3651 = vmatpush.bf16.msra.mxu2 %v6358_v35  ;;  %v1883_v43 = vunpack.c.l.bf16 %v8683_v40  ;;  %v1903_v22 = vpack.c.bf16 %v1888_v25, %v1887_v28 }
 0x2f2   :  { %v8671_v30 = vld [vmem:[#allocation8 + $0x6dc] sm:$0xf0]  ;;  %7713 = vtanh.f32 %v1926_v3  ;;  %v1905_v21 = vpack.c.bf16 %v1892_v51, %v1891_v60  ;;  %v1895_v32 = vmul.f32 0.5, %v1879_v18  ;;  %v7419_v60 = vld [vmem:[#allocation8 + $0x1c4] sm:$0xf] }
 0x2f3   :  { %v8673_v5 = vld [vmem:[#allocation8 + $0x80] sm:$0xf]  ;;  %v7126_v15 = vor.u32 %v8671_v30, %v8669_v52  ;;  %3670 = vmatpush.bf16.msra.mxu3 %v6614_v57  ;;  %v1911_v0 = vunpack.c.l.bf16 %v1903_v22  ;;  %v1912_v62 = vunpack.c.h.bf16 %v1903_v22 }
 0x2f4   :  { %v8675_v27 = vld [vmem:[#allocation8 + $0x9c] sm:$0xf0]  ;;  %3689 = vmatpush.bf16.msrb.mxu0 %v6870_v36 }
 0x2f5   :  { %v8677_v54 = vld [vmem:[#allocation8 + $0x280] sm:$0xf]  ;;  %v6326_v6 = vor.u32 %v8675_v27, %v8673_v5  ;;  %v1884_v5 = vunpack.c.h.bf16 %v8683_v40  ;;  %v7708_v27 = vpop.eup %7707  ;;  %3708 = vmatpush.bf16.msrb.mxu1 %v7126_v15  ;;  %7715 = vtanh.f32 %v1911_v0 }
 0x2f6   :  { %v8686_v41 = vld [vmem:[#allocation8 + $0x29c] sm:$0xf0]  ;;  %7717 = vtanh.f32 %v1912_v62 }
 0x2f7   :  { %v8688_v29 = vld [vmem:[#allocation8 + $0x480] sm:$0xf]  ;;  %v6582_v39 = vor.u32 %v8686_v41, %v8677_v54  ;;  %3652 = vmatpush.bf16.msra.mxu2 %v6326_v6  ;;  %v1896_v41 = vmul.f32 0.5, %v1880_v53  ;;  %v1900_v35 = vmul.f32 0.5, %v1884_v5  ;;  %v1916_v6 = vunpack.c.h.bf16 %v1905_v21 }
 0x2f8   :  { %v8690_v11 = vld [vmem:[#allocation8 + $0x49c] sm:$0xf0] }
 0x2f9   :  { %v8694_v45 = vld [vmem:[#allocation8 + $0x680] sm:$0xf]  ;;  %v6838_v55 = vor.u32 %v8690_v11, %v8688_v29  ;;  %v1899_v29 = vmul.f32 0.5, %v1883_v43  ;;  %v7710_v11 = vpop.eup %7709  ;;  %3671 = vmatpush.bf16.msra.mxu3 %v6582_v39  ;;  %v8782_v57 = vpack.c.bf16 %v1896_v41, %v1895_v32  ;;  %v7611_v32 = vld [vmem:[#allocation8 + $0x7c4] sm:$0xf] }
 0x2fa   :  { %v8696_v61 = vld [vmem:[#allocation8 + $0x69c] sm:$0xf0]  ;;  %v7255_v41 = vld [vmem:[#allocation8 + $0x7e0] sm:$0xf0] }
 0x2fb   :  { %v8698_v1 = vld [vmem:[#allocation8 + $0x40] sm:$0xf]  ;;  %v7094_v44 = vor.u32 %v8696_v61, %v8694_v45  ;;  %v7712_v45 = vpop.eup %7711  ;;  %v1948_v61 = vpack.c.bf16 %v7710_v11, %v7708_v27  ;;  %3690 = vmatpush.bf16.msrb.mxu0 %v6838_v55  ;;  %v7483_v55 = vld [vmem:[#allocation8 + $0x3c4] sm:$0xf]  ;;  %v1920_v51 = vunpack.c.h.bf16 %v8782_v57 }
 0x2fc   :  { %v8708_v37 = vld [vmem:[#allocation8 + $0x5c] sm:$0xf0]  ;;  %v7714_v36 = vpop.eup %7713 }
 0x2fd   :  { %v8710_v10 = vld [vmem:[#allocation8 + $0x240] sm:$0xf]  ;;  %v6294_v2 = vor.u32 %v8708_v37, %v8698_v1  ;;  %v1915_v37 = vunpack.c.l.bf16 %v1905_v21  ;;  %v1950_v39 = vpack.c.bf16 %v7714_v36, %v7712_v45  ;;  %v1962_v28 = vunpack.c.h.bf16 %v1948_v61  ;;  %3709 = vmatpush.bf16.msrb.mxu1 %v7094_v44  ;;  %v6743_v44 = vld [vmem:[#allocation8 + $0x3e0] sm:$0xf0] }
 0x2fe   :  { %v8712_v49 = vld [vmem:[#allocation8 + $0x25c] sm:$0xf0]  ;;  %v6999_v21 = vld [vmem:[#allocation8 + $0x5e0] sm:$0xf0] }
 0x2ff   :  { %v8724_v8 = vld [vmem:[#allocation8 + $0x440] sm:$0xf]  ;;  %v6550_v4 = vor.u32 %v8712_v49, %v8710_v10  ;;  %3653 = vmatpush.bf16.msra.mxu2 %v6294_v2  ;;  %7719 = vtanh.f32 %v1915_v37  ;;  %v1978_v22 = vadd.f32 1.0, %v1962_v28  ;;  %v7547_v2 = vld [vmem:[#allocation8 + $0x5c4] sm:$0xf] }
 0x300   :  { %v8732_v26 = vld [vmem:[#allocation8 + $0x45c] sm:$0xf0]  ;;  %7721 = vtanh.f32 %v1916_v6  ;;  %v7002_v10 = vor.u32 %v7547_v2, %v6999_v21  ;;  %v7411_v49 = vld [vmem:[#allocation8 + $0x184] sm:$0xf] }
 0x301   :  { %v8734_v17 = vld [vmem:[#allocation8 + $0x640] sm:$0xf]  ;;  %v6806_v58 = vor.u32 %v8732_v26, %v8724_v8  ;;  %v8786_v8 = vpack.c.bf16 %v1900_v35, %v1899_v29  ;;  %v1961_v26 = vunpack.c.l.bf16 %v1948_v61  ;;  %3672 = vmatpush.bf16.msra.mxu3 %v6550_v4  ;;  %v6455_v4 = vld [vmem:[#allocation8 + $0x1a0] sm:$0xf0]  ;;  %v7258_v35 = vor.u32 %v7611_v32, %v7255_v41 }
 0x302   :  { %v8736_v20 = vld [vmem:[#allocation8 + $0x65c] sm:$0xf0]  ;;  %v6458_v45 = vor.u32 %v7411_v49, %v6455_v4  ;;  %v7475_v61 = vld [vmem:[#allocation8 + $0x384] sm:$0xf] }
 0x303   :  { %v8744_v38 = vld [vmem:[#allocation8] sm:$0xf]  ;;  %v7062_v42 = vor.u32 %v8736_v20, %v8734_v17  ;;  %3691 = vmatpush.bf16.msrb.mxu0 %v6806_v58  ;;  %v1923_v29 = vunpack.c.l.bf16 %v8786_v8  ;;  %v7716_v58 = vpop.eup %7715  ;;  %v1924_v37 = vunpack.c.h.bf16 %v8786_v8  ;;  %v6967_v20 = vld [vmem:[#allocation8 + $0x5a0] sm:$0xf0] }
 0x304   :  { %v8746_v31 = vld [vmem:[#allocation8 + $0x1c] sm:$0xf0]  ;;  %v7531_v2 = vld [vmem:[#allocation8 + $0x544] sm:$0xf] }
 0x305   :  { %v8757_v52 = vld [vmem:[#allocation8 + $0x200] sm:$0xf]  ;;  %v6262_v56 = vor.u32 %v8746_v31, %v8744_v38  ;;  %v6487_v38 = vld [vmem:[#allocation8 + $0x1e0] sm:$0xf0]  ;;  %v1919_v31 = vunpack.c.l.bf16 %v8782_v57  ;;  %3710 = vmatpush.bf16.msrb.mxu1 %v7062_v42  ;;  %v7718_v57 = vpop.eup %7717 }
 0x306   :  { %v8759_v30 = vld [vmem:[#allocation8 + $0x21c] sm:$0xf0]  ;;  %v6490_v27 = vor.u32 %v7419_v60, %v6487_v38  ;;  %v7603_v42 = vld [vmem:[#allocation8 + $0x784] sm:$0xf]  ;;  %v1943_v28 = vpack.c.bf16 %v7718_v57, %v7716_v58 }
 0x307   :  { %v8761_v13 = vld [vmem:[#allocation8 + $0x400] sm:$0xf]  ;;  %v6518_v1 = vor.u32 %v8759_v30, %v8757_v52  ;;  %v1965_v52 = vunpack.c.l.bf16 %v1950_v39  ;;  %v1966_v30 = vunpack.c.h.bf16 %v1950_v39  ;;  %3654 = vmatpush.bf16.msra.mxu2 %v6262_v56  ;;  %7723 = vtanh.f32 %v1919_v31  ;;  %v7223_v56 = vld [vmem:[#allocation8 + $0x7a0] sm:$0xf0] }
 0x308   :  { %v8764_v54 = vld [vmem:[#allocation8 + $0x41c] sm:$0xf0]  ;;  %v7226_v38 = vor.u32 %v7603_v42, %v7223_v56  ;;  %7725 = vtanh.f32 %v1920_v51  ;;  %v1951_v21 = vunpack.c.l.bf16 %v1943_v28  ;;  %v1952_v32 = vunpack.c.h.bf16 %v1943_v28  ;;  %v6935_v41 = vld [vmem:[#allocation8 + $0x560] sm:$0xf0] }
 0x309   :  { %v8778_v23 = vld [vmem:[#allocation8 + $0x600] sm:$0xf]  ;;  %v6774_v15 = vor.u32 %v8764_v54, %v8761_v13  ;;  %v1977_v13 = vadd.f32 1.0, %v1961_v26  ;;  %v6746_v54 = vor.u32 %v7483_v55, %v6743_v44  ;;  %v1981_v11 = vadd.f32 1.0, %v1965_v52  ;;  %3673 = vmatpush.bf16.msra.mxu3 %v6518_v1  ;;  %v7720_v26 = vpop.eup %7719  ;;  %v7403_v55 = vld [vmem:[#allocation8 + $0x144] sm:$0xf] }
 0x30a   :  { %v8780_v3 = vld [vmem:[#allocation8 + $0x61c] sm:$0xf0]  ;;  %v1982_v0 = vadd.f32 1.0, %v1966_v30  ;;  %v6423_v52 = vld [vmem:[#allocation8 + $0x160] sm:$0xf0]  ;;  %7727 = vtanh.f32 %v1923_v29 }
 0x30b   :  { %v7030_v25 = vor.u32 %v8780_v3, %v8778_v23  ;;  %v1988_v62 = vpack.c.bf16 %v1978_v22, %v1977_v13  ;;  %3723 = vmatpush.bf16.msrb.mxu2 %v6490_v27  ;;  %v6711_v23 = vld [vmem:[#allocation8 + $0x3a0] sm:$0xf0]  ;;  %3692 = vmatpush.bf16.msrb.mxu0 %v6774_v15  ;;  %v7722_v27 = vpop.eup %7721  ;;  %v6426_v15 = vor.u32 %v7403_v55, %v6423_v52  ;;  %7729 = vtanh.f32 %v1924_v37 }
 0x30c   :  { %v7539_v3 = vld [vmem:[#allocation8 + $0x584] sm:$0xf]  ;;  %v1990_v36 = vpack.c.bf16 %v1982_v0, %v1981_v11  ;;  %v6714_v17 = vor.u32 %v7475_v61, %v6711_v23  ;;  %v1945_v4 = vpack.c.bf16 %v7722_v27, %v7720_v26  ;;  %v1967_v61 = vadd.f32 1.0, %v1951_v21 }
 0x30d   :  { %v2001_v6 = vunpack.c.l.bf16 %v1988_v62  ;;  %v2002_v39 = vunpack.c.h.bf16 %v1988_v62  ;;  %3742 = vmatpush.bf16.msrb.mxu3 %v6746_v54  ;;  %v6970_v60 = vor.u32 %v7539_v3, %v6967_v20  ;;  %v7467_v30 = vld [vmem:[#allocation8 + $0x344] sm:$0xf]  ;;  %3711 = vmatpush.bf16.msrb.mxu1 %v7030_v25  ;;  %v7724_v58 = vpop.eup %7723  ;;  %v1968_v23 = vadd.f32 1.0, %v1952_v32 }
 0x30e   :  { %v2005_v31 = vunpack.c.l.bf16 %v1990_v36  ;;  %v2006_v13 = vunpack.c.h.bf16 %v1990_v36  ;;  %v6679_v1 = vld [vmem:[#allocation8 + $0x360] sm:$0xf0]  ;;  %3693 = vmatmul.bf16.vlgmr.msrb.gmra.mxu0 %v8702_v46  ;;  %v1955_v20 = vunpack.c.l.bf16 %v1945_v4  ;;  %v7726_v42 = vpop.eup %7725  ;;  %v1956_v56 = vunpack.c.h.bf16 %v1945_v4 }
 0x30f   :  { %v2017_v22 = vmul.f32 0.5, %v2001_v6  ;;  %v2018_v44 = vmul.f32 0.5, %v2002_v39  ;;  %3761 = vmatpush.bf16.msra.mxu0 %v7002_v10  ;;  %3724 = vmatpush.bf16.msrb.mxu2 %v6458_v45  ;;  %v6682_v54 = vor.u32 %v7467_v30, %v6679_v1  ;;  %v7595_v11 = vld [vmem:[#allocation8 + $0x744] sm:$0xf]  ;;  %v1983_v26 = vpack.c.bf16 %v1968_v23, %v1967_v61 }
 0x310   :  { %v7191_v0 = vld [vmem:[#allocation8 + $0x760] sm:$0xf0]  ;;  %v2021_v62 = vmul.f32 0.5, %v2005_v31  ;;  %v2022_v51 = vmul.f32 0.5, %v2006_v13  ;;  %3712 = vmatmul.bf16.vlgmr.msrb.gmra.mxu1 %v8706_v47  ;;  %v1947_v61 = vpack.c.bf16 %v7726_v42, %v7724_v58 }
 0x311   :  { %3780 = vmatpush.bf16.msra.mxu1 %v7258_v35  ;;  %v2028_v49 = vpack.c.bf16 %v2018_v44, %v2017_v22  ;;  %v7395_v25 = vld [vmem:[#allocation8 + $0x104] sm:$0xf]  ;;  %3743 = vmatpush.bf16.msrb.mxu3 %v6714_v17  ;;  %v6938_v35 = vor.u32 %v7531_v2, %v6935_v41  ;;  %v7194_v45 = vor.u32 %v7595_v11, %v7191_v0  ;;  %v1972_v2 = vadd.f32 1.0, %v1956_v56 }
 0x312   :  { %v6391_v10 = vld [vmem:[#allocation8 + $0x120] sm:$0xf0]  ;;  %v2030_v36 = vpack.c.bf16 %v2022_v51, %v2021_v62  ;;  %v1991_v27 = vunpack.c.l.bf16 %v1983_v26  ;;  %v1992_v21 = vunpack.c.h.bf16 %v1983_v26  ;;  %v1959_v37 = vunpack.c.l.bf16 %v1947_v61 }
 0x313   :  { %v7459_v3 = vld [vmem:[#allocation8 + $0x304] sm:$0xf]  ;;  %v2041_v6 = vunpack.c.l.bf16 %v2028_v49  ;;  %v2042_v39 = vunpack.c.h.bf16 %v2028_v49  ;;  %3762 = vmatpush.bf16.msra.mxu0 %v6970_v60  ;;  %3725 = vmatpush.bf16.msrb.mxu2 %v6426_v15  ;;  %v6394_v28 = vor.u32 %v7395_v25, %v6391_v10  ;;  %v1971_v60 = vadd.f32 1.0, %v1955_v20 }
 0x314   :  { %v6647_v57 = vld [vmem:[#allocation8 + $0x320] sm:$0xf0]  ;;  %v2045_v31 = vunpack.c.l.bf16 %v2030_v36  ;;  %v2046_v17 = vunpack.c.h.bf16 %v2030_v36  ;;  %v2007_v11 = vmul.f32 0.5, %v1991_v27  ;;  %v2008_v59 = vmul.f32 0.5, %v1992_v21 }
 0x315   :  { %3781 = vmatpush.bf16.msra.mxu1 %v7226_v38  ;;  %v6650_v55 = vor.u32 %v7459_v3, %v6647_v57  ;;  %v7523_v52 = vld [vmem:[#allocation8 + $0x504] sm:$0xf]  ;;  %v2057_v13 = vmul.f32 %v2041_v6, %v1881_v33  ;;  %v2058_v22 = vmul.f32 %v2042_v39, %v1882_v9  ;;  %3744 = vmatpush.bf16.msrb.mxu3 %v6682_v54  ;;  %v1960_v26 = vunpack.c.h.bf16 %v1947_v61 }
 0x316   :  { %v6903_v30 = vld [vmem:[#allocation8 + $0x520] sm:$0xf0]  ;;  %v2061_v38 = vmul.f32 %v2045_v31, %v1885_v19  ;;  %v2062_v32 = vmul.f32 %v2046_v17, %v1886_v7  ;;  %v1985_v33 = vpack.c.bf16 %v1972_v2, %v1971_v60  ;;  %v2023_v7 = vpack.c.bf16 %v2008_v59, %v2007_v11 }
 0x317   :  { %v7587_v44 = vld [vmem:[#allocation8 + $0x704] sm:$0xf]  ;;  %v2068_v15 = vpack.c.bf16 %v2058_v22, %v2057_v13  ;;  %3763 = vmatpush.bf16.msra.mxu0 %v6938_v35  ;;  %v6906_v41 = vor.u32 %v7523_v52, %v6903_v30  ;;  %3726 = vmatpush.bf16.msrb.mxu2 %v6394_v28  ;;  %v7728_v13 = vpop.eup %7727  ;;  %v1975_v22 = vadd.f32 1.0, %v1959_v37 }
 0x318   :  { %v7159_v1 = vld [vmem:[#allocation8 + $0x720] sm:$0xf0]  ;;  %v2070_v51 = vpack.c.bf16 %v2062_v32, %v2061_v38  ;;  %v1995_v19 = vunpack.c.l.bf16 %v1985_v33  ;;  %v1996_v34 = vunpack.c.h.bf16 %v1985_v33  ;;  %v2031_v6 = vunpack.c.l.bf16 %v2023_v7  ;;  %v7730_v21 = vpop.eup %7729 }
 0x319   :  { %3782 = vmatpush.bf16.msra.mxu1 %v7194_v45  ;;  %v7162_v9 = vor.u32 %v7587_v44, %v7159_v1  ;;  %v7387_v0 = vld [vmem:[#allocation8 + $0xc4] sm:$0xf]  ;;  %v2345_v49 = vunpack.c.l.b16 %v2068_v15  ;;  %v2346_v54 = vunpack.c.h.b16 %v2068_v15  ;;  %3745 = vmatpush.bf16.msrb.mxu3 %v6650_v55  ;;  %v2032_v29 = vunpack.c.h.bf16 %v2023_v7 }
 0x31a   :  { %v6359_v62 = vld [vmem:[#allocation8 + $0xe0] sm:$0xf0]  ;;  %v2349_v25 = vunpack.c.l.b16 %v2070_v51  ;;  %v2350_v10 = vunpack.c.h.b16 %v2070_v51  ;;  %v2011_v57 = vmul.f32 0.5, %v1995_v19  ;;  %v2012_v36 = vmul.f32 0.5, %v1996_v34 }
 0x31b   :  { %v7451_v4 = vld [vmem:[#allocation8 + $0x2c4] sm:$0xf]  ;;  %3764 = vmatpush.bf16.msra.mxu0 %v6906_v41  ;;  %v6362_v23 = vor.u32 %v7387_v0, %v6359_v62  ;;  %v2047_v55 = vmul.f32 %v2031_v6, %v1871_v14  ;;  %v2048_v52 = vmul.f32 %v2032_v29, %v1872_v50  ;;  %v1976_v44 = vadd.f32 1.0, %v1960_v26 }
 0x31c   :  { %v6615_v35 = vld [vmem:[#allocation8 + $0x2e0] sm:$0xf0]  ;;  %v8814_v56 = vpack.c.b16 %v2349_v25, %v2345_v49  ;;  %v8816_v8 = vpack.c.b16 %v2350_v10, %v2346_v54  ;;  %v2025_v42 = vpack.c.bf16 %v2012_v36, %v2011_v57  ;;  %v1949_v50 = vpack.c.bf16 %v7730_v21, %v7728_v13  ;;  %v6493_v21 = vld [vmem:[#allocation8 + $0x1c8] sm:$0xf] }
 0x31d   :  { %v7515_v45 = vld [vmem:[#allocation8 + $0x4c4] sm:$0xf]  ;;  %3783 = vmatpush.bf16.msra.mxu1 %v7162_v9  ;;  %3727 = vmatpush.bf16.msrb.mxu2 %v6362_v23  ;;  %v6618_v30 = vor.u32 %v7451_v4, %v6615_v35  ;;  %v2063_v15 = vpack.c.bf16 %v2048_v52, %v2047_v55  ;;  %v1987_v11 = vpack.c.bf16 %v1976_v44, %v1975_v22 }
 0x31e   :  { %v6871_v3 = vld [vmem:[#allocation8 + $0x4e0] sm:$0xf0]  ;;  %v2035_v38 = vunpack.c.l.bf16 %v2025_v42  ;;  %v2036_v32 = vunpack.c.h.bf16 %v2025_v42  ;;  %3698 = vmatmul.bf16.gmra.mxu0 %v8814_v56  ;;  %v1963_v25 = vunpack.c.l.bf16 %v1949_v50  ;;  %v1964_v10 = vunpack.c.h.bf16 %v1949_v50  ;;  %v7005_v50 = vld [vmem:[#allocation8 + $0x5c8] sm:$0xf] }
 0x31f   :  { %v7579_v39 = vld [vmem:[#allocation8 + $0x6c4] sm:$0xf]  ;;  %v6874_v1 = vor.u32 %v7515_v45, %v6871_v3  ;;  %3746 = vmatpush.bf16.msrb.mxu3 %v6618_v30  ;;  %v2335_v54 = vunpack.c.l.b16 %v2063_v15  ;;  %v2336_v19 = vunpack.c.h.b16 %v2063_v15  ;;  %v1999_v61 = vunpack.c.l.bf16 %v1987_v11 }
 0x320   :  { %v7127_v20 = vld [vmem:[#allocation8 + $0x6e0] sm:$0xf0]  ;;  %v2051_v51 = vmul.f32 %v2035_v38, %v1875_v16  ;;  %v2052_v49 = vmul.f32 %v2036_v32, %v1876_v63  ;;  %3717 = vmatmul.bf16.gmra.mxu1 %v8816_v8  ;;  %v2000_v23 = vunpack.c.h.bf16 %v1987_v11  ;;  %v7424_v38 = vld [vmem:[#allocation8 + $0x1e4] sm:$0xf0] }
 0x321   :  { %v7379_v28 = vld [vmem:[#allocation8 + $0x84] sm:$0xf]  ;;  %v7130_v60 = vor.u32 %v7579_v39, %v7127_v20  ;;  %3765 = vmatpush.bf16.msra.mxu0 %v6874_v1  ;;  %v1979_v39 = vadd.f32 1.0, %v1963_v25  ;;  %v1980_v20 = vadd.f32 1.0, %v1964_v10  ;;  %v2015_v37 = vmul.f32 0.5, %v1999_v61 }
 0x322   :  { %v6327_v58 = vld [vmem:[#allocation8 + $0xa0] sm:$0xf0]  ;;  %v2065_v63 = vpack.c.bf16 %v2052_v49, %v2051_v51  ;;  %v2016_v26 = vmul.f32 0.5, %v2000_v23  ;;  %v6749_v32 = vld [vmem:[#allocation8 + $0x3c8] sm:$0xf] }
 0x323   :  { %v7443_v31 = vld [vmem:[#allocation8 + $0x284] sm:$0xf]  ;;  %v6330_v41 = vor.u32 %v7379_v28, %v6327_v58  ;;  %3784 = vmatpush.bf16.msra.mxu1 %v7130_v60  ;;  %v1989_v30 = vpack.c.bf16 %v1980_v20, %v1979_v39  ;;  %v7552_v11 = vld [vmem:[#allocation8 + $0x5e4] sm:$0xf0] }
 0x324   :  { %v6583_v17 = vld [vmem:[#allocation8 + $0x2a0] sm:$0xf0]  ;;  %v2339_v58 = vunpack.c.l.b16 %v2065_v63  ;;  %v2340_v42 = vunpack.c.h.b16 %v2065_v63  ;;  %v7616_v51 = vld [vmem:[#allocation8 + $0x7e4] sm:$0xf0]  ;;  %v7006_v10 = vor.u32 %v7552_v11, %v7005_v50 }
 0x325   :  { %v7507_v2 = vld [vmem:[#allocation8 + $0x484] sm:$0xf]  ;;  %v6586_v59 = vor.u32 %v7443_v31, %v6583_v17  ;;  %3728 = vmatpush.bf16.msrb.mxu2 %v6330_v41  ;;  %v2027_v31 = vpack.c.bf16 %v2016_v26, %v2015_v37  ;;  %v2003_v15 = vunpack.c.l.bf16 %v1989_v30  ;;  %v2004_v41 = vunpack.c.h.bf16 %v1989_v30  ;;  %v6461_v49 = vld [vmem:[#allocation8 + $0x188] sm:$0xf] }
 0x326   :  { %v6839_v27 = vld [vmem:[#allocation8 + $0x4a0] sm:$0xf0]  ;;  %v8841_v1 = vpack.c.b16 %v2339_v58, %v2335_v54  ;;  %v8843_v60 = vpack.c.b16 %v2340_v42, %v2336_v19  ;;  %v6717_v25 = vld [vmem:[#allocation8 + $0x388] sm:$0xf] }
 0x327   :  { %v7571_v14 = vld [vmem:[#allocation8 + $0x684] sm:$0xf]  ;;  %3747 = vmatpush.bf16.msrb.mxu3 %v6586_v59  ;;  %v6842_v45 = vor.u32 %v7507_v2, %v6839_v27  ;;  %v2019_v54 = vmul.f32 0.5, %v2003_v15  ;;  %v2020_v19 = vmul.f32 0.5, %v2004_v41  ;;  %v7480_v23 = vld [vmem:[#allocation8 + $0x3a4] sm:$0xf0] }
 0x328   :  { %v7095_v33 = vld [vmem:[#allocation8 + $0x6a0] sm:$0xf0]  ;;  %3655 = vmatmul.bf16.vlgmr.msra.gmra.mxu2 %v8841_v1  ;;  %3674 = vmatmul.bf16.vlgmr.msra.gmra.mxu3 %v8843_v60  ;;  %v7536_v58 = vld [vmem:[#allocation8 + $0x564] sm:$0xf0] }
 0x329   :  { %v6295_v9 = vld [vmem:[#allocation8 + $0x60] sm:$0xf0]  ;;  %v7098_v3 = vor.u32 %v7571_v14, %v7095_v33  ;;  %3766 = vmatpush.bf16.msra.mxu0 %v6842_v45  ;;  %v2039_v14 = vunpack.c.l.bf16 %v2027_v31  ;;  %v2040_v33 = vunpack.c.h.bf16 %v2027_v31  ;;  %v6718_v45 = vor.u32 %v7480_v23, %v6717_v25  ;;  %v7197_v30 = vld [vmem:[#allocation8 + $0x748] sm:$0xf] }
 0x32a   :  { %v7435_v0 = vld [vmem:[#allocation8 + $0x244] sm:$0xf]  ;;  %v6298_v57 = vor.u32 %v7371_v48, %v6295_v9  ;;  %v7488_v48 = vld [vmem:[#allocation8 + $0x3e4] sm:$0xf0]  ;;  %v6494_v9 = vor.u32 %v7424_v38, %v6493_v21 }
 0x32b   :  { %v6551_v62 = vld [vmem:[#allocation8 + $0x260] sm:$0xf0]  ;;  %3785 = vmatpush.bf16.msra.mxu1 %v7098_v3  ;;  %v7608_v3 = vld [vmem:[#allocation8 + $0x7a4] sm:$0xf0] }
 0x32c   :  { %v8828_v34 = vld [vmem:[#allocation8 + $0x444] sm:$0xf]  ;;  %v6554_v55 = vor.u32 %v7435_v0, %v6551_v62  ;;  %3729 = vmatpush.bf16.msrb.mxu2 %v6298_v57  ;;  %v6750_v0 = vor.u32 %v7488_v48, %v6749_v32  ;;  %v7261_v62 = vld [vmem:[#allocation8 + $0x7c8] sm:$0xf] }
 0x32d   :  { %v8830_v7 = vld [vmem:[#allocation8 + $0x460] sm:$0xf0]  ;;  %v7262_v61 = vor.u32 %v7616_v51, %v7261_v62  ;;  %v6685_v57 = vld [vmem:[#allocation8 + $0x348] sm:$0xf] }
 0x32e   :  { %v8832_v4 = vld [vmem:[#allocation8 + $0x644] sm:$0xf]  ;;  %v6810_v52 = vor.u32 %v8828_v34, %v8830_v7  ;;  %3748 = vmatpush.bf16.msrb.mxu3 %v6554_v55  ;;  %v2055_v34 = vmul.f32 %v2039_v14, %v1879_v18  ;;  %v2056_v7 = vmul.f32 %v2040_v33, %v1880_v53  ;;  %v7229_v18 = vld [vmem:[#allocation8 + $0x788] sm:$0xf] }
 0x32f   :  { %v7063_v16 = vld [vmem:[#allocation8 + $0x660] sm:$0xf0]  ;;  %v7408_v53 = vld [vmem:[#allocation8 + $0x164] sm:$0xf0]  ;;  %v7230_v37 = vor.u32 %v7608_v3, %v7229_v18 }
 0x330   :  { %v7363_v35 = vld [vmem:[#allocation8 + $0x4] sm:$0xf]  ;;  %v7066_v17 = vor.u32 %v8832_v4, %v7063_v16  ;;  %3767 = vmatpush.bf16.msra.mxu0 %v6810_v52  ;;  %v7416_v4 = vld [vmem:[#allocation8 + $0x1a4] sm:$0xf0]  ;;  %v2067_v39 = vpack.c.bf16 %v2056_v7, %v2055_v34  ;;  %v6430_v26 = vor.u32 %v7408_v53, %v6429_v24 }
 0x331   :  { %v7427_v36 = vld [vmem:[#allocation8 + $0x204] sm:$0xf]  ;;  %v6266_v13 = vor.u32 %v7363_v35, %v6263_v12  ;;  %v6973_v16 = vld [vmem:[#allocation8 + $0x588] sm:$0xf]  ;;  %v2029_v12 = vpack.c.bf16 %v2020_v19, %v2019_v54  ;;  %v6462_v63 = vor.u32 %v7416_v4, %v6461_v49 }
 0x332   :  { %v6519_v6 = vld [vmem:[#allocation8 + $0x220] sm:$0xf0]  ;;  %3786 = vmatpush.bf16.msra.mxu1 %v7066_v17  ;;  %v7544_v35 = vld [vmem:[#allocation8 + $0x5a4] sm:$0xf0]  ;;  %v2344_v21 = vunpack.c.h.b16 %v2067_v39 }
 0x333   :  { %v8834_v29 = vld [vmem:[#allocation8 + $0x404] sm:$0xf]  ;;  %v6522_v2 = vor.u32 %v7427_v36, %v6519_v6  ;;  %3730 = vmatpush.bf16.msrb.mxu2 %v6266_v13  ;;  %v7472_v36 = vld [vmem:[#allocation8 + $0x364] sm:$0xf0]  ;;  %v2043_v6 = vunpack.c.l.bf16 %v2029_v12  ;;  %v6974_v20 = vor.u32 %v7544_v35, %v6973_v16 }
 0x334   :  { %v8836_v28 = vld [vmem:[#allocation8 + $0x420] sm:$0xf0]  ;;  %v6686_v52 = vor.u32 %v7472_v36, %v6685_v57  ;;  %v7600_v31 = vld [vmem:[#allocation8 + $0x764] sm:$0xf0] }
 0x335   :  { %v7555_v22 = vld [vmem:[#allocation8 + $0x604] sm:$0xf]  ;;  %v6778_v27 = vor.u32 %v8834_v29, %v8836_v28  ;;  %3749 = vmatpush.bf16.msrb.mxu3 %v6522_v2  ;;  %v2044_v29 = vunpack.c.h.bf16 %v2029_v12  ;;  %v6941_v28 = vld [vmem:[#allocation8 + $0x548] sm:$0xf]  ;;  %v2059_v42 = vmul.f32 %v2043_v6, %v1883_v43  ;;  %v7198_v43 = vor.u32 %v7600_v31, %v7197_v30 }
 0x336   :  { %v7031_v44 = vld [vmem:[#allocation8 + $0x620] sm:$0xf0]  ;;  %v6397_v17 = vld [vmem:[#allocation8 + $0x108] sm:$0xf]  ;;  %v6942_v40 = vor.u32 %v7536_v58, %v6941_v28 }
 0x337   :  { %v7034_v59 = vor.u32 %v7555_v22, %v7031_v44  ;;  %3799 = vmatpush.bf16.msra.mxu2 %v6494_v9  ;;  %3768 = vmatpush.bf16.msra.mxu0 %v6778_v27  ;;  %v2060_v55 = vmul.f32 %v2044_v29, %v1884_v5  ;;  %v7400_v13 = vld [vmem:[#allocation8 + $0x124] sm:$0xf0]  ;;  %v2343_v27 = vunpack.c.l.b16 %v2067_v39 }
 0x338   :  { %v6653_v22 = vld [vmem:[#allocation8 + $0x308] sm:$0xf]  ;;  %v6398_v15 = vor.u32 %v7400_v13, %v6397_v17 }
 0x339   :  { %3818 = vmatpush.bf16.msra.mxu3 %v6750_v0  ;;  %3787 = vmatpush.bf16.msra.mxu1 %v7034_v59  ;;  %v7464_v44 = vld [vmem:[#allocation8 + $0x324] sm:$0xf0]  ;;  %v2069_v2 = vpack.c.bf16 %v2060_v55, %v2059_v42 }
 0x33a   :  { %3769 = vmatmul.bf16.vlgmr.msra.gmra.mxu0 %v8702_v46  ;;  %v6909_v5 = vld [vmem:[#allocation8 + $0x508] sm:$0xf]  ;;  %v6654_v41 = vor.u32 %v7464_v44, %v6653_v22 }
 0x33b   :  { %3837 = vmatpush.bf16.msrb.mxu0 %v7006_v10  ;;  %3800 = vmatpush.bf16.msra.mxu2 %v6462_v63  ;;  %v2347_v38 = vunpack.c.l.b16 %v2069_v2  ;;  %v2348_v32 = vunpack.c.h.b16 %v2069_v2  ;;  %v7528_v14 = vld [vmem:[#allocation8 + $0x524] sm:$0xf0] }
 0x33c   :  { %3788 = vmatmul.bf16.vlgmr.msra.gmra.mxu1 %v8706_v47  ;;  %v7165_v33 = vld [vmem:[#allocation8 + $0x708] sm:$0xf]  ;;  %v6910_v59 = vor.u32 %v7528_v14, %v6909_v5 }
 0x33d   :  { %3856 = vmatpush.bf16.msrb.mxu1 %v7262_v61  ;;  %3819 = vmatpush.bf16.msra.mxu3 %v6718_v45  ;;  %v7592_v48 = vld [vmem:[#allocation8 + $0x724] sm:$0xf0]  ;;  %v8859_v50 = vpack.c.b16 %v2347_v38, %v2343_v27  ;;  %v8861_v11 = vpack.c.b16 %v2348_v32, %v2344_v21  ;;  %v7420_v32 = vld [vmem:[#allocation8 + $0x1cc] sm:$0xf] }
 0x33e   :  { %v7166_v9 = vor.u32 %v7592_v48, %v7165_v33  ;;  %v6365_v0 = vld [vmem:[#allocation8 + $0xc8] sm:$0xf]  ;;  %v6751_v33 = vld [vmem:[#allocation8 + $0x3e8] sm:$0xf0] }
 0x33f   :  { %3838 = vmatpush.bf16.msrb.mxu0 %v6974_v20  ;;  %3801 = vmatpush.bf16.msra.mxu2 %v6430_v26  ;;  %v7392_v62 = vld [vmem:[#allocation8 + $0xe4] sm:$0xf0]  ;;  %v7548_v48 = vld [vmem:[#allocation8 + $0x5cc] sm:$0xf] }
 0x340   :  { %v6621_v51 = vld [vmem:[#allocation8 + $0x2c8] sm:$0xf]  ;;  %v6366_v49 = vor.u32 %v7392_v62, %v6365_v0  ;;  %3660 = vmatmul.bf16.gmra.mxu2 %v8859_v50  ;;  %3679 = vmatmul.bf16.gmra.mxu3 %v8861_v11  ;;  %v7612_v62 = vld [vmem:[#allocation8 + $0x7cc] sm:$0xf] }
 0x341   :  { %3857 = vmatpush.bf16.msrb.mxu1 %v7230_v37  ;;  %3820 = vmatpush.bf16.msra.mxu3 %v6686_v52  ;;  %v7456_v54 = vld [vmem:[#allocation8 + $0x2e4] sm:$0xf0] }
 0x342   :  { %v6877_v19 = vld [vmem:[#allocation8 + $0x4c8] sm:$0xf]  ;;  %v6622_v7 = vor.u32 %v7456_v54, %v6621_v51  ;;  %v7263_v51 = vld [vmem:[#allocation8 + $0x7e8] sm:$0xf0] }
 0x343   :  { %3839 = vmatpush.bf16.msrb.mxu0 %v6942_v40  ;;  %3802 = vmatpush.bf16.msra.mxu2 %v6398_v15  ;;  %v7520_v34 = vld [vmem:[#allocation8 + $0x4e4] sm:$0xf0]  ;;  %v6495_v15 = vld [vmem:[#allocation8 + $0x1e8] sm:$0xf0]  ;;  %v7266_v54 = vor.u32 %v7612_v62, %v7263_v51 }
 0x344   :  { %v7133_v4 = vld [vmem:[#allocation8 + $0x6c8] sm:$0xf]  ;;  %v6878_v35 = vor.u32 %v7520_v34, %v6877_v19  ;;  %v6498_v14 = vor.u32 %v7420_v32, %v6495_v15  ;;  %v6463_v19 = vld [vmem:[#allocation8 + $0x1a8] sm:$0xf0] }
 0x345   :  { %3858 = vmatpush.bf16.msrb.mxu1 %v7198_v43  ;;  %3821 = vmatpush.bf16.msra.mxu3 %v6654_v41  ;;  %v7584_v25 = vld [vmem:[#allocation8 + $0x6e4] sm:$0xf0]  ;;  %v7484_v41 = vld [vmem:[#allocation8 + $0x3cc] sm:$0xf] }
 0x346   :  { %v6333_v10 = vld [vmem:[#allocation8 + $0x88] sm:$0xf]  ;;  %v7134_v12 = vor.u32 %v7584_v25, %v7133_v4  ;;  %v7476_v34 = vld [vmem:[#allocation8 + $0x38c] sm:$0xf] }
 0x347   :  { %v7384_v61 = vld [vmem:[#allocation8 + $0xa4] sm:$0xf0]  ;;  %3840 = vmatpush.bf16.msrb.mxu0 %v6910_v59  ;;  %3803 = vmatpush.bf16.msra.mxu2 %v6366_v49  ;;  %v7007_v59 = vld [vmem:[#allocation8 + $0x5e8] sm:$0xf0] }
 0x348   :  { %v6589_v23 = vld [vmem:[#allocation8 + $0x288] sm:$0xf]  ;;  %v6334_v18 = vor.u32 %v7384_v61, %v6333_v10  ;;  %v7010_v0 = vor.u32 %v7548_v48, %v7007_v59  ;;  %v7412_v49 = vld [vmem:[#allocation8 + $0x18c] sm:$0xf] }
 0x349   :  { %v7448_v16 = vld [vmem:[#allocation8 + $0x2a4] sm:$0xf0]  ;;  %3859 = vmatpush.bf16.msrb.mxu1 %v7166_v9  ;;  %3822 = vmatpush.bf16.msra.mxu3 %v6622_v7  ;;  %v6754_v9 = vor.u32 %v7484_v41, %v6751_v33  ;;  %v6719_v7 = vld [vmem:[#allocation8 + $0x3a8] sm:$0xf0]  ;;  %v6466_v4 = vor.u32 %v7412_v49, %v6463_v19 }
 0x34a   :  { %v6845_v63 = vld [vmem:[#allocation8 + $0x488] sm:$0xf]  ;;  %v6590_v3 = vor.u32 %v7448_v16, %v6589_v23  ;;  %3774 = vmatmul.bf16.gmra.mxu0 %v8814_v56  ;;  %v7540_v25 = vld [vmem:[#allocation8 + $0x58c] sm:$0xf]  ;;  %v6722_v23 = vor.u32 %v7476_v34, %v6719_v7 }
 0x34b   :  { %v7512_v45 = vld [vmem:[#allocation8 + $0x4a4] sm:$0xf0]  ;;  %3841 = vmatpush.bf16.msrb.mxu0 %v6878_v35  ;;  %3804 = vmatpush.bf16.msra.mxu2 %v6334_v18  ;;  %v6975_v10 = vld [vmem:[#allocation8 + $0x5a8] sm:$0xf0] }
 0x34c   :  { %v7101_v24 = vld [vmem:[#allocation8 + $0x688] sm:$0xf]  ;;  %v6846_v39 = vor.u32 %v7512_v45, %v6845_v63  ;;  %3793 = vmatmul.bf16.gmra.mxu1 %v8816_v8  ;;  %v7604_v61 = vld [vmem:[#allocation8 + $0x78c] sm:$0xf]  ;;  %v6978_v16 = vor.u32 %v7540_v25, %v6975_v10 }
 0x34d   :  { %v7576_v53 = vld [vmem:[#allocation8 + $0x6a4] sm:$0xf0]  ;;  %3860 = vmatpush.bf16.msrb.mxu1 %v7134_v12  ;;  %3823 = vmatpush.bf16.msra.mxu3 %v6590_v3  ;;  %v7231_v35 = vld [vmem:[#allocation8 + $0x7a8] sm:$0xf0] }
 0x34e   :  { %v6301_v57 = vld [vmem:[#allocation8 + $0x48] sm:$0xf]  ;;  %v7102_v20 = vor.u32 %v7576_v53, %v7101_v24  ;;  %v7404_v12 = vld [vmem:[#allocation8 + $0x14c] sm:$0xf]  ;;  %v7234_v24 = vor.u32 %v7604_v61, %v7231_v35 }
 0x34f   :  { %v7376_v36 = vld [vmem:[#allocation8 + $0x64] sm:$0xf0]  ;;  %3842 = vmatpush.bf16.msrb.mxu0 %v6846_v39  ;;  %v6431_v63 = vld [vmem:[#allocation8 + $0x168] sm:$0xf0] }
 0x350   :  { %v6557_v6 = vld [vmem:[#allocation8 + $0x248] sm:$0xf]  ;;  %v6302_v28 = vor.u32 %v7376_v36, %v6301_v57  ;;  %3731 = vmatmul.bf16.vlgmr.msrb.gmra.mxu2 %v8841_v1  ;;  %3750 = vmatmul.bf16.vlgmr.msrb.gmra.mxu3 %v8843_v60  ;;  %v7468_v45 = vld [vmem:[#allocation8 + $0x34c] sm:$0xf]  ;;  %v6434_v53 = vor.u32 %v7404_v12, %v6431_v63 }
 0x351   :  { %v7440_v29 = vld [vmem:[#allocation8 + $0x264] sm:$0xf0]  ;;  %3861 = vmatpush.bf16.msrb.mxu1 %v7102_v20  ;;  %v6687_v18 = vld [vmem:[#allocation8 + $0x368] sm:$0xf0] }
 0x352   :  { %v6813_v37 = vld [vmem:[#allocation8 + $0x448] sm:$0xf]  ;;  %v6558_v58 = vor.u32 %v7440_v29, %v6557_v6  ;;  %3805 = vmatpush.bf16.msra.mxu2 %v6302_v28  ;;  %v7532_v3 = vld [vmem:[#allocation8 + $0x54c] sm:$0xf]  ;;  %v6690_v20 = vor.u32 %v7468_v45, %v6687_v18 }
 0x353   :  { %v7504_v26 = vld [vmem:[#allocation8 + $0x464] sm:$0xf0]  ;;  %v6943_v57 = vld [vmem:[#allocation8 + $0x568] sm:$0xf0] }
 0x354   :  { %v7069_v42 = vld [vmem:[#allocation8 + $0x648] sm:$0xf]  ;;  %v6814_v13 = vor.u32 %v7504_v26, %v6813_v37  ;;  %3824 = vmatpush.bf16.msra.mxu3 %v6558_v58  ;;  %v7596_v36 = vld [vmem:[#allocation8 + $0x74c] sm:$0xf]  ;;  %v6946_v37 = vor.u32 %v7532_v3, %v6943_v57 }
 0x355   :  { %v7568_v55 = vld [vmem:[#allocation8 + $0x664] sm:$0xf0]  ;;  %v7199_v6 = vld [vmem:[#allocation8 + $0x768] sm:$0xf0] }
 0x356   :  { %v6269_v52 = vld [vmem:[#allocation8 + $0x8] sm:$0xf]  ;;  %v7070_v22 = vor.u32 %v7568_v55, %v7069_v42  ;;  %3843 = vmatpush.bf16.msrb.mxu0 %v6814_v13  ;;  %v7396_v29 = vld [vmem:[#allocation8 + $0x10c] sm:$0xf]  ;;  %v7202_v55 = vor.u32 %v7596_v36, %v7199_v6 }
 0x357   :  { %v7368_v30 = vld [vmem:[#allocation8 + $0x24] sm:$0xf0]  ;;  %v6399_v39 = vld [vmem:[#allocation8 + $0x128] sm:$0xf0] }
 0x358   :  { %v6525_v31 = vld [vmem:[#allocation8 + $0x208] sm:$0xf]  ;;  %v6270_v2 = vor.u32 %v7368_v30, %v6269_v52  ;;  %3862 = vmatpush.bf16.msrb.mxu1 %v7070_v22  ;;  %v7460_v26 = vld [vmem:[#allocation8 + $0x30c] sm:$0xf]  ;;  %v6402_v52 = vor.u32 %v7396_v29, %v6399_v39 }
 0x359   :  { %v7432_v17 = vld [vmem:[#allocation8 + $0x224] sm:$0xf0]  ;;  %v6655_v28 = vld [vmem:[#allocation8 + $0x328] sm:$0xf0] }
 0x35a   :  { %v6781_v44 = vld [vmem:[#allocation8 + $0x408] sm:$0xf]  ;;  %v6526_v27 = vor.u32 %v7432_v17, %v6525_v31  ;;  %3806 = vmatpush.bf16.msra.mxu2 %v6270_v2  ;;  %v7524_v58 = vld [vmem:[#allocation8 + $0x50c] sm:$0xf]  ;;  %v6658_v17 = vor.u32 %v7460_v26, %v6655_v28 }
 0x35b   :  { %v7496_v21 = vld [vmem:[#allocation8 + $0x424] sm:$0xf0]  ;;  %v6911_v42 = vld [vmem:[#allocation8 + $0x528] sm:$0xf0] }
 0x35c   :  { %v7037_v40 = vld [vmem:[#allocation8 + $0x608] sm:$0xf]  ;;  %v6782_v5 = vor.u32 %v7496_v21, %v6781_v44  ;;  %3825 = vmatpush.bf16.msra.mxu3 %v6526_v27  ;;  %v7588_v30 = vld [vmem:[#allocation8 + $0x70c] sm:$0xf]  ;;  %v6914_v13 = vor.u32 %v7524_v58, %v6911_v42  ;;  %v6501_v42 = vld [vmem:[#allocation8 + $0x1d0] sm:$0xf] }
 0x35d   :  { %v7560_v43 = vld [vmem:[#allocation8 + $0x624] sm:$0xf0]  ;;  %v7167_v31 = vld [vmem:[#allocation8 + $0x728] sm:$0xf0] }
 0x35e   :  { %v7038_v38 = vor.u32 %v7560_v43, %v7037_v40  ;;  %3875 = vmatpush.bf16.msrb.mxu2 %v6498_v14  ;;  %3844 = vmatpush.bf16.msrb.mxu0 %v6782_v5  ;;  %v7170_v22 = vor.u32 %v7588_v30, %v7167_v31  ;;  %v7388_v44 = vld [vmem:[#allocation8 + $0xcc] sm:$0xf]  ;;  %v7489_v31 = vld [vmem:[#allocation8 + $0x3ec] sm:$0xf0] }
 0x35f   :  { %v6367_v2 = vld [vmem:[#allocation8 + $0xe8] sm:$0xf0] }
 0x360   :  { %3863 = vmatpush.bf16.msrb.mxu1 %v7038_v38  ;;  %3894 = vmatpush.bf16.msrb.mxu3 %v6754_v9  ;;  %v7452_v27 = vld [vmem:[#allocation8 + $0x2cc] sm:$0xf]  ;;  %v6370_v21 = vor.u32 %v7388_v44, %v6367_v2  ;;  %v7269_v2 = vld [vmem:[#allocation8 + $0x7d0] sm:$0xf] }
 0x361   :  { %3845 = vmatmul.bf16.vlgmr.msrb.gmra.mxu0 %v8702_v46  ;;  %v6623_v40 = vld [vmem:[#allocation8 + $0x2e8] sm:$0xf0]  ;;  %3736 = vmatmul.bf16.gmra.mxu2 %v8859_v50 }
 0x362   :  { %3913 = vmatpush.bf16.msra.mxu0 %v7010_v0  ;;  %3876 = vmatpush.bf16.msrb.mxu2 %v6466_v4  ;;  %v7516_v43 = vld [vmem:[#allocation8 + $0x4cc] sm:$0xf]  ;;  %v6626_v38 = vor.u32 %v7452_v27, %v6623_v40  ;;  %v7617_v27 = vld [vmem:[#allocation8 + $0x7ec] sm:$0xf0] }
 0x363   :  { %3864 = vmatmul.bf16.vlgmr.msrb.gmra.mxu1 %v8706_v47  ;;  %v6879_v5 = vld [vmem:[#allocation8 + $0x4e8] sm:$0xf0]  ;;  %3755 = vmatmul.bf16.gmra.mxu3 %v8861_v11  ;;  %v7270_v40 = vor.u32 %v7617_v27, %v7269_v2  ;;  %v6853_v27 = vld [vmem:[#allocation8 + $0x490] sm:$0xf] }
 0x364   :  { %3932 = vmatpush.bf16.msra.mxu1 %v7266_v54  ;;  %3895 = vmatpush.bf16.msrb.mxu3 %v6722_v23  ;;  %v6882_v32 = vor.u32 %v7516_v43, %v6879_v5  ;;  %v7580_v15 = vld [vmem:[#allocation8 + $0x6cc] sm:$0xf]  ;;  %v7417_v43 = vld [vmem:[#allocation8 + $0x1ac] sm:$0xf0] }
 0x365   :  { %v7135_v41 = vld [vmem:[#allocation8 + $0x6e8] sm:$0xf0]  ;;  %v6725_v5 = vld [vmem:[#allocation8 + $0x390] sm:$0xf] }
 0x366   :  { %3914 = vmatpush.bf16.msra.mxu0 %v6978_v16  ;;  %3877 = vmatpush.bf16.msrb.mxu2 %v6434_v53  ;;  %v7380_v14 = vld [vmem:[#allocation8 + $0x8c] sm:$0xf]  ;;  %v7138_v33 = vor.u32 %v7580_v15, %v7135_v41  ;;  %v6981_v41 = vld [vmem:[#allocation8 + $0x590] sm:$0xf] }
 0x367   :  { %v6335_v48 = vld [vmem:[#allocation8 + $0xa8] sm:$0xf0] }
 0x368   :  { %3933 = vmatpush.bf16.msra.mxu1 %v7234_v24  ;;  %3896 = vmatpush.bf16.msrb.mxu3 %v6690_v20  ;;  %v7444_v59 = vld [vmem:[#allocation8 + $0x28c] sm:$0xf]  ;;  %v6338_v0 = vor.u32 %v7380_v14, %v6335_v48  ;;  %v7545_v14 = vld [vmem:[#allocation8 + $0x5ac] sm:$0xf0] }
 0x369   :  { %v6591_v9 = vld [vmem:[#allocation8 + $0x2a8] sm:$0xf0]  ;;  %v6982_v48 = vor.u32 %v7545_v14, %v6981_v41  ;;  %v6565_v41 = vld [vmem:[#allocation8 + $0x250] sm:$0xf] }
 0x36a   :  { %3915 = vmatpush.bf16.msra.mxu0 %v6946_v37  ;;  %3878 = vmatpush.bf16.msrb.mxu2 %v6402_v52  ;;  %v7508_v62 = vld [vmem:[#allocation8 + $0x48c] sm:$0xf]  ;;  %v6594_v54 = vor.u32 %v7444_v59, %v6591_v9  ;;  %v6757_v52 = vld [vmem:[#allocation8 + $0x3d0] sm:$0xf] }
 0x36b   :  { %v6847_v51 = vld [vmem:[#allocation8 + $0x4a8] sm:$0xf0]  ;;  %v7609_v59 = vld [vmem:[#allocation8 + $0x7ac] sm:$0xf0] }
 0x36c   :  { %3934 = vmatpush.bf16.msra.mxu1 %v7202_v55  ;;  %3897 = vmatpush.bf16.msrb.mxu3 %v6658_v17  ;;  %v7572_v49 = vld [vmem:[#allocation8 + $0x68c] sm:$0xf]  ;;  %v6850_v19 = vor.u32 %v7508_v62, %v6847_v51  ;;  %v7425_v55 = vld [vmem:[#allocation8 + $0x1ec] sm:$0xf0] }
 0x36d   :  { %v7103_v34 = vld [vmem:[#allocation8 + $0x6a8] sm:$0xf0]  ;;  %v6502_v30 = vor.u32 %v7425_v55, %v6501_v42  ;;  %v7013_v17 = vld [vmem:[#allocation8 + $0x5d0] sm:$0xf] }
 0x36e   :  { %3916 = vmatpush.bf16.msra.mxu0 %v6914_v13  ;;  %3879 = vmatpush.bf16.msrb.mxu2 %v6370_v21  ;;  %v7372_v7 = vld [vmem:[#allocation8 + $0x4c] sm:$0xf]  ;;  %v7106_v23 = vor.u32 %v7572_v49, %v7103_v34  ;;  %v7553_v13 = vld [vmem:[#allocation8 + $0x5ec] sm:$0xf0] }
 0x36f   :  { %v6303_v4 = vld [vmem:[#allocation8 + $0x68] sm:$0xf0]  ;;  %v7014_v44 = vor.u32 %v7553_v13, %v7013_v17  ;;  %v6469_v21 = vld [vmem:[#allocation8 + $0x190] sm:$0xf] }
 0x370   :  { %3935 = vmatpush.bf16.msra.mxu1 %v7170_v22  ;;  %3898 = vmatpush.bf16.msrb.mxu3 %v6626_v38  ;;  %v7436_v25 = vld [vmem:[#allocation8 + $0x24c] sm:$0xf]  ;;  %v6306_v16 = vor.u32 %v7372_v7, %v6303_v4  ;;  %v6758_v22 = vor.u32 %v7489_v31, %v6757_v52  ;;  %v7481_v38 = vld [vmem:[#allocation8 + $0x3ac] sm:$0xf0] }
 0x371   :  { %v6559_v10 = vld [vmem:[#allocation8 + $0x268] sm:$0xf0]  ;;  %3850 = vmatmul.bf16.gmra.mxu0 %v8814_v56  ;;  %3807 = vmatmul.bf16.vlgmr.msra.gmra.mxu2 %v8841_v1  ;;  %v6726_v15 = vor.u32 %v7481_v38, %v6725_v5  ;;  %v6437_v9 = vld [vmem:[#allocation8 + $0x150] sm:$0xf] }
 0x372   :  { %3917 = vmatpush.bf16.msra.mxu0 %v6882_v32  ;;  %v7500_v61 = vld [vmem:[#allocation8 + $0x44c] sm:$0xf]  ;;  %3880 = vmatpush.bf16.msrb.mxu2 %v6338_v0  ;;  %v6562_v3 = vor.u32 %v7436_v25, %v6559_v10  ;;  %v6470_v32 = vor.u32 %v7417_v43, %v6469_v21  ;;  %v7409_v0 = vld [vmem:[#allocation8 + $0x16c] sm:$0xf0] }
 0x373   :  { %v6815_v35 = vld [vmem:[#allocation8 + $0x468] sm:$0xf0]  ;;  %3869 = vmatmul.bf16.gmra.mxu1 %v8816_v8  ;;  %3826 = vmatmul.bf16.vlgmr.msra.gmra.mxu3 %v8843_v60  ;;  %v6693_v51 = vld [vmem:[#allocation8 + $0x350] sm:$0xf] }
 0x374   :  { %3936 = vmatpush.bf16.msra.mxu1 %v7138_v33  ;;  %v7564_v12 = vld [vmem:[#allocation8 + $0x64c] sm:$0xf]  ;;  %3899 = vmatpush.bf16.msrb.mxu3 %v6594_v54  ;;  %v6818_v24 = vor.u32 %v7500_v61, %v6815_v35  ;;  %v7237_v33 = vld [vmem:[#allocation8 + $0x790] sm:$0xf] }
 0x375   :  { %v7071_v63 = vld [vmem:[#allocation8 + $0x668] sm:$0xf0]  ;;  %v7238_v62 = vor.u32 %v7609_v59, %v7237_v33  ;;  %v7473_v49 = vld [vmem:[#allocation8 + $0x36c] sm:$0xf0] }
 0x376   :  { %v7364_v45 = vld [vmem:[#allocation8 + $0xc] sm:$0xf]  ;;  %3918 = vmatpush.bf16.msra.mxu0 %v6850_v19  ;;  %3881 = vmatpush.bf16.msrb.mxu2 %v6306_v16  ;;  %v7074_v29 = vor.u32 %v7564_v12, %v7071_v63  ;;  %v6949_v54 = vld [vmem:[#allocation8 + $0x550] sm:$0xf]  ;;  %v6438_v19 = vor.u32 %v7409_v0, %v6437_v9  ;;  %v6694_v25 = vor.u32 %v7473_v49, %v6693_v51 }
 0x377   :  { %v6271_v18 = vld [vmem:[#allocation8 + $0x28] sm:$0xf0]  ;;  %v7537_v34 = vld [vmem:[#allocation8 + $0x56c] sm:$0xf0] }
 0x378   :  { %v7428_v53 = vld [vmem:[#allocation8 + $0x20c] sm:$0xf]  ;;  %3937 = vmatpush.bf16.msra.mxu1 %v7106_v23  ;;  %v6274_v39 = vor.u32 %v7364_v45, %v6271_v18  ;;  %3900 = vmatpush.bf16.msrb.mxu3 %v6562_v3  ;;  %v7205_v7 = vld [vmem:[#allocation8 + $0x750] sm:$0xf]  ;;  %v6950_v10 = vor.u32 %v7537_v34, %v6949_v54 }
 0x379   :  { %v6527_v57 = vld [vmem:[#allocation8 + $0x228] sm:$0xf0]  ;;  %v7601_v4 = vld [vmem:[#allocation8 + $0x76c] sm:$0xf0] }
 0x37a   :  { %v7492_v36 = vld [vmem:[#allocation8 + $0x40c] sm:$0xf]  ;;  %3919 = vmatpush.bf16.msra.mxu0 %v6818_v24  ;;  %v6530_v26 = vor.u32 %v7428_v53, %v6527_v57  ;;  %3882 = vmatpush.bf16.msrb.mxu2 %v6274_v39  ;;  %v6405_v61 = vld [vmem:[#allocation8 + $0x110] sm:$0xf]  ;;  %v7206_v35 = vor.u32 %v7601_v4, %v7205_v7 }
 0x37b   :  { %v6783_v6 = vld [vmem:[#allocation8 + $0x428] sm:$0xf0]  ;;  %v7401_v23 = vld [vmem:[#allocation8 + $0x12c] sm:$0xf0] }
 0x37c   :  { %v7556_v20 = vld [vmem:[#allocation8 + $0x60c] sm:$0xf]  ;;  %v6786_v28 = vor.u32 %v7492_v36, %v6783_v6  ;;  %3938 = vmatpush.bf16.msra.mxu1 %v7074_v29  ;;  %3901 = vmatpush.bf16.msrb.mxu3 %v6530_v26  ;;  %v6661_v16 = vld [vmem:[#allocation8 + $0x310] sm:$0xf]  ;;  %v6406_v24 = vor.u32 %v7401_v23, %v6405_v61 }
 0x37d   :  { %v7039_v37 = vld [vmem:[#allocation8 + $0x628] sm:$0xf0]  ;;  %v7465_v12 = vld [vmem:[#allocation8 + $0x32c] sm:$0xf0] }
 0x37e   :  { %v7042_v58 = vor.u32 %v7556_v20, %v7039_v37  ;;  %3920 = vmatpush.bf16.msra.mxu0 %v6786_v28  ;;  %3951 = vmatpush.bf16.msra.mxu2 %v6502_v30  ;;  %v6917_v63 = vld [vmem:[#allocation8 + $0x510] sm:$0xf]  ;;  %v6662_v53 = vor.u32 %v7465_v12, %v6661_v16 }
 0x37f   :  { %v7529_v45 = vld [vmem:[#allocation8 + $0x52c] sm:$0xf0] }
 0x380   :  { %3939 = vmatpush.bf16.msra.mxu1 %v7042_v58  ;;  %3970 = vmatpush.bf16.msra.mxu3 %v6758_v22  ;;  %v7173_v18 = vld [vmem:[#allocation8 + $0x710] sm:$0xf]  ;;  %v6918_v57 = vor.u32 %v7529_v45, %v6917_v63  ;;  %v7421_v63 = vld [vmem:[#allocation8 + $0x1d4] sm:$0xf] }
 0x381   :  { %3921 = vmatmul.bf16.vlgmr.msra.gmra.mxu0 %v8702_v46  ;;  %v7593_v3 = vld [vmem:[#allocation8 + $0x72c] sm:$0xf0]  ;;  %3812 = vmatmul.bf16.gmra.mxu2 %v8859_v50  ;;  %v6503_v45 = vld [vmem:[#allocation8 + $0x1f0] sm:$0xf0] }
 0x382   :  { %3989 = vmatpush.bf16.msrb.mxu0 %v7014_v44  ;;  %3952 = vmatpush.bf16.msra.mxu2 %v6470_v32  ;;  %v7174_v36 = vor.u32 %v7593_v3, %v7173_v18  ;;  %v6373_v6 = vld [vmem:[#allocation8 + $0xd0] sm:$0xf]  ;;  %v7485_v18 = vld [vmem:[#allocation8 + $0x3d4] sm:$0xf]  ;;  %v6506_v3 = vor.u32 %v7421_v63, %v6503_v45 }
 0x383   :  { %3940 = vmatmul.bf16.vlgmr.msra.gmra.mxu1 %v8706_v47  ;;  %v7393_v29 = vld [vmem:[#allocation8 + $0xec] sm:$0xf0]  ;;  %3831 = vmatmul.bf16.gmra.mxu3 %v8861_v11  ;;  %v6631_v63 = vld [vmem:[#allocation8 + $0x2f0] sm:$0xf0] }
 0x384   :  { %4008 = vmatpush.bf16.msrb.mxu1 %v7270_v40  ;;  %3971 = vmatpush.bf16.msra.mxu3 %v6726_v15  ;;  %v6629_v39 = vld [vmem:[#allocation8 + $0x2d0] sm:$0xf]  ;;  %v6374_v20 = vor.u32 %v7393_v29, %v6373_v6  ;;  %v7613_v29 = vld [vmem:[#allocation8 + $0x7d4] sm:$0xf] }
 0x385   :  { %v7457_v37 = vld [vmem:[#allocation8 + $0x2ec] sm:$0xf0]  ;;  %v7517_v45 = vld [vmem:[#allocation8 + $0x4d4] sm:$0xf] }
 0x386   :  { %3990 = vmatpush.bf16.msrb.mxu0 %v6982_v48  ;;  %3953 = vmatpush.bf16.msra.mxu2 %v6438_v19  ;;  %v6885_v26 = vld [vmem:[#allocation8 + $0x4d0] sm:$0xf]  ;;  %v6630_v58 = vor.u32 %v7457_v37, %v6629_v39  ;;  %v7271_v39 = vld [vmem:[#allocation8 + $0x7f0] sm:$0xf0] }
 0x387   :  { %v7521_v28 = vld [vmem:[#allocation8 + $0x4ec] sm:$0xf0]  ;;  %v7413_v37 = vld [vmem:[#allocation8 + $0x194] sm:$0xf] }
 0x388   :  { %4009 = vmatpush.bf16.msrb.mxu1 %v7238_v62  ;;  %3972 = vmatpush.bf16.msra.mxu3 %v6694_v25  ;;  %v6886_v42 = vor.u32 %v7521_v28, %v6885_v26  ;;  %v7141_v55 = vld [vmem:[#allocation8 + $0x6d0] sm:$0xf]  ;;  %v6471_v26 = vld [vmem:[#allocation8 + $0x1b0] sm:$0xf0] }
 0x389   :  { %v7585_v52 = vld [vmem:[#allocation8 + $0x6ec] sm:$0xf0]  ;;  %v7477_v28 = vld [vmem:[#allocation8 + $0x394] sm:$0xf] }
 0x38a   :  { %3991 = vmatpush.bf16.msrb.mxu0 %v6950_v10  ;;  %3954 = vmatpush.bf16.msra.mxu2 %v6406_v24  ;;  %v6341_v30 = vld [vmem:[#allocation8 + $0x90] sm:$0xf]  ;;  %v7142_v31 = vor.u32 %v7585_v52, %v7141_v55  ;;  %v6759_v24 = vld [vmem:[#allocation8 + $0x3f0] sm:$0xf0] }
 0x38b   :  { %v7385_v17 = vld [vmem:[#allocation8 + $0xac] sm:$0xf0]  ;;  %v7541_v55 = vld [vmem:[#allocation8 + $0x594] sm:$0xf] }
 0x38c   :  { %4010 = vmatpush.bf16.msrb.mxu1 %v7206_v35  ;;  %3973 = vmatpush.bf16.msra.mxu3 %v6662_v53  ;;  %v6597_v13 = vld [vmem:[#allocation8 + $0x290] sm:$0xf]  ;;  %v6342_v44 = vor.u32 %v7385_v17, %v6341_v30  ;;  %v7549_v53 = vld [vmem:[#allocation8 + $0x5d4] sm:$0xf]  ;;  %v8885_v30 = vpop.f32.mrf.mxu0 }
 0x38d   :  { %v7449_v22 = vld [vmem:[#allocation8 + $0x2ac] sm:$0xf0]  ;;  %v6983_v52 = vld [vmem:[#allocation8 + $0x5b0] sm:$0xf0] }
 0x38e   :  { %3992 = vmatpush.bf16.msrb.mxu0 %v6918_v57  ;;  %3955 = vmatpush.bf16.msra.mxu2 %v6374_v20  ;;  %v6598_v2 = vor.u32 %v7449_v22, %v6597_v13  ;;  %v7513_v21 = vld [vmem:[#allocation8 + $0x4ac] sm:$0xf0]  ;;  %v7015_v57 = vld [vmem:[#allocation8 + $0x5f0] sm:$0xf0]  ;;  %v7274_v20 = vor.u32 %v7613_v29, %v7271_v39  ;;  %v6986_v17 = vor.u32 %v7541_v55, %v6983_v52 }
 0x38f   :  { %v7109_v40 = vld [vmem:[#allocation8 + $0x690] sm:$0xf]  ;;  %v6854_v43 = vor.u32 %v7513_v21, %v6853_v27  ;;  %v7018_v6 = vor.u32 %v7549_v53, %v7015_v57  ;;  %v7605_v13 = vld [vmem:[#allocation8 + $0x794] sm:$0xf] }
 0x390   :  { %4011 = vmatpush.bf16.msrb.mxu1 %v7174_v36  ;;  %3974 = vmatpush.bf16.msra.mxu3 %v6630_v58  ;;  %v7577_v5 = vld [vmem:[#allocation8 + $0x6ac] sm:$0xf0]  ;;  %v6762_v36 = vor.u32 %v7485_v18, %v6759_v24  ;;  %v6474_v58 = vor.u32 %v7413_v37, %v6471_v26  ;;  %v7239_v22 = vld [vmem:[#allocation8 + $0x7b0] sm:$0xf0] }
 0x391   :  { %v6309_v38 = vld [vmem:[#allocation8 + $0x50] sm:$0xf]  ;;  %v7110_v15 = vor.u32 %v7577_v5, %v7109_v40  ;;  %3926 = vmatmul.bf16.gmra.mxu0 %v8814_v56  ;;  %3883 = vmatmul.bf16.vlgmr.msrb.gmra.mxu2 %v8841_v1  ;;  %v7405_v27 = vld [vmem:[#allocation8 + $0x154] sm:$0xf] }
 0x392   :  { %3993 = vmatpush.bf16.msrb.mxu0 %v6886_v42  ;;  %v7377_v32 = vld [vmem:[#allocation8 + $0x6c] sm:$0xf0]  ;;  %3956 = vmatpush.bf16.msra.mxu2 %v6342_v44  ;;  %v6727_v42 = vld [vmem:[#allocation8 + $0x3b0] sm:$0xf0]  ;;  %v8887_v44 = vpop.f32.mrf.mxu1 }
 0x393   :  { %v7441_v14 = vld [vmem:[#allocation8 + $0x26c] sm:$0xf0]  ;;  %v6310_v48 = vor.u32 %v7377_v32, %v6309_v38  ;;  %3945 = vmatmul.bf16.gmra.mxu1 %v8816_v8  ;;  %3902 = vmatmul.bf16.vlgmr.msrb.gmra.mxu3 %v8843_v60  ;;  %v6439_v21 = vld [vmem:[#allocation8 + $0x170] sm:$0xf0] }
 0x394   :  { %4012 = vmatpush.bf16.msrb.mxu1 %v7142_v31  ;;  %v6821_v33 = vld [vmem:[#allocation8 + $0x450] sm:$0xf]  ;;  %3975 = vmatpush.bf16.msra.mxu3 %v6598_v2  ;;  %v6566_v62 = vor.u32 %v7441_v14, %v6565_v41  ;;  %v6730_v31 = vor.u32 %v7477_v28, %v6727_v42  ;;  %v7242_v2 = vor.u32 %v7605_v13, %v7239_v22  ;;  %v7469_v40 = vld [vmem:[#allocation8 + $0x354] sm:$0xf] }
 0x395   :  { %v7505_v59 = vld [vmem:[#allocation8 + $0x46c] sm:$0xf0]  ;;  %v6695_v5 = vld [vmem:[#allocation8 + $0x370] sm:$0xf0] }
 0x396   :  { %v7077_v9 = vld [vmem:[#allocation8 + $0x650] sm:$0xf]  ;;  %3994 = vmatpush.bf16.msrb.mxu0 %v6854_v43  ;;  %v6822_v51 = vor.u32 %v7505_v59, %v6821_v33  ;;  %3957 = vmatpush.bf16.msra.mxu2 %v6310_v48  ;;  %v6442_v43 = vor.u32 %v7405_v27, %v6439_v21  ;;  %v7533_v38 = vld [vmem:[#allocation8 + $0x554] sm:$0xf] }
 0x397   :  { %v7569_v0 = vld [vmem:[#allocation8 + $0x66c] sm:$0xf0]  ;;  %v6951_v32 = vld [vmem:[#allocation8 + $0x570] sm:$0xf0] }
 0x398   :  { %v6277_v49 = vld [vmem:[#allocation8 + $0x10] sm:$0xf]  ;;  %4013 = vmatpush.bf16.msrb.mxu1 %v7110_v15  ;;  %v7078_v34 = vor.u32 %v7569_v0, %v7077_v9  ;;  %3976 = vmatpush.bf16.msra.mxu3 %v6566_v62  ;;  %v6698_v15 = vor.u32 %v7469_v40, %v6695_v5  ;;  %v6954_v41 = vor.u32 %v7533_v38, %v6951_v32  ;;  %v7597_v14 = vld [vmem:[#allocation8 + $0x754] sm:$0xf] }
 0x399   :  { %v7369_v54 = vld [vmem:[#allocation8 + $0x2c] sm:$0xf0]  ;;  %v7207_v33 = vld [vmem:[#allocation8 + $0x770] sm:$0xf0] }
 0x39a   :  { %v6533_v19 = vld [vmem:[#allocation8 + $0x210] sm:$0xf]  ;;  %v6278_v23 = vor.u32 %v7369_v54, %v6277_v49  ;;  %3995 = vmatpush.bf16.msrb.mxu0 %v6822_v51  ;;  %v7210_v48 = vor.u32 %v7597_v14, %v7207_v33  ;;  %v7397_v59 = vld [vmem:[#allocation8 + $0x114] sm:$0xf] }
 0x39b   :  { %v7433_v7 = vld [vmem:[#allocation8 + $0x22c] sm:$0xf0]  ;;  %v6407_v9 = vld [vmem:[#allocation8 + $0x130] sm:$0xf0] }
 0x39c   :  { %v6789_v4 = vld [vmem:[#allocation8 + $0x410] sm:$0xf]  ;;  %v6534_v16 = vor.u32 %v7433_v7, %v6533_v19  ;;  %4014 = vmatpush.bf16.msrb.mxu1 %v7078_v34  ;;  %3958 = vmatpush.bf16.msra.mxu2 %v6278_v23  ;;  %v7461_v0 = vld [vmem:[#allocation8 + $0x314] sm:$0xf]  ;;  %v6410_v62 = vor.u32 %v7397_v59, %v6407_v9  ;;  %v8891_v19 = vpop.f32.mrf.mxu0 }
 0x39d   :  { %v7497_v25 = vld [vmem:[#allocation8 + $0x42c] sm:$0xf0]  ;;  %v6663_v51 = vld [vmem:[#allocation8 + $0x330] sm:$0xf0] }
 0x39e   :  { %v7045_v10 = vld [vmem:[#allocation8 + $0x610] sm:$0xf]  ;;  %v6790_v35 = vor.u32 %v7497_v25, %v6789_v4  ;;  %3977 = vmatpush.bf16.msra.mxu3 %v6534_v16  ;;  %v7525_v49 = vld [vmem:[#allocation8 + $0x514] sm:$0xf]  ;;  %v6666_v34 = vor.u32 %v7461_v0, %v6663_v51 }
 0x39f   :  { %v7561_v61 = vld [vmem:[#allocation8 + $0x62c] sm:$0xf0]  ;;  %v6919_v54 = vld [vmem:[#allocation8 + $0x530] sm:$0xf0] }
 0x3a0   :  { %v7046_v12 = vor.u32 %v7561_v61, %v7045_v10  ;;  %3996 = vmatpush.bf16.msrb.mxu0 %v6790_v35  ;;  %4027 = vmatpush.bf16.msrb.mxu2 %v6506_v3  ;;  %v6922_v7 = vor.u32 %v7525_v49, %v6919_v54  ;;  %v7589_v4 = vld [vmem:[#allocation8 + $0x714] sm:$0xf]  ;;  %v8893_v10 = vpop.f32.mrf.mxu1 }
 0x3a1   :  { %v7175_v25 = vld [vmem:[#allocation8 + $0x730] sm:$0xf0]  ;;  %3888 = vmatmul.bf16.gmra.mxu2 %v8859_v50 }
 0x3a2   :  { %4015 = vmatpush.bf16.msrb.mxu1 %v7046_v12  ;;  %4046 = vmatpush.bf16.msrb.mxu3 %v6762_v36  ;;  %v7178_v61 = vor.u32 %v7589_v4, %v7175_v25  ;;  %v7389_v23 = vld [vmem:[#allocation8 + $0xd4] sm:$0xf] }
 0x3a3   :  { %3997 = vmatmul.bf16.vlgmr.msrb.gmra.mxu0 %v8702_v46  ;;  %v6375_v16 = vld [vmem:[#allocation8 + $0xf0] sm:$0xf0]  ;;  %3907 = vmatmul.bf16.gmra.mxu3 %v8861_v11 }
 0x3a4   :  { %4065 = vmatpush.bf16.msra.mxu0 %v7018_v6  ;;  %4028 = vmatpush.bf16.msrb.mxu2 %v6474_v58  ;;  %v7453_v35 = vld [vmem:[#allocation8 + $0x2d4] sm:$0xf]  ;;  %v6378_v12 = vor.u32 %v7389_v23, %v6375_v16  ;;  %v8897_v58 = vpop.f32.mrf.mxu0  ;;  %v6509_v23 = vld [vmem:[#allocation8 + $0x1d8] sm:$0xf] }
 0x3a5   :  { %4016 = vmatmul.bf16.vlgmr.msrb.gmra.mxu1 %v8706_v47  ;;  %v6887_v18 = vld [vmem:[#allocation8 + $0x4f0] sm:$0xf0]  ;;  %v6634_v3 = vor.u32 %v7453_v35, %v6631_v63  ;;  %v7426_v16 = vld [vmem:[#allocation8 + $0x1f4] sm:$0xf0] }
 0x3a6   :  { %4084 = vmatpush.bf16.msra.mxu1 %v7274_v20  ;;  %4047 = vmatpush.bf16.msrb.mxu3 %v6730_v31  ;;  %v6890_v24 = vor.u32 %v7517_v45, %v6887_v18  ;;  %v7581_v53 = vld [vmem:[#allocation8 + $0x6d4] sm:$0xf]  ;;  %v6765_v35 = vld [vmem:[#allocation8 + $0x3d8] sm:$0xf] }
 0x3a7   :  { %v7143_v57 = vld [vmem:[#allocation8 + $0x6f0] sm:$0xf0]  ;;  %v7490_v63 = vld [vmem:[#allocation8 + $0x3f4] sm:$0xf0] }
 0x3a8   :  { %4066 = vmatpush.bf16.msra.mxu0 %v6986_v17  ;;  %4029 = vmatpush.bf16.msrb.mxu2 %v6442_v43  ;;  %v7146_v36 = vor.u32 %v7581_v53, %v7143_v57  ;;  %v7381_v6 = vld [vmem:[#allocation8 + $0x94] sm:$0xf]  ;;  %v8899_v17 = vpop.f32.mrf.mxu1  ;;  %v7021_v45 = vld [vmem:[#allocation8 + $0x5d8] sm:$0xf] }
 0x3a9   :  { %v6343_v29 = vld [vmem:[#allocation8 + $0xb0] sm:$0xf0]  ;;  %v7554_v18 = vld [vmem:[#allocation8 + $0x5f4] sm:$0xf0] }
 0x3aa   :  { %4085 = vmatpush.bf16.msra.mxu1 %v7242_v2  ;;  %4048 = vmatpush.bf16.msrb.mxu3 %v6698_v15  ;;  %v7445_v39 = vld [vmem:[#allocation8 + $0x294] sm:$0xf]  ;;  %v6346_v20 = vor.u32 %v7381_v6, %v6343_v29  ;;  %v7277_v53 = vld [vmem:[#allocation8 + $0x7d8] sm:$0xf] }
 0x3ab   :  { %v6599_v37 = vld [vmem:[#allocation8 + $0x2b0] sm:$0xf0]  ;;  %v7618_v57 = vld [vmem:[#allocation8 + $0x7f4] sm:$0xf0]  ;;  %v3656_v6 = vpop.f32.mrf.mxu2  ;;  %v3675_v29 = vpop.f32.mrf.mxu3 }
 0x3ac   :  { %4067 = vmatpush.bf16.msra.mxu0 %v6954_v41  ;;  %4030 = vmatpush.bf16.msrb.mxu2 %v6410_v62  ;;  %v7509_v26 = vld [vmem:[#allocation8 + $0x494] sm:$0xf]  ;;  %v6602_v42 = vor.u32 %v7445_v39, %v6599_v37  ;;  %v8903_v49 = vpop.f32.mrf.mxu0  ;;  %v6477_v39 = vld [vmem:[#allocation8 + $0x198] sm:$0xf] }
 0x3ad   :  { %v6855_v28 = vld [vmem:[#allocation8 + $0x4b0] sm:$0xf0]  ;;  %v6733_v37 = vld [vmem:[#allocation8 + $0x398] sm:$0xf] }
 0x3ae   :  { %4086 = vmatpush.bf16.msra.mxu1 %v7210_v48  ;;  %4049 = vmatpush.bf16.msrb.mxu3 %v6666_v34  ;;  %v6858_v55 = vor.u32 %v7509_v26, %v6855_v28  ;;  %v7573_v52 = vld [vmem:[#allocation8 + $0x694] sm:$0xf]  ;;  %v3676_v26 = vadd.f32 %v3675_v29, %v3656_v6  ;;  %v7394_v6 = vld [vmem:[#allocation8 + $0xf4] sm:$0xf0] }
 0x3af   :  { %v7111_v31 = vld [vmem:[#allocation8 + $0x6b0] sm:$0xf0]  ;;  %v6637_v29 = vld [vmem:[#allocation8 + $0x2d8] sm:$0xf] }
 0x3b0   :  { %4068 = vmatpush.bf16.msra.mxu0 %v6922_v7  ;;  %4031 = vmatpush.bf16.msrb.mxu2 %v6378_v12  ;;  %v7114_v13 = vor.u32 %v7573_v52, %v7111_v31  ;;  %v7373_v22 = vld [vmem:[#allocation8 + $0x54] sm:$0xf]  ;;  %v8905_v25 = vpop.f32.mrf.mxu1  ;;  %v6510_v12 = vor.u32 %v7426_v16, %v6509_v23  ;;  %v7546_v52 = vld [vmem:[#allocation8 + $0x5b4] sm:$0xf0] }
 0x3b1   :  { %v6311_v2 = vld [vmem:[#allocation8 + $0x70] sm:$0xf0]  ;;  %3959 = vmatmul.bf16.vlgmr.msra.gmra.mxu2 %v8841_v1  ;;  %v7466_v23 = vld [vmem:[#allocation8 + $0x334] sm:$0xf0] }
 0x3b2   :  { %4087 = vmatpush.bf16.msra.mxu1 %v7178_v61  ;;  %4050 = vmatpush.bf16.msrb.mxu3 %v6634_v3  ;;  %v7437_v27 = vld [vmem:[#allocation8 + $0x254] sm:$0xf]  ;;  %v6314_v21 = vor.u32 %v7373_v22, %v6311_v2  ;;  %v6766_v3 = vor.u32 %v7490_v63, %v6765_v35  ;;  %v6925_v16 = vld [vmem:[#allocation8 + $0x518] sm:$0xf] }
 0x3b3   :  { %v6567_v40 = vld [vmem:[#allocation8 + $0x270] sm:$0xf0]  ;;  %4002 = vmatmul.bf16.gmra.mxu0 %v8814_v56  ;;  %3978 = vmatmul.bf16.vlgmr.msra.gmra.mxu3 %v8843_v60  ;;  %v7530_v35 = vld [vmem:[#allocation8 + $0x534] sm:$0xf0] }
 0x3b4   :  { %4069 = vmatpush.bf16.msra.mxu0 %v6890_v24  ;;  %4032 = vmatpush.bf16.msrb.mxu2 %v6346_v20  ;;  %v7501_v43 = vld [vmem:[#allocation8 + $0x454] sm:$0xf]  ;;  %v6570_v38 = vor.u32 %v7437_v27, %v6567_v40  ;;  %v7022_v24 = vor.u32 %v7554_v18, %v7021_v45  ;;  %v7418_v20 = vld [vmem:[#allocation8 + $0x1b4] sm:$0xf0]  ;;  %v3695_v40 = vadd.f32 %v8885_v30, %v3676_v26 }
 0x3b5   :  { %v6823_v5 = vld [vmem:[#allocation8 + $0x470] sm:$0xf0]  ;;  %4021 = vmatmul.bf16.gmra.mxu1 %v8816_v8  ;;  %v6478_v28 = vor.u32 %v7418_v20, %v6477_v39  ;;  %v7245_v27 = vld [vmem:[#allocation8 + $0x798] sm:$0xf]  ;;  %v6926_v18 = vor.u32 %v7530_v35, %v6925_v16 }
 0x3b6   :  { %4088 = vmatpush.bf16.msra.mxu1 %v7146_v36  ;;  %4051 = vmatpush.bf16.msrb.mxu3 %v6602_v42  ;;  %v6826_v32 = vor.u32 %v7501_v43, %v6823_v5  ;;  %v7565_v15 = vld [vmem:[#allocation8 + $0x654] sm:$0xf]  ;;  %v7278_v36 = vor.u32 %v7618_v57, %v7277_v53  ;;  %v7482_v42 = vld [vmem:[#allocation8 + $0x3b4] sm:$0xf0] }
 0x3b7   :  { %v7079_v41 = vld [vmem:[#allocation8 + $0x670] sm:$0xf0]  ;;  %v8909_v31 = vpop.f32.mrf.mxu0  ;;  %v6734_v22 = vor.u32 %v7482_v42, %v6733_v37  ;;  %v6445_v5 = vld [vmem:[#allocation8 + $0x158] sm:$0xf] }
 0x3b8   :  { %4070 = vmatpush.bf16.msra.mxu0 %v6858_v55  ;;  %4033 = vmatpush.bf16.msrb.mxu2 %v6314_v21  ;;  %v7082_v14 = vor.u32 %v7565_v15, %v7079_v41  ;;  %v7365_v33 = vld [vmem:[#allocation8 + $0x14] sm:$0xf]  ;;  %v6989_v55 = vld [vmem:[#allocation8 + $0x598] sm:$0xf]  ;;  %v8915_v15 = vadd.f32 %v8887_v44, %v3695_v40 }
 0x3b9   :  { %v6279_v48 = vld [vmem:[#allocation8 + $0x30] sm:$0xf0]  ;;  %v6990_v2 = vor.u32 %v7546_v52, %v6989_v55  ;;  %v7610_v21 = vld [vmem:[#allocation8 + $0x7b4] sm:$0xf0] }
 0x3ba   :  { %4089 = vmatpush.bf16.msra.mxu1 %v7114_v13  ;;  %4052 = vmatpush.bf16.msrb.mxu3 %v6570_v38  ;;  %v7429_v59 = vld [vmem:[#allocation8 + $0x214] sm:$0xf]  ;;  %v6282_v9 = vor.u32 %v7365_v33, %v6279_v48  ;;  %v8911_v13 = vpop.f32.mrf.mxu1  ;;  %v7246_v43 = vor.u32 %v7610_v21, %v7245_v27  ;;  %v7410_v38 = vld [vmem:[#allocation8 + $0x174] sm:$0xf0] }
 0x3bb   :  { %v6535_v0 = vld [vmem:[#allocation8 + $0x230] sm:$0xf0]  ;;  %v6446_v41 = vor.u32 %v7410_v38, %v6445_v5  ;;  %v6957_v33 = vld [vmem:[#allocation8 + $0x558] sm:$0xf] }
 0x3bc   :  { %4071 = vmatpush.bf16.msra.mxu0 %v6826_v32  ;;  %v7493_v62 = vld [vmem:[#allocation8 + $0x414] sm:$0xf]  ;;  %v6538_v54 = vor.u32 %v7429_v59, %v6535_v0  ;;  %4034 = vmatpush.bf16.msrb.mxu2 %v6282_v9  ;;  %v6701_v32 = vld [vmem:[#allocation8 + $0x358] sm:$0xf] }
 0x3bd   :  { %v6791_v51 = vld [vmem:[#allocation8 + $0x430] sm:$0xf0]  ;;  %v7538_v48 = vld [vmem:[#allocation8 + $0x574] sm:$0xf0] }
 0x3be   :  { %4090 = vmatpush.bf16.msra.mxu1 %v7082_v14  ;;  %v6794_v34 = vor.u32 %v7493_v62, %v6791_v51  ;;  %v7557_v7 = vld [vmem:[#allocation8 + $0x614] sm:$0xf]  ;;  %4053 = vmatpush.bf16.msrb.mxu3 %v6538_v54  ;;  %v7474_v14 = vld [vmem:[#allocation8 + $0x374] sm:$0xf0]  ;;  %v6958_v59 = vor.u32 %v7538_v48, %v6957_v33  ;;  %v3658_v51 = vpop.f32.mrf.mxu2  ;;  %v3677_v54 = vpop.f32.mrf.mxu3 }
 0x3bf   :  { %v7047_v4 = vld [vmem:[#allocation8 + $0x630] sm:$0xf0]  ;;  %v6702_v30 = vor.u32 %v7474_v14, %v6701_v32  ;;  %v7213_v9 = vld [vmem:[#allocation8 + $0x758] sm:$0xf] }
 0x3c0   :  { %v7050_v61 = vor.u32 %v7557_v7, %v7047_v4  ;;  %4072 = vmatpush.bf16.msra.mxu0 %v6794_v34  ;;  %4103 = vmatpush.bf16.msra.mxu2 %v6510_v12  ;;  %v7602_v0 = vld [vmem:[#allocation8 + $0x774] sm:$0xf0]  ;;  %v3678_v4 = vadd.f32 %v3677_v54, %v3658_v51  ;;  %v8919_v12 = vpop.f32.mrf.mxu0 }
 0x3c1   :  { %v7214_v62 = vor.u32 %v7602_v0, %v7213_v9  ;;  %v6413_v44 = vld [vmem:[#allocation8 + $0x118] sm:$0xf]  ;;  %3964 = vmatmul.bf16.gmra.mxu2 %v8859_v50 }
 0x3c2   :  { %4091 = vmatpush.bf16.msra.mxu1 %v7050_v61  ;;  %4122 = vmatpush.bf16.msra.mxu3 %v6766_v3  ;;  %v7402_v34 = vld [vmem:[#allocation8 + $0x134] sm:$0xf0]  ;;  %v8921_v63 = vpop.f32.mrf.mxu1  ;;  %v3697_v53 = vadd.f32 %v8891_v19, %v3678_v4 }
 0x3c3   :  { %4073 = vmatmul.bf16.vlgmr.msra.gmra.mxu0 %v8702_v46  ;;  %v6669_v7 = vld [vmem:[#allocation8 + $0x318] sm:$0xf]  ;;  %v6414_v61 = vor.u32 %v7402_v34, %v6413_v44  ;;  %3983 = vmatmul.bf16.gmra.mxu3 %v8861_v11 }
 0x3c4   :  { %4141 = vmatpush.bf16.msrb.mxu0 %v7022_v24  ;;  %4104 = vmatpush.bf16.msra.mxu2 %v6478_v28  ;;  %v6670_v45 = vor.u32 %v7466_v23, %v6669_v7  ;;  %v7181_v3 = vld [vmem:[#allocation8 + $0x718] sm:$0xf]  ;;  %v8925_v39 = vadd.f32 %v8893_v10, %v3697_v53 }
 0x3c5   :  { %4092 = vmatmul.bf16.vlgmr.msra.gmra.mxu1 %v8706_v47  ;;  %v7594_v24 = vld [vmem:[#allocation8 + $0x734] sm:$0xf0] }
 0x3c6   :  { %4160 = vmatpush.bf16.msrb.mxu1 %v7278_v36  ;;  %4123 = vmatpush.bf16.msra.mxu3 %v6734_v22  ;;  %v7182_v57 = vor.u32 %v7594_v24, %v7181_v3  ;;  %v6381_v36 = vld [vmem:[#allocation8 + $0xd8] sm:$0xf]  ;;  %v4383_v22 = vmul.f32 %v8915_v15, %v8915_v15  ;;  %v4255_v10 = vadd.f32 %v8925_v39, %v8915_v15  ;;  %v3661_v21 = vpop.f32.mrf.mxu2  ;;  %v3680_v40 = vpop.f32.mrf.mxu3 }
 0x3c7   :  { %v6382_v20 = vor.u32 %v7394_v6, %v6381_v36  ;;  %v7458_v37 = vld [vmem:[#allocation8 + $0x2f4] sm:$0xf0]  ;;  %v3681_v14 = vadd.f32 %v3680_v40, %v3661_v21 }
 0x3c8   :  { %4142 = vmatpush.bf16.msrb.mxu0 %v6990_v2  ;;  %4105 = vmatpush.bf16.msra.mxu2 %v6446_v41  ;;  %v6893_v26 = vld [vmem:[#allocation8 + $0x4d8] sm:$0xf]  ;;  %v6638_v19 = vor.u32 %v7458_v37, %v6637_v29  ;;  %v4391_v2 = vmul.f32 %v8925_v39, %v8925_v39  ;;  %v4256_v32 = vrot.slane %v4255_v10, 4 }
 0x3c9   :  { %v7522_v28 = vld [vmem:[#allocation8 + $0x4f4] sm:$0xf0]  ;;  %v3700_v7 = vadd.f32 %v8897_v58, %v3681_v14 }
 0x3ca   :  { %4161 = vmatpush.bf16.msrb.mxu1 %v7246_v43  ;;  %4124 = vmatpush.bf16.msra.mxu3 %v6702_v30  ;;  %v6894_v42 = vor.u32 %v7522_v28, %v6893_v26  ;;  %v7149_v55 = vld [vmem:[#allocation8 + $0x6d8] sm:$0xf]  ;;  %v4415_v41 = vadd.f32 %v4391_v2, %v4383_v22  ;;  %v8937_v9 = vpop.f32.mrf.mxu1  ;;  %v4257_v44 = vadd.f32 %v4256_v32, %v4255_v10 }
 0x3cb   :  { %v7586_v52 = vld [vmem:[#allocation8 + $0x6f4] sm:$0xf0]  ;;  %v8941_v3 = vadd.f32 %v8899_v17, %v3700_v7 }
 0x3cc   :  { %4143 = vmatpush.bf16.msrb.mxu0 %v6958_v59  ;;  %4106 = vmatpush.bf16.msra.mxu2 %v6414_v61  ;;  %v7150_v27 = vor.u32 %v7586_v52, %v7149_v55  ;;  %v6349_v43 = vld [vmem:[#allocation8 + $0x98] sm:$0xf]  ;;  %v8935_v59 = vpop.f32.mrf.mxu0  ;;  %v4416_v34 = vrot.slane %v4415_v41, 4 }
 0x3cd   :  { %v7386_v5 = vld [vmem:[#allocation8 + $0xb4] sm:$0xf0] }
 0x3ce   :  { %4162 = vmatpush.bf16.msrb.mxu1 %v7214_v62  ;;  %4125 = vmatpush.bf16.msra.mxu3 %v6670_v45  ;;  %v6605_v38 = vld [vmem:[#allocation8 + $0x298] sm:$0xf]  ;;  %v6350_v33 = vor.u32 %v7386_v5, %v6349_v43  ;;  %v4258_v45 = vrot.slane %v4257_v44, 2  ;;  %v3663_v28 = vpop.f32.mrf.mxu2  ;;  %v3682_v17 = vpop.f32.mrf.mxu3 }
 0x3cf   :  { %v7450_v48 = vld [vmem:[#allocation8 + $0x2b4] sm:$0xf0]  ;;  %v3683_v2 = vadd.f32 %v3682_v17, %v3663_v28  ;;  %v7478_v28 = vld [vmem:[#allocation8 + $0x39c] sm:$0xf] }
 0x3d0   :  { %4144 = vmatpush.bf16.msrb.mxu0 %v6926_v18  ;;  %4107 = vmatpush.bf16.msra.mxu2 %v6382_v20  ;;  %v6861_v30 = vld [vmem:[#allocation8 + $0x498] sm:$0xf]  ;;  %v6606_v0 = vor.u32 %v7450_v48, %v6605_v38  ;;  %v4417_v18 = vadd.f32 %v4416_v34, %v4415_v41  ;;  %v4259_v20 = vadd.f32 %v4258_v45, %v4257_v44  ;;  %v7486_v44 = vld [vmem:[#allocation8 + $0x3dc] sm:$0xf] }
 0x3d1   :  { %v7514_v62 = vld [vmem:[#allocation8 + $0x4b4] sm:$0xf0]  ;;  %4035 = vmatmul.bf16.vlgmr.msrb.gmra.mxu2 %v8841_v1  ;;  %v7023_v45 = vld [vmem:[#allocation8 + $0x5f8] sm:$0xf0] }
 0x3d2   :  { %4163 = vmatpush.bf16.msrb.mxu1 %v7182_v57  ;;  %4126 = vmatpush.bf16.msra.mxu3 %v6638_v19  ;;  %v7117_v51 = vld [vmem:[#allocation8 + $0x698] sm:$0xf]  ;;  %v6862_v4 = vor.u32 %v7514_v62, %v6861_v30  ;;  %v4418_v37 = vrot.slane %v4417_v18, 2  ;;  %v4260_v22 = vrot.slane %v4259_v20, 1  ;;  %v8947_v5 = vpop.f32.mrf.mxu1  ;;  %v3702_v30 = vadd.f32 %v8903_v49, %v3683_v2  ;;  %v7550_v49 = vld [vmem:[#allocation8 + $0x5dc] sm:$0xf] }
 0x3d3   :  { %v7578_v54 = vld [vmem:[#allocation8 + $0x6b4] sm:$0xf0]  ;;  %4078 = vmatmul.bf16.gmra.mxu0 %v8814_v56  ;;  %4054 = vmatmul.bf16.vlgmr.msrb.gmra.mxu3 %v8843_v60 }
 0x3d4   :  { %4145 = vmatpush.bf16.msrb.mxu0 %v6894_v42  ;;  %4108 = vmatpush.bf16.msra.mxu2 %v6350_v33  ;;  %v7118_v61 = vor.u32 %v7578_v54, %v7117_v51  ;;  %v6317_v23 = vld [vmem:[#allocation8 + $0x58] sm:$0xf]  ;;  %v4419_v10 = vadd.f32 %v4418_v37, %v4417_v18  ;;  %v8945_v43 = vpop.f32.mrf.mxu0  ;;  %v4261_v33 = vadd.f32 %v4260_v22, %v4259_v20  ;;  %v7422_v51 = vld [vmem:[#allocation8 + $0x1dc] sm:$0xf] }
 0x3d5   :  { %v7378_v16 = vld [vmem:[#allocation8 + $0x74] sm:$0xf0]  ;;  %4097 = vmatmul.bf16.gmra.mxu1 %v8816_v8  ;;  %v6511_v54 = vld [vmem:[#allocation8 + $0x1f8] sm:$0xf0] }
 0x3d6   :  { %4164 = vmatpush.bf16.msrb.mxu1 %v7150_v27  ;;  %4127 = vmatpush.bf16.msra.mxu3 %v6606_v0  ;;  %v6573_v35 = vld [vmem:[#allocation8 + $0x258] sm:$0xf]  ;;  %v6318_v24 = vor.u32 %v7378_v16, %v6317_v23  ;;  %v4420_v48 = vrot.slane %v4419_v10, 1  ;;  %v8950_v34 = vmul.f32 0.0625, %v4261_v33  ;;  %v6767_v23 = vld [vmem:[#allocation8 + $0x3f8] sm:$0xf0]  ;;  %v4399_v16 = vmul.f32 %v8941_v3, %v8941_v3 }
 0x3d7   :  { %v7442_v53 = vld [vmem:[#allocation8 + $0x274] sm:$0xf0]  ;;  %v7614_v18 = vld [vmem:[#allocation8 + $0x7dc] sm:$0xf] }
 0x3d8   :  { %v6829_v57 = vld [vmem:[#allocation8 + $0x458] sm:$0xf]  ;;  %4146 = vmatpush.bf16.msrb.mxu0 %v6862_v4  ;;  %v6574_v58 = vor.u32 %v7442_v53, %v6573_v35  ;;  %4109 = vmatpush.bf16.msra.mxu2 %v6318_v24  ;;  %10278 = vst [vmem:[#allocation13_spill] sm:$0xff] %v8950_v34  ;;  %v4421_v7 = vadd.f32 %v4420_v48, %v4419_v10  ;;  %v7279_v24 = vld [vmem:[#allocation8 + $0x7f8] sm:$0xf0] }
 0x3d9   :  { %v7506_v36 = vld [vmem:[#allocation8 + $0x474] sm:$0xf0]  ;;  %v8953_v4 = vadd.f32 %v8905_v25, %v3702_v30  ;;  %v6770_v35 = vor.u32 %v7486_v44, %v6767_v23  ;;  %v8963_v25 = vmul.f32 %v8950_v34, %v8950_v34  ;;  %v8971_v20 = vor.u32 %v7614_v18, %v7279_v24  ;;  %v7414_v37 = vld [vmem:[#allocation8 + $0x19c] sm:$0xf] }
 0x3da   :  { %4165 = vmatpush.bf16.msrb.mxu1 %v7118_v61  ;;  %v7085_v6 = vld [vmem:[#allocation8 + $0x658] sm:$0xf]  ;;  %v6830_v26 = vor.u32 %v7506_v36, %v6829_v57  ;;  %4128 = vmatpush.bf16.msra.mxu3 %v6574_v58  ;;  %v6514_v61 = vor.u32 %v7422_v51, %v6511_v54  ;;  %v8959_v53 = vmul.f32 0.0625, %v4421_v7  ;;  %v3732_v36 = vpop.f32.mrf.mxu2  ;;  %v7542_v22 = vld [vmem:[#allocation8 + $0x59c] sm:$0xf] }
 0x3db   :  { %v7570_v29 = vld [vmem:[#allocation8 + $0x674] sm:$0xf0]  ;;  %v4311_v57 = vadd.f32 %v8953_v4, %v8941_v3  ;;  %v4407_v58 = vmul.f32 %v8953_v4, %v8953_v4  ;;  %v7470_v51 = vld [vmem:[#allocation8 + $0x35c] sm:$0xf] }
 0x3dc   :  { %v7086_v19 = vor.u32 %v7570_v29, %v7085_v6  ;;  %v6285_v42 = vld [vmem:[#allocation8 + $0x18] sm:$0xf]  ;;  %4147 = vmatpush.bf16.msrb.mxu0 %v6830_v26  ;;  %v3751_v6 = vpop.f32.mrf.mxu3  ;;  %v8969_v29 = vor.u32 %v7550_v49, %v7023_v45  ;;  %v6479_v26 = vld [vmem:[#allocation8 + $0x1b8] sm:$0xf0]  ;;  %v4559_v17 = vsub.f32 %v8959_v53, %v8963_v25 }
 0x3dd   :  { %v7370_v55 = vld [vmem:[#allocation8 + $0x34] sm:$0xf0]  ;;  %v7534_v49 = vld [vmem:[#allocation8 + $0x55c] sm:$0xf] }
 0x3de   :  { %v6541_v52 = vld [vmem:[#allocation8 + $0x218] sm:$0xf]  ;;  %v6286_v27 = vor.u32 %v7370_v55, %v6285_v42  ;;  %4166 = vmatpush.bf16.msrb.mxu1 %v7086_v19  ;;  %v4312_v19 = vrot.slane %v4311_v57, 4  ;;  %v4471_v42 = vadd.f32 %v4407_v58, %v4399_v16  ;;  %v3752_v55 = vadd.f32 %v3751_v6, %v3732_v36  ;;  %v8975_v10 = vpop.f32.mrf.mxu0  ;;  %v6959_v16 = vld [vmem:[#allocation8 + $0x578] sm:$0xf0] }
 0x3df   :  { %v7434_v21 = vld [vmem:[#allocation8 + $0x234] sm:$0xf0]  ;;  %v7215_v24 = vld [vmem:[#allocation8 + $0x778] sm:$0xf0]  ;;  %v8997_v36 = vor.u32 %v7534_v49, %v6959_v16 }
 0x3e0   :  { %v6797_v40 = vld [vmem:[#allocation8 + $0x418] sm:$0xf]  ;;  %v6542_v38 = vor.u32 %v7434_v21, %v6541_v52  ;;  %4110 = vmatpush.bf16.msra.mxu2 %v6286_v27  ;;  %v6735_v52 = vld [vmem:[#allocation8 + $0x3b8] sm:$0xf0]  ;;  %v8977_v2 = vpop.f32.mrf.mxu1  ;;  %v6482_v27 = vor.u32 %v7414_v37, %v6479_v26  ;;  %v3771_v33 = vadd.f32 %v8909_v31, %v3752_v55 }
 0x3e1   :  { %v7498_v32 = vld [vmem:[#allocation8 + $0x434] sm:$0xf0]  ;;  %v6738_v21 = vor.u32 %v7478_v28, %v6735_v52  ;;  %v7398_v6 = vld [vmem:[#allocation8 + $0x11c] sm:$0xf]  ;;  %4040 = vmatmul.bf16.gmra.mxu2 %v8859_v50 }
 0x3e2   :  { %v7053_v41 = vld [vmem:[#allocation8 + $0x618] sm:$0xf]  ;;  %v6798_v0 = vor.u32 %v7498_v32, %v6797_v40  ;;  %4129 = vmatpush.bf16.msra.mxu3 %v6542_v38  ;;  %v6991_v40 = vld [vmem:[#allocation8 + $0x5b8] sm:$0xf0]  ;;  %v8987_v7 = vadd.f32 %v8911_v13, %v3771_v33 }
 0x3e3   :  { %v7562_v14 = vld [vmem:[#allocation8 + $0x634] sm:$0xf0]  ;;  %v7606_v38 = vld [vmem:[#allocation8 + $0x79c] sm:$0xf]  ;;  %v8982_v48 = vor.u32 %v7542_v22, %v6991_v40  ;;  %4059 = vmatmul.bf16.gmra.mxu3 %v8861_v11 }
 0x3e4   :  { %v7054_v62 = vor.u32 %v7562_v14, %v7053_v41  ;;  %4148 = vmatpush.bf16.msrb.mxu0 %v6798_v0  ;;  %4179 = vmatpush.bf16.msrb.mxu2 %v6514_v61  ;;  %v7247_v32 = vld [vmem:[#allocation8 + $0x7b8] sm:$0xf0]  ;;  %v4313_v41 = vadd.f32 %v4312_v19, %v4311_v57  ;;  %v4472_v14 = vrot.slane %v4471_v42, 4  ;;  %v8995_v13 = vpack.c.bf16 %v8987_v7, %v8915_v15  ;;  %v3734_v57 = vpop.f32.mrf.mxu2  ;;  %v3753_v58 = vpop.f32.mrf.mxu3 }
 0x3e5   :  { %v8984_v30 = vor.u32 %v7606_v38, %v7247_v32  ;;  %v7406_v0 = vld [vmem:[#allocation8 + $0x15c] sm:$0xf] }
 0x3e6   :  { %4167 = vmatpush.bf16.msrb.mxu1 %v7054_v62  ;;  %4198 = vmatpush.bf16.msrb.mxu3 %v6770_v35  ;;  %v6447_v62 = vld [vmem:[#allocation8 + $0x178] sm:$0xf0]  ;;  %v4314_v54 = vrot.slane %v4313_v41, 2  ;;  %v4473_v44 = vadd.f32 %v4472_v14, %v4471_v42  ;;  %v3754_v42 = vadd.f32 %v3753_v58, %v3734_v57 }
 0x3e7   :  { %4149 = vmatmul.bf16.vlgmr.msrb.gmra.mxu0 %v8702_v46  ;;  %v6703_v61 = vld [vmem:[#allocation8 + $0x378] sm:$0xf0]  ;;  %v6450_v31 = vor.u32 %v7406_v0, %v6447_v62 }
 0x3e8   :  { %4217 = vmatpush.bf16.msra.mxu0 %v8969_v29  ;;  %4180 = vmatpush.bf16.msrb.mxu2 %v6482_v27  ;;  %v6706_v23 = vor.u32 %v7470_v51, %v6703_v61  ;;  %v7598_v35 = vld [vmem:[#allocation8 + $0x75c] sm:$0xf]  ;;  %v4315_v45 = vadd.f32 %v4314_v54, %v4313_v41  ;;  %v4474_v18 = vrot.slane %v4473_v44, 2  ;;  %v9001_v27 = vpop.f32.mrf.mxu0  ;;  %v9003_v15 = vpop.f32.mrf.mxu1  ;;  %v3773_v0 = vadd.f32 %v8919_v12, %v3754_v42 }
 0x3e9   :  { %4168 = vmatmul.bf16.vlgmr.msrb.gmra.mxu1 %v8706_v47  ;;  %v6415_v37 = vld [vmem:[#allocation8 + $0x138] sm:$0xf0]  ;;  %v8999_v55 = vor.u32 %v7598_v35, %v7215_v24 }
 0x3ea   :  { %4236 = vmatpush.bf16.msra.mxu1 %v8971_v20  ;;  %4199 = vmatpush.bf16.msrb.mxu3 %v6738_v21  ;;  %v7462_v26 = vld [vmem:[#allocation8 + $0x31c] sm:$0xf]  ;;  %v4316_v28 = vrot.slane %v4315_v45, 1  ;;  %v4475_v19 = vadd.f32 %v4474_v18, %v4473_v44  ;;  %v6418_v21 = vor.u32 %v7398_v6, %v6415_v37  ;;  %v3792_v49 = vadd.f32 %v8921_v63, %v3773_v0 }
 0x3eb   :  { %v6671_v52 = vld [vmem:[#allocation8 + $0x338] sm:$0xf0]  ;;  %v4384_v18 = vmul.f32 %v8987_v7, %v8987_v7 }
 0x3ec   :  { %4218 = vmatpush.bf16.msra.mxu0 %v8982_v48  ;;  %4181 = vmatpush.bf16.msrb.mxu2 %v6450_v31  ;;  %v7526_v22 = vld [vmem:[#allocation8 + $0x51c] sm:$0xf]  ;;  %v6674_v40 = vor.u32 %v7462_v26, %v6671_v52  ;;  %v4317_v14 = vadd.f32 %v4316_v28, %v4315_v45  ;;  %v4476_v33 = vrot.slane %v4475_v19, 1  ;;  %v4575_v45 = vmax.f32 %v4559_v17, 0.0  ;;  %v3737_v26 = vpop.f32.mrf.mxu2  ;;  %v3756_v28 = vpop.f32.mrf.mxu3 }
 0x3ed   :  { %v6927_v38 = vld [vmem:[#allocation8 + $0x538] sm:$0xf0]  ;;  %v4262_v6 = vadd.f32 %v3792_v49, %v8987_v7  ;;  %v4392_v37 = vmul.f32 %v3792_v49, %v3792_v49  ;;  %v9032_v17 = vpack.c.bf16 %v3792_v49, %v8925_v39 }
 0x3ee   :  { %4237 = vmatpush.bf16.msra.mxu1 %v8984_v30  ;;  %4200 = vmatpush.bf16.msrb.mxu3 %v6706_v23  ;;  %v7590_v32 = vld [vmem:[#allocation8 + $0x71c] sm:$0xf]  ;;  %v9008_v62 = vor.u32 %v7526_v22, %v6927_v38  ;;  %v9012_v31 = vmul.f32 0.0625, %v4317_v14  ;;  %v4477_v23 = vadd.f32 %v4476_v33, %v4475_v19  ;;  %v3757_v38 = vadd.f32 %v3756_v28, %v3737_v26 }
 0x3ef   :  { %v7183_v41 = vld [vmem:[#allocation8 + $0x738] sm:$0xf0] }
 0x3f0   :  { %4219 = vmatpush.bf16.msra.mxu0 %v8997_v36  ;;  %4182 = vmatpush.bf16.msrb.mxu2 %v6418_v21  ;;  %v9010_v51 = vor.u32 %v7590_v32, %v7183_v41  ;;  %v7390_v54 = vld [vmem:[#allocation8 + $0xdc] sm:$0xf]  ;;  %10279 = vst [vmem:[#allocation14_spill] sm:$0xff] %v9012_v31  ;;  %v9023_v58 = vmul.f32 0.0625, %v4477_v23  ;;  %v9027_v63 = vmul.f32 %v9012_v31, %v9012_v31  ;;  %v4263_v21 = vrot.slane %v4262_v6, 4  ;;  %v9038_v14 = vpop.f32.mrf.mxu0  ;;  %v9040_v39 = vpop.f32.mrf.mxu1 }
 0x3f1   :  { %v6383_v44 = vld [vmem:[#allocation8 + $0xf8] sm:$0xf0]  ;;  %4111 = vmatmul.bf16.vlgmr.msra.gmra.mxu2 %v8841_v1 }
 0x3f2   :  { %4238 = vmatpush.bf16.msra.mxu1 %v8999_v55  ;;  %4201 = vmatpush.bf16.msrb.mxu3 %v6674_v40  ;;  %v7454_v61 = vld [vmem:[#allocation8 + $0x2dc] sm:$0xf]  ;;  %v6386_v12 = vor.u32 %v7390_v54, %v6383_v44  ;;  %v4422_v40 = vadd.f32 %v4392_v37, %v4384_v18  ;;  %v4264_v54 = vadd.f32 %v4263_v21, %v4262_v6 }
 0x3f3   :  { %v6639_v16 = vld [vmem:[#allocation8 + $0x2f8] sm:$0xf0]  ;;  %4130 = vmatmul.bf16.vlgmr.msra.gmra.mxu3 %v8843_v60 }
 0x3f4   :  { %v7518_v35 = vld [vmem:[#allocation8 + $0x4dc] sm:$0xf]  ;;  %4220 = vmatpush.bf16.msra.mxu0 %v9008_v62  ;;  %v6642_v24 = vor.u32 %v7454_v61, %v6639_v16  ;;  %4183 = vmatpush.bf16.msrb.mxu2 %v6386_v12  ;;  %v4423_v44 = vrot.slane %v4422_v40, 4  ;;  %v3776_v61 = vadd.f32 %v8935_v59, %v3757_v38  ;;  %v4265_v37 = vrot.slane %v4264_v54, 2  ;;  %v3739_v38 = vpop.f32.mrf.mxu2 }
 0x3f5   :  { %v6895_v57 = vld [vmem:[#allocation8 + $0x4f8] sm:$0xf0] }
 0x3f6   :  { %4239 = vmatpush.bf16.msra.mxu1 %v9010_v51  ;;  %v7582_v53 = vld [vmem:[#allocation8 + $0x6dc] sm:$0xf]  ;;  %4202 = vmatpush.bf16.msrb.mxu3 %v6642_v24  ;;  %v9034_v19 = vor.u32 %v7518_v35, %v6895_v57  ;;  %v9049_v57 = vadd.f32 1e-05, %v4575_v45 }
 0x3f7   :  { %v7151_v25 = vld [vmem:[#allocation8 + $0x6f8] sm:$0xf0]  ;;  %4154 = vmatmul.bf16.gmra.mxu0 %v8814_v56 }
 0x3f8   :  { %v7382_v42 = vld [vmem:[#allocation8 + $0x9c] sm:$0xf]  ;;  %4221 = vmatpush.bf16.msra.mxu0 %v9034_v19  ;;  %v9043_v33 = vor.u32 %v7582_v53, %v7151_v25  ;;  %v4424_v53 = vadd.f32 %v4423_v44, %v4422_v40  ;;  %v3795_v25 = vadd.f32 %v8937_v9, %v3776_v61  ;;  %7731 = vrsqrt.f32 %v9049_v57 }
 0x3f9   :  { %v6351_v52 = vld [vmem:[#allocation8 + $0xb8] sm:$0xf0]  ;;  %4173 = vmatmul.bf16.gmra.mxu1 %v8816_v8  ;;  %vm4614_vm15 = vweird.f32 %v9049_v57 }
 0x3fa   :  { %v7446_v22 = vld [vmem:[#allocation8 + $0x29c] sm:$0xf]  ;;  %4240 = vmatpush.bf16.msra.mxu1 %v9043_v33  ;;  %v6354_v12 = vor.u32 %v7382_v42, %v6351_v52  ;;  %v4425_v45 = vrot.slane %v4424_v53, 2  ;;  %v9058_v9 = vpack.c.bf16 %v3795_v25, %v8941_v3 }
 0x3fb   :  { %v6607_v32 = vld [vmem:[#allocation8 + $0x2b8] sm:$0xf0] }
 0x3fc   :  { %v7510_v41 = vld [vmem:[#allocation8 + $0x49c] sm:$0xf]  ;;  %v6610_v16 = vor.u32 %v7446_v22, %v6607_v32  ;;  %4184 = vmatpush.bf16.msrb.mxu2 %v6354_v12  ;;  %v4266_v22 = vadd.f32 %v4265_v37, %v4264_v54  ;;  %10280 = vst [vmem:[#allocation15_spill] sm:$0xff] %v9058_v9  ;;  %v3758_v32 = vpop.f32.mrf.mxu3  ;;  %v9065_v37 = vpop.f32.mrf.mxu1 }
 0x3fd   :  { %v6863_v0 = vld [vmem:[#allocation8 + $0x4b8] sm:$0xf0]  ;;  %v3759_v12 = vadd.f32 %v3758_v32, %v3739_v38 }
 0x3fe   :  { %v7574_v23 = vld [vmem:[#allocation8 + $0x69c] sm:$0xf]  ;;  %v9047_v35 = vor.u32 %v7510_v41, %v6863_v0  ;;  %4203 = vmatpush.bf16.msrb.mxu3 %v6610_v16 }
 0x3ff   :  { %v7119_v49 = vld [vmem:[#allocation8 + $0x6b8] sm:$0xf0] }
 0x400   :  { %v7374_v18 = vld [vmem:[#allocation8 + $0x5c] sm:$0xf]  ;;  %v9054_v6 = vor.u32 %v7574_v23, %v7119_v49  ;;  %4222 = vmatpush.bf16.msra.mxu0 %v9047_v35  ;;  %v4267_v23 = vrot.slane %v4266_v22, 1  ;;  %v4426_v49 = vadd.f32 %v4425_v45, %v4424_v53  ;;  %v3778_v53 = vadd.f32 %v8945_v43, %v3759_v12 }
 0x401   :  { %v6319_v24 = vld [vmem:[#allocation8 + $0x78] sm:$0xf0]  ;;  %v4400_v43 = vmul.f32 %v3795_v25, %v3795_v25  ;;  %4116 = vmatmul.bf16.gmra.mxu2 %v8859_v50 }
 0x402   :  { %v7438_v59 = vld [vmem:[#allocation8 + $0x25c] sm:$0xf]  ;;  %v6322_v26 = vor.u32 %v7374_v18, %v6319_v24  ;;  %4241 = vmatpush.bf16.msra.mxu1 %v9054_v6  ;;  %v9063_v24 = vpop.f32.mrf.mxu0  ;;  %v4268_v34 = vadd.f32 %v4267_v23, %v4266_v22  ;;  %v4427_v9 = vrot.slane %v4426_v49, 1  ;;  %v9095_v23 = vpop.eup %7731 }
 0x403   :  { %v6575_v28 = vld [vmem:[#allocation8 + $0x278] sm:$0xf0]  ;;  %4135 = vmatmul.bf16.gmra.mxu3 %v8861_v11  ;;  %vm4615_vm9 = vweird.f32 %v9095_v23 }
 0x404   :  { %v7502_v42 = vld [vmem:[#allocation8 + $0x45c] sm:$0xf]  ;;  %v6578_v41 = vor.u32 %v7438_v59, %v6575_v28  ;;  %4185 = vmatpush.bf16.msrb.mxu2 %v6322_v26  ;;  %v9077_v26 = vmul.f32 0.0625, %v4268_v34  ;;  %vm4616_vm0 = vmor %vm4614_vm15, %vm4615_vm9 }
 0x405   :  { %v6831_v52 = vld [vmem:[#allocation8 + $0x478] sm:$0xf0] }
 0x406   :  { %v7566_v21 = vld [vmem:[#allocation8 + $0x65c] sm:$0xf]  ;;  %v9061_v54 = vor.u32 %v7502_v42, %v6831_v52  ;;  %4204 = vmatpush.bf16.msrb.mxu3 %v6578_v41  ;;  %v4544_v38 = vmul.f32 %v9077_v26, %v9077_v26 }
 0x407   :  { %v7087_v40 = vld [vmem:[#allocation8 + $0x678] sm:$0xf0] }
 0x408   :  { %v7366_v0 = vld [vmem:[#allocation8 + $0x1c] sm:$0xf]  ;;  %v9067_v3 = vor.u32 %v7566_v21, %v7087_v40  ;;  %4223 = vmatpush.bf16.msra.mxu0 %v9061_v54  ;;  %v4428_v21 = vadd.f32 %v4427_v9, %v4426_v49  ;;  %v3797_v40 = vadd.f32 %v8947_v5, %v3778_v53  ;;  %v3808_v5 = vpop.f32.mrf.mxu2  ;;  %v3827_v9 = vpop.f32.mrf.mxu3 }
 0x409   :  { %v6287_v44 = vld [vmem:[#allocation8 + $0x38] sm:$0xf0] }
 0x40a   :  { %v7430_v61 = vld [vmem:[#allocation8 + $0x21c] sm:$0xf]  ;;  %v6290_v7 = vor.u32 %v7366_v0, %v6287_v44  ;;  %4242 = vmatpush.bf16.msra.mxu1 %v9067_v3  ;;  %v4528_v22 = vmul.f32 0.0625, %v4428_v21  ;;  %v4408_v32 = vmul.f32 %v3797_v40, %v3797_v40  ;;  %v9087_v34 = vpack.c.bf16 %v3797_v40, %v8953_v4 }
 0x40b   :  { %v6543_v16 = vld [vmem:[#allocation8 + $0x238] sm:$0xf0]  ;;  %v3828_v44 = vadd.f32 %v3827_v9, %v3808_v5 }
 0x40c   :  { %v7494_v18 = vld [vmem:[#allocation8 + $0x41c] sm:$0xf]  ;;  %v6546_v42 = vor.u32 %v7430_v61, %v6543_v16  ;;  %4186 = vmatpush.bf16.msrb.mxu2 %v6290_v7  ;;  %v4560_v7 = vsub.f32 %v4528_v22, %v4544_v38  ;;  %v4478_v0 = vadd.f32 %v4408_v32, %v4400_v43  ;;  %v9091_v61 = vpop.f32.mrf.mxu0 }
 0x40d   :  { %v6799_v59 = vld [vmem:[#allocation8 + $0x438] sm:$0xf0]  ;;  %v3847_v12 = vadd.f32 %v8975_v10, %v3828_v44  ;;  %v4609_v10 = vmul.f32 %v9095_v23, %v9049_v57 }
 0x40e   :  { %v7558_v28 = vld [vmem:[#allocation8 + $0x61c] sm:$0xf]  ;;  %v9072_v52 = vor.u32 %v7494_v18, %v6799_v59  ;;  %4205 = vmatpush.bf16.msrb.mxu3 %v6546_v42  ;;  %v4479_v4 = vrot.slane %v4478_v0, 4 }
 0x40f   :  { %v7055_v31 = vld [vmem:[#allocation8 + $0x638] sm:$0xf0]  ;;  %v9106_v53 = vadd.f32 %v8977_v2, %v3847_v12 }
 0x410   :  { %v9074_v45 = vor.u32 %v7558_v28, %v7055_v31  ;;  %v4318_v31 = vadd.f32 %v3797_v40, %v3795_v25  ;;  %4224 = vmatpush.bf16.msra.mxu0 %v9072_v52  ;;  %7619 = vmatpush.bf16.msra.mxu2 %v8969_v29  ;;  %v9093_v25 = vpop.f32.mrf.mxu1  ;;  %v4576_v29 = vmax.f32 %v4560_v7, 0.0  ;;  %v4480_v28 = vadd.f32 %v4479_v4, %v4478_v0 }
 0x411   :  { %4187 = vmatmul.bf16.vlgmr.msrb.gmra.mxu2 %v8841_v1 }
 0x412   :  { %4243 = vmatpush.bf16.msra.mxu1 %v9074_v45  ;;  %7627 = vmatpush.bf16.msra.mxu3 %v8971_v20  ;;  %v4319_v41 = vrot.slane %v4318_v31, 4  ;;  %v10281_v20 = vsub.f32 %v9023_v58, %v9027_v63  ;;  %v9103_v18 = vadd.f32 1e-05, %v4576_v29  ;;  %v4481_v58 = vrot.slane %v4480_v28, 2  ;;  %v3829_v63 = vpop.f32.mrf.mxu3 }
 0x413   :  { %4225 = vmatmul.bf16.vlgmr.msra.gmra.mxu0 %v8702_v46  ;;  %4206 = vmatmul.bf16.vlgmr.msrb.gmra.mxu3 %v8843_v60 }
 0x414   :  { %v4320_v49 = vadd.f32 %v4319_v41, %v4318_v31  ;;  %7620 = vmatpush.bf16.msra.mxu2 %v8982_v48  ;;  %v4583_v16 = vmax.f32 %v10281_v20, 0.0  ;;  %7733 = vrsqrt.f32 %v9103_v18  ;;  %v4482_v21 = vadd.f32 %v4481_v58, %v4480_v28  ;;  %v9118_v40 = vpop.f32.mrf.mxu0 }
 0x415   :  { %4244 = vmatmul.bf16.vlgmr.msra.gmra.mxu1 %v8706_v47  ;;  %v4610_v47 = vmul.f32 %v9095_v23, %v4609_v10  ;;  %vm4624_vm13 = vweird.f32 %v9103_v18 }
 0x416   :  { %7628 = vmatpush.bf16.msra.mxu3 %v8984_v30  ;;  %v4321_v59 = vrot.slane %v4320_v49, 2  ;;  %v3810_v30 = vpop.f32.mrf.mxu2  ;;  %v9115_v42 = vadd.f32 1e-05, %v4583_v16  ;;  %v4483_v22 = vrot.slane %v4482_v21, 1 }
 0x417   :  { %v3830_v46 = vadd.f32 %v3829_v63, %v3810_v30 }
 0x418   :  { %v4322_v48 = vadd.f32 %v4321_v59, %v4320_v49  ;;  %7621 = vmatpush.bf16.msra.mxu2 %v8997_v36  ;;  %v9121_v31 = vpop.f32.mrf.mxu1  ;;  %7735 = vrsqrt.f32 %v9115_v42  ;;  %v4484_v32 = vadd.f32 %v4483_v22, %v4482_v21  ;;  %vm4694_vm6 = vweird.f32 %v9115_v42 }
 0x419   :  { %v3849_v38 = vadd.f32 %v9001_v27, %v3830_v46  ;;  %v4611_v27 = vmul.f32 0.5, %v4610_v47 }
 0x41a   :  { %7629 = vmatpush.bf16.msra.mxu3 %v8999_v55  ;;  %v4323_v2 = vrot.slane %v4322_v48, 1  ;;  %v7734_v36 = vpop.eup %7733  ;;  %v3832_v29 = vpop.f32.mrf.mxu3 }
 0x41b   :  { %v9129_v5 = vadd.f32 %v9003_v15, %v3849_v38  ;;  %v4619_v9 = vmul.f32 %v7734_v36, %v9103_v18  ;;  %v4612_v16 = vsub.f32 1.5, %v4611_v27  ;;  %vm4625_vm10 = vweird.f32 %v7734_v36 }
 0x41c   :  { %v4324_v43 = vadd.f32 %v4323_v2, %v4322_v48  ;;  %7622 = vmatpush.bf16.msra.mxu2 %v9008_v62  ;;  %v4385_v62 = vmul.f32 %v9106_v53, %v9106_v53  ;;  %v9147_v63 = vpop.f32.mrf.mxu0  ;;  %vm4626_vm14 = vmor %vm4624_vm13, %vm4625_vm10 }
 0x41d   :  { %v4269_v41 = vadd.f32 %v9129_v5, %v9106_v53  ;;  %v4393_v15 = vmul.f32 %v9129_v5, %v9129_v5  ;;  %v4620_v0 = vmul.f32 %v7734_v36, %v4619_v9 }
 0x41e   :  { %7630 = vmatpush.bf16.msra.mxu3 %v9010_v51  ;;  %v9126_v55 = vmul.f32 0.0625, %v4324_v43  ;;  %v4536_v51 = vmul.f32 0.0625, %v4484_v32  ;;  %v3813_v44 = vpop.f32.mrf.mxu2  ;;  %v9144_v28 = vpop.eup %7735 }
 0x41f   :  { %v4270_v4 = vrot.slane %v4269_v41, 4  ;;  %v4429_v12 = vadd.f32 %v4393_v15, %v4385_v62  ;;  %v3833_v20 = vadd.f32 %v3832_v29, %v3813_v44  ;;  %v4621_v59 = vmul.f32 0.5, %v4620_v0 }
 0x420   :  { %v4552_v7 = vmul.f32 %v9126_v55, %v9126_v55  ;;  %7623 = vmatpush.bf16.msra.mxu2 %v9034_v19  ;;  %v9157_v47 = vpop.f32.mrf.mxu1  ;;  %vm4695_vm2 = vweird.f32 %v9144_v28 }
 0x421   :  { %v4271_v48 = vadd.f32 %v4270_v4, %v4269_v41  ;;  %v4430_v58 = vrot.slane %v4429_v12, 4  ;;  %v3852_v30 = vadd.f32 %v9038_v14, %v3833_v20  ;;  %v4622_v19 = vsub.f32 1.5, %v4621_v59  ;;  %vm4696_vm7 = vmor %vm4694_vm6, %vm4695_vm2  ;;  %4192 = vmatmul.bf16.gmra.mxu2 %v8859_v50 }
 0x422   :  { %7631 = vmatpush.bf16.msra.mxu3 %v9043_v33  ;;  %v4568_v49 = vsub.f32 %v4536_v51, %v4552_v7  ;;  %v4613_v14 = vmul.f32 %v9095_v23, %v4612_v16  ;;  %v3834_v32 = vpop.f32.mrf.mxu3 }
 0x423   :  { %v4272_v2 = vrot.slane %v4271_v48, 2  ;;  %v4431_v21 = vadd.f32 %v4430_v58, %v4429_v12  ;;  %v9155_v46 = vadd.f32 %v9040_v39, %v3852_v30  ;;  %v4623_v43 = vmul.f32 %v7734_v36, %v4622_v19  ;;  %4211 = vmatmul.bf16.gmra.mxu3 %v8861_v11 }
 0x424   :  { %v4584_v10 = vmax.f32 %v4568_v49, 0.0  ;;  %7624 = vmatpush.bf16.msra.mxu2 %v9047_v35  ;;  %v4689_v35 = vmul.f32 %v9144_v28, %v9115_v42  ;;  %v4617_v51 = vsel %vm4616_vm0, %v9095_v23, %v4613_v14  ;;  %v9184_v23 = vpop.f32.mrf.mxu0 }
 0x425   :  { %v4432_v22 = vrot.slane %v4431_v21, 2  ;;  %v4627_v39 = vsel %vm4626_vm14, %v7734_v36, %v4623_v43 }
 0x426   :  { %7632 = vmatpush.bf16.msra.mxu3 %v9054_v6  ;;  %v9152_v33 = vadd.f32 1e-05, %v4584_v10  ;;  %v4273_v6 = vadd.f32 %v4272_v2, %v4271_v48  ;;  %v3815_v38 = vpop.f32.mrf.mxu2  ;;  %v4784_v27 = vrot.slane %v4627_v39, 7  ;;  %v4690_v7 = vmul.f32 %v9144_v28, %v4689_v35 }
 0x427   :  { %v4433_v18 = vadd.f32 %v4432_v22, %v4431_v21  ;;  %v3835_v62 = vadd.f32 %v3834_v32, %v3815_v38 }
 0x428   :  { %7737 = vrsqrt.f32 %v9152_v33  ;;  %7625 = vmatpush.bf16.msra.mxu2 %v9061_v54  ;;  %v4274_v9 = vrot.slane %v4273_v6, 1  ;;  %v9172_v54 = vsel %vm495_vm5, %v4617_v51, %v4784_v27  ;;  %v4691_v29 = vmul.f32 0.5, %v4690_v7  ;;  %v9195_v4 = vpop.f32.mrf.mxu1 }
 0x429   :  { %v4434_v36 = vrot.slane %v4433_v18, 1  ;;  %v3854_v41 = vadd.f32 %v9063_v24, %v3835_v62  ;;  %vm4704_vm3 = vweird.f32 %v9152_v33 }
 0x42a   :  { %7633 = vmatpush.bf16.msra.mxu3 %v9067_v3  ;;  %v4275_v57 = vadd.f32 %v4274_v9, %v4273_v6  ;;  %v3903_v20 = vpop.f32.mrf.mxu3  ;;  %v4692_v58 = vsub.f32 1.5, %v4691_v29 }
 0x42b   :  { %v4435_v0 = vadd.f32 %v4434_v36, %v4433_v18  ;;  %v9180_v44 = vadd.f32 %v9065_v37, %v3854_v41 }
 0x42c   :  { %7626 = vmatpush.bf16.msra.mxu2 %v9072_v52  ;;  %v9177_v15 = vmul.f32 0.0625, %v4275_v57  ;;  %v4401_v52 = vmul.f32 %v9155_v46, %v9155_v46  ;;  %v4693_v22 = vmul.f32 %v9144_v28, %v4692_v58  ;;  %v9202_v27 = vpop.f32.mrf.mxu0 }
 0x42d   :  { %v4325_v37 = vadd.f32 %v9180_v44, %v9155_v46  ;;  %v4409_v1 = vmul.f32 %v9180_v44, %v9180_v44 }
 0x42e   :  { %7634 = vmatpush.bf16.msra.mxu3 %v9074_v45  ;;  %v7738_v3 = vpop.eup %7737  ;;  %v4529_v45 = vmul.f32 0.0625, %v4435_v0  ;;  %v4545_v49 = vmul.f32 %v9177_v15, %v9177_v15  ;;  %v3884_v12 = vpop.f32.mrf.mxu2 }
 0x42f   :  { %v4699_v24 = vmul.f32 %v7738_v3, %v9152_v33  ;;  %v4326_v59 = vrot.slane %v4325_v37, 4  ;;  %v4485_v10 = vadd.f32 %v4409_v1, %v4401_v52  ;;  %v3904_v48 = vadd.f32 %v3903_v20, %v3884_v12 }
 0x430   :  { %v4561_v16 = vsub.f32 %v4529_v45, %v4545_v49  ;;  %vm4705_vm1 = vweird.f32 %v7738_v3  ;;  %v9208_v36 = vpop.f32.mrf.mxu1  ;;  %v4697_v33 = vsel %vm4696_vm7, %v9144_v28, %v4693_v22 }
 0x431   :  { %v4700_v60 = vmul.f32 %v7738_v3, %v4699_v24  ;;  %v4327_v19 = vadd.f32 %v4326_v59, %v4325_v37  ;;  %v4486_v2 = vrot.slane %v4485_v10, 4  ;;  %v3923_v21 = vadd.f32 %v9091_v61, %v3904_v48  ;;  %vm4706_vm4 = vmor %vm4704_vm3, %vm4705_vm1  ;;  %4230 = vmatmul.bf16.vlgmr.msra.gmra.mxu2 %v8814_v56 }
 0x432   :  { %v4577_v52 = vmax.f32 %v4561_v16, 0.0 }
 0x433   :  { %v4701_v30 = vmul.f32 0.5, %v4700_v60  ;;  %v4328_v35 = vrot.slane %v4327_v19, 2  ;;  %v4487_v43 = vadd.f32 %v4486_v2, %v4485_v10  ;;  %v3942_v6 = vadd.f32 %v9093_v25, %v3923_v21  ;;  %v3905_v25 = vpop.f32.mrf.mxu3  ;;  %4249 = vmatmul.bf16.vlgmr.msra.gmra.mxu3 %v8816_v8 }
 0x434   :  { %v9225_v50 = vpop.f32.mrf.mxu0  ;;  %v9227_v11 = vadd.f32 1e-05, %v4577_v52 }
 0x435   :  { %v4702_v14 = vsub.f32 1.5, %v4701_v30  ;;  %v4329_v38 = vadd.f32 %v4328_v35, %v4327_v19  ;;  %v4488_v32 = vrot.slane %v4487_v43, 2  ;;  %v9206_v9 = vpack.c.bf16 %v3942_v6, %v9106_v53 }
 0x436   :  { %v3886_v18 = vpop.f32.mrf.mxu2  ;;  %v4386_v45 = vmul.f32 %v3942_v6, %v3942_v6  ;;  %7739 = vrsqrt.f32 %v9227_v11  ;;  %vm4634_vm9 = vweird.f32 %v9227_v11 }
 0x437   :  { %v4703_v39 = vmul.f32 %v7738_v3, %v4702_v14  ;;  %v4330_v51 = vrot.slane %v4329_v38, 1  ;;  %v4489_v7 = vadd.f32 %v4488_v32, %v4487_v43  ;;  %v3906_v57 = vadd.f32 %v3905_v25, %v3886_v18 }
 0x438   :  { %v9230_v30 = vpop.f32.mrf.mxu1 }
 0x439   :  { %v4707_v61 = vsel %vm4706_vm4, %v7738_v3, %v4703_v39  ;;  %v4331_v0 = vadd.f32 %v4330_v51, %v4329_v38  ;;  %v4490_v42 = vrot.slane %v4489_v7, 1  ;;  %v3925_v3 = vadd.f32 %v9118_v40, %v3906_v57 }
 0x43a   :  { %v4791_v62 = vrot.slane %v4707_v61, 7 }
 0x43b   :  { %v9215_v53 = vmul.f32 0.0625, %v4331_v0  ;;  %v4491_v29 = vadd.f32 %v4490_v42, %v4489_v7  ;;  %v3944_v24 = vadd.f32 %v9121_v31, %v3925_v3  ;;  %v3908_v12 = vpop.f32.mrf.mxu3 }
 0x43c   :  { %v9212_v41 = vsel %vm495_vm5, %v4697_v33, %v4791_v62  ;;  %v9238_v18 = vpop.f32.mrf.mxu0  ;;  %v9240_v25 = vpop.eup %7739 }
 0x43d   :  { %v4537_v49 = vmul.f32 0.0625, %v4491_v29  ;;  %v4553_v28 = vmul.f32 %v9215_v53, %v9215_v53  ;;  %v4276_v37 = vadd.f32 %v3944_v24, %v3942_v6  ;;  %v4394_v1 = vmul.f32 %v3944_v24, %v3944_v24 }
 0x43e   :  { %v9223_v60 = vpack.c.bf16 %v3944_v24, %v9129_v5  ;;  %v3889_v40 = vpop.f32.mrf.mxu2  ;;  %v4629_v3 = vmul.f32 %v9240_v25, %v9227_v11  ;;  %vm4635_vm8 = vweird.f32 %v9240_v25 }
 0x43f   :  { %v4569_v20 = vsub.f32 %v4537_v49, %v4553_v28  ;;  %v4277_v59 = vrot.slane %v4276_v37, 4  ;;  %v4436_v31 = vadd.f32 %v4394_v1, %v4386_v45  ;;  %v3909_v10 = vadd.f32 %v3908_v12, %v3889_v40  ;;  %vm9293_vm10 = vmor %vm4634_vm9, %vm4635_vm8 }
 0x440   :  { %v4630_v12 = vmul.f32 %v9240_v25, %v4629_v3 }
 0x441   :  { %v4278_v16 = vadd.f32 %v4277_v59, %v4276_v37  ;;  %v4437_v48 = vrot.slane %v4436_v31, 4  ;;  %v3928_v58 = vadd.f32 %v9147_v63, %v3909_v10  ;;  %v4585_v7 = vmax.f32 %v4569_v20, 0.0 }
 0x443   :  { %v4279_v19 = vrot.slane %v4278_v16, 2  ;;  %v4438_v2 = vadd.f32 %v4437_v48, %v4436_v31  ;;  %v3947_v5 = vadd.f32 %v9157_v47, %v3928_v58  ;;  %v3910_v6 = vpop.f32.mrf.mxu3  ;;  %v9256_v49 = vadd.f32 1e-05, %v4585_v7 }
 0x444   :  { %v9263_v10 = vpop.f32.mrf.mxu0 }
 0x445   :  { %v4280_v21 = vadd.f32 %v4279_v19, %v4278_v16  ;;  %v4439_v14 = vrot.slane %v4438_v2, 2  ;;  %v9235_v35 = vpack.c.bf16 %v3947_v5, %v9155_v46  ;;  %v9247_v46 = vpop.f32.mrf.mxu1  ;;  %v4402_v57 = vmul.f32 %v3947_v5, %v3947_v5 }
 0x446   :  { %v3891_v43 = vpop.f32.mrf.mxu2  ;;  %7741 = vrsqrt.f32 %v9256_v49  ;;  %v4631_v19 = vmul.f32 0.5, %v4630_v12  ;;  %vm4714_vm1 = vweird.f32 %v9256_v49 }
 0x447   :  { %v4281_v22 = vrot.slane %v4280_v21, 1  ;;  %v4440_v39 = vadd.f32 %v4439_v14, %v4438_v2  ;;  %v3911_v38 = vadd.f32 %v3910_v6, %v3891_v43 }
 0x449   :  { %v4282_v32 = vadd.f32 %v4281_v22, %v4280_v21  ;;  %v4441_v63 = vrot.slane %v4440_v39, 1  ;;  %v3930_v61 = vadd.f32 %v9184_v23, %v3911_v38 }
 0x44b   :  { %v9242_v47 = vmul.f32 0.0625, %v4282_v32  ;;  %v4442_v62 = vadd.f32 %v4441_v63, %v4440_v39  ;;  %v3949_v51 = vadd.f32 %v9195_v4, %v3930_v61  ;;  %v3979_v56 = vpop.f32.mrf.mxu3  ;;  %v4632_v39 = vsub.f32 1.5, %v4631_v19 }
 0x44c   :  { %v9269_v22 = vpop.eup %7741 }
 0x44d   :  { %v4530_v33 = vmul.f32 0.0625, %v4442_v62  ;;  %v4546_v23 = vmul.f32 %v9242_v47, %v9242_v47  ;;  %v4332_v0 = vadd.f32 %v3949_v51, %v3947_v5  ;;  %v4410_v42 = vmul.f32 %v3949_v51, %v3949_v51  ;;  %v9266_v58 = vpop.f32.mrf.mxu1 }
 0x44e   :  { %v9254_v29 = vpack.c.bf16 %v3949_v51, %v9180_v44  ;;  %v3960_v4 = vpop.f32.mrf.mxu2  ;;  %vm4715_vm0 = vweird.f32 %v9269_v22 }
 0x44f   :  { %v4562_v24 = vsub.f32 %v4530_v33, %v4546_v23  ;;  %v4333_v8 = vrot.slane %v4332_v0, 4  ;;  %v4492_v52 = vadd.f32 %v4410_v42, %v4402_v57  ;;  %v3980_v45 = vadd.f32 %v3979_v56, %v3960_v4  ;;  %v9284_v23 = vpop.f32.mrf.mxu0  ;;  %vm4716_vm2 = vmor %vm4714_vm1, %vm4715_vm0 }
 0x451   :  { %v4578_v28 = vmax.f32 %v4562_v24, 0.0  ;;  %v4334_v37 = vadd.f32 %v4333_v8, %v4332_v0  ;;  %v4493_v1 = vrot.slane %v4492_v52, 4  ;;  %v3999_v40 = vadd.f32 %v9202_v27, %v3980_v45 }
 0x452   :  { %v4633_v0 = vmul.f32 %v9240_v25, %v4632_v39 }
 0x453   :  { %v4595_v20 = vadd.f32 1e-05, %v4578_v28  ;;  %v4335_v59 = vrot.slane %v4334_v37, 2  ;;  %v4494_v31 = vadd.f32 %v4493_v1, %v4492_v52  ;;  %v9261_v44 = vadd.f32 %v9208_v36, %v3999_v40  ;;  %v3981_v27 = vpop.f32.mrf.mxu3 }
 0x455   :  { %7743 = vrsqrt.f32 %v4595_v20  ;;  %v4336_v16 = vadd.f32 %v4335_v59, %v4334_v37  ;;  %v4495_v48 = vrot.slane %v4494_v31, 2  ;;  %v4387_v51 = vmul.f32 %v9261_v44, %v9261_v44  ;;  %v9290_v45 = vpop.f32.mrf.mxu1 }
 0x456   :  { %v3962_v2 = vpop.f32.mrf.mxu2  ;;  %vm4644_vm14 = vweird.f32 %v4595_v20 }
 0x457   :  { %v4337_v5 = vrot.slane %v4336_v16, 1  ;;  %v4496_v21 = vadd.f32 %v4495_v48, %v4494_v31  ;;  %v3982_v14 = vadd.f32 %v3981_v27, %v3962_v2  ;;  %v4637_v31 = vsel %vm9293_vm10, %v9240_v25, %v4633_v0 }
 0x459   :  { %v4338_v43 = vadd.f32 %v4337_v5, %v4336_v16  ;;  %v4497_v6 = vrot.slane %v4496_v21, 1  ;;  %v4001_v36 = vadd.f32 %v9225_v50, %v3982_v14  ;;  %v4785_v14 = vrot.slane %v4637_v31, 6 }
 0x45b   :  { %v7744_v38 = vpop.eup %7743  ;;  %v9271_v32 = vmul.f32 0.0625, %v4338_v43  ;;  %v4498_v63 = vadd.f32 %v4497_v6, %v4496_v21  ;;  %v9274_v61 = vadd.f32 %v9230_v30, %v4001_v36  ;;  %v4709_v30 = vmul.f32 %v9269_v22, %v9256_v49  ;;  %v3984_v4 = vpop.f32.mrf.mxu3 }
 0x45c   :  { %v4639_v62 = vmul.f32 %v7744_v38, %v4595_v20  ;;  %vm4645_vm13 = vweird.f32 %v7744_v38 }
 0x45d   :  { %v4538_v7 = vmul.f32 0.0625, %v4498_v63  ;;  %v4554_v57 = vmul.f32 %v9271_v32, %v9271_v32  ;;  %v4283_v50 = vadd.f32 %v9274_v61, %v9261_v44  ;;  %v4395_v33 = vmul.f32 %v9274_v61, %v9274_v61  ;;  %vm4646_vm15 = vmor %vm4644_vm14, %vm4645_vm13 }
 0x45e   :  { %v4640_v42 = vmul.f32 %v7744_v38, %v4639_v62  ;;  %v3965_v3 = vpop.f32.mrf.mxu2  ;;  %v4710_v16 = vmul.f32 %v9269_v22, %v4709_v30 }
 0x45f   :  { %v4570_v56 = vsub.f32 %v4538_v7, %v4554_v57  ;;  %v4284_v24 = vrot.slane %v4283_v50, 4  ;;  %v4443_v8 = vadd.f32 %v4395_v33, %v4387_v51  ;;  %v3985_v52 = vadd.f32 %v3984_v4, %v3965_v3  ;;  %v4076_v7 = vpop.f32.mrf.mxu0  ;;  %v4095_v33 = vpop.f32.mrf.mxu1 }
 0x460   :  { %v4641_v28 = vmul.f32 0.5, %v4640_v42  ;;  %v4711_v43 = vmul.f32 0.5, %v4710_v16 }
 0x461   :  { %v4586_v1 = vmax.f32 %v4570_v56, 0.0  ;;  %v4285_v40 = vadd.f32 %v4284_v24, %v4283_v50  ;;  %v4444_v12 = vrot.slane %v4443_v8, 4  ;;  %v4004_v59 = vadd.f32 %v9238_v18, %v3985_v52 }
 0x462   :  { %v4642_v48 = vsub.f32 1.5, %v4641_v28  ;;  %v4712_v0 = vsub.f32 1.5, %v4711_v43 }
 0x463   :  { %v4603_v19 = vadd.f32 1e-05, %v4586_v1  ;;  %v4286_v11 = vrot.slane %v4285_v40, 2  ;;  %v4445_v2 = vadd.f32 %v4444_v12, %v4443_v8  ;;  %v9303_v27 = vadd.f32 %v9247_v46, %v4004_v59  ;;  %v3986_v36 = vpop.f32.mrf.mxu3 }
 0x464   :  { %v4643_v5 = vmul.f32 %v7744_v38, %v4642_v48  ;;  %v4713_v28 = vmul.f32 %v9269_v22, %v4712_v0 }
 0x465   :  { %7745 = vrsqrt.f32 %v4603_v19  ;;  %v4287_v21 = vadd.f32 %v4286_v11, %v4285_v40  ;;  %v4446_v18 = vrot.slane %v4445_v2, 2  ;;  %v4403_v24 = vmul.f32 %v9303_v27, %v9303_v27 }
 0x466   :  { %v4647_v6 = vsel %vm4646_vm15, %v7744_v38, %v4643_v5  ;;  %v3967_v25 = vpop.f32.mrf.mxu2  ;;  %vm4724_vm4 = vweird.f32 %v4603_v19  ;;  %vm4801_vm15 = vcmask 1044484  }
 0x467   :  { %v4786_v39 = vrot.slane %v4647_v6, 5  ;;  %v4288_v63 = vrot.slane %v4287_v21, 1  ;;  %v4447_v62 = vadd.f32 %v4446_v18, %v4445_v2  ;;  %v3987_v51 = vadd.f32 %v3986_v36, %v3967_v25  ;;  %v4079_v5 = vpop.f32.mrf.mxu0  ;;  %v4098_v25 = vpop.f32.mrf.mxu1 }
 0x468   :  { %v4717_v18 = vsel %vm4716_vm2, %v9269_v22, %v4713_v28 }
 0x469   :  { %v4799_v57 = vsel %vm1575_vm11, %v4785_v14, %v4786_v39  ;;  %v4289_v46 = vadd.f32 %v4288_v63, %v4287_v21  ;;  %v4448_v50 = vrot.slane %v4447_v62, 1  ;;  %v4006_v20 = vadd.f32 %v9263_v10, %v3987_v51 }
 0x46a   :  { %v9309_v30 = vsel %vm1577_vm12, %v9172_v54, %v4799_v57  ;;  %v4792_v63 = vrot.slane %v4717_v18, 6 }
 0x46b   :  { %v7746_v38 = vpop.eup %7745  ;;  %v9311_v42 = vmul.f32 0.0625, %v4289_v46  ;;  %v4449_v3 = vadd.f32 %v4448_v50, %v4447_v62  ;;  %v9314_v4 = vadd.f32 %v9266_v58, %v4006_v20  ;;  %v4055_v1 = vpop.f32.mrf.mxu3 }
 0x46c   :  { %v4719_v56 = vmul.f32 %v7746_v38, %v4603_v19  ;;  %vm4725_vm3 = vweird.f32 %v7746_v38 }
 0x46d   :  { %v4531_v8 = vmul.f32 0.0625, %v4449_v3  ;;  %v4547_v10 = vmul.f32 %v9311_v42, %v9311_v42  ;;  %v4339_v52 = vadd.f32 %v9314_v4, %v9303_v27  ;;  %v4411_v54 = vmul.f32 %v9314_v4, %v9314_v4  ;;  %vm4726_vm6 = vmor %vm4724_vm4, %vm4725_vm3 }
 0x46e   :  { %v4720_v58 = vmul.f32 %v7746_v38, %v4719_v56  ;;  %v4036_v37 = vpop.f32.mrf.mxu2 }
 0x46f   :  { %v4563_v40 = vsub.f32 %v4531_v8, %v4547_v10  ;;  %v4340_v12 = vrot.slane %v4339_v52, 4  ;;  %v4499_v59 = vadd.f32 %v4411_v54, %v4403_v24  ;;  %v4056_v31 = vadd.f32 %v4055_v1, %v4036_v37  ;;  %v4081_v8 = vpop.f32.mrf.mxu0  ;;  %v4100_v37 = vpop.f32.mrf.mxu1 }
 0x470   :  { %v4721_v16 = vmul.f32 0.5, %v4720_v58 }
 0x471   :  { %v4341_v48 = vadd.f32 %v4340_v12, %v4339_v52  ;;  %v4500_v11 = vrot.slane %v4499_v59, 4  ;;  %v4075_v2 = vadd.f32 %v9284_v23, %v4056_v31  ;;  %v4579_v1 = vmax.f32 %v4563_v40, 0.0 }
 0x472   :  { %v4722_v21 = vsub.f32 1.5, %v4721_v16 }
 0x473   :  { %v4342_v14 = vrot.slane %v4341_v48, 2  ;;  %v4501_v43 = vadd.f32 %v4500_v11, %v4499_v59  ;;  %v4094_v6 = vadd.f32 %v9290_v45, %v4075_v2  ;;  %v4057_v57 = vpop.f32.mrf.mxu3 }
 0x474   :  { %v4723_v36 = vmul.f32 %v7746_v38, %v4722_v21  ;;  %v9345_v21 = vadd.f32 1e-05, %v4579_v1 }
 0x475   :  { %v4343_v39 = vadd.f32 %v4342_v14, %v4341_v48  ;;  %v4502_v49 = vrot.slane %v4501_v43, 2  ;;  %v9331_v23 = vpack.c.bf16 %v4094_v6, %v9261_v44  ;;  %v4388_v10 = vmul.f32 %v4094_v6, %v4094_v6 }
 0x476   :  { %v4727_v62 = vsel %vm4726_vm6, %v7746_v38, %v4723_v36  ;;  %v4038_v51 = vpop.f32.mrf.mxu2  ;;  %7747 = vrsqrt.f32 %v9345_v21  ;;  %vm4654_vm8 = vweird.f32 %v9345_v21 }
 0x477   :  { %v4793_v46 = vrot.slane %v4727_v62, 5  ;;  %v4344_v50 = vrot.slane %v4343_v39, 1  ;;  %v4503_v22 = vadd.f32 %v4502_v49, %v4501_v43  ;;  %v4058_v20 = vadd.f32 %v4057_v57, %v4038_v51  ;;  %v4150_v40 = vpop.f32.mrf.mxu0  ;;  %v4169_v57 = vpop.f32.mrf.mxu1 }
 0x479   :  { %v4810_v0 = vsel %vm1575_vm11, %v4792_v63, %v4793_v46  ;;  %v4345_v45 = vadd.f32 %v4344_v50, %v4343_v39  ;;  %v4504_v3 = vrot.slane %v4503_v22, 1  ;;  %v4077_v56 = vadd.f32 %v4076_v7, %v4058_v20 }
 0x47a   :  { %v9336_v19 = vsel %vm1577_vm12, %v9212_v41, %v4810_v0 }
 0x47b   :  { %v9338_v24 = vmul.f32 0.0625, %v4345_v45  ;;  %v4505_v38 = vadd.f32 %v4504_v3, %v4503_v22  ;;  %v4096_v44 = vadd.f32 %v4095_v33, %v4077_v56  ;;  %v4060_v41 = vpop.f32.mrf.mxu3 }
 0x47c   :  { %v9353_v3 = vpop.eup %7747 }
 0x47d   :  { %v4539_v52 = vmul.f32 0.0625, %v4505_v38  ;;  %v4555_v54 = vmul.f32 %v9338_v24, %v9338_v24  ;;  %v4290_v28 = vadd.f32 %v4096_v44, %v4094_v6  ;;  %v4396_v58 = vmul.f32 %v4096_v44, %v4096_v44 }
 0x47e   :  { %v9343_v7 = vpack.c.bf16 %v4096_v44, %v9274_v61  ;;  %v4041_v12 = vpop.f32.mrf.mxu2  ;;  %vm4655_vm7 = vweird.f32 %v9353_v3 }
 0x47f   :  { %v4571_v59 = vsub.f32 %v4539_v52, %v4555_v54  ;;  %v4291_v31 = vrot.slane %v4290_v28, 4  ;;  %v4450_v16 = vadd.f32 %v4396_v58, %v4388_v10  ;;  %v4061_v48 = vadd.f32 %v4060_v41, %v4041_v12  ;;  %v4152_v1 = vpop.f32.mrf.mxu0  ;;  %vm9388_vm10 = vmor %vm4654_vm8, %vm4655_vm7 }
 0x481   :  { %v4292_v33 = vadd.f32 %v4291_v31, %v4290_v28  ;;  %v4451_v11 = vrot.slane %v4450_v16, 4  ;;  %v4080_v2 = vadd.f32 %v4079_v5, %v4061_v48  ;;  %v4587_v0 = vmax.f32 %v4571_v59, 0.0  ;;  %v4171_v48 = vpop.f32.mrf.mxu1 }
 0x483   :  { %v4293_v18 = vrot.slane %v4292_v33, 2  ;;  %v4452_v14 = vadd.f32 %v4451_v11, %v4450_v16  ;;  %v4099_v43 = vadd.f32 %v4098_v25, %v4080_v2  ;;  %v4062_v49 = vpop.f32.mrf.mxu3  ;;  %v9362_v12 = vadd.f32 1e-05, %v4587_v0 }
 0x485   :  { %v4294_v6 = vadd.f32 %v4293_v18, %v4292_v33  ;;  %v4453_v36 = vrot.slane %v4452_v14, 2  ;;  %v9348_v61 = vpack.c.bf16 %v4099_v43, %v9303_v27  ;;  %v4404_v45 = vmul.f32 %v4099_v43, %v4099_v43 }
 0x486   :  { %v4043_v39 = vpop.f32.mrf.mxu2  ;;  %7749 = vrsqrt.f32 %v9362_v12  ;;  %vm4734_vm1 = vweird.f32 %v9362_v12 }
 0x487   :  { %v4295_v63 = vrot.slane %v4294_v6, 1  ;;  %v4454_v62 = vadd.f32 %v4453_v36, %v4452_v14  ;;  %v4063_v51 = vadd.f32 %v4062_v49, %v4043_v39 }
 0x489   :  { %v4296_v5 = vadd.f32 %v4295_v63, %v4294_v6  ;;  %v4455_v46 = vrot.slane %v4454_v62, 1  ;;  %v4082_v50 = vadd.f32 %v4081_v8, %v4063_v51 }
 0x48b   :  { %v9351_v22 = vmul.f32 0.0625, %v4296_v5  ;;  %v4456_v25 = vadd.f32 %v4455_v46, %v4454_v62  ;;  %v4101_v20 = vadd.f32 %v4100_v37, %v4082_v50  ;;  %v4131_v54 = vpop.f32.mrf.mxu3  ;;  %v4649_v37 = vmul.f32 %v9353_v3, %v9345_v21 }
 0x48d   :  { %v4532_v27 = vmul.f32 0.0625, %v4456_v25  ;;  %v4548_v56 = vmul.f32 %v9351_v22, %v9351_v22  ;;  %v4346_v38 = vadd.f32 %v4101_v20, %v4099_v43  ;;  %v4412_v44 = vmul.f32 %v4101_v20, %v4101_v20  ;;  %v4155_v25 = vpop.f32.mrf.mxu0 }
 0x48e   :  { %v9358_v10 = vpack.c.bf16 %v4101_v20, %v9314_v4  ;;  %v4112_v52 = vpop.f32.mrf.mxu2  ;;  %v4650_v2 = vmul.f32 %v9353_v3, %v4649_v37  ;;  %v9368_v20 = vpop.eup %7749 }
 0x48f   :  { %v4564_v8 = vsub.f32 %v4532_v27, %v4548_v56  ;;  %v4347_v28 = vrot.slane %v4346_v38, 4  ;;  %v4506_v58 = vadd.f32 %v4412_v44, %v4404_v45  ;;  %v4132_v41 = vadd.f32 %v4131_v54, %v4112_v52  ;;  %v4174_v56 = vpop.f32.mrf.mxu1 }
 0x490   :  { %v4651_v62 = vmul.f32 0.5, %v4650_v2  ;;  %vm4735_vm0 = vweird.f32 %v9368_v20 }
 0x491   :  { %v4580_v59 = vmax.f32 %v4564_v8, 0.0  ;;  %v4348_v31 = vadd.f32 %v4347_v28, %v4346_v38  ;;  %v4507_v16 = vrot.slane %v4506_v58, 4  ;;  %v4151_v18 = vadd.f32 %v4150_v40, %v4132_v41  ;;  %vm4736_vm2 = vmor %vm4734_vm1, %vm4735_vm0 }
 0x492   :  { %v4652_v38 = vsub.f32 1.5, %v4651_v62  ;;  %vm4803_vm1 = vcmask 1046534  }
 0x493   :  { %v4597_v33 = vadd.f32 1e-05, %v4580_v59  ;;  %v4349_v11 = vrot.slane %v4348_v31, 2  ;;  %v4508_v4 = vadd.f32 %v4507_v16, %v4506_v58  ;;  %v4133_v36 = vpop.f32.mrf.mxu3  ;;  %v9366_v51 = vadd.f32 %v4169_v57, %v4151_v18 }
 0x494   :  { %v4729_v58 = vmul.f32 %v9368_v20, %v9362_v12 }
 0x495   :  { %7751 = vrsqrt.f32 %v4597_v33  ;;  %v4350_v14 = vadd.f32 %v4349_v11, %v4348_v31  ;;  %v4509_v43 = vrot.slane %v4508_v4, 2  ;;  %v4389_v52 = vmul.f32 %v9366_v51, %v9366_v51 }
 0x496   :  { %v4114_v6 = vpop.f32.mrf.mxu2  ;;  %v4653_v11 = vmul.f32 %v9353_v3, %v4652_v38  ;;  %vm4664_vm13 = vweird.f32 %v4597_v33 }
 0x497   :  { %v4351_v39 = vrot.slane %v4350_v14, 1  ;;  %v4510_v49 = vadd.f32 %v4509_v43, %v4508_v4  ;;  %v4134_v63 = vadd.f32 %v4133_v36, %v4114_v6  ;;  %v4730_v6 = vmul.f32 %v9368_v20, %v4729_v58  ;;  %v4176_v38 = vpop.f32.mrf.mxu1 }
 0x499   :  { %v4352_v5 = vadd.f32 %v4351_v39, %v4350_v14  ;;  %v4511_v46 = vrot.slane %v4510_v49, 1  ;;  %v4153_v50 = vadd.f32 %v4152_v1, %v4134_v63 }
 0x49b   :  { %v7752_v0 = vpop.eup %7751  ;;  %v9370_v45 = vmul.f32 0.0625, %v4352_v5  ;;  %v4512_v40 = vadd.f32 %v4511_v46, %v4510_v49  ;;  %v9372_v27 = vadd.f32 %v4171_v48, %v4153_v50  ;;  %v4136_v41 = vpop.f32.mrf.mxu3  ;;  %v4657_v50 = vsel %vm9388_vm10, %v9353_v3, %v4653_v11 }
 0x49c   :  { %v4659_v44 = vmul.f32 %v7752_v0, %v4597_v33  ;;  %vm4665_vm9 = vweird.f32 %v7752_v0  ;;  %v4157_v46 = vpop.f32.mrf.mxu0 }
 0x49d   :  { %v4540_v57 = vmul.f32 0.0625, %v4512_v40  ;;  %v4556_v54 = vmul.f32 %v9370_v45, %v9370_v45  ;;  %v4297_v8 = vadd.f32 %v9372_v27, %v9366_v51  ;;  %v4397_v28 = vmul.f32 %v9372_v27, %v9372_v27  ;;  %vm4666_vm14 = vmor %vm4664_vm13, %vm4665_vm9 }
 0x49e   :  { %v4660_v1 = vmul.f32 %v7752_v0, %v4659_v44  ;;  %v4117_v37 = vpop.f32.mrf.mxu2 }
 0x49f   :  { %v4572_v59 = vsub.f32 %v4540_v57, %v4556_v54  ;;  %v4298_v31 = vrot.slane %v4297_v8, 4  ;;  %v4457_v16 = vadd.f32 %v4397_v28, %v4389_v52  ;;  %v4137_v48 = vadd.f32 %v4136_v41, %v4117_v37 }
 0x4a0   :  { %v4661_v4 = vmul.f32 0.5, %v4660_v1  ;;  %v4787_v54 = vrot.slane %v4657_v50, 4 }
 0x4a1   :  { %v4588_v2 = vmax.f32 %v4572_v59, 0.0  ;;  %v4299_v18 = vadd.f32 %v4298_v31, %v4297_v8  ;;  %v4458_v14 = vrot.slane %v4457_v16, 4  ;;  %v4156_v43 = vadd.f32 %v4155_v25, %v4137_v48 }
 0x4a2   :  { %v4662_v36 = vsub.f32 1.5, %v4661_v4  ;;  %v4731_v8 = vmul.f32 0.5, %v4730_v6 }
 0x4a3   :  { %v4605_v49 = vadd.f32 1e-05, %v4588_v2  ;;  %v4300_v63 = vrot.slane %v4299_v18, 2  ;;  %v4459_v62 = vadd.f32 %v4458_v14, %v4457_v16  ;;  %v9392_v5 = vadd.f32 %v4174_v56, %v4156_v43  ;;  %v4138_v57 = vpop.f32.mrf.mxu3 }
 0x4a4   :  { %v4663_v25 = vmul.f32 %v7752_v0, %v4662_v36  ;;  %v4732_v41 = vsub.f32 1.5, %v4731_v8  ;;  %v4226_v2 = vpop.f32.mrf.mxu0 }
 0x4a5   :  { %7753 = vrsqrt.f32 %v4605_v49  ;;  %v4301_v21 = vadd.f32 %v4300_v63, %v4299_v18  ;;  %v4460_v40 = vrot.slane %v4459_v62, 2  ;;  %v4405_v48 = vmul.f32 %v9392_v5, %v9392_v5 }
 0x4a6   :  { %v4667_v44 = vsel %vm4666_vm14, %v7752_v0, %v4663_v25  ;;  %v4119_v52 = vpop.f32.mrf.mxu2  ;;  %v4733_v6 = vmul.f32 %v9368_v20, %v4732_v41  ;;  %v4245_v25 = vpop.f32.mrf.mxu1  ;;  %vm4744_vm4 = vweird.f32 %v4605_v49 }
 0x4a7   :  { %v4788_v56 = vrot.slane %v4667_v44, 3  ;;  %v4139_v28 = vadd.f32 %v4138_v57, %v4119_v52  ;;  %v4302_v58 = vrot.slane %v4301_v21, 1  ;;  %v4461_v1 = vadd.f32 %v4460_v40, %v4459_v62 }
 0x4a8   :  { %v4737_v52 = vsel %vm4736_vm2, %v9368_v20, %v4733_v6  ;;  %vm4805_vm2 = vcmask 1045508  }
 0x4a9   :  { %v4158_v37 = vadd.f32 %v4157_v46, %v4139_v28  ;;  %v9398_v3 = vsel %vm4801_vm15, %v4787_v54, %v4788_v56  ;;  %v4303_v16 = vadd.f32 %v4302_v58, %v4301_v21  ;;  %v4462_v0 = vrot.slane %v4461_v1, 1 }
 0x4ab   :  { %v7754_v33 = vpop.eup %7753  ;;  %v9400_v59 = vadd.f32 %v4176_v38, %v4158_v37  ;;  %v4207_v43 = vpop.f32.mrf.mxu3  ;;  %v9410_v46 = vmul.f32 0.0625, %v4303_v16  ;;  %v4463_v50 = vadd.f32 %v4462_v0, %v4461_v1  ;;  %v4794_v37 = vrot.slane %v4737_v52, 4 }
 0x4ac   :  { %v4739_v31 = vmul.f32 %v7754_v33, %v4605_v49  ;;  %vm4745_vm3 = vweird.f32 %v7754_v33  ;;  %v4228_v49 = vpop.f32.mrf.mxu0 }
 0x4ad   :  { %v4353_v11 = vadd.f32 %v9400_v59, %v9392_v5  ;;  %v4413_v4 = vmul.f32 %v9400_v59, %v9400_v59  ;;  %v4533_v28 = vmul.f32 0.0625, %v4463_v50  ;;  %v4549_v58 = vmul.f32 %v9410_v46, %v9410_v46  ;;  %vm4746_vm6 = vmor %vm4744_vm4, %vm4745_vm3 }
 0x4ae   :  { %v4740_v18 = vmul.f32 %v7754_v33, %v4739_v31  ;;  %v4188_v14 = vpop.f32.mrf.mxu2  ;;  %vm4807_vm4 = vcmask 1043456  }
 0x4af   :  { %v4354_v36 = vrot.slane %v4353_v11, 4  ;;  %v4513_v39 = vadd.f32 %v4413_v4, %v4405_v48  ;;  %v4208_v63 = vadd.f32 %v4207_v43, %v4188_v14 }
 0x4b0   :  { %v4741_v62 = vmul.f32 0.5, %v4740_v18 }
 0x4b1   :  { %v4355_v21 = vadd.f32 %v4354_v36, %v4353_v11  ;;  %v4514_v40 = vrot.slane %v4513_v39, 4  ;;  %v4227_v38 = vadd.f32 %v4226_v2, %v4208_v63  ;;  %v4565_v2 = vsub.f32 %v4533_v28, %v4549_v58  ;;  %v4247_v36 = vpop.f32.mrf.mxu1 }
 0x4b2   :  { %v4742_v44 = vsub.f32 1.5, %v4741_v62 }
 0x4b3   :  { %v4356_v57 = vrot.slane %v4355_v21, 2  ;;  %v4515_v54 = vadd.f32 %v4514_v40, %v4513_v39  ;;  %v4246_v8 = vadd.f32 %v4245_v25, %v4227_v38  ;;  %v4209_v0 = vpop.f32.mrf.mxu3  ;;  %v4581_v63 = vmax.f32 %v4565_v2, 0.0 }
 0x4b4   :  { %v4743_v56 = vmul.f32 %v7754_v33, %v4742_v44 }
 0x4b5   :  { %v4357_v12 = vadd.f32 %v4356_v57, %v4355_v21  ;;  %v4516_v1 = vrot.slane %v4515_v54, 2  ;;  %v9419_v31 = vpack.c.bf16 %v4246_v8, %v9366_v51  ;;  %v4390_v62 = vmul.f32 %v4246_v8, %v4246_v8 }
 0x4b6   :  { %v4747_v41 = vsel %vm4746_vm6, %v7754_v33, %v4743_v56  ;;  %v4190_v16 = vpop.f32.mrf.mxu2  ;;  %v9431_v28 = vadd.f32 1e-05, %v4581_v63 }
 0x4b7   :  { %v4795_v20 = vrot.slane %v4747_v41, 3  ;;  %v4358_v48 = vrot.slane %v4357_v12, 1  ;;  %v4517_v11 = vadd.f32 %v4516_v1, %v4515_v54  ;;  %v4210_v4 = vadd.f32 %v4209_v0, %v4190_v16 }
 0x4b8   :  { %7755 = vrsqrt.f32 %v9431_v28  ;;  %vm4674_vm8 = vweird.f32 %v9431_v28 }
 0x4b9   :  { %v4359_v18 = vadd.f32 %v4358_v48, %v4357_v12  ;;  %v4518_v14 = vrot.slane %v4517_v11, 1  ;;  %v4229_v43 = vadd.f32 %v4228_v49, %v4210_v4  ;;  %v9422_v6 = vsel %vm4801_vm15, %v4794_v37, %v4795_v20 }
 0x4bb   :  { %v9424_v39 = vmul.f32 0.0625, %v4359_v18  ;;  %v4519_v33 = vadd.f32 %v4518_v14, %v4517_v11  ;;  %v4248_v51 = vadd.f32 %v4247_v36, %v4229_v43  ;;  %v4212_v52 = vpop.f32.mrf.mxu3 }
 0x4bd   :  { %v4541_v50 = vmul.f32 0.0625, %v4519_v33  ;;  %v4557_v25 = vmul.f32 %v9424_v39, %v9424_v39  ;;  %v4304_v21 = vadd.f32 %v4248_v51, %v4246_v8  ;;  %v4398_v40 = vmul.f32 %v4248_v51, %v4248_v51 }
 0x4be   :  { %v9429_v38 = vpack.c.bf16 %v4248_v51, %v9372_v27  ;;  %v4193_v44 = vpop.f32.mrf.mxu2  ;;  %v9436_v49 = vpop.eup %7755 }
 0x4bf   :  { %v4573_v57 = vsub.f32 %v4541_v50, %v4557_v25  ;;  %v4305_v54 = vrot.slane %v4304_v21, 4  ;;  %v4464_v56 = vadd.f32 %v4398_v40, %v4390_v62  ;;  %v4213_v33 = vadd.f32 %v4212_v52, %v4193_v44 }
 0x4c0   :  { %v4669_v51 = vmul.f32 %v9436_v49, %v9431_v28  ;;  %vm4675_vm7 = vweird.f32 %v9436_v49 }
 0x4c1   :  { %v4306_v58 = vadd.f32 %v4305_v54, %v4304_v21  ;;  %v4465_v12 = vrot.slane %v4464_v56, 4  ;;  %v4589_v41 = vmax.f32 %v4573_v57, 0.0  ;;  %vm9475_vm9 = vmor %vm4674_vm8, %vm4675_vm7 }
 0x4c2   :  { %v4670_v57 = vmul.f32 %v9436_v49, %v4669_v51 }
 0x4c3   :  { %v4307_v1 = vrot.slane %v4306_v58, 2  ;;  %v4466_v37 = vadd.f32 %v4465_v12, %v4464_v56  ;;  %v4214_v20 = vpop.f32.mrf.mxu3  ;;  %v9434_v11 = vadd.f32 1e-05, %v4589_v41 }
 0x4c4   :  { %v4671_v44 = vmul.f32 0.5, %v4670_v57 }
 0x4c5   :  { %v4308_v16 = vadd.f32 %v4307_v1, %v4306_v58  ;;  %v4467_v8 = vrot.slane %v4466_v37, 2  ;;  %7757 = vrsqrt.f32 %v9434_v11  ;;  %vm4754_vm3 = vweird.f32 %v9434_v11 }
 0x4c6   :  { %v4195_v0 = vpop.f32.mrf.mxu2 }
 0x4c7   :  { %v4309_v27 = vrot.slane %v4308_v16, 1  ;;  %v4468_v48 = vadd.f32 %v4467_v8, %v4466_v37  ;;  %v4215_v12 = vadd.f32 %v4214_v20, %v4195_v0 }
 0x4c9   :  { %v4310_v4 = vadd.f32 %v4309_v27, %v4308_v16  ;;  %v4469_v2 = vrot.slane %v4468_v48, 1 }
 0x4cb   :  { %v9438_v18 = vmul.f32 0.0625, %v4310_v4  ;;  %v4470_v14 = vadd.f32 %v4469_v2, %v4468_v48  ;;  %v4250_v62 = vpop.f32.mrf.mxu3  ;;  %v9446_v54 = vpop.eup %7757 }
 0x4cc   :  { %v4749_v52 = vmul.f32 %v9446_v54, %v9434_v11  ;;  %vm4755_vm0 = vweird.f32 %v9446_v54 }
 0x4cd   :  { %v4534_v43 = vmul.f32 0.0625, %v4470_v14  ;;  %v4550_v36 = vmul.f32 %v9438_v18, %v9438_v18  ;;  %vm9493_vm6 = vmor %vm4754_vm3, %vm4755_vm0 }
 0x4ce   :  { %v4231_v63 = vpop.f32.mrf.mxu2  ;;  %v4750_v2 = vmul.f32 %v9446_v54, %v4749_v52 }
 0x4cf   :  { %v4566_v50 = vsub.f32 %v4534_v43, %v4550_v36  ;;  %v4232_v25 = vadd.f32 %v4231_v63, %v4213_v33  ;;  %v10286_v33 = vld [vmem:[#allocation15_spill] sm:$0xff] }
 0x4d1   :  { %v4582_v21 = vmax.f32 %v4566_v50, 0.0  ;;  %v4251_v40 = vadd.f32 %v4250_v62, %v4232_v25 }
 0x4d3   :  { %v4599_v56 = vadd.f32 1e-05, %v4582_v21  ;;  %v9449_v58 = vpack.c.bf16 %v4251_v40, %v9392_v5  ;;  %v4252_v41 = vpop.f32.mrf.mxu3  ;;  %v4672_v5 = vsub.f32 1.5, %v4671_v44  ;;  %v4406_v20 = vmul.f32 %v4251_v40, %v4251_v40 }
 0x4d5   :  { %7759 = vrsqrt.f32 %v4599_v56  ;;  %v4673_v44 = vmul.f32 %v9436_v49, %v4672_v5  ;;  %vm4684_vm13 = vweird.f32 %v4599_v56 }
 0x4d6   :  { %v4233_v1 = vpop.f32.mrf.mxu2 }
 0x4d7   :  { %v4234_v37 = vadd.f32 %v4233_v1, %v4215_v12 }
 0x4d9   :  { %v4253_v27 = vadd.f32 %v4252_v41, %v4234_v37 }
 0x4db   :  { %v7760_v0 = vpop.eup %7759  ;;  %v4360_v14 = vadd.f32 %v4253_v27, %v4251_v40  ;;  %v4414_v43 = vmul.f32 %v4253_v27, %v4253_v27  ;;  %v9459_v36 = vpack.c.bf16 %v4253_v27, %v9400_v59  ;;  %v4751_v40 = vmul.f32 0.5, %v4750_v2 }
 0x4dc   :  { %v4679_v50 = vmul.f32 %v7760_v0, %v4599_v56  ;;  %vm4685_vm10 = vweird.f32 %v7760_v0 }
 0x4dd   :  { %v4361_v57 = vrot.slane %v4360_v14, 4  ;;  %v4520_v12 = vadd.f32 %v4414_v43, %v4406_v20  ;;  %vm4686_vm14 = vmor %vm4684_vm13, %vm4685_vm10 }
 0x4de   :  { %v4680_v59 = vmul.f32 %v7760_v0, %v4679_v50 }
 0x4df   :  { %v4362_v37 = vadd.f32 %v4361_v57, %v4360_v14  ;;  %v4521_v41 = vrot.slane %v4520_v12, 4  ;;  %v4677_v14 = vsel %vm9475_vm9, %v9436_v49, %v4673_v44  ;;  %v4752_v57 = vsub.f32 1.5, %v4751_v40 }
 0x4e0   :  { %v4681_v51 = vmul.f32 0.5, %v4680_v59 }
 0x4e1   :  { %v4363_v43 = vrot.slane %v4362_v37, 2  ;;  %v4522_v50 = vadd.f32 %v4521_v41, %v4520_v12  ;;  %v4789_v41 = vrot.slane %v4677_v14, 2 }
 0x4e2   :  { %v4682_v25 = vsub.f32 1.5, %v4681_v51  ;;  %v4753_v51 = vmul.f32 %v9446_v54, %v4752_v57  ;;  %v5053_v57 = vunpack.c.l.bf16 %v9419_v31 }
 0x4e3   :  { %v4364_v20 = vadd.f32 %v4363_v43, %v4362_v37  ;;  %v4523_v63 = vrot.slane %v4522_v50, 2 }
 0x4e4   :  { %v4683_v27 = vmul.f32 %v7760_v0, %v4682_v25  ;;  %v4757_v11 = vsel %vm9493_vm6, %v9446_v54, %v4753_v51  ;;  %v5062_v54 = vunpack.c.h.bf16 %v9429_v38 }
 0x4e5   :  { %v4365_v49 = vrot.slane %v4364_v20, 1  ;;  %v4524_v44 = vadd.f32 %v4523_v63, %v4522_v50 }
 0x4e6   :  { %v4687_v40 = vsel %vm4686_vm14, %v7760_v0, %v4683_v27  ;;  %v9500_v0 = vld [vmem:[%s10229_s10] sm:$0xff] }
 0x4e7   :  { %v4790_v37 = vrot.slane %v4687_v40, 1  ;;  %v4366_v2 = vadd.f32 %v4365_v49, %v4364_v20  ;;  %v4525_v43 = vrot.slane %v4524_v44, 1  ;;  %v5054_v40 = vunpack.c.h.bf16 %v9419_v31 }
 0x4e9   :  { %v4804_v27 = vsel %vm4803_vm1, %v4789_v41, %v4790_v37  ;;  %v9503_v20 = vmul.f32 0.0625, %v4366_v2  ;;  %v4526_v50 = vadd.f32 %v4525_v43, %v4524_v44  ;;  %v5061_v2 = vunpack.c.l.bf16 %v9429_v38 }
 0x4ea   :  { %v4806_v49 = vsel %vm4805_vm2, %v9398_v3, %v4804_v27  ;;  %v9521_v43 = vrot.slane %v4757_v11, 2  ;;  %v10291_v27 = vld [vmem:[#allocation13_spill] sm:$0xff] }
 0x4eb   :  { %v4808_v56 = vsel %vm4807_vm4, %v9309_v30, %v4806_v49  ;;  %v4542_v41 = vmul.f32 0.0625, %v4526_v50  ;;  %v4558_v44 = vmul.f32 %v9503_v20, %v9503_v20 }
 0x4ec   :  { %v4818_v37 = vmul.f32 %v4808_v56, %v9500_v0 }
 0x4ed   :  { %v4574_v63 = vsub.f32 %v4542_v41, %v4558_v44 }
 0x4ee   :  { %v4827_v30 = vperm.slane %v4818_v37, 4  ;;  %v4828_v50 = vperm.slane %v4818_v37, 5  ;;  %v4829_v49 = vperm.slane %v4818_v37, 6  ;;  %v4830_v28 = vperm.slane %v4818_v37, 7 }
 0x4ef   :  { %v4590_v14 = vmax.f32 %v4574_v63, 0.0  ;;  %v4823_v25 = vperm.slane %v4818_v37, 0  ;;  %v4824_v56 = vperm.slane %v4818_v37, 1  ;;  %v4825_v12 = vperm.slane %v4818_v37, 2 }
 0x4f0   :  { %v4859_v62 = vmul.f32 %v4827_v30, %v9311_v42  ;;  %v4860_v1 = vmul.f32 %v4828_v50, %v9351_v22  ;;  %v4861_v11 = vmul.f32 %v4829_v49, %v9410_v46  ;;  %v4862_v4 = vmul.f32 %v4830_v28, %v9438_v18 }
 0x4f1   :  { %v4938_v48 = vpack.c.bf16 %v4830_v28, %v4829_v49  ;;  %v9529_v41 = vadd.f32 1e-05, %v4590_v14  ;;  %v4826_v44 = vperm.slane %v4818_v37, 3  ;;  %v4855_v3 = vmul.f32 %v4823_v25, %v10291_v27 }
 0x4f2   :  { %v4890_v51 = vrot.slane %v4859_v62, 4  ;;  %v4891_v5 = vrot.slane %v4860_v1, 3  ;;  %v4892_v63 = vrot.slane %v4861_v11, 2  ;;  %v4893_v59 = vrot.slane %v4862_v4, 1 }
 0x4f3   :  { %v4957_v52 = vunpack.c.l.b16 %v4938_v48  ;;  %v4958_v21 = vunpack.c.h.b16 %v4938_v48  ;;  %7761 = vrsqrt.f32 %v9529_v41  ;;  %v4856_v18 = vmul.f32 %v4824_v56, %v9077_v26 }
 0x4f4   :  { %v4904_v22 = vsel %vm4801_vm15, %v4890_v51, %v4891_v5  ;;  %v4905_v46 = vsel %vm4803_vm1, %v4892_v63, %v4893_v59  ;;  %v4857_v28 = vmul.f32 %v4825_v12, %v9177_v15  ;;  %v4858_v4 = vmul.f32 %v4826_v44, %v9242_v47  ;;  %v9544_v47 = vld [vmem:[%s10230_s11] sm:$0xff] }
 0x4f5   :  { %v4906_v14 = vsel %vm4805_vm2, %v4904_v22, %v4905_v46  ;;  %v4973_v62 = vpack.c.b16 %v4957_v52, %v4957_v52  ;;  %v4974_v1 = vpack.c.b16 %v4958_v21, %v4958_v21  ;;  %v4887_v37 = vrot.slane %v4856_v18, 7 }
 0x4f6   :  { %v4888_v48 = vrot.slane %v4857_v28, 6  ;;  %v4935_v27 = vpack.c.bf16 %v4824_v56, %v4823_v25  ;;  %v4936_v49 = vpack.c.bf16 %v4826_v44, %v4825_v12  ;;  %v4889_v8 = vrot.slane %v4858_v4, 5 }
 0x4f7   :  { %v5008_v11 = vpack.i.b16 %v4973_v62, %v4973_v62  ;;  %v5012_v42 = vpack.i.b16 %v4974_v1, %v4974_v1  ;;  %v4937_v5 = vpack.c.bf16 %v4828_v50, %v4827_v30  ;;  %v4901_v59 = vsel %vm495_vm5, %v4855_v3, %v4887_v37 }
 0x4f8   :  { %v4951_v51 = vunpack.c.l.b16 %v4935_v27  ;;  %v4952_v26 = vunpack.c.h.b16 %v4935_v27  ;;  %v4953_v63 = vunpack.c.l.b16 %v4936_v49  ;;  %v4902_v21 = vsel %vm1575_vm11, %v4888_v48, %v4889_v8 }
 0x4f9   :  { %v7762_v15 = vpop.eup %7761  ;;  %v5010_v16 = vperm.slane %v5008_v11, 0  ;;  %v5014_v22 = vperm.slane %v5012_v42, 0  ;;  %v4954_v52 = vunpack.c.h.b16 %v4936_v49  ;;  %vm4764_vm7 = vweird.f32 %v9529_v41 }
 0x4fa   :  { %v4759_v12 = vmul.f32 %v7762_v15, %v9529_v41  ;;  %vm4765_vm8 = vweird.f32 %v7762_v15  ;;  %v4903_v25 = vsel %vm1577_vm12, %v4901_v59, %v4902_v21  ;;  %v4955_v3 = vunpack.c.l.b16 %v4937_v5 }
 0x4fb   :  { %v5085_v30 = vunpack.c.l.bf16 %v5010_v16  ;;  %v5086_v50 = vunpack.c.l.bf16 %v5014_v22  ;;  %v4907_v56 = vsel %vm4807_vm4, %v4903_v25, %v4906_v14  ;;  %v4956_v44 = vunpack.c.h.b16 %v4937_v5  ;;  %vm4766_vm9 = vmor %vm4764_vm7, %vm4765_vm8 }
 0x4fc   :  { %v4760_v42 = vmul.f32 %v7762_v15, %v4759_v12  ;;  %v9552_v46 = vsub.f32 %v9544_v47, %v4907_v56  ;;  %v4967_v18 = vpack.c.b16 %v4951_v51, %v4951_v51  ;;  %v4968_v8 = vpack.c.b16 %v4952_v26, %v4952_v26 }
 0x4fd   :  { %v5101_v28 = vmul.f32 %v5085_v30, %v5053_v57  ;;  %v5102_v62 = vmul.f32 %v5086_v50, %v5054_v40  ;;  %v5109_v1 = vmul.f32 %v5085_v30, %v5061_v2  ;;  %v5110_v16 = vmul.f32 %v5086_v50, %v5062_v54 }
 0x4fe   :  { %v4761_v14 = vmul.f32 0.5, %v4760_v42  ;;  %v4969_v4 = vpack.c.b16 %v4953_v63, %v4953_v63  ;;  %v4970_v37 = vpack.c.b16 %v4954_v52, %v4954_v52  ;;  %v4971_v48 = vpack.c.b16 %v4955_v3, %v4955_v3 }
 0x4ff   :  { %v9562_v27 = vpack.c.bf16 %v5110_v16, %v5109_v1  ;;  %v4972_v49 = vpack.c.b16 %v4956_v44, %v4956_v44  ;;  %v4984_v11 = vpack.i.b16 %v4967_v18, %v4967_v18  ;;  %v4988_v5 = vpack.i.b16 %v4968_v8, %v4968_v8 }
 0x500   :  { %v4762_v59 = vsub.f32 1.5, %v4761_v14  ;;  %v4992_v57 = vpack.i.b16 %v4969_v4, %v4969_v4  ;;  %v4996_v51 = vpack.i.b16 %v4970_v37, %v4970_v37  ;;  %v5000_v31 = vpack.i.b16 %v4971_v48, %v4971_v48 }
 0x501   :  { %v9566_v26 = vperm.slane %v4984_v11, 0  ;;  %v9568_v38 = vperm.slane %v4988_v5, 0  ;;  %v5004_v52 = vpack.i.b16 %v4972_v49, %v4972_v49  ;;  %v9581_v3 = vpack.c.bf16 %v5102_v62, %v5101_v28 }
 0x502   :  { %v4763_v54 = vmul.f32 %v7762_v15, %v4762_v59  ;;  %v9570_v63 = vperm.slane %v4992_v57, 0  ;;  %v9572_v22 = vperm.slane %v4996_v51, 0  ;;  %v9574_v21 = vperm.slane %v5000_v31, 0 }
 0x503   :  { %v5079_v12 = vunpack.c.l.bf16 %v9566_v26  ;;  %v5080_v25 = vunpack.c.l.bf16 %v9568_v38  ;;  %v9586_v18 = vperm.slane %v5004_v52, 0  ;;  %v10292_v41 = vunpack.c.l.bf16 %v8995_v13 }
 0x504   :  { %v4767_v30 = vsel %vm4766_vm9, %v7762_v15, %v4763_v54  ;;  %v5081_v50 = vunpack.c.l.bf16 %v9570_v63  ;;  %v5082_v56 = vunpack.c.l.bf16 %v9572_v22  ;;  %v5083_v44 = vunpack.c.l.bf16 %v9574_v21 }
 0x505   :  { %v4797_v42 = vrot.slane %v4767_v30, 1  ;;  %v5095_v8 = vmul.f32 %v5079_v12, %v10292_v41  ;;  %v10293_v1 = vunpack.c.h.bf16 %v8995_v13  ;;  %v10294_v15 = vunpack.c.l.bf16 %v9206_v9 }
 0x506   :  { %v10295_v16 = vunpack.c.h.bf16 %v9206_v9  ;;  %v10296_v4 = vunpack.c.l.bf16 %v9331_v23  ;;  %v5145_v13 = vperm.slane %v9552_v46, 0  ;;  %v5084_v49 = vunpack.c.l.bf16 %v9586_v18 }
 0x507   :  { %v5096_v28 = vmul.f32 %v5080_v25, %v10293_v1  ;;  %v5097_v62 = vmul.f32 %v5081_v50, %v10294_v15  ;;  %v4813_v48 = vsel %vm4803_vm1, %v9521_v43, %v4797_v42  ;;  %v5146_v5 = vperm.slane %v9552_v46, 1 }
 0x508   :  { %v5098_v14 = vmul.f32 %v5082_v56, %v10295_v16  ;;  %v5099_v37 = vmul.f32 %v5083_v44, %v10296_v4  ;;  %v4814_v9 = vsel %vm4805_vm2, %v9422_v6, %v4813_v48  ;;  %v5147_v57 = vperm.slane %v9552_v46, 2 }
 0x509   :  { %v9612_v11 = vpack.c.bf16 %v5096_v28, %v5095_v8  ;;  %v5148_v51 = vperm.slane %v9552_v46, 3  ;;  %v4815_v31 = vsel %vm4807_vm4, %v9336_v19, %v4814_v9  ;;  %v10297_v43 = vunpack.c.h.bf16 %v9331_v23 }
 0x50a   :  { %v9617_v59 = vpack.c.bf16 %v5098_v14, %v5097_v62  ;;  %v5149_v52 = vperm.slane %v9552_v46, 4  ;;  %v5150_v30 = vperm.slane %v9552_v46, 5  ;;  %v9630_v6 = vmul.f32 %v4815_v31, %v9500_v0 }
 0x50b   :  { %v5100_v54 = vmul.f32 %v5084_v49, %v10297_v43  ;;  %v5151_v42 = vperm.slane %v9552_v46, 6  ;;  %v5152_v41 = vperm.slane %v9552_v46, 7  ;;  %v5177_v8 = vpack.c.bf16 %v5146_v5, %v5145_v13  ;;  %v10298_v13 = vld [vmem:[#allocation14_spill] sm:$0xff] }
 0x50c   :  { %v5178_v19 = vpack.c.bf16 %v5148_v51, %v5147_v57  ;;  %v5179_v28 = vpack.c.bf16 %v5150_v30, %v5149_v52  ;;  %v5289_v23 = vunpack.c.l.bf16 %v9612_v11  ;;  %v4831_v15 = vperm.slane %v9630_v6, 0 }
 0x50d   :  { %v9634_v1 = vpack.c.bf16 %v5100_v54, %v5099_v37  ;;  %v4832_v62 = vperm.slane %v9630_v6, 1  ;;  %v10237_v16 = vperm.slane %v9630_v6, 2  ;;  %v10238_v0 = vperm.slane %v9630_v6, 3 }
 0x50e   :  { %v10239_v14 = vperm.slane %v9630_v6, 4  ;;  %v10249_v4 = vperm.slane %v9630_v6, 5  ;;  %v4837_v46 = vperm.slane %v9630_v6, 6  ;;  %v4838_v37 = vperm.slane %v9630_v6, 7 }
 0x50f   :  { %v4863_v48 = vmul.f32 %v4831_v15, %v10298_v13  ;;  %v4864_v5 = vmul.f32 %v4832_v62, %v9126_v55  ;;  %v4865_v9 = vmul.f32 %v10237_v16, %v9215_v53  ;;  %v4866_v57 = vmul.f32 %v10238_v0, %v9271_v32 }
 0x510   :  { %v4867_v51 = vmul.f32 %v10239_v14, %v9338_v24  ;;  %v4868_v31 = vmul.f32 %v10249_v4, %v9370_v45  ;;  %v4869_v43 = vmul.f32 %v4837_v46, %v9424_v39  ;;  %v4870_v55 = vmul.f32 %v4838_v37, %v9503_v20 }
 0x511   :  { %v4894_v54 = vrot.slane %v4864_v5, 7  ;;  %v4895_v52 = vrot.slane %v4865_v9, 6  ;;  %v4896_v30 = vrot.slane %v4866_v57, 5  ;;  %v9661_v53 = vpack.c.bf16 %v4832_v62, %v4831_v15 }
 0x512   :  { %v4897_v13 = vrot.slane %v4867_v51, 4  ;;  %v4898_v16 = vrot.slane %v4868_v31, 3  ;;  %v4899_v32 = vrot.slane %v4869_v43, 2  ;;  %v4900_v0 = vrot.slane %v4870_v55, 1 }
 0x513   :  { %v4908_v2 = vsel %vm495_vm5, %v4863_v48, %v4894_v54  ;;  %v4909_v24 = vsel %vm1575_vm11, %v4895_v52, %v4896_v30  ;;  %v4942_v14 = vpack.c.bf16 %v4838_v37, %v4837_v46  ;;  %v5180_v40 = vpack.c.bf16 %v5152_v41, %v5151_v42 }
 0x514   :  { %v4910_v45 = vsel %vm1577_vm12, %v4908_v2, %v4909_v24  ;;  %v4911_v39 = vsel %vm4801_vm15, %v4897_v13, %v4898_v16  ;;  %v4912_v20 = vsel %vm4803_vm1, %v4899_v32, %v4900_v0  ;;  %v5193_v5 = vunpack.c.l.b16 %v5177_v8 }
 0x515   :  { %v4913_v15 = vsel %vm4805_vm2, %v4911_v39, %v4912_v20  ;;  %v4965_v62 = vunpack.c.l.b16 %v4942_v14  ;;  %v4966_v9 = vunpack.c.h.b16 %v4942_v14  ;;  %v5194_v57 = vunpack.c.h.b16 %v5177_v8 }
 0x516   :  { %v4914_v51 = vsel %vm4807_vm4, %v4910_v45, %v4913_v15  ;;  %v5195_v31 = vunpack.c.l.b16 %v5178_v19  ;;  %v5196_v48 = vunpack.c.h.b16 %v5178_v19  ;;  %v5197_v43 = vunpack.c.l.b16 %v5179_v28 }
 0x517   :  { %v9671_v46 = vsub.f32 %v9544_v47, %v4914_v51  ;;  %v4981_v42 = vpack.c.b16 %v4965_v62, %v4965_v62  ;;  %v4982_v2 = vpack.c.b16 %v4966_v9, %v4966_v9  ;;  %v5198_v41 = vunpack.c.h.b16 %v5179_v28 }
 0x518   :  { %v5199_v16 = vunpack.c.l.b16 %v5180_v40  ;;  %v5200_v37 = vunpack.c.h.b16 %v5180_v40  ;;  %v5209_v0 = vpack.c.b16 %v5193_v5, %v5193_v5  ;;  %v5210_v55 = vpack.c.b16 %v5194_v57, %v5194_v57 }
 0x519   :  { %v5040_v54 = vpack.i.b16 %v4981_v42, %v4981_v42  ;;  %v5044_v52 = vpack.i.b16 %v4982_v2, %v4982_v2  ;;  %v5159_v14 = vperm.slane %v9671_v46, 6  ;;  %v5160_v8 = vperm.slane %v9671_v46, 7 }
 0x51a   :  { %v5211_v30 = vpack.c.b16 %v5195_v31, %v5195_v31  ;;  %v5212_v13 = vpack.c.b16 %v5196_v48, %v5196_v48  ;;  %v5213_v19 = vpack.c.b16 %v5197_v43, %v5197_v43  ;;  %v5214_v32 = vpack.c.b16 %v5198_v41, %v5198_v41 }
 0x51b   :  { %v5042_v24 = vperm.slane %v5040_v54, 0  ;;  %v5046_v47 = vperm.slane %v5044_v52, 0  ;;  %v5184_v45 = vpack.c.bf16 %v5160_v8, %v5159_v14  ;;  %v5215_v39 = vpack.c.b16 %v5199_v16, %v5199_v16 }
 0x51c   :  { %v5216_v20 = vpack.c.b16 %v5200_v37, %v5200_v37  ;;  %v5226_v28 = vpack.i.b16 %v5209_v0, %v5209_v0  ;;  %v5230_v15 = vpack.i.b16 %v5210_v55, %v5210_v55  ;;  %v5234_v40 = vpack.i.b16 %v5211_v30, %v5211_v30 }
 0x51d   :  { %v5093_v5 = vunpack.c.l.bf16 %v5042_v24  ;;  %v5094_v62 = vunpack.c.l.bf16 %v5046_v47  ;;  %v5207_v9 = vunpack.c.l.b16 %v5184_v45  ;;  %v5208_v57 = vunpack.c.h.b16 %v5184_v45 }
 0x51e   :  { %v9675_v51 = vperm.slane %v5226_v28, 0  ;;  %v9677_v42 = vperm.slane %v5230_v15, 0  ;;  %v9679_v31 = vperm.slane %v5234_v40, 0  ;;  %v5238_v48 = vpack.i.b16 %v5212_v13, %v5212_v13 }
 0x51f   :  { %v10299_v43 = vunpack.c.l.bf16 %v9449_v58  ;;  %v10300_v41 = vunpack.c.h.bf16 %v9449_v58  ;;  %v10301_v37 = vunpack.c.l.bf16 %v9459_v36  ;;  %v10302_v55 = vunpack.c.h.bf16 %v9459_v36 }
 0x520   :  { %v5223_v52 = vpack.c.b16 %v5207_v9, %v5207_v9  ;;  %v5224_v14 = vpack.c.b16 %v5208_v57, %v5208_v57  ;;  %v9689_v8 = vperm.slane %v5238_v48, 0  ;;  %v5242_v30 = vpack.i.b16 %v5213_v19, %v5213_v19 }
 0x521   :  { %v5117_v2 = vmul.f32 %v5093_v5, %v10299_v43  ;;  %v5118_v16 = vmul.f32 %v5094_v62, %v10300_v41  ;;  %v5125_v0 = vmul.f32 %v5093_v5, %v10301_v37  ;;  %v5126_v54 = vmul.f32 %v5094_v62, %v10302_v55 }
 0x522   :  { %v5246_v47 = vpack.i.b16 %v5214_v32, %v5214_v32  ;;  %v5250_v45 = vpack.i.b16 %v5215_v39, %v5215_v39  ;;  %v5282_v28 = vpack.i.b16 %v5223_v52, %v5223_v52  ;;  %v5286_v15 = vpack.i.b16 %v5224_v14, %v5224_v14 }
 0x523   :  { %v9691_v24 = vpack.c.bf16 %v5118_v16, %v5117_v2  ;;  %v5142_v13 = vpack.c.bf16 %v5126_v54, %v5125_v0  ;;  %v9693_v58 = vperm.slane %v5242_v30, 0  ;;  %v5254_v40 = vpack.i.b16 %v5216_v20, %v5216_v20 }
 0x524   :  { %v9697_v57 = vperm.slane %v5282_v28, 0  ;;  %v9699_v48 = vperm.slane %v5286_v15, 0  ;;  %v9701_v19 = vperm.slane %v5246_v47, 0  ;;  %v9703_v43 = vperm.slane %v5250_v45, 0 }
 0x525   :  { %v5319_v62 = vunpack.c.l.bf16 %v5142_v13  ;;  %v5320_v9 = vunpack.c.h.bf16 %v5142_v13  ;;  %v9705_v32 = vperm.slane %v5254_v40, 0  ;;  %v5290_v39 = vunpack.c.h.bf16 %v9612_v11 }
 0x526   :  { %v5291_v20 = vunpack.c.l.bf16 %v9617_v59  ;;  %v5292_v2 = vunpack.c.h.bf16 %v9617_v59  ;;  %v10241_v41 = vunpack.c.l.bf16 %v9697_v57  ;;  %v10240_v16 = vunpack.c.l.bf16 %v9699_v48 }
 0x527   :  { %v5293_v37 = vunpack.c.l.bf16 %v9634_v1  ;;  %v5294_v0 = vunpack.c.h.bf16 %v9634_v1  ;;  %v5295_v55 = vunpack.c.l.bf16 %v9581_v3  ;;  %v5296_v54 = vunpack.c.h.bf16 %v9581_v3 }
 0x528   :  { %v5321_v52 = vunpack.c.l.bf16 %v9675_v51  ;;  %v5322_v14 = vunpack.c.l.bf16 %v9677_v42  ;;  %v9720_v30 = vadd.f32 %v10241_v41, %v5319_v62  ;;  %v9724_v59 = vadd.f32 %v10240_v16, %v5320_v9 }
 0x529   :  { %v5323_v13 = vunpack.c.l.bf16 %v9679_v31  ;;  %v5324_v1 = vunpack.c.l.bf16 %v9689_v8  ;;  %v5325_v47 = vunpack.c.l.bf16 %v9693_v58  ;;  %v5326_v3 = vunpack.c.l.bf16 %v9701_v19 }
 0x52a   :  { %v5327_v45 = vunpack.c.l.bf16 %v9703_v43  ;;  %v10250_v28 = vunpack.c.l.bf16 %v9705_v32  ;;  %v5337_v15 = vadd.f32 %v5321_v52, %v5289_v23  ;;  %v5338_v40 = vadd.f32 %v5322_v14, %v5290_v39 }
 0x52b   :  { %v5339_v62 = vadd.f32 %v5323_v13, %v5291_v20  ;;  %v5340_v9 = vadd.f32 %v5324_v1, %v5292_v2  ;;  %v5341_v16 = vadd.f32 %v5325_v47, %v5293_v37  ;;  %v5342_v43 = vadd.f32 %v5326_v3, %v5294_v0 }
 0x52c   :  { %v5343_v36 = vadd.f32 %v5327_v45, %v5295_v55  ;;  %v5344_v11 = vadd.f32 %v10250_v28, %v5296_v54  ;;  %v9748_v23 = vpack.c.bf16 %v5338_v40, %v5337_v15  ;;  %v10303_v39 = vunpack.c.l.bf16 %v9032_v17 }
 0x52d   :  { %v9750_v41 = vpack.c.bf16 %v5340_v9, %v5339_v62  ;;  %v10304_v2 = vunpack.c.h.bf16 %v9032_v17  ;;  %v9760_v5 = vpack.c.bf16 %v5342_v43, %v5341_v16  ;;  %v10305_v55 = vunpack.c.l.bf16 %v9223_v60 }
 0x52e   :  { %v5103_v20 = vmul.f32 %v5079_v12, %v10303_v39  ;;  %v9762_v0 = vpack.c.bf16 %v5344_v11, %v5343_v36  ;;  %v10306_v15 = vunpack.c.h.bf16 %v9223_v60  ;;  %v10247_v12 = vunpack.c.l.bf16 %v9748_v23 }
 0x52f   :  { %v5104_v37 = vmul.f32 %v5080_v25, %v10304_v2  ;;  %v5105_v54 = vmul.f32 %v5081_v50, %v10305_v55  ;;  %v10246_v17 = vunpack.c.h.bf16 %v9748_v23  ;;  %v10244_v38 = vunpack.c.l.bf16 %v9750_v41 }
 0x530   :  { %v5106_v26 = vmul.f32 %v5082_v56, %v10306_v15  ;;  %v10242_v25 = vunpack.c.h.bf16 %v9750_v41  ;;  %v10243_v36 = vunpack.c.l.bf16 %v9760_v5  ;;  %v10245_v16 = vunpack.c.h.bf16 %v9760_v5 }
 0x531   :  { %v10248_v63 = vunpack.c.l.bf16 %v9762_v0  ;;  %v10251_v50 = vunpack.c.h.bf16 %v9762_v0  ;;  %v5417_v60 = vmul.f32 0.5, %v10247_v12  ;;  %v5418_v22 = vmul.f32 0.5, %v10246_v17 }
 0x532   :  { %v5419_v56 = vmul.f32 0.5, %v10244_v38  ;;  %v5420_v40 = vmul.f32 0.5, %v10242_v25  ;;  %v5421_v62 = vmul.f32 0.5, %v10243_v36  ;;  %v5422_v9 = vmul.f32 0.5, %v10245_v16 }
 0x533   :  { %v5423_v43 = vmul.f32 0.5, %v10248_v63  ;;  %v5424_v11 = vmul.f32 0.5, %v10251_v50  ;;  %v5449_v39 = vpack.c.bf16 %v5418_v22, %v5417_v60  ;;  %v10307_v55 = vunpack.c.l.bf16 %v9343_v7 }
 0x534   :  { %v5450_v2 = vpack.c.bf16 %v5420_v40, %v5419_v56  ;;  %v10308_v25 = vunpack.c.h.bf16 %v9343_v7  ;;  %v5451_v38 = vpack.c.bf16 %v5422_v9, %v5421_v62  ;;  %v5131_v17 = vpack.c.bf16 %v5104_v37, %v5103_v20  ;;  %v5817_v7 = vld [vmem:[%s10231_s12] sm:$0xff] }
 0x535   :  { %v5107_v15 = vmul.f32 %v5083_v44, %v10307_v55  ;;  %v5452_v16 = vpack.c.bf16 %v5424_v11, %v5423_v43  ;;  %v5132_v12 = vpack.c.bf16 %v5106_v26, %v5105_v54  ;;  %v5465_v63 = vunpack.c.l.bf16 %v5449_v39 }
 0x536   :  { %v5108_v36 = vmul.f32 %v5084_v49, %v10308_v25  ;;  %v5466_v4 = vunpack.c.h.bf16 %v5449_v39  ;;  %v5467_v28 = vunpack.c.l.bf16 %v5450_v2  ;;  %v5468_v50 = vunpack.c.h.bf16 %v5450_v2 }
 0x537   :  { %v5469_v60 = vunpack.c.l.bf16 %v5451_v38  ;;  %v5470_v22 = vunpack.c.h.bf16 %v5451_v38  ;;  %v5471_v56 = vunpack.c.l.bf16 %v5452_v16  ;;  %v5472_v40 = vunpack.c.h.bf16 %v5452_v16 }
 0x538   :  { %7763 = vtanh.f32 %v5465_v63  ;;  %v5133_v21 = vpack.c.bf16 %v5108_v36, %v5107_v15  ;;  %v5297_v44 = vunpack.c.l.bf16 %v5131_v17  ;;  %v5298_v55 = vunpack.c.h.bf16 %v5131_v17 }
 0x539   :  { %7765 = vtanh.f32 %v5466_v4  ;;  %v5299_v18 = vunpack.c.l.bf16 %v5132_v12  ;;  %v5300_v49 = vunpack.c.h.bf16 %v5132_v12  ;;  %v10309_v20 = vunpack.c.l.bf16 %v9562_v27 }
 0x53a   :  { %7767 = vtanh.f32 %v5467_v28  ;;  %v9809_v54 = vperm.slane %v5817_v7, 0  ;;  %v9811_v26 = vperm.slane %v5817_v7, 1  ;;  %v9813_v38 = vperm.slane %v5817_v7, 2 }
 0x53b   :  { %v5351_v37 = vadd.f32 %v5327_v45, %v10309_v20  ;;  %7769 = vtanh.f32 %v5468_v50  ;;  %v9815_v25 = vperm.slane %v5817_v7, 3  ;;  %v9817_v4 = vperm.slane %v5817_v7, 4 }
 0x53c   :  { %v9819_v17 = vperm.slane %v5817_v7, 5  ;;  %7771 = vtanh.f32 %v5469_v60  ;;  %v9821_v36 = vperm.slane %v5817_v7, 6  ;;  %v9823_v12 = vperm.slane %v5817_v7, 7 }
 0x53d   :  { %v5301_v45 = vunpack.c.l.bf16 %v5133_v21  ;;  %7773 = vtanh.f32 %v5470_v22  ;;  %v5302_v28 = vunpack.c.h.bf16 %v5133_v21  ;;  %v5345_v16 = vadd.f32 %v5321_v52, %v5297_v44 }
 0x53e   :  { %v5346_v63 = vadd.f32 %v5322_v14, %v5298_v55  ;;  %v7764_v50 = vpop.eup %7763  ;;  %7775 = vtanh.f32 %v5471_v56  ;;  %v5347_v62 = vadd.f32 %v5323_v13, %v5299_v18  ;;  %v5348_v9 = vadd.f32 %v5324_v1, %v5300_v49 }
 0x53f   :  { %v5349_v43 = vadd.f32 %v5325_v47, %v5301_v45  ;;  %v7766_v11 = vpop.eup %7765  ;;  %7777 = vtanh.f32 %v5472_v40  ;;  %v5350_v51 = vadd.f32 %v5326_v3, %v5302_v28  ;;  %v10310_v52 = vunpack.c.h.bf16 %v9562_v27 }
 0x540   :  { %v10311_v42 = vunpack.c.l.bf16 %v9705_v32  ;;  %v9841_v39 = vpack.c.bf16 %v5346_v63, %v5345_v16  ;;  %v7768_v31 = vpop.eup %7767  ;;  %v5529_v13 = vpack.c.bf16 %v7766_v11, %v7764_v50  ;;  %v9843_v2 = vpack.c.bf16 %v5348_v9, %v5347_v62 }
 0x541   :  { %v10312_v8 = vperm.slane %v9630_v6, 2  ;;  %v10313_v58 = vperm.slane %v9630_v6, 3  ;;  %v10314_v19 = vperm.slane %v9630_v6, 4  ;;  %v10315_v47 = vperm.slane %v9630_v6, 5  ;;  %v7770_v32 = vpop.eup %7769 }
 0x542   :  { %v5352_v14 = vadd.f32 %v10311_v42, %v10310_v52  ;;  %v9857_v3 = vpack.c.bf16 %v5350_v51, %v5349_v43  ;;  %v10257_v60 = vunpack.c.l.bf16 %v9841_v39  ;;  %v10256_v22 = vunpack.c.h.bf16 %v9841_v39  ;;  %v7772_v56 = vpop.eup %7771 }
 0x543   :  { %v9849_v1 = vpack.c.bf16 %v10313_v58, %v10312_v8  ;;  %v9855_v27 = vpack.c.bf16 %v10315_v47, %v10314_v19  ;;  %v5530_v40 = vpack.c.bf16 %v7770_v32, %v7768_v31  ;;  %v5545_v21 = vunpack.c.l.bf16 %v5529_v13  ;;  %v7774_v7 = vpop.eup %7773 }
 0x544   :  { %v9859_v15 = vpack.c.bf16 %v5352_v14, %v5351_v37  ;;  %v5546_v44 = vunpack.c.h.bf16 %v5529_v13  ;;  %v10253_v55 = vunpack.c.l.bf16 %v9843_v2  ;;  %v10252_v6 = vunpack.c.h.bf16 %v9843_v2  ;;  %v7776_v37 = vpop.eup %7775 }
 0x545   :  { %v10255_v18 = vunpack.c.l.bf16 %v9857_v3  ;;  %v10254_v49 = vunpack.c.h.bf16 %v9857_v3  ;;  %v5531_v45 = vpack.c.bf16 %v7774_v7, %v7772_v56  ;;  %v5547_v28 = vunpack.c.l.bf16 %v5530_v40  ;;  %v7778_v50 = vpop.eup %7777 }
 0x546   :  { %v10258_v20 = vunpack.c.l.bf16 %v9859_v15  ;;  %v5548_v16 = vunpack.c.h.bf16 %v5530_v40  ;;  %v5577_v63 = vadd.f32 1.0, %v5545_v21  ;;  %v5578_v62 = vadd.f32 1.0, %v5546_v44 }
 0x547   :  { %v10259_v9 = vunpack.c.h.bf16 %v9859_v15  ;;  %v5425_v43 = vmul.f32 0.5, %v10257_v60  ;;  %v5426_v11 = vmul.f32 0.5, %v10256_v22  ;;  %v5532_v51 = vpack.c.bf16 %v7778_v50, %v7776_v37 }
 0x548   :  { %v5549_v52 = vunpack.c.l.bf16 %v5531_v45  ;;  %v5550_v42 = vunpack.c.h.bf16 %v5531_v45  ;;  %v5579_v14 = vadd.f32 1.0, %v5547_v28  ;;  %v5580_v31 = vadd.f32 1.0, %v5548_v16 }
 0x549   :  { %v5609_v13 = vpack.c.bf16 %v5578_v62, %v5577_v63  ;;  %v5427_v8 = vmul.f32 0.5, %v10253_v55  ;;  %v5428_v58 = vmul.f32 0.5, %v10252_v6  ;;  %v5551_v19 = vunpack.c.l.bf16 %v5532_v51 }
 0x54a   :  { %v5552_v47 = vunpack.c.h.bf16 %v5532_v51  ;;  %v5581_v32 = vadd.f32 1.0, %v5549_v52  ;;  %v5582_v56 = vadd.f32 1.0, %v5550_v42  ;;  %v5610_v40 = vpack.c.bf16 %v5580_v31, %v5579_v14 }
 0x54b   :  { %v5625_v21 = vunpack.c.l.bf16 %v5609_v13  ;;  %v5626_v44 = vunpack.c.h.bf16 %v5609_v13  ;;  %v5429_v7 = vmul.f32 0.5, %v10255_v18  ;;  %v5583_v37 = vadd.f32 1.0, %v5551_v19 }
 0x54c   :  { %v5584_v45 = vadd.f32 1.0, %v5552_v47  ;;  %v5611_v28 = vpack.c.bf16 %v5582_v56, %v5581_v32  ;;  %v5430_v16 = vmul.f32 0.5, %v10254_v49  ;;  %v5627_v63 = vunpack.c.l.bf16 %v5610_v40 }
 0x54d   :  { %v5628_v50 = vunpack.c.h.bf16 %v5610_v40  ;;  %v5657_v62 = vmul.f32 0.5, %v5625_v21  ;;  %v5658_v6 = vmul.f32 0.5, %v5626_v44  ;;  %v5431_v42 = vmul.f32 0.5, %v10258_v20 }
 0x54e   :  { %v5612_v55 = vpack.c.bf16 %v5584_v45, %v5583_v37  ;;  %v5629_v51 = vunpack.c.l.bf16 %v5611_v28  ;;  %v5630_v52 = vunpack.c.h.bf16 %v5611_v28  ;;  %v5659_v14 = vmul.f32 0.5, %v5627_v63 }
 0x54f   :  { %v5660_v31 = vmul.f32 0.5, %v5628_v50  ;;  %v5689_v13 = vpack.c.bf16 %v5658_v6, %v5657_v62  ;;  %v5432_v19 = vmul.f32 0.5, %v10259_v9  ;;  %v5453_v44 = vpack.c.bf16 %v5426_v11, %v5425_v43 }
 0x550   :  { %v5631_v47 = vunpack.c.l.bf16 %v5612_v55  ;;  %v5632_v32 = vunpack.c.h.bf16 %v5612_v55  ;;  %v5661_v56 = vmul.f32 0.5, %v5629_v51  ;;  %v5662_v49 = vmul.f32 0.5, %v5630_v52 }
 0x551   :  { %v5690_v18 = vpack.c.bf16 %v5660_v31, %v5659_v14  ;;  %v5705_v40 = vunpack.c.l.bf16 %v5689_v13  ;;  %v5706_v21 = vunpack.c.h.bf16 %v5689_v13  ;;  %v5454_v22 = vpack.c.bf16 %v5428_v58, %v5427_v8 }
 0x552   :  { %v5663_v37 = vmul.f32 0.5, %v5631_v47  ;;  %v5664_v45 = vmul.f32 0.5, %v5632_v32  ;;  %v5691_v28 = vpack.c.bf16 %v5662_v49, %v5661_v56  ;;  %v10316_v63 = vunpack.c.l.bf16 %v9748_v23 }
 0x553   :  { %v5707_v60 = vunpack.c.l.bf16 %v5690_v18  ;;  %v5708_v20 = vunpack.c.h.bf16 %v5690_v18  ;;  %v10317_v50 = vunpack.c.h.bf16 %v9748_v23  ;;  %v5455_v52 = vpack.c.bf16 %v5430_v16, %v5429_v7 }
 0x554   :  { %v5737_v6 = vmul.f32 %v5705_v40, %v10316_v63  ;;  %v5692_v9 = vpack.c.bf16 %v5664_v45, %v5663_v37  ;;  %v5709_v55 = vunpack.c.l.bf16 %v5691_v28  ;;  %v5710_v51 = vunpack.c.h.bf16 %v5691_v28 }
 0x555   :  { %v5738_v62 = vmul.f32 %v5706_v21, %v10317_v50  ;;  %v10318_v14 = vunpack.c.l.bf16 %v9750_v41  ;;  %v10319_v43 = vunpack.c.h.bf16 %v9750_v41  ;;  %v9893_v8 = vpack.c.bf16 %v5432_v19, %v5431_v42 }
 0x556   :  { %v5711_v18 = vunpack.c.l.bf16 %v5692_v9  ;;  %v5712_v58 = vunpack.c.h.bf16 %v5692_v9  ;;  %v10320_v13 = vunpack.c.l.bf16 %v9760_v5  ;;  %v10321_v23 = vunpack.c.h.bf16 %v9760_v5 }
 0x557   :  { %v5739_v31 = vmul.f32 %v5707_v60, %v10318_v14  ;;  %v5740_v11 = vmul.f32 %v5708_v20, %v10319_v43  ;;  %v5769_v49 = vpack.c.bf16 %v5738_v62, %v5737_v6  ;;  %v5473_v16 = vunpack.c.l.bf16 %v5453_v44 }
 0x558   :  { %v5741_v47 = vmul.f32 %v5709_v55, %v10320_v13  ;;  %v5742_v32 = vmul.f32 %v5710_v51, %v10321_v23  ;;  %v10322_v60 = vunpack.c.l.bf16 %v9762_v0  ;;  %v10323_v41 = vunpack.c.h.bf16 %v9762_v0 }
 0x559   :  { %v5770_v56 = vpack.c.bf16 %v5740_v11, %v5739_v31  ;;  %v5785_v40 = vunpack.c.l.bf16 %v5769_v49  ;;  %v5786_v7 = vunpack.c.h.bf16 %v5769_v49  ;;  %v5474_v19 = vunpack.c.h.bf16 %v5453_v44 }
 0x55a   :  { %v5743_v21 = vmul.f32 %v5711_v18, %v10322_v60  ;;  %v5744_v20 = vmul.f32 %v5712_v58, %v10323_v41  ;;  %v5771_v42 = vpack.c.bf16 %v5742_v32, %v5741_v47  ;;  %v5475_v50 = vunpack.c.l.bf16 %v5454_v22 }
 0x55b   :  { %v5787_v37 = vunpack.c.l.bf16 %v5770_v56  ;;  %v5788_v9 = vunpack.c.h.bf16 %v5770_v56  ;;  %v5835_v45 = vmul.f32 %v9809_v54, %v5785_v40  ;;  %v5836_v28 = vmul.f32 %v9811_v26, %v5786_v7 }
 0x55c   :  { %v5772_v5 = vpack.c.bf16 %v5744_v20, %v5743_v21  ;;  %v5789_v63 = vunpack.c.l.bf16 %v5771_v42  ;;  %v5790_v6 = vunpack.c.h.bf16 %v5771_v42  ;;  %v5476_v14 = vunpack.c.h.bf16 %v5454_v22 }
 0x55d   :  { %v5837_v62 = vmul.f32 %v9813_v38, %v5787_v37  ;;  %v5838_v55 = vmul.f32 %v9815_v25, %v5788_v9  ;;  %v5867_v51 = vadd.f32 %v5836_v28, %v5835_v45  ;;  %v5477_v49 = vunpack.c.l.bf16 %v5455_v52 }
 0x55e   :  { %v5791_v0 = vunpack.c.l.bf16 %v5772_v5  ;;  %v5792_v31 = vunpack.c.h.bf16 %v5772_v5  ;;  %v5839_v44 = vmul.f32 %v9817_v4, %v5789_v63  ;;  %v5840_v43 = vmul.f32 %v9819_v17, %v5790_v6 }
 0x55f   :  { %v5868_v11 = vadd.f32 %v5867_v51, %v5837_v62  ;;  %v5478_v18 = vunpack.c.h.bf16 %v5455_v52  ;;  %v5479_v58 = vunpack.c.l.bf16 %v9893_v8  ;;  %v5480_v23 = vunpack.c.h.bf16 %v9893_v8 }
 0x560   :  { %v5841_v13 = vmul.f32 %v9821_v36, %v5791_v0  ;;  %v5842_v47 = vmul.f32 %v9823_v12, %v5792_v31  ;;  %7779 = vtanh.f32 %v5473_v16  ;;  %v4959_v22 = vunpack.c.l.b16 %v9661_v53 }
 0x561   :  { %v5869_v32 = vadd.f32 %v5868_v11, %v5838_v55  ;;  %7781 = vtanh.f32 %v5474_v19  ;;  %v4960_v56 = vunpack.c.h.b16 %v9661_v53  ;;  %v4961_v40 = vunpack.c.l.b16 %v9849_v1 }
 0x562   :  { %7783 = vtanh.f32 %v5475_v50  ;;  %v4962_v52 = vunpack.c.h.b16 %v9849_v1  ;;  %v4963_v7 = vunpack.c.l.b16 %v9855_v27  ;;  %v4964_v21 = vunpack.c.h.b16 %v9855_v27 }
 0x563   :  { %v5870_v60 = vadd.f32 %v5869_v32, %v5839_v44  ;;  %7785 = vtanh.f32 %v5476_v14  ;;  %v4975_v41 = vpack.c.b16 %v4959_v22, %v4959_v22  ;;  %v4976_v8 = vpack.c.b16 %v4960_v56, %v4960_v56 }
 0x564   :  { %7787 = vtanh.f32 %v5477_v49  ;;  %v4977_v16 = vpack.c.b16 %v4961_v40, %v4961_v40  ;;  %v4978_v20 = vpack.c.b16 %v4962_v52, %v4962_v52  ;;  %v4979_v19 = vpack.c.b16 %v4963_v7, %v4963_v7 }
 0x565   :  { %v5871_v42 = vadd.f32 %v5870_v60, %v5840_v43  ;;  %7789 = vtanh.f32 %v5478_v18  ;;  %v4980_v53 = vpack.c.b16 %v4964_v21, %v4964_v21  ;;  %v5016_v9 = vpack.i.b16 %v4975_v41, %v4975_v41 }
 0x566   :  { %v7780_v37 = vpop.eup %7779  ;;  %7791 = vtanh.f32 %v5479_v58  ;;  %v5020_v45 = vpack.i.b16 %v4976_v8, %v4976_v8  ;;  %v5024_v1 = vpack.i.b16 %v4977_v16, %v4977_v16  ;;  %v5028_v63 = vpack.i.b16 %v4978_v20, %v4978_v20 }
 0x567   :  { %v7782_v28 = vpop.eup %7781  ;;  %v5872_v5 = vadd.f32 %v5871_v42, %v5841_v13  ;;  %7793 = vtanh.f32 %v5480_v23  ;;  %v5032_v6 = vpack.i.b16 %v4979_v19, %v4979_v19  ;;  %v9919_v62 = vperm.slane %v5016_v9, 0 }
 0x568   :  { %v7784_v27 = vpop.eup %7783  ;;  %v5533_v50 = vpack.c.bf16 %v7782_v28, %v7780_v37  ;;  %v9921_v55 = vperm.slane %v5020_v45, 0  ;;  %v9923_v51 = vperm.slane %v5024_v1, 0  ;;  %v9925_v31 = vperm.slane %v5028_v63, 0 }
 0x569   :  { %v7786_v14 = vpop.eup %7785  ;;  %v5873_v0 = vadd.f32 %v5872_v5, %v5842_v47  ;;  %v9927_v44 = vperm.slane %v5032_v6, 0  ;;  %v5036_v43 = vpack.i.b16 %v4980_v53, %v4980_v53  ;;  %v5087_v13 = vunpack.c.l.bf16 %v9919_v62 }
 0x56a   :  { %v7788_v11 = vpop.eup %7787  ;;  %v5534_v49 = vpack.c.bf16 %v7786_v14, %v7784_v27  ;;  %v5553_v18 = vunpack.c.l.bf16 %v5533_v50  ;;  %v5554_v58 = vunpack.c.h.bf16 %v5533_v50  ;;  %v5088_v22 = vunpack.c.l.bf16 %v9921_v55 }
 0x56b   :  { %v7790_v23 = vpop.eup %7789  ;;  %5874 = vadd.xlane.f32.xlu2 %v5873_v0  ;;  %v9930_v32 = vperm.slane %v5036_v43, 0  ;;  %v5089_v56 = vunpack.c.l.bf16 %v9923_v51  ;;  %v5090_v47 = vunpack.c.l.bf16 %v9925_v31  ;;  %v5091_v16 = vunpack.c.l.bf16 %v9927_v44 }
 0x56c   :  { %v7792_v40 = vpop.eup %7791  ;;  %v5535_v52 = vpack.c.bf16 %v7790_v23, %v7788_v11  ;;  %v5555_v7 = vunpack.c.l.bf16 %v5534_v49  ;;  %v5556_v60 = vunpack.c.h.bf16 %v5534_v49  ;;  %v5585_v21 = vadd.f32 1.0, %v5553_v18 }
 0x56d   :  { %v7794_v41 = vpop.eup %7793  ;;  %v5586_v8 = vadd.f32 1.0, %v5554_v58  ;;  %v5092_v20 = vunpack.c.l.bf16 %v9930_v32  ;;  %v10324_v42 = vunpack.c.l.bf16 %v9087_v34  ;;  %v10325_v5 = vunpack.c.h.bf16 %v9087_v34 }
 0x56e   :  { %v5536_v53 = vpack.c.bf16 %v7794_v41, %v7792_v40  ;;  %v5557_v37 = vunpack.c.l.bf16 %v5535_v52  ;;  %v5558_v9 = vunpack.c.h.bf16 %v5535_v52  ;;  %v5587_v45 = vadd.f32 1.0, %v5555_v7 }
 0x56f   :  { %v5119_v19 = vmul.f32 %v5087_v13, %v10324_v42  ;;  %v5588_v1 = vadd.f32 1.0, %v5556_v60  ;;  %v5613_v28 = vpack.c.bf16 %v5586_v8, %v5585_v21  ;;  %v5120_v63 = vmul.f32 %v5088_v22, %v10325_v5 }
 0x570   :  { %v10326_v6 = vunpack.c.l.bf16 %v9254_v29  ;;  %v5559_v50 = vunpack.c.l.bf16 %v5536_v53  ;;  %v5560_v14 = vunpack.c.h.bf16 %v5536_v53  ;;  %v5589_v0 = vadd.f32 1.0, %v5557_v37 }
 0x571   :  { %v5590_v43 = vadd.f32 1.0, %v5558_v9  ;;  %v5614_v11 = vpack.c.bf16 %v5588_v1, %v5587_v45  ;;  %v5633_v49 = vunpack.c.l.bf16 %v5613_v28  ;;  %v5634_v18 = vunpack.c.h.bf16 %v5613_v28 }
 0x572   :  { %v5121_v27 = vmul.f32 %v5089_v56, %v10326_v6  ;;  %v10327_v58 = vunpack.c.h.bf16 %v9254_v29  ;;  %v5591_v23 = vadd.f32 1.0, %v5559_v50  ;;  %v5592_v40 = vadd.f32 1.0, %v5560_v14 }
 0x573   :  { %v5615_v52 = vpack.c.bf16 %v5590_v43, %v5589_v0  ;;  %v10328_v7 = vunpack.c.l.bf16 %v9358_v10  ;;  %v5635_v21 = vunpack.c.l.bf16 %v5614_v11  ;;  %v5636_v41 = vunpack.c.h.bf16 %v5614_v11 }
 0x574   :  { %v5122_v34 = vmul.f32 %v5090_v47, %v10327_v58  ;;  %v5665_v8 = vmul.f32 0.5, %v5633_v49  ;;  %v5666_v42 = vmul.f32 0.5, %v5634_v18  ;;  %v5616_v53 = vpack.c.bf16 %v5592_v40, %v5591_v23 }
 0x575   :  { %v5123_v60 = vmul.f32 %v5091_v16, %v10328_v7  ;;  %v5637_v37 = vunpack.c.l.bf16 %v5615_v52  ;;  %v5638_v9 = vunpack.c.h.bf16 %v5615_v52  ;;  %v10329_v29 = vunpack.c.h.bf16 %v9358_v10 }
 0x576   :  { %v5667_v1 = vmul.f32 0.5, %v5635_v21  ;;  %v5668_v28 = vmul.f32 0.5, %v5636_v41  ;;  %v5693_v5 = vpack.c.bf16 %v5666_v42, %v5665_v8  ;;  %v9961_v6 = vpack.c.bf16 %v5120_v63, %v5119_v19 }
 0x577   :  { %v5124_v45 = vmul.f32 %v5092_v20, %v10329_v29  ;;  %v5639_v50 = vunpack.c.l.bf16 %v5616_v53  ;;  %v5640_v14 = vunpack.c.h.bf16 %v5616_v53  ;;  %v5669_v0 = vmul.f32 0.5, %v5637_v37 }
 0x578   :  { %v5670_v43 = vmul.f32 0.5, %v5638_v9  ;;  %v5694_v11 = vpack.c.bf16 %v5668_v28, %v5667_v1  ;;  %v5713_v49 = vunpack.c.l.bf16 %v5693_v5  ;;  %v5714_v18 = vunpack.c.h.bf16 %v5693_v5 }
 0x579   :  { %v9963_v58 = vpack.c.bf16 %v5122_v34, %v5121_v27  ;;  %v5671_v23 = vmul.f32 0.5, %v5639_v50  ;;  %v5672_v40 = vmul.f32 0.5, %v5640_v14  ;;  %v9965_v52 = vpack.c.bf16 %v5124_v45, %v5123_v60 }
 0x57a   :  { %v5695_v10 = vpack.c.bf16 %v5670_v43, %v5669_v0  ;;  %v5715_v7 = vunpack.c.l.bf16 %v5694_v11  ;;  %v5716_v21 = vunpack.c.h.bf16 %v5694_v11  ;;  %v10330_v41 = vunpack.c.l.bf16 %v9841_v39 }
 0x57b   :  { %v10331_v63 = vunpack.c.h.bf16 %v9841_v39  ;;  %v5696_v42 = vpack.c.bf16 %v5672_v40, %v5671_v23  ;;  %v5153_v9 = vperm.slane %v9671_v46, 0  ;;  %v10332_v27 = vunpack.c.l.bf16 %v9843_v2 }
 0x57c   :  { %v5745_v19 = vmul.f32 %v5713_v49, %v10330_v41  ;;  %v5717_v53 = vunpack.c.l.bf16 %v5695_v10  ;;  %v5718_v37 = vunpack.c.h.bf16 %v5695_v10  ;;  %v10333_v29 = vunpack.c.h.bf16 %v9843_v2 }
 0x57d   :  { %v5746_v8 = vmul.f32 %v5714_v18, %v10331_v63  ;;  %v5747_v34 = vmul.f32 %v5715_v7, %v10332_v27  ;;  %v5154_v1 = vperm.slane %v9671_v46, 1  ;;  %v5719_v28 = vunpack.c.l.bf16 %v5696_v42 }
 0x57e   :  { %v5748_v60 = vmul.f32 %v5716_v21, %v10333_v29  ;;  %v5720_v5 = vunpack.c.h.bf16 %v5696_v42  ;;  %v10334_v50 = vunpack.c.l.bf16 %v9857_v3  ;;  %v10335_v14 = vunpack.c.h.bf16 %v9857_v3 }
 0x57f   :  { %v5773_v45 = vpack.c.bf16 %v5746_v8, %v5745_v19  ;;  %v5155_v18 = vperm.slane %v9671_v46, 2  ;;  %v10336_v23 = vunpack.c.l.bf16 %v9859_v15  ;;  %v10337_v40 = vunpack.c.h.bf16 %v9859_v15 }
 0x580   :  { %v5749_v39 = vmul.f32 %v5717_v53, %v10334_v50  ;;  %v5750_v0 = vmul.f32 %v5718_v37, %v10335_v14  ;;  %v5774_v43 = vpack.c.bf16 %v5748_v60, %v5747_v34  ;;  %v5156_v21 = vperm.slane %v9671_v46, 3 }
 0x581   :  { %v5793_v11 = vunpack.c.l.bf16 %v5773_v45  ;;  %v5794_v49 = vunpack.c.h.bf16 %v5773_v45  ;;  %v5751_v2 = vmul.f32 %v5719_v28, %v10336_v23  ;;  %v5752_v10 = vmul.f32 %v5720_v5, %v10337_v40 }
 0x582   :  { %v5775_v7 = vpack.c.bf16 %v5750_v0, %v5749_v39  ;;  %v5795_v41 = vunpack.c.l.bf16 %v5774_v43  ;;  %v5796_v19 = vunpack.c.h.bf16 %v5774_v43  ;;  %v5157_v37 = vperm.slane %v9671_v46, 4 }
 0x583   :  { %v5843_v63 = vmul.f32 %v9809_v54, %v5793_v11  ;;  %v5844_v3 = vmul.f32 %v9811_v26, %v5794_v49  ;;  %v5776_v8 = vpack.c.bf16 %v5752_v10, %v5751_v2  ;;  %v5158_v29 = vperm.slane %v9671_v46, 5 }
 0x584   :  { %v5797_v42 = vunpack.c.l.bf16 %v5775_v7  ;;  %v5798_v53 = vunpack.c.h.bf16 %v5775_v7  ;;  %v5845_v27 = vmul.f32 %v9813_v38, %v5795_v41  ;;  %v5846_v34 = vmul.f32 %v9815_v25, %v5796_v19 }
 0x585   :  { %v5876_v15 = vadd.f32 %v5844_v3, %v5843_v63  ;;  %v5799_v60 = vunpack.c.l.bf16 %v5776_v8  ;;  %v5800_v45 = vunpack.c.h.bf16 %v5776_v8  ;;  %v5181_v39 = vpack.c.bf16 %v5154_v1, %v5153_v9 }
 0x586   :  { %v5847_v28 = vmul.f32 %v9817_v4, %v5797_v42  ;;  %v5848_v5 = vmul.f32 %v9819_v17, %v5798_v53  ;;  %v5182_v14 = vpack.c.bf16 %v5156_v21, %v5155_v18  ;;  %v5183_v0 = vpack.c.bf16 %v5158_v29, %v5157_v37 }
 0x587   :  { %v5877_v50 = vadd.f32 %v5876_v15, %v5845_v27  ;;  %v5849_v43 = vmul.f32 %v9821_v36, %v5799_v60  ;;  %v5850_v11 = vmul.f32 %v9823_v12, %v5800_v45  ;;  %v5313_v49 = vunpack.c.l.bf16 %v9961_v6 }
 0x588   :  { %v5314_v23 = vunpack.c.h.bf16 %v9961_v6  ;;  %v5201_v46 = vunpack.c.l.b16 %v5181_v39  ;;  %v5202_v40 = vunpack.c.h.b16 %v5181_v39  ;;  %v5203_v10 = vunpack.c.l.b16 %v5182_v14 }
 0x589   :  { %v5878_v2 = vadd.f32 %v5877_v50, %v5846_v34  ;;  %v5204_v7 = vunpack.c.h.b16 %v5182_v14  ;;  %v5205_v41 = vunpack.c.l.b16 %v5183_v0  ;;  %v5206_v19 = vunpack.c.h.b16 %v5183_v0 }
 0x58a   :  { %v5315_v63 = vunpack.c.l.bf16 %v9963_v58  ;;  %v5217_v1 = vpack.c.b16 %v5201_v46, %v5201_v46  ;;  %v5218_v18 = vpack.c.b16 %v5202_v40, %v5202_v40  ;;  %v5219_v21 = vpack.c.b16 %v5203_v10, %v5203_v10 }
 0x58b   :  { %v5879_v9 = vadd.f32 %v5878_v2, %v5847_v28  ;;  %v5220_v3 = vpack.c.b16 %v5204_v7, %v5204_v7  ;;  %v5221_v8 = vpack.c.b16 %v5205_v41, %v5205_v41  ;;  %v5222_v42 = vpack.c.b16 %v5206_v19, %v5206_v19 }
 0x58c   :  { %v5316_v53 = vunpack.c.h.bf16 %v9963_v58  ;;  %v5258_v6 = vpack.i.b16 %v5217_v1, %v5217_v1  ;;  %v5262_v27 = vpack.i.b16 %v5218_v18, %v5218_v18  ;;  %v5266_v34 = vpack.i.b16 %v5219_v21, %v5219_v21 }
 0x58d   :  { %v5880_v37 = vadd.f32 %v5879_v9, %v5848_v5  ;;  %v5270_v15 = vpack.i.b16 %v5220_v3, %v5220_v3  ;;  %v5274_v29 = vpack.i.b16 %v5221_v8, %v5221_v8  ;;  %v5278_v60 = vpack.i.b16 %v5222_v42, %v5222_v42 }
 0x58e   :  { %v5317_v45 = vunpack.c.l.bf16 %v9965_v52  ;;  %v10002_v39 = vperm.slane %v5258_v6, 0  ;;  %v10004_v28 = vperm.slane %v5262_v27, 0  ;;  %v10006_v14 = vperm.slane %v5266_v34, 0 }
 0x58f   :  { %v5881_v50 = vadd.f32 %v5880_v37, %v5849_v43  ;;  %v10008_v0 = vperm.slane %v5270_v15, 0  ;;  %v10010_v2 = vperm.slane %v5274_v29, 0  ;;  %v10012_v58 = vperm.slane %v5278_v60, 0 }
 0x590   :  { %v5318_v5 = vunpack.c.h.bf16 %v9965_v52  ;;  %v5329_v40 = vunpack.c.l.bf16 %v10002_v39  ;;  %v5330_v10 = vunpack.c.l.bf16 %v10004_v28  ;;  %v5331_v43 = vunpack.c.l.bf16 %v10006_v14 }
 0x591   :  { %v5882_v46 = vadd.f32 %v5881_v50, %v5850_v11  ;;  %v5332_v7 = vunpack.c.l.bf16 %v10008_v0  ;;  %v5333_v41 = vunpack.c.l.bf16 %v10010_v2  ;;  %v5334_v19 = vunpack.c.l.bf16 %v10012_v58 }
 0x592   :  { %v10023_v9 = vpack.c.bf16 %v9724_v59, %v9720_v30  ;;  %v5361_v52 = vadd.f32 %v5329_v40, %v5313_v49  ;;  %v5362_v11 = vadd.f32 %v5330_v10, %v5314_v23  ;;  %v5363_v1 = vadd.f32 %v5331_v43, %v5315_v63 }
 0x593   :  { %5883 = vadd.xlane.f32.xlu2 %v5882_v46  ;;  %v10338_v18 = vunpack.c.l.bf16 %v10286_v33  ;;  %v5364_v3 = vadd.f32 %v5332_v7, %v5316_v53  ;;  %v5365_v30 = vadd.f32 %v5333_v41, %v5317_v45  ;;  %v5366_v59 = vadd.f32 %v5334_v19, %v5318_v5 }
 0x594   :  { %v10261_v49 = vunpack.c.l.bf16 %v10023_v9  ;;  %v10042_v23 = vpack.c.bf16 %v5362_v11, %v5361_v52  ;;  %v10260_v63 = vunpack.c.h.bf16 %v10023_v9  ;;  %v10339_v8 = vunpack.c.h.bf16 %v10286_v33 }
 0x595   :  { %v5111_v21 = vmul.f32 %v5087_v13, %v10338_v18  ;;  %v10340_v13 = vunpack.c.l.bf16 %v9235_v35  ;;  %v10053_v53 = vpack.c.bf16 %v5364_v3, %v5363_v1  ;;  %v10055_v37 = vpack.c.bf16 %v5366_v59, %v5365_v30 }
 0x596   :  { %v5112_v62 = vmul.f32 %v5088_v22, %v10339_v8  ;;  %v5447_v6 = vmul.f32 0.5, %v10261_v49  ;;  %v10341_v27 = vunpack.c.h.bf16 %v9235_v35  ;;  %v5409_v55 = vunpack.c.l.bf16 %v10042_v23 }
 0x597   :  { %v5113_v42 = vmul.f32 %v5089_v56, %v10340_v13  ;;  %v5410_v22 = vunpack.c.h.bf16 %v10042_v23  ;;  %v5448_v51 = vmul.f32 0.5, %v10260_v63  ;;  %v10342_v56 = vunpack.c.l.bf16 %v9348_v61 }
 0x598   :  { %v5114_v33 = vmul.f32 %v5090_v47, %v10341_v27  ;;  %v5411_v15 = vunpack.c.l.bf16 %v10053_v53  ;;  %v5412_v29 = vunpack.c.h.bf16 %v10053_v53  ;;  %v5413_v35 = vunpack.c.l.bf16 %v10055_v37 }
 0x599   :  { %v5115_v34 = vmul.f32 %v5091_v16, %v10342_v56  ;;  %v5414_v31 = vunpack.c.h.bf16 %v10055_v37  ;;  %v5441_v47 = vmul.f32 0.5, %v5409_v55  ;;  %v5442_v60 = vmul.f32 0.5, %v5410_v22 }
 0x59a   :  { %v5464_v45 = vpack.c.bf16 %v5448_v51, %v5447_v6  ;;  %v10343_v50 = vunpack.c.h.bf16 %v9348_v61  ;;  %v5443_v16 = vmul.f32 0.5, %v5411_v15  ;;  %v5444_v5 = vmul.f32 0.5, %v5412_v29 }
 0x59b   :  { %v5445_v46 = vmul.f32 0.5, %v5413_v35  ;;  %v5446_v52 = vmul.f32 0.5, %v5414_v31  ;;  %v5461_v11 = vpack.c.bf16 %v5442_v60, %v5441_v47  ;;  %v5135_v3 = vpack.c.bf16 %v5112_v62, %v5111_v21 }
 0x59c   :  { %v5116_v44 = vmul.f32 %v5092_v20, %v10343_v50  ;;  %v5495_v1 = vunpack.c.l.bf16 %v5464_v45  ;;  %v5496_v18 = vunpack.c.h.bf16 %v5464_v45  ;;  %v5462_v61 = vpack.c.bf16 %v5444_v5, %v5443_v16 }
 0x59d   :  { %v5463_v30 = vpack.c.bf16 %v5446_v52, %v5445_v46  ;;  %v5136_v32 = vpack.c.bf16 %v5114_v33, %v5113_v42  ;;  %v5489_v59 = vunpack.c.l.bf16 %v5461_v11  ;;  %v5490_v8 = vunpack.c.h.bf16 %v5461_v11 }
 0x59e   :  { %v5137_v20 = vpack.c.bf16 %v5116_v44, %v5115_v34  ;;  %7795 = vtanh.f32 %v5495_v1  ;;  %v5305_v13 = vunpack.c.l.bf16 %v5135_v3  ;;  %v5491_v6 = vunpack.c.l.bf16 %v5462_v61 }
 0x59f   :  { %v5492_v27 = vunpack.c.h.bf16 %v5462_v61  ;;  %v5493_v51 = vunpack.c.l.bf16 %v5463_v30  ;;  %v5494_v56 = vunpack.c.h.bf16 %v5463_v30  ;;  %7797 = vtanh.f32 %v5489_v59 }
 0x5a0   :  { %v5306_v50 = vunpack.c.h.bf16 %v5135_v3  ;;  %v5307_v63 = vunpack.c.l.bf16 %v5136_v32  ;;  %v5308_v49 = vunpack.c.h.bf16 %v5136_v32  ;;  %7799 = vtanh.f32 %v5490_v8 }
 0x5a1   :  { %v5309_v47 = vunpack.c.l.bf16 %v5137_v20  ;;  %v5310_v60 = vunpack.c.h.bf16 %v5137_v20  ;;  %v5353_v21 = vadd.f32 %v5329_v40, %v5305_v13  ;;  %7801 = vtanh.f32 %v5491_v6 }
 0x5a2   :  { %v5354_v62 = vadd.f32 %v5330_v10, %v5306_v50  ;;  %v5355_v42 = vadd.f32 %v5331_v43, %v5307_v63  ;;  %v5356_v33 = vadd.f32 %v5332_v7, %v5308_v49  ;;  %7803 = vtanh.f32 %v5492_v27 }
 0x5a3   :  { %v5357_v34 = vadd.f32 %v5333_v41, %v5309_v47  ;;  %v5358_v45 = vadd.f32 %v5334_v19, %v5310_v60  ;;  %v10344_v39 = vunpack.c.l.bf16 %v9691_v24  ;;  %v10345_v40 = vunpack.c.l.bf16 %v9697_v57 }
 0x5a4   :  { %v7796_v28 = vpop.eup %7795  ;;  %7805 = vtanh.f32 %v5493_v51  ;;  %v10346_v14 = vunpack.c.h.bf16 %v9691_v24  ;;  %v10347_v10 = vunpack.c.l.bf16 %v9699_v48  ;;  %v10111_v43 = vpack.c.bf16 %v5354_v62, %v5353_v21 }
 0x5a5   :  { %v5359_v44 = vadd.f32 %v10345_v40, %v10344_v39  ;;  %v10113_v7 = vpack.c.bf16 %v5356_v33, %v5355_v42  ;;  %7807 = vtanh.f32 %v5494_v56  ;;  %v10115_v2 = vpack.c.bf16 %v5358_v45, %v5357_v34  ;;  %v7798_v58 = vpop.eup %7797 }
 0x5a6   :  { %v5360_v0 = vadd.f32 %v10347_v10, %v10346_v14  ;;  %7809 = vtanh.f32 %v5496_v18  ;;  %v5401_v57 = vunpack.c.l.bf16 %v10111_v43  ;;  %v5402_v19 = vunpack.c.h.bf16 %v10111_v43  ;;  %v7800_v49 = vpop.eup %7799 }
 0x5a7   :  { %v5403_v24 = vunpack.c.l.bf16 %v10113_v7  ;;  %v5404_v48 = vunpack.c.h.bf16 %v10113_v7  ;;  %v5405_v63 = vunpack.c.l.bf16 %v10115_v2  ;;  %v5406_v16 = vunpack.c.h.bf16 %v10115_v2  ;;  %v7802_v5 = vpop.eup %7801 }
 0x5a8   :  { %v10117_v41 = vpack.c.bf16 %v5360_v0, %v5359_v44  ;;  %v5541_v46 = vpack.c.bf16 %v7800_v49, %v7798_v58  ;;  %v7804_v1 = vpop.eup %7803  ;;  %v5433_v18 = vmul.f32 0.5, %v5401_v57  ;;  %v5434_v3 = vmul.f32 0.5, %v5402_v19 }
 0x5a9   :  { %v5435_v61 = vmul.f32 0.5, %v5403_v24  ;;  %v5436_v30 = vmul.f32 0.5, %v5404_v48  ;;  %v5542_v20 = vpack.c.bf16 %v7804_v1, %v7802_v5  ;;  %v5437_v6 = vmul.f32 0.5, %v5405_v63 }
 0x5aa   :  { %v5407_v52 = vunpack.c.l.bf16 %v10117_v41  ;;  %v5408_v11 = vunpack.c.h.bf16 %v10117_v41  ;;  %v7806_v32 = vpop.eup %7805  ;;  %v5569_v59 = vunpack.c.l.bf16 %v5541_v46  ;;  %v5570_v8 = vunpack.c.h.bf16 %v5541_v46 }
 0x5ab   :  { %v7808_v13 = vpop.eup %7807  ;;  %v5438_v27 = vmul.f32 0.5, %v5406_v16  ;;  %v5571_v60 = vunpack.c.l.bf16 %v5542_v20  ;;  %v5572_v21 = vunpack.c.h.bf16 %v5542_v20  ;;  %v5457_v34 = vpack.c.bf16 %v5434_v3, %v5433_v18 }
 0x5ac   :  { %v5439_v51 = vmul.f32 0.5, %v5407_v52  ;;  %v5440_v56 = vmul.f32 0.5, %v5408_v11  ;;  %v7810_v50 = vpop.eup %7809  ;;  %v5543_v47 = vpack.c.bf16 %v7808_v13, %v7806_v32  ;;  %v5601_v62 = vadd.f32 1.0, %v5569_v59 }
 0x5ad   :  { %v5544_v42 = vpack.c.bf16 %v7810_v50, %v7796_v28  ;;  %v5602_v33 = vadd.f32 1.0, %v5570_v8  ;;  %v10143_v45 = vpack.c.bf16 %v5436_v30, %v5435_v61  ;;  %v5603_v44 = vadd.f32 1.0, %v5571_v60 }
 0x5ae   :  { %v5573_v39 = vunpack.c.l.bf16 %v5543_v47  ;;  %v5574_v40 = vunpack.c.h.bf16 %v5543_v47  ;;  %v5604_v14 = vadd.f32 1.0, %v5572_v21  ;;  %v10145_v49 = vpack.c.bf16 %v5438_v27, %v5437_v6 }
 0x5af   :  { %v5575_v10 = vunpack.c.l.bf16 %v5544_v42  ;;  %v5576_v0 = vunpack.c.h.bf16 %v5544_v42  ;;  %v5621_v58 = vpack.c.bf16 %v5602_v33, %v5601_v62  ;;  %v10147_v32 = vpack.c.bf16 %v5440_v56, %v5439_v51 }
 0x5b0   :  { %v5605_v5 = vadd.f32 1.0, %v5573_v39  ;;  %v5606_v46 = vadd.f32 1.0, %v5574_v40  ;;  %v5622_v1 = vpack.c.bf16 %v5604_v14, %v5603_v44  ;;  %v5481_v8 = vunpack.c.l.bf16 %v5457_v34 }
 0x5b1   :  { %v5607_v20 = vadd.f32 1.0, %v5575_v10  ;;  %v5608_v28 = vadd.f32 1.0, %v5576_v0  ;;  %v5649_v59 = vunpack.c.l.bf16 %v5621_v58  ;;  %v5650_v18 = vunpack.c.h.bf16 %v5621_v58 }
 0x5b2   :  { %v5623_v3 = vpack.c.bf16 %v5606_v46, %v5605_v5  ;;  %v5651_v61 = vunpack.c.l.bf16 %v5622_v1  ;;  %v5652_v30 = vunpack.c.h.bf16 %v5622_v1  ;;  %v5482_v60 = vunpack.c.h.bf16 %v5457_v34 }
 0x5b3   :  { %v5624_v13 = vpack.c.bf16 %v5608_v28, %v5607_v20  ;;  %v5681_v50 = vmul.f32 0.5, %v5649_v59  ;;  %v5682_v47 = vmul.f32 0.5, %v5650_v18  ;;  %v5483_v56 = vunpack.c.l.bf16 %v10143_v45 }
 0x5b4   :  { %v5653_v21 = vunpack.c.l.bf16 %v5623_v3  ;;  %v5654_v6 = vunpack.c.h.bf16 %v5623_v3  ;;  %v5683_v27 = vmul.f32 0.5, %v5651_v61  ;;  %v5684_v62 = vmul.f32 0.5, %v5652_v30 }
 0x5b5   :  { %v5655_v42 = vunpack.c.l.bf16 %v5624_v13  ;;  %v5656_v33 = vunpack.c.h.bf16 %v5624_v13  ;;  %v5701_v51 = vpack.c.bf16 %v5682_v47, %v5681_v50  ;;  %v5484_v14 = vunpack.c.h.bf16 %v10143_v45 }
 0x5b6   :  { %v5685_v39 = vmul.f32 0.5, %v5653_v21  ;;  %v5686_v40 = vmul.f32 0.5, %v5654_v6  ;;  %v5702_v44 = vpack.c.bf16 %v5684_v62, %v5683_v27  ;;  %v5485_v20 = vunpack.c.l.bf16 %v10145_v49 }
 0x5b7   :  { %v5687_v10 = vmul.f32 0.5, %v5655_v42  ;;  %v5688_v0 = vmul.f32 0.5, %v5656_v33  ;;  %v5729_v58 = vunpack.c.l.bf16 %v5701_v51  ;;  %v5730_v5 = vunpack.c.h.bf16 %v5701_v51 }
 0x5b8   :  { %v5703_v46 = vpack.c.bf16 %v5686_v40, %v5685_v39  ;;  %v5731_v34 = vunpack.c.l.bf16 %v5702_v44  ;;  %v5732_v1 = vunpack.c.h.bf16 %v5702_v44  ;;  %v5486_v3 = vunpack.c.h.bf16 %v10145_v49 }
 0x5b9   :  { %v5704_v28 = vpack.c.bf16 %v5688_v0, %v5687_v10  ;;  %v5761_v59 = vmul.f32 %v5729_v58, %v5409_v55  ;;  %v5762_v18 = vmul.f32 %v5730_v5, %v5410_v22  ;;  %7811 = vtanh.f32 %v5481_v8 }
 0x5ba   :  { %v5733_v61 = vunpack.c.l.bf16 %v5703_v46  ;;  %v5734_v45 = vunpack.c.h.bf16 %v5703_v46  ;;  %v5763_v30 = vmul.f32 %v5731_v34, %v5411_v15  ;;  %v5764_v13 = vmul.f32 %v5732_v1, %v5412_v29 }
 0x5bb   :  { %v5735_v50 = vunpack.c.l.bf16 %v5704_v28  ;;  %v5736_v47 = vunpack.c.h.bf16 %v5704_v28  ;;  %v5781_v21 = vpack.c.bf16 %v5762_v18, %v5761_v59  ;;  %7813 = vtanh.f32 %v5482_v60 }
 0x5bc   :  { %v5765_v55 = vmul.f32 %v5733_v61, %v5413_v35  ;;  %v5766_v23 = vmul.f32 %v5734_v45, %v5414_v31  ;;  %v5782_v22 = vpack.c.bf16 %v5764_v13, %v5763_v30  ;;  %v10348_v49 = vunpack.c.l.bf16 %v10023_v9 }
 0x5bd   :  { %v10349_v15 = vunpack.c.h.bf16 %v10023_v9  ;;  %v5809_v53 = vunpack.c.l.bf16 %v5781_v21  ;;  %v5810_v29 = vunpack.c.h.bf16 %v5781_v21  ;;  %v5487_v8 = vunpack.c.l.bf16 %v10147_v32 }
 0x5be   :  { %v5767_v6 = vmul.f32 %v5735_v50, %v10348_v49  ;;  %v5783_v62 = vpack.c.bf16 %v5766_v23, %v5765_v55  ;;  %v5811_v42 = vunpack.c.l.bf16 %v5782_v22  ;;  %7815 = vtanh.f32 %v5483_v56 }
 0x5bf   :  { %v5768_v27 = vmul.f32 %v5736_v47, %v10349_v15  ;;  %v5812_v33 = vunpack.c.h.bf16 %v5782_v22  ;;  %v5859_v35 = vmul.f32 %v9809_v54, %v5809_v53  ;;  %v5860_v37 = vmul.f32 %v9811_v26, %v5810_v29  ;;  %v7812_v51 = vpop.eup %7811 }
 0x5c0   :  { %7817 = vtanh.f32 %v5484_v14  ;;  %v5488_v60 = vunpack.c.h.bf16 %v10147_v32  ;;  %v5813_v39 = vunpack.c.l.bf16 %v5783_v62  ;;  %v5861_v9 = vmul.f32 %v9813_v38, %v5811_v42 }
 0x5c1   :  { %v5784_v31 = vpack.c.bf16 %v5768_v27, %v5767_v6  ;;  %v5894_v40 = vadd.f32 %v5860_v37, %v5859_v35  ;;  %7819 = vtanh.f32 %v5485_v20  ;;  %v7814_v44 = vpop.eup %7813  ;;  %v5814_v10 = vunpack.c.h.bf16 %v5783_v62 }
 0x5c2   :  { %7821 = vtanh.f32 %v5486_v3  ;;  %v5862_v56 = vmul.f32 %v9815_v25, %v5812_v33  ;;  %v5537_v5 = vpack.c.bf16 %v7814_v44, %v7812_v51  ;;  %v5863_v32 = vmul.f32 %v9817_v4, %v5813_v39 }
 0x5c3   :  { %v5895_v0 = vadd.f32 %v5894_v40, %v5861_v9  ;;  %7823 = vtanh.f32 %v5487_v8  ;;  %v5815_v46 = vunpack.c.l.bf16 %v5784_v31  ;;  %v5816_v1 = vunpack.c.h.bf16 %v5784_v31 }
 0x5c4   :  { %v7816_v58 = vpop.eup %7815  ;;  %7825 = vtanh.f32 %v5488_v60  ;;  %v5561_v59 = vunpack.c.l.bf16 %v5537_v5  ;;  %v5562_v18 = vunpack.c.h.bf16 %v5537_v5  ;;  %v5864_v3 = vmul.f32 %v9819_v17, %v5814_v10 }
 0x5c5   :  { %v5896_v34 = vadd.f32 %v5895_v0, %v5862_v56  ;;  %v5865_v55 = vmul.f32 %v9821_v36, %v5815_v46  ;;  %v5866_v6 = vmul.f32 %v9823_v12, %v5816_v1  ;;  %vm5927_vm5 = vcmask 7168  }
 0x5c6   :  { %v7818_v14 = vpop.eup %7817  ;;  %v5593_v50 = vadd.f32 1.0, %v5561_v59  ;;  %v5594_v47 = vadd.f32 1.0, %v5562_v18 }
 0x5c7   :  { %v5538_v28 = vpack.c.bf16 %v7818_v14, %v7816_v58  ;;  %v7820_v20 = vpop.eup %7819  ;;  %v5897_v61 = vadd.f32 %v5896_v34, %v5863_v32 }
 0x5c8   :  { %v7822_v45 = vpop.eup %7821  ;;  %v5617_v53 = vpack.c.bf16 %v5594_v47, %v5593_v50 }
 0x5c9   :  { %v5563_v30 = vunpack.c.l.bf16 %v5538_v28  ;;  %v5564_v13 = vunpack.c.h.bf16 %v5538_v28  ;;  %v7824_v21 = vpop.eup %7823  ;;  %v5898_v23 = vadd.f32 %v5897_v61, %v5864_v3  ;;  %v5539_v22 = vpack.c.bf16 %v7822_v45, %v7820_v20 }
 0x5ca   :  { %v7826_v49 = vpop.eup %7825  ;;  %v5641_v35 = vunpack.c.l.bf16 %v5617_v53  ;;  %v5642_v37 = vunpack.c.h.bf16 %v5617_v53 }
 0x5cb   :  { %v5595_v15 = vadd.f32 1.0, %v5563_v30  ;;  %v5596_v27 = vadd.f32 1.0, %v5564_v13  ;;  %v5899_v29 = vadd.f32 %v5898_v23, %v5865_v55  ;;  %v5540_v62 = vpack.c.bf16 %v7826_v49, %v7824_v21 }
 0x5cc   :  { %v5565_v42 = vunpack.c.l.bf16 %v5539_v22  ;;  %v5566_v8 = vunpack.c.h.bf16 %v5539_v22  ;;  %v5673_v10 = vmul.f32 0.5, %v5641_v35  ;;  %v5674_v58 = vmul.f32 0.5, %v5642_v37 }
 0x5cd   :  { %v5618_v33 = vpack.c.bf16 %v5596_v27, %v5595_v15  ;;  %v5900_v31 = vadd.f32 %v5899_v29, %v5866_v6  ;;  %v5567_v60 = vunpack.c.l.bf16 %v5540_v62  ;;  %v5568_v51 = vunpack.c.h.bf16 %v5540_v62 }
 0x5ce   :  { %v5597_v39 = vadd.f32 1.0, %v5565_v42  ;;  %v5598_v9 = vadd.f32 1.0, %v5566_v8  ;;  %v5697_v34 = vpack.c.bf16 %v5674_v58, %v5673_v10 }
 0x5cf   :  { %v5643_v40 = vunpack.c.l.bf16 %v5618_v33  ;;  %v5644_v44 = vunpack.c.h.bf16 %v5618_v33  ;;  %5901 = vadd.xlane.f32.xlu1 %v5900_v31  ;;  %v5599_v56 = vadd.f32 1.0, %v5567_v60  ;;  %v5600_v0 = vadd.f32 1.0, %v5568_v51 }
 0x5d0   :  { %v5619_v5 = vpack.c.bf16 %v5598_v9, %v5597_v39  ;;  %v5721_v3 = vunpack.c.l.bf16 %v5697_v34  ;;  %v5722_v61 = vunpack.c.h.bf16 %v5697_v34 }
 0x5d1   :  { %v5675_v14 = vmul.f32 0.5, %v5643_v40  ;;  %v5676_v46 = vmul.f32 0.5, %v5644_v44  ;;  %v5620_v32 = vpack.c.bf16 %v5600_v0, %v5599_v56  ;;  %v7650_v44 = vld [vmem:[#allocation2] ss:$0 sm:$0xff] }
 0x5d2   :  { %v5645_v1 = vunpack.c.l.bf16 %v5619_v5  ;;  %v5646_v28 = vunpack.c.h.bf16 %v5619_v5  ;;  %v5753_v55 = vmul.f32 %v5721_v3, %v5401_v57  ;;  %v5754_v23 = vmul.f32 %v5722_v61, %v5402_v19 }
 0x5d3   :  { %v5698_v59 = vpack.c.bf16 %v5676_v46, %v5675_v14  ;;  %v5647_v18 = vunpack.c.l.bf16 %v5620_v32  ;;  %v5648_v20 = vunpack.c.h.bf16 %v5620_v32 }
 0x5d4   :  { %v5677_v45 = vmul.f32 0.5, %v5645_v1  ;;  %v5678_v30 = vmul.f32 0.5, %v5646_v28  ;;  %v5777_v27 = vpack.c.bf16 %v5754_v23, %v5753_v55 }
 0x5d5   :  { %v5723_v13 = vunpack.c.l.bf16 %v5698_v59  ;;  %v5724_v50 = vunpack.c.h.bf16 %v5698_v59  ;;  %v5679_v47 = vmul.f32 0.5, %v5647_v18  ;;  %v5680_v21 = vmul.f32 0.5, %v5648_v20 }
 0x5d6   :  { %v5699_v22 = vpack.c.bf16 %v5678_v30, %v5677_v45  ;;  %v5801_v33 = vunpack.c.l.bf16 %v5777_v27  ;;  %v5802_v35 = vunpack.c.h.bf16 %v5777_v27 }
 0x5d7   :  { %v5755_v49 = vmul.f32 %v5723_v13, %v5403_v24  ;;  %v5756_v6 = vmul.f32 %v5724_v50, %v5404_v48  ;;  %v5700_v15 = vpack.c.bf16 %v5680_v21, %v5679_v47 }
 0x5d8   :  { %v5725_v53 = vunpack.c.l.bf16 %v5699_v22  ;;  %v5726_v29 = vunpack.c.h.bf16 %v5699_v22  ;;  %v5851_v37 = vmul.f32 %v9809_v54, %v5801_v33  ;;  %v5852_v31 = vmul.f32 %v9811_v26, %v5802_v35 }
 0x5d9   :  { %v5778_v62 = vpack.c.bf16 %v5756_v6, %v5755_v49  ;;  %v5727_v42 = vunpack.c.l.bf16 %v5700_v15  ;;  %v5728_v8 = vunpack.c.h.bf16 %v5700_v15 }
 0x5da   :  { %v5757_v43 = vmul.f32 %v5725_v53, %v5405_v63  ;;  %v5758_v57 = vmul.f32 %v5726_v29, %v5406_v16  ;;  %v5885_v63 = vadd.f32 %v5852_v31, %v5851_v37 }
 0x5db   :  { %v5803_v19 = vunpack.c.l.bf16 %v5778_v62  ;;  %v5804_v24 = vunpack.c.h.bf16 %v5778_v62  ;;  %v5759_v7 = vmul.f32 %v5727_v42, %v5407_v52  ;;  %v5760_v48 = vmul.f32 %v5728_v8, %v5408_v11 }
 0x5dc   :  { %v5779_v60 = vpack.c.bf16 %v5758_v57, %v5757_v43 }
 0x5dd   :  { %v5780_v51 = vpack.c.bf16 %v5760_v48, %v5759_v7  ;;  %v5853_v39 = vmul.f32 %v9813_v38, %v5803_v19  ;;  %v5854_v16 = vmul.f32 %v9815_v25, %v5804_v24 }
 0x5de   :  { %v5805_v9 = vunpack.c.l.bf16 %v5779_v60  ;;  %v5806_v2 = vunpack.c.h.bf16 %v5779_v60  ;;  %v5875_v26 = vpop.xlane.xlu2 %5874 }
 0x5df   :  { %v5886_v40 = vadd.f32 %v5885_v63, %v5853_v39  ;;  %v5807_v10 = vunpack.c.l.bf16 %v5780_v51  ;;  %v5808_v11 = vunpack.c.h.bf16 %v5780_v51  ;;  %v5907_v0 = vadd.f32 %v7650_v44, %v5875_v26 }
 0x5e0   :  { %v5855_v52 = vmul.f32 %v9817_v4, %v5805_v9  ;;  %v5856_v54 = vmul.f32 %v9819_v17, %v5806_v2 }
 0x5e1   :  { %v5887_v41 = vadd.f32 %v5886_v40, %v5854_v16  ;;  %v5857_v58 = vmul.f32 %v9821_v36, %v5807_v10  ;;  %v5911_v5 = vmul.f32 0.5, %v5907_v0  ;;  %v5858_v14 = vmul.f32 %v9823_v12, %v5808_v11 }
 0x5e3   :  { %v5888_v56 = vadd.f32 %v5887_v41, %v5855_v52  ;;  %7827 = vtanh.f32 %v5911_v5 }
 0x5e5   :  { %v5889_v38 = vadd.f32 %v5888_v56, %v5856_v54 }
 0x5e7   :  { %v5890_v46 = vadd.f32 %v5889_v38, %v5857_v58 }
 0x5e9   :  { %v5891_v25 = vadd.f32 %v5890_v46, %v5858_v14  ;;  %v7828_v32 = vpop.eup %7827 }
 0x5ea   :  { %v5919_v34 = vadd.f32 1.0, %v7828_v32 }
 0x5eb   :  { %5892 = vadd.xlane.f32.xlu0 %v5891_v25 }
 0x5ec   :  { %v5923_v4 = vmul.f32 0.5, %v5919_v34 }
 0x5ee   :  { %5928 = vst.msk [vmem:[%s10233_s14] sm:$0xff] %vm5927_vm5, %v5923_v4 }
 0x606   :  { %v5884_v17 = vpop.xlane.xlu2 %5883 }
 0x607   :  { %v5908_v1 = vadd.f32 %v7650_v44, %v5884_v17 }
 0x609   :  { %v5912_v36 = vmul.f32 0.5, %v5908_v1 }
 0x60b   :  { %7829 = vtanh.f32 %v5912_v36 }
 0x611   :  { %v7830_v28 = vpop.eup %7829 }
 0x612   :  { %v5920_v59 = vadd.f32 1.0, %v7830_v28 }
 0x614   :  { %v5924_v12 = vmul.f32 0.5, %v5920_v59 }
 0x616   :  { %5929 = vst.msk [vmem:[%s10233_s14 + $0x8] sm:$0xff] %vm5927_vm5, %v5924_v12 }
 0x642   :  { %v5902_v18 = vpop.xlane.xlu1 %5901 }
 0x643   :  { %v5910_v20 = vadd.f32 %v7650_v44, %v5902_v18 }
 0x645   :  { %v5914_v3 = vmul.f32 0.5, %v5910_v20 }
 0x647   :  { %7831 = vtanh.f32 %v5914_v3 }
 0x64d   :  { %v7832_v61 = vpop.eup %7831 }
 0x64e   :  { %v5922_v45 = vadd.f32 1.0, %v7832_v61 }
 0x650   :  { %v5926_v30 = vmul.f32 0.5, %v5922_v45 }
 0x652   :  { %5931 = vst.msk [vmem:[%s10233_s14 + $0x18] sm:$0xff] %vm5927_vm5, %v5926_v30 }
 0x65e   :  { %v5893_v13 = vpop.xlane.xlu0 %5892 }
 0x65f   :  { %v5909_v50 = vadd.f32 %v7650_v44, %v5893_v13 }
 0x661   :  { %v5913_v47 = vmul.f32 0.5, %v5909_v50 }
 0x663   :  { %7833 = vtanh.f32 %v5913_v47 }
 0x669   :  { %v7834_v21 = vpop.eup %7833 }
 0x66a   :  { %v5921_v55 = vadd.f32 1.0, %v7834_v21 }
 0x66c   :  { %v5925_v23 = vmul.f32 0.5, %v5921_v55 }
 0x66e   :  { %5930 = vst.msk [vmem:[%s10233_s14 + $0x10] sm:$0xff] %vm5927_vm5, %v5925_v23 }
 0x66f   :  { %5936 = vsyncpa [#allocation4], 1 }
 0x670   :  { %5937 = vsyncpa [#allocation6], 1 }
 0x671   :  { %5938 = vsyncpa [#allocation9], 1 }

</bundles_post_ra>
